<compile_context>
chip_gen: v7x
topology: tpu7x:2x2x1
jax: 0.10.0
libtpu: 0.0.40
codegen_flags: <defaults>
</compile_context>

<pallas_src>
import jax
import jax.numpy as jnp
from jax.experimental import pallas as pl
from jax.experimental.pallas import tpu as pltpu

INPUT_SIZE = 12 * 32   # 384
HIDDEN = 128
NUM_LAYERS = 5
FC_OUT = 64
FC_PAD = 128           # lane-dense padded FC output width (sliced to 64 outside)
SUBLANE = 8            # f32 sublane count -> batch padding target
WEIGHT_DTYPE = jnp.float32   # jnp.bfloat16 on v6e/v7x halves weight bytes


# ---------------------------------------------------------------------------
# Fused kernel: 5 LSTM layers (layer-major) + final FC, one invocation.
# ---------------------------------------------------------------------------
def make_fused_kernel(T, B):
    H = HIDDEN

    def kernel(x_ref, w_ih0_ref, w_hh_ref, w_ih_r_ref, b_ref, wfc_ref, bfc_ref,
               out_ref, hseq_scr, gx_scr):
        # hseq_scr: (T*B, H)   previous layer's hidden states for all timesteps
        # gx_scr:   (T*B, 4H)  batched gate pre-activations (x-part + bias)

        def run_time_loop(layer):
            """Sequential recurrence for one layer; reads gx_scr, writes hseq_scr."""
            h = jnp.zeros((B, H), jnp.float32)
            c = jnp.zeros((B, H), jnp.float32)
            w_hh = w_hh_ref[layer]                                   # (H, 4H)
            for t in range(T):                                       # static unroll
                r0 = t * B                                           # 8-row aligned
                gates = gx_scr[r0:r0 + B, :] + jnp.dot(
                    h, w_hh, preferred_element_type=jnp.float32)     # (B, 4H)
                i_g = jax.nn.sigmoid(gates[:, 0 * H:1 * H])
                f_g = jax.nn.sigmoid(gates[:, 1 * H:2 * H])
                g_g = jnp.tanh(gates[:, 2 * H:3 * H])
                o_g = jax.nn.sigmoid(gates[:, 3 * H:4 * H])
                c = f_g * c + i_g * g_g
                h = o_g * jnp.tanh(c)
                if layer < NUM_LAYERS - 1:         # last layer's seq never re-read
                    hseq_scr[r0:r0 + B, :] = h
            return h

        # ---- Layer 0: one big input projection over all timesteps ----------
        gx_scr[...] = (jnp.dot(x_ref[...], w_ih0_ref[...],
                               preferred_element_type=jnp.float32) + b_ref[0])
        h_last = run_time_loop(0)

        # ---- Layers 1..4 ----------------------------------------------------
        for layer in range(1, NUM_LAYERS):
            # Batched projection of the previous layer's full hidden sequence.
            gx_scr[...] = (jnp.dot(hseq_scr[...], w_ih_r_ref[layer - 1],
                                   preferred_element_type=jnp.float32)
                           + b_ref[layer])
            h_last = run_time_loop(layer)

        # ---- Final FC on last layer's final hidden state (lane-dense out) ---
        out_ref[...] = (jnp.dot(h_last, wfc_ref[...],
                                preferred_element_type=jnp.float32)
                        + bfc_ref[...]).astype(out_ref.dtype)

    return kernel


def fused_forward(x_flat, T, B_pad, params):
    """x_flat: (T*B_pad, 384) f32 (time-major, batch-padded). -> (B_pad, FC_PAD)."""
    TB = T * B_pad
    return pl.pallas_call(
        make_fused_kernel(T, B_pad),
        out_shape=jax.ShapeDtypeStruct((B_pad, FC_PAD), jnp.float32),
        scratch_shapes=[
            pltpu.VMEM((TB, HIDDEN), jnp.float32),       # hidden sequence buffer
            pltpu.VMEM((TB, 4 * HIDDEN), jnp.float32),   # batched gate pre-acts
        ],
    )(x_flat, params["w_ih0"], params["w_hh"], params["w_ih_rest"],
      params["biases"], params["w_fc_pad"], params["b_fc_pad"])


# ---------------------------------------------------------------------------
# Parameter init (deterministic; same shapes/init ranges as PyTorch defaults)
# ---------------------------------------------------------------------------
def init_params(key):
    k = 1.0 / jnp.sqrt(HIDDEN)
    w_ih_t, w_hh_t, bs = [], [], []
    for layer in range(NUM_LAYERS):
        d_in = INPUT_SIZE if layer == 0 else HIDDEN
        key, k1, k2, k3, k4 = jax.random.split(key, 5)
        w_ih = jax.random.uniform(k1, (4 * HIDDEN, d_in), jnp.float32, -k, k)
        w_hh = jax.random.uniform(k2, (4 * HIDDEN, HIDDEN), jnp.float32, -k, k)
        b_ih = jax.random.uniform(k3, (4 * HIDDEN,), jnp.float32, -k, k)
        b_hh = jax.random.uniform(k4, (4 * HIDDEN,), jnp.float32, -k, k)
        w_ih_t.append(w_ih.T)                              # (d_in, 4H)
        w_hh_t.append(w_hh.T)                              # (H, 4H)
        bs.append((b_ih + b_hh).reshape(1, 4 * HIDDEN))    # (1, 4H)

    key, k1, k2 = jax.random.split(key, 3)
    w_fc = jax.random.uniform(k1, (FC_OUT, HIDDEN), jnp.float32, -k, k)
    b_fc = jax.random.uniform(k2, (FC_OUT,), jnp.float32, -k, k)
    w_fc_pad = jnp.zeros((HIDDEN, FC_PAD), jnp.float32).at[:, :FC_OUT].set(w_fc.T)
    b_fc_pad = jnp.zeros((1, FC_PAD), jnp.float32).at[:, :FC_OUT].set(b_fc)

    return {
        "w_ih0": w_ih_t[0].astype(WEIGHT_DTYPE),                         # (384, 512)
        "w_ih_rest": jnp.stack(w_ih_t[1:], 0).astype(WEIGHT_DTYPE),      # (4, 128, 512)
        "w_hh": jnp.stack(w_hh_t, 0).astype(WEIGHT_DTYPE),               # (5, 128, 512)
        "biases": jnp.stack(bs, 0),                                      # (5, 1, 512) f32
        "w_fc_pad": w_fc_pad.astype(WEIGHT_DTYPE),                       # (128, 128)
        "b_fc_pad": b_fc_pad,                                            # (1, 128) f32
    }


# ---------------------------------------------------------------------------
# Forward pass (matches model_LSTM.forward)
# ---------------------------------------------------------------------------
@jax.jit
def model_lstm_forward(seq, params):
    B, T = seq.shape[0], seq.shape[1]
    x = seq.reshape(B, T, -1).astype(jnp.float32)      # (B, T, 384)
    x = jnp.transpose(x, (1, 0, 2))                    # time-major (T, B, 384)

    # Pad batch (sublane dim) up to a multiple of 8 so vregs/stores are dense.
    B_pad = max(SUBLANE, ((B + SUBLANE - 1) // SUBLANE) * SUBLANE)
    if B_pad != B:
        x = jnp.pad(x, ((0, 0), (0, B_pad - B), (0, 0)))
    x_flat = x.reshape(T * B_pad, INPUT_SIZE)          # (T*B_pad, 384)

    out_pad = fused_forward(x_flat, T, B_pad, params)  # (B_pad, 128)
    # y[:, -1, :] @ W_fc + b; .squeeze(1) is a no-op on (B, 64)
    return out_pad[:B, :FC_OUT]


if __name__ == "__main__":
    key = jax.random.PRNGKey(0)
    key, pkey, xkey = jax.random.split(key, 3)
    params = init_params(pkey)

    B, T = 2, 8
    seq = jax.random.normal(xkey, (B, T, 12, 32), dtype=jnp.float32)

    out = model_lstm_forward(seq, params)
    out = jax.block_until_ready(out)
    assert out.shape == (B, FC_OUT), out.shape
    print("KERNEL_OK")
</pallas_src>

<mosaic_0001>
module attributes {stable_mosaic.version = 11 : i64} {
  func.func @kernel(%arg0: memref<64x384xf32, #tpu.memory_space<vmem>>, %arg1: memref<384x512xf32, #tpu.memory_space<vmem>>, %arg2: memref<5x128x512xf32, #tpu.memory_space<vmem>>, %arg3: memref<4x128x512xf32, #tpu.memory_space<vmem>>, %arg4: memref<5x1x512xf32, #tpu.memory_space<vmem>>, %arg5: memref<128x128xf32, #tpu.memory_space<vmem>>, %arg6: memref<1x128xf32, #tpu.memory_space<vmem>>, %arg7: memref<8x128xf32, #tpu.memory_space<vmem>>, %arg8: memref<64x128xf32, #tpu.memory_space<vmem>>, %arg9: memref<64x512xf32, #tpu.memory_space<vmem>>) attributes {dimension_semantics = [], scalar_prefetch = 0 : i64, scratch_operands = 2 : i64, tpu.core_type = #tpu.core_type<tc>} {
    %c0 = arith.constant 0 : index
    %c0_0 = arith.constant 0 : index
    %0 = vector.load %arg0[%c0, %c0_0] : memref<64x384xf32, #tpu.memory_space<vmem>>, vector<64x384xf32>
    %c0_1 = arith.constant 0 : index
    %c0_2 = arith.constant 0 : index
    %1 = vector.load %arg1[%c0_1, %c0_2] : memref<384x512xf32, #tpu.memory_space<vmem>>, vector<384x512xf32>
    %cst = arith.constant dense<0.000000e+00> : vector<64x512xf32>
    %2 = tpu.matmul %0, %1, %cst {dimension_numbers = #tpu.dot_dimension_numbers<[1], [0], [0], [1], [0, 0, 1, 1], [], []>} : vector<64x384xf32>, vector<384x512xf32>, vector<64x512xf32> -> vector<64x512xf32>
    %c0_3 = arith.constant 0 : index
    %c0_4 = arith.constant 0 : index
    %c0_5 = arith.constant 0 : index
    %3 = vector.load %arg4[%c0_3, %c0_4, %c0_5] : memref<5x1x512xf32, #tpu.memory_space<vmem>>, vector<1x1x512xf32>
    %4 = vector.shape_cast %3 : vector<1x1x512xf32> to vector<1x512xf32>
    %5 = vector.broadcast %4 : vector<1x512xf32> to vector<64x512xf32>
    %6 = arith.addf %2, %5 : vector<64x512xf32>
    %c0_6 = arith.constant 0 : index
    %c0_7 = arith.constant 0 : index
    %7 = vector.load %arg9[%c0_6, %c0_7] : memref<64x512xf32, #tpu.memory_space<vmem>>, vector<64x512xf32>
    tpu.vector_store %arg9[%c0_6, %c0_7], %6 {strides = array<i32>} : memref<64x512xf32, #tpu.memory_space<vmem>>, vector<64x512xf32>,
    %cst_8 = arith.constant 0.000000e+00 : f32
    %8 = vector.broadcast %cst_8 : f32 to vector<8x128xf32>
    %cst_9 = arith.constant 0.000000e+00 : f32
    %9 = vector.broadcast %cst_9 : f32 to vector<8x128xf32>
    %c0_10 = arith.constant 0 : index
    %c0_11 = arith.constant 0 : index
    %c0_12 = arith.constant 0 : index
    %10 = vector.load %arg2[%c0_10, %c0_11, %c0_12] : memref<5x128x512xf32, #tpu.memory_space<vmem>>, vector<1x128x512xf32>
    %11 = vector.shape_cast %10 : vector<1x128x512xf32> to vector<128x512xf32>
    %c0_13 = arith.constant 0 : index
    %c0_14 = arith.constant 0 : index
    %12 = vector.load %arg9[%c0_13, %c0_14] : memref<64x512xf32, #tpu.memory_space<vmem>>, vector<8x512xf32>
    %cst_15 = arith.constant dense<0.000000e+00> : vector<8x512xf32>
    %13 = tpu.matmul %8, %11, %cst_15 {dimension_numbers = #tpu.dot_dimension_numbers<[1], [0], [0], [1], [0, 0, 1, 1], [], []>} : vector<8x128xf32>, vector<128x512xf32>, vector<8x512xf32> -> vector<8x512xf32>
    %14 = arith.addf %12, %13 : vector<8x512xf32>
    %15 = vector.extract_strided_slice %14 {offsets = [0, 0], sizes = [8, 128], strides = [1, 1]} : vector<8x512xf32> to vector<8x128xf32>
    %16 = arith.negf %15 : vector<8x128xf32>
    %17 = math.exp %16 : vector<8x128xf32>
    %cst_16 = arith.constant 1.000000e+00 : f32
    %18 = vector.broadcast %cst_16 : f32 to vector<8x128xf32>
    %19 = arith.addf %18, %17 : vector<8x128xf32>
    %20 = arith.divf %18, %19 : vector<8x128xf32>
    %21 = vector.extract_strided_slice %14 {offsets = [0, 128], sizes = [8, 128], strides = [1, 1]} : vector<8x512xf32> to vector<8x128xf32>
    %22 = arith.negf %21 : vector<8x128xf32>
    %23 = math.exp %22 : vector<8x128xf32>
    %cst_17 = arith.constant 1.000000e+00 : f32
    %24 = vector.broadcast %cst_17 : f32 to vector<8x128xf32>
    %25 = arith.addf %24, %23 : vector<8x128xf32>
    %26 = arith.divf %24, %25 : vector<8x128xf32>
    %27 = vector.extract_strided_slice %14 {offsets = [0, 256], sizes = [8, 128], strides = [1, 1]} : vector<8x512xf32> to vector<8x128xf32>
    %28 = math.tanh %27 : vector<8x128xf32>
    %29 = vector.extract_strided_slice %14 {offsets = [0, 384], sizes = [8, 128], strides = [1, 1]} : vector<8x512xf32> to vector<8x128xf32>
    %30 = arith.negf %29 : vector<8x128xf32>
    %31 = math.exp %30 : vector<8x128xf32>
    %cst_18 = arith.constant 1.000000e+00 : f32
    %32 = vector.broadcast %cst_18 : f32 to vector<8x128xf32>
    %33 = arith.addf %32, %31 : vector<8x128xf32>
    %34 = arith.divf %32, %33 : vector<8x128xf32>
    %35 = arith.mulf %26, %9 : vector<8x128xf32>
    %36 = arith.mulf %20, %28 : vector<8x128xf32>
    %37 = arith.addf %35, %36 : vector<8x128xf32>
    %38 = math.tanh %37 : vector<8x128xf32>
    %39 = arith.mulf %34, %38 : vector<8x128xf32>
    %c0_19 = arith.constant 0 : index
    %c0_20 = arith.constant 0 : index
    %40 = vector.load %arg8[%c0_19, %c0_20] : memref<64x128xf32, #tpu.memory_space<vmem>>, vector<8x128xf32>
    tpu.vector_store %arg8[%c0_19, %c0_20], %39 {strides = array<i32>} : memref<64x128xf32, #tpu.memory_space<vmem>>, vector<8x128xf32>,
    %c8 = arith.constant 8 : index
    %c0_21 = arith.constant 0 : index
    %41 = vector.load %arg9[%c8, %c0_21] : memref<64x512xf32, #tpu.memory_space<vmem>>, vector<8x512xf32>
    %cst_22 = arith.constant dense<0.000000e+00> : vector<8x512xf32>
    %42 = tpu.matmul %39, %11, %cst_22 {dimension_numbers = #tpu.dot_dimension_numbers<[1], [0], [0], [1], [0, 0, 1, 1], [], []>} : vector<8x128xf32>, vector<128x512xf32>, vector<8x512xf32> -> vector<8x512xf32>
    %43 = arith.addf %41, %42 : vector<8x512xf32>
    %44 = vector.extract_strided_slice %43 {offsets = [0, 0], sizes = [8, 128], strides = [1, 1]} : vector<8x512xf32> to vector<8x128xf32>
    %45 = arith.negf %44 : vector<8x128xf32>
    %46 = math.exp %45 : vector<8x128xf32>
    %cst_23 = arith.constant 1.000000e+00 : f32
    %47 = vector.broadcast %cst_23 : f32 to vector<8x128xf32>
    %48 = arith.addf %47, %46 : vector<8x128xf32>
    %49 = arith.divf %47, %48 : vector<8x128xf32>
    %50 = vector.extract_strided_slice %43 {offsets = [0, 128], sizes = [8, 128], strides = [1, 1]} : vector<8x512xf32> to vector<8x128xf32>
    %51 = arith.negf %50 : vector<8x128xf32>
    %52 = math.exp %51 : vector<8x128xf32>
    %cst_24 = arith.constant 1.000000e+00 : f32
    %53 = vector.broadcast %cst_24 : f32 to vector<8x128xf32>
    %54 = arith.addf %53, %52 : vector<8x128xf32>
    %55 = arith.divf %53, %54 : vector<8x128xf32>
    %56 = vector.extract_strided_slice %43 {offsets = [0, 256], sizes = [8, 128], strides = [1, 1]} : vector<8x512xf32> to vector<8x128xf32>
    %57 = math.tanh %56 : vector<8x128xf32>
    %58 = vector.extract_strided_slice %43 {offsets = [0, 384], sizes = [8, 128], strides = [1, 1]} : vector<8x512xf32> to vector<8x128xf32>
    %59 = arith.negf %58 : vector<8x128xf32>
    %60 = math.exp %59 : vector<8x128xf32>
    %cst_25 = arith.constant 1.000000e+00 : f32
    %61 = vector.broadcast %cst_25 : f32 to vector<8x128xf32>
    %62 = arith.addf %61, %60 : vector<8x128xf32>
    %63 = arith.divf %61, %62 : vector<8x128xf32>
    %64 = arith.mulf %55, %37 : vector<8x128xf32>
    %65 = arith.mulf %49, %57 : vector<8x128xf32>
    %66 = arith.addf %64, %65 : vector<8x128xf32>
    %67 = math.tanh %66 : vector<8x128xf32>
    %68 = arith.mulf %63, %67 : vector<8x128xf32>
    %c8_26 = arith.constant 8 : index
    %c0_27 = arith.constant 0 : index
    %69 = vector.load %arg8[%c8_26, %c0_27] : memref<64x128xf32, #tpu.memory_space<vmem>>, vector<8x128xf32>
    tpu.vector_store %arg8[%c8_26, %c0_27], %68 {strides = array<i32>} : memref<64x128xf32, #tpu.memory_space<vmem>>, vector<8x128xf32>,
    %c16 = arith.constant 16 : index
    %c0_28 = arith.constant 0 : index
    %70 = vector.load %arg9[%c16, %c0_28] : memref<64x512xf32, #tpu.memory_space<vmem>>, vector<8x512xf32>
    %cst_29 = arith.constant dense<0.000000e+00> : vector<8x512xf32>
    %71 = tpu.matmul %68, %11, %cst_29 {dimension_numbers = #tpu.dot_dimension_numbers<[1], [0], [0], [1], [0, 0, 1, 1], [], []>} : vector<8x128xf32>, vector<128x512xf32>, vector<8x512xf32> -> vector<8x512xf32>
    %72 = arith.addf %70, %71 : vector<8x512xf32>
    %73 = vector.extract_strided_slice %72 {offsets = [0, 0], sizes = [8, 128], strides = [1, 1]} : vector<8x512xf32> to vector<8x128xf32>
    %74 = arith.negf %73 : vector<8x128xf32>
    %75 = math.exp %74 : vector<8x128xf32>
    %cst_30 = arith.constant 1.000000e+00 : f32
    %76 = vector.broadcast %cst_30 : f32 to vector<8x128xf32>
    %77 = arith.addf %76, %75 : vector<8x128xf32>
    %78 = arith.divf %76, %77 : vector<8x128xf32>
    %79 = vector.extract_strided_slice %72 {offsets = [0, 128], sizes = [8, 128], strides = [1, 1]} : vector<8x512xf32> to vector<8x128xf32>
    %80 = arith.negf %79 : vector<8x128xf32>
    %81 = math.exp %80 : vector<8x128xf32>
    %cst_31 = arith.constant 1.000000e+00 : f32
    %82 = vector.broadcast %cst_31 : f32 to vector<8x128xf32>
    %83 = arith.addf %82, %81 : vector<8x128xf32>
    %84 = arith.divf %82, %83 : vector<8x128xf32>
    %85 = vector.extract_strided_slice %72 {offsets = [0, 256], sizes = [8, 128], strides = [1, 1]} : vector<8x512xf32> to vector<8x128xf32>
    %86 = math.tanh %85 : vector<8x128xf32>
    %87 = vector.extract_strided_slice %72 {offsets = [0, 384], sizes = [8, 128], strides = [1, 1]} : vector<8x512xf32> to vector<8x128xf32>
    %88 = arith.negf %87 : vector<8x128xf32>
    %89 = math.exp %88 : vector<8x128xf32>
    %cst_32 = arith.constant 1.000000e+00 : f32
    %90 = vector.broadcast %cst_32 : f32 to vector<8x128xf32>
    %91 = arith.addf %90, %89 : vector<8x128xf32>
    %92 = arith.divf %90, %91 : vector<8x128xf32>
    %93 = arith.mulf %84, %66 : vector<8x128xf32>
    %94 = arith.mulf %78, %86 : vector<8x128xf32>
    %95 = arith.addf %93, %94 : vector<8x128xf32>
    %96 = math.tanh %95 : vector<8x128xf32>
    %97 = arith.mulf %92, %96 : vector<8x128xf32>
    %c16_33 = arith.constant 16 : index
    %c0_34 = arith.constant 0 : index
    %98 = vector.load %arg8[%c16_33, %c0_34] : memref<64x128xf32, #tpu.memory_space<vmem>>, vector<8x128xf32>
    tpu.vector_store %arg8[%c16_33, %c0_34], %97 {strides = array<i32>} : memref<64x128xf32, #tpu.memory_space<vmem>>, vector<8x128xf32>,
    %c24 = arith.constant 24 : index
    %c0_35 = arith.constant 0 : index
    %99 = vector.load %arg9[%c24, %c0_35] : memref<64x512xf32, #tpu.memory_space<vmem>>, vector<8x512xf32>
    %cst_36 = arith.constant dense<0.000000e+00> : vector<8x512xf32>
    %100 = tpu.matmul %97, %11, %cst_36 {dimension_numbers = #tpu.dot_dimension_numbers<[1], [0], [0], [1], [0, 0, 1, 1], [], []>} : vector<8x128xf32>, vector<128x512xf32>, vector<8x512xf32> -> vector<8x512xf32>
    %101 = arith.addf %99, %100 : vector<8x512xf32>
    %102 = vector.extract_strided_slice %101 {offsets = [0, 0], sizes = [8, 128], strides = [1, 1]} : vector<8x512xf32> to vector<8x128xf32>
    %103 = arith.negf %102 : vector<8x128xf32>
    %104 = math.exp %103 : vector<8x128xf32>
    %cst_37 = arith.constant 1.000000e+00 : f32
    %105 = vector.broadcast %cst_37 : f32 to vector<8x128xf32>
    %106 = arith.addf %105, %104 : vector<8x128xf32>
    %107 = arith.divf %105, %106 : vector<8x128xf32>
    %108 = vector.extract_strided_slice %101 {offsets = [0, 128], sizes = [8, 128], strides = [1, 1]} : vector<8x512xf32> to vector<8x128xf32>
    %109 = arith.negf %108 : vector<8x128xf32>
    %110 = math.exp %109 : vector<8x128xf32>
    %cst_38 = arith.constant 1.000000e+00 : f32
    %111 = vector.broadcast %cst_38 : f32 to vector<8x128xf32>
    %112 = arith.addf %111, %110 : vector<8x128xf32>
    %113 = arith.divf %111, %112 : vector<8x128xf32>
    %114 = vector.extract_strided_slice %101 {offsets = [0, 256], sizes = [8, 128], strides = [1, 1]} : vector<8x512xf32> to vector<8x128xf32>
    %115 = math.tanh %114 : vector<8x128xf32>
    %116 = vector.extract_strided_slice %101 {offsets = [0, 384], sizes = [8, 128], strides = [1, 1]} : vector<8x512xf32> to vector<8x128xf32>
    %117 = arith.negf %116 : vector<8x128xf32>
    %118 = math.exp %117 : vector<8x128xf32>
    %cst_39 = arith.constant 1.000000e+00 : f32
    %119 = vector.broadcast %cst_39 : f32 to vector<8x128xf32>
    %120 = arith.addf %119, %118 : vector<8x128xf32>
    %121 = arith.divf %119, %120 : vector<8x128xf32>
    %122 = arith.mulf %113, %95 : vector<8x128xf32>
    %123 = arith.mulf %107, %115 : vector<8x128xf32>
    %124 = arith.addf %122, %123 : vector<8x128xf32>
    %125 = math.tanh %124 : vector<8x128xf32>
    %126 = arith.mulf %121, %125 : vector<8x128xf32>
    %c24_40 = arith.constant 24 : index
    %c0_41 = arith.constant 0 : index
    %127 = vector.load %arg8[%c24_40, %c0_41] : memref<64x128xf32, #tpu.memory_space<vmem>>, vector<8x128xf32>
    tpu.vector_store %arg8[%c24_40, %c0_41], %126 {strides = array<i32>} : memref<64x128xf32, #tpu.memory_space<vmem>>, vector<8x128xf32>,
    %c32 = arith.constant 32 : index
    %c0_42 = arith.constant 0 : index
    %128 = vector.load %arg9[%c32, %c0_42] : memref<64x512xf32, #tpu.memory_space<vmem>>, vector<8x512xf32>
    %cst_43 = arith.constant dense<0.000000e+00> : vector<8x512xf32>
    %129 = tpu.matmul %126, %11, %cst_43 {dimension_numbers = #tpu.dot_dimension_numbers<[1], [0], [0], [1], [0, 0, 1, 1], [], []>} : vector<8x128xf32>, vector<128x512xf32>, vector<8x512xf32> -> vector<8x512xf32>
    %130 = arith.addf %128, %129 : vector<8x512xf32>
    %131 = vector.extract_strided_slice %130 {offsets = [0, 0], sizes = [8, 128], strides = [1, 1]} : vector<8x512xf32> to vector<8x128xf32>
    %132 = arith.negf %131 : vector<8x128xf32>
    %133 = math.exp %132 : vector<8x128xf32>
    %cst_44 = arith.constant 1.000000e+00 : f32
    %134 = vector.broadcast %cst_44 : f32 to vector<8x128xf32>
    %135 = arith.addf %134, %133 : vector<8x128xf32>
    %136 = arith.divf %134, %135 : vector<8x128xf32>
    %137 = vector.extract_strided_slice %130 {offsets = [0, 128], sizes = [8, 128], strides = [1, 1]} : vector<8x512xf32> to vector<8x128xf32>
    %138 = arith.negf %137 : vector<8x128xf32>
    %139 = math.exp %138 : vector<8x128xf32>
    %cst_45 = arith.constant 1.000000e+00 : f32
    %140 = vector.broadcast %cst_45 : f32 to vector<8x128xf32>
    %141 = arith.addf %140, %139 : vector<8x128xf32>
    %142 = arith.divf %140, %141 : vector<8x128xf32>
    %143 = vector.extract_strided_slice %130 {offsets = [0, 256], sizes = [8, 128], strides = [1, 1]} : vector<8x512xf32> to vector<8x128xf32>
    %144 = math.tanh %143 : vector<8x128xf32>
    %145 = vector.extract_strided_slice %130 {offsets = [0, 384], sizes = [8, 128], strides = [1, 1]} : vector<8x512xf32> to vector<8x128xf32>
    %146 = arith.negf %145 : vector<8x128xf32>
    %147 = math.exp %146 : vector<8x128xf32>
    %cst_46 = arith.constant 1.000000e+00 : f32
    %148 = vector.broadcast %cst_46 : f32 to vector<8x128xf32>
    %149 = arith.addf %148, %147 : vector<8x128xf32>
    %150 = arith.divf %148, %149 : vector<8x128xf32>
    %151 = arith.mulf %142, %124 : vector<8x128xf32>
    %152 = arith.mulf %136, %144 : vector<8x128xf32>
    %153 = arith.addf %151, %152 : vector<8x128xf32>
    %154 = math.tanh %153 : vector<8x128xf32>
    %155 = arith.mulf %150, %154 : vector<8x128xf32>
    %c32_47 = arith.constant 32 : index
    %c0_48 = arith.constant 0 : index
    %156 = vector.load %arg8[%c32_47, %c0_48] : memref<64x128xf32, #tpu.memory_space<vmem>>, vector<8x128xf32>
    tpu.vector_store %arg8[%c32_47, %c0_48], %155 {strides = array<i32>} : memref<64x128xf32, #tpu.memory_space<vmem>>, vector<8x128xf32>,
    %c40 = arith.constant 40 : index
    %c0_49 = arith.constant 0 : index
    %157 = vector.load %arg9[%c40, %c0_49] : memref<64x512xf32, #tpu.memory_space<vmem>>, vector<8x512xf32>
    %cst_50 = arith.constant dense<0.000000e+00> : vector<8x512xf32>
    %158 = tpu.matmul %155, %11, %cst_50 {dimension_numbers = #tpu.dot_dimension_numbers<[1], [0], [0], [1], [0, 0, 1, 1], [], []>} : vector<8x128xf32>, vector<128x512xf32>, vector<8x512xf32> -> vector<8x512xf32>
    %159 = arith.addf %157, %158 : vector<8x512xf32>
    %160 = vector.extract_strided_slice %159 {offsets = [0, 0], sizes = [8, 128], strides = [1, 1]} : vector<8x512xf32> to vector<8x128xf32>
    %161 = arith.negf %160 : vector<8x128xf32>
    %162 = math.exp %161 : vector<8x128xf32>
    %cst_51 = arith.constant 1.000000e+00 : f32
    %163 = vector.broadcast %cst_51 : f32 to vector<8x128xf32>
    %164 = arith.addf %163, %162 : vector<8x128xf32>
    %165 = arith.divf %163, %164 : vector<8x128xf32>
    %166 = vector.extract_strided_slice %159 {offsets = [0, 128], sizes = [8, 128], strides = [1, 1]} : vector<8x512xf32> to vector<8x128xf32>
    %167 = arith.negf %166 : vector<8x128xf32>
    %168 = math.exp %167 : vector<8x128xf32>
    %cst_52 = arith.constant 1.000000e+00 : f32
    %169 = vector.broadcast %cst_52 : f32 to vector<8x128xf32>
    %170 = arith.addf %169, %168 : vector<8x128xf32>
    %171 = arith.divf %169, %170 : vector<8x128xf32>
    %172 = vector.extract_strided_slice %159 {offsets = [0, 256], sizes = [8, 128], strides = [1, 1]} : vector<8x512xf32> to vector<8x128xf32>
    %173 = math.tanh %172 : vector<8x128xf32>
    %174 = vector.extract_strided_slice %159 {offsets = [0, 384], sizes = [8, 128], strides = [1, 1]} : vector<8x512xf32> to vector<8x128xf32>
    %175 = arith.negf %174 : vector<8x128xf32>
    %176 = math.exp %175 : vector<8x128xf32>
    %cst_53 = arith.constant 1.000000e+00 : f32
    %177 = vector.broadcast %cst_53 : f32 to vector<8x128xf32>
    %178 = arith.addf %177, %176 : vector<8x128xf32>
    %179 = arith.divf %177, %178 : vector<8x128xf32>
    %180 = arith.mulf %171, %153 : vector<8x128xf32>
    %181 = arith.mulf %165, %173 : vector<8x128xf32>
    %182 = arith.addf %180, %181 : vector<8x128xf32>
    %183 = math.tanh %182 : vector<8x128xf32>
    %184 = arith.mulf %179, %183 : vector<8x128xf32>
    %c40_54 = arith.constant 40 : index
    %c0_55 = arith.constant 0 : index
    %185 = vector.load %arg8[%c40_54, %c0_55] : memref<64x128xf32, #tpu.memory_space<vmem>>, vector<8x128xf32>
    tpu.vector_store %arg8[%c40_54, %c0_55], %184 {strides = array<i32>} : memref<64x128xf32, #tpu.memory_space<vmem>>, vector<8x128xf32>,
    %c48 = arith.constant 48 : index
    %c0_56 = arith.constant 0 : index
    %186 = vector.load %arg9[%c48, %c0_56] : memref<64x512xf32, #tpu.memory_space<vmem>>, vector<8x512xf32>
    %cst_57 = arith.constant dense<0.000000e+00> : vector<8x512xf32>
    %187 = tpu.matmul %184, %11, %cst_57 {dimension_numbers = #tpu.dot_dimension_numbers<[1], [0], [0], [1], [0, 0, 1, 1], [], []>} : vector<8x128xf32>, vector<128x512xf32>, vector<8x512xf32> -> vector<8x512xf32>
    %188 = arith.addf %186, %187 : vector<8x512xf32>
    %189 = vector.extract_strided_slice %188 {offsets = [0, 0], sizes = [8, 128], strides = [1, 1]} : vector<8x512xf32> to vector<8x128xf32>
    %190 = arith.negf %189 : vector<8x128xf32>
    %191 = math.exp %190 : vector<8x128xf32>
    %cst_58 = arith.constant 1.000000e+00 : f32
    %192 = vector.broadcast %cst_58 : f32 to vector<8x128xf32>
    %193 = arith.addf %192, %191 : vector<8x128xf32>
    %194 = arith.divf %192, %193 : vector<8x128xf32>
    %195 = vector.extract_strided_slice %188 {offsets = [0, 128], sizes = [8, 128], strides = [1, 1]} : vector<8x512xf32> to vector<8x128xf32>
    %196 = arith.negf %195 : vector<8x128xf32>
    %197 = math.exp %196 : vector<8x128xf32>
    %cst_59 = arith.constant 1.000000e+00 : f32
    %198 = vector.broadcast %cst_59 : f32 to vector<8x128xf32>
    %199 = arith.addf %198, %197 : vector<8x128xf32>
    %200 = arith.divf %198, %199 : vector<8x128xf32>
    %201 = vector.extract_strided_slice %188 {offsets = [0, 256], sizes = [8, 128], strides = [1, 1]} : vector<8x512xf32> to vector<8x128xf32>
    %202 = math.tanh %201 : vector<8x128xf32>
    %203 = vector.extract_strided_slice %188 {offsets = [0, 384], sizes = [8, 128], strides = [1, 1]} : vector<8x512xf32> to vector<8x128xf32>
    %204 = arith.negf %203 : vector<8x128xf32>
    %205 = math.exp %204 : vector<8x128xf32>
    %cst_60 = arith.constant 1.000000e+00 : f32
    %206 = vector.broadcast %cst_60 : f32 to vector<8x128xf32>
    %207 = arith.addf %206, %205 : vector<8x128xf32>
    %208 = arith.divf %206, %207 : vector<8x128xf32>
    %209 = arith.mulf %200, %182 : vector<8x128xf32>
    %210 = arith.mulf %194, %202 : vector<8x128xf32>
    %211 = arith.addf %209, %210 : vector<8x128xf32>
    %212 = math.tanh %211 : vector<8x128xf32>
    %213 = arith.mulf %208, %212 : vector<8x128xf32>
    %c48_61 = arith.constant 48 : index
    %c0_62 = arith.constant 0 : index
    %214 = vector.load %arg8[%c48_61, %c0_62] : memref<64x128xf32, #tpu.memory_space<vmem>>, vector<8x128xf32>
    tpu.vector_store %arg8[%c48_61, %c0_62], %213 {strides = array<i32>} : memref<64x128xf32, #tpu.memory_space<vmem>>, vector<8x128xf32>,
    %c56 = arith.constant 56 : index
    %c0_63 = arith.constant 0 : index
    %215 = vector.load %arg9[%c56, %c0_63] : memref<64x512xf32, #tpu.memory_space<vmem>>, vector<8x512xf32>
    %cst_64 = arith.constant dense<0.000000e+00> : vector<8x512xf32>
    %216 = tpu.matmul %213, %11, %cst_64 {dimension_numbers = #tpu.dot_dimension_numbers<[1], [0], [0], [1], [0, 0, 1, 1], [], []>} : vector<8x128xf32>, vector<128x512xf32>, vector<8x512xf32> -> vector<8x512xf32>
    %217 = arith.addf %215, %216 : vector<8x512xf32>
    %218 = vector.extract_strided_slice %217 {offsets = [0, 0], sizes = [8, 128], strides = [1, 1]} : vector<8x512xf32> to vector<8x128xf32>
    %219 = arith.negf %218 : vector<8x128xf32>
    %220 = math.exp %219 : vector<8x128xf32>
    %cst_65 = arith.constant 1.000000e+00 : f32
    %221 = vector.broadcast %cst_65 : f32 to vector<8x128xf32>
    %222 = arith.addf %221, %220 : vector<8x128xf32>
    %223 = arith.divf %221, %222 : vector<8x128xf32>
    %224 = vector.extract_strided_slice %217 {offsets = [0, 128], sizes = [8, 128], strides = [1, 1]} : vector<8x512xf32> to vector<8x128xf32>
    %225 = arith.negf %224 : vector<8x128xf32>
    %226 = math.exp %225 : vector<8x128xf32>
    %cst_66 = arith.constant 1.000000e+00 : f32
    %227 = vector.broadcast %cst_66 : f32 to vector<8x128xf32>
    %228 = arith.addf %227, %226 : vector<8x128xf32>
    %229 = arith.divf %227, %228 : vector<8x128xf32>
    %230 = vector.extract_strided_slice %217 {offsets = [0, 256], sizes = [8, 128], strides = [1, 1]} : vector<8x512xf32> to vector<8x128xf32>
    %231 = math.tanh %230 : vector<8x128xf32>
    %232 = vector.extract_strided_slice %217 {offsets = [0, 384], sizes = [8, 128], strides = [1, 1]} : vector<8x512xf32> to vector<8x128xf32>
    %233 = arith.negf %232 : vector<8x128xf32>
    %234 = math.exp %233 : vector<8x128xf32>
    %cst_67 = arith.constant 1.000000e+00 : f32
    %235 = vector.broadcast %cst_67 : f32 to vector<8x128xf32>
    %236 = arith.addf %235, %234 : vector<8x128xf32>
    %237 = arith.divf %235, %236 : vector<8x128xf32>
    %238 = arith.mulf %229, %211 : vector<8x128xf32>
    %239 = arith.mulf %223, %231 : vector<8x128xf32>
    %240 = arith.addf %238, %239 : vector<8x128xf32>
    %241 = math.tanh %240 : vector<8x128xf32>
    %242 = arith.mulf %237, %241 : vector<8x128xf32>
    %c56_68 = arith.constant 56 : index
    %c0_69 = arith.constant 0 : index
    %243 = vector.load %arg8[%c56_68, %c0_69] : memref<64x128xf32, #tpu.memory_space<vmem>>, vector<8x128xf32>
    tpu.vector_store %arg8[%c56_68, %c0_69], %242 {strides = array<i32>} : memref<64x128xf32, #tpu.memory_space<vmem>>, vector<8x128xf32>,
    %c0_70 = arith.constant 0 : index
    %c0_71 = arith.constant 0 : index
    %244 = vector.load %arg8[%c0_70, %c0_71] : memref<64x128xf32, #tpu.memory_space<vmem>>, vector<64x128xf32>
    %c0_72 = arith.constant 0 : index
    %c0_73 = arith.constant 0 : index
    %c0_74 = arith.constant 0 : index
    %245 = vector.load %arg3[%c0_72, %c0_73, %c0_74] : memref<4x128x512xf32, #tpu.memory_space<vmem>>, vector<1x128x512xf32>
    %246 = vector.shape_cast %245 : vector<1x128x512xf32> to vector<128x512xf32>
    %cst_75 = arith.constant dense<0.000000e+00> : vector<64x512xf32>
    %247 = tpu.matmul %244, %246, %cst_75 {dimension_numbers = #tpu.dot_dimension_numbers<[1], [0], [0], [1], [0, 0, 1, 1], [], []>} : vector<64x128xf32>, vector<128x512xf32>, vector<64x512xf32> -> vector<64x512xf32>
    %c1 = arith.constant 1 : index
    %c0_76 = arith.constant 0 : index
    %c0_77 = arith.constant 0 : index
    %248 = vector.load %arg4[%c1, %c0_76, %c0_77] : memref<5x1x512xf32, #tpu.memory_space<vmem>>, vector<1x1x512xf32>
    %249 = vector.shape_cast %248 : vector<1x1x512xf32> to vector<1x512xf32>
    %250 = vector.broadcast %249 : vector<1x512xf32> to vector<64x512xf32>
    %251 = arith.addf %247, %250 : vector<64x512xf32>
    %c0_78 = arith.constant 0 : index
    %c0_79 = arith.constant 0 : index
    %252 = vector.load %arg9[%c0_78, %c0_79] : memref<64x512xf32, #tpu.memory_space<vmem>>, vector<64x512xf32>
    tpu.vector_store %arg9[%c0_78, %c0_79], %251 {strides = array<i32>} : memref<64x512xf32, #tpu.memory_space<vmem>>, vector<64x512xf32>,
    %cst_80 = arith.constant 0.000000e+00 : f32
    %253 = vector.broadcast %cst_80 : f32 to vector<8x128xf32>
    %cst_81 = arith.constant 0.000000e+00 : f32
    %254 = vector.broadcast %cst_81 : f32 to vector<8x128xf32>
    %c1_82 = arith.constant 1 : index
    %c0_83 = arith.constant 0 : index
    %c0_84 = arith.constant 0 : index
    %255 = vector.load %arg2[%c1_82, %c0_83, %c0_84] : memref<5x128x512xf32, #tpu.memory_space<vmem>>, vector<1x128x512xf32>
    %256 = vector.shape_cast %255 : vector<1x128x512xf32> to vector<128x512xf32>
    %c0_85 = arith.constant 0 : index
    %c0_86 = arith.constant 0 : index
    %257 = vector.load %arg9[%c0_85, %c0_86] : memref<64x512xf32, #tpu.memory_space<vmem>>, vector<8x512xf32>
    %cst_87 = arith.constant dense<0.000000e+00> : vector<8x512xf32>
    %258 = tpu.matmul %253, %256, %cst_87 {dimension_numbers = #tpu.dot_dimension_numbers<[1], [0], [0], [1], [0, 0, 1, 1], [], []>} : vector<8x128xf32>, vector<128x512xf32>, vector<8x512xf32> -> vector<8x512xf32>
    %259 = arith.addf %257, %258 : vector<8x512xf32>
    %260 = vector.extract_strided_slice %259 {offsets = [0, 0], sizes = [8, 128], strides = [1, 1]} : vector<8x512xf32> to vector<8x128xf32>
    %261 = arith.negf %260 : vector<8x128xf32>
    %262 = math.exp %261 : vector<8x128xf32>
    %cst_88 = arith.constant 1.000000e+00 : f32
    %263 = vector.broadcast %cst_88 : f32 to vector<8x128xf32>
    %264 = arith.addf %263, %262 : vector<8x128xf32>
    %265 = arith.divf %263, %264 : vector<8x128xf32>
    %266 = vector.extract_strided_slice %259 {offsets = [0, 128], sizes = [8, 128], strides = [1, 1]} : vector<8x512xf32> to vector<8x128xf32>
    %267 = arith.negf %266 : vector<8x128xf32>
    %268 = math.exp %267 : vector<8x128xf32>
    %cst_89 = arith.constant 1.000000e+00 : f32
    %269 = vector.broadcast %cst_89 : f32 to vector<8x128xf32>
    %270 = arith.addf %269, %268 : vector<8x128xf32>
    %271 = arith.divf %269, %270 : vector<8x128xf32>
    %272 = vector.extract_strided_slice %259 {offsets = [0, 256], sizes = [8, 128], strides = [1, 1]} : vector<8x512xf32> to vector<8x128xf32>
    %273 = math.tanh %272 : vector<8x128xf32>
    %274 = vector.extract_strided_slice %259 {offsets = [0, 384], sizes = [8, 128], strides = [1, 1]} : vector<8x512xf32> to vector<8x128xf32>
    %275 = arith.negf %274 : vector<8x128xf32>
    %276 = math.exp %275 : vector<8x128xf32>
    %cst_90 = arith.constant 1.000000e+00 : f32
    %277 = vector.broadcast %cst_90 : f32 to vector<8x128xf32>
    %278 = arith.addf %277, %276 : vector<8x128xf32>
    %279 = arith.divf %277, %278 : vector<8x128xf32>
    %280 = arith.mulf %271, %254 : vector<8x128xf32>
    %281 = arith.mulf %265, %273 : vector<8x128xf32>
    %282 = arith.addf %280, %281 : vector<8x128xf32>
    %283 = math.tanh %282 : vector<8x128xf32>
    %284 = arith.mulf %279, %283 : vector<8x128xf32>
    %c0_91 = arith.constant 0 : index
    %c0_92 = arith.constant 0 : index
    %285 = vector.load %arg8[%c0_91, %c0_92] : memref<64x128xf32, #tpu.memory_space<vmem>>, vector<8x128xf32>
    tpu.vector_store %arg8[%c0_91, %c0_92], %284 {strides = array<i32>} : memref<64x128xf32, #tpu.memory_space<vmem>>, vector<8x128xf32>,
    %c8_93 = arith.constant 8 : index
    %c0_94 = arith.constant 0 : index
    %286 = vector.load %arg9[%c8_93, %c0_94] : memref<64x512xf32, #tpu.memory_space<vmem>>, vector<8x512xf32>
    %cst_95 = arith.constant dense<0.000000e+00> : vector<8x512xf32>
    %287 = tpu.matmul %284, %256, %cst_95 {dimension_numbers = #tpu.dot_dimension_numbers<[1], [0], [0], [1], [0, 0, 1, 1], [], []>} : vector<8x128xf32>, vector<128x512xf32>, vector<8x512xf32> -> vector<8x512xf32>
    %288 = arith.addf %286, %287 : vector<8x512xf32>
    %289 = vector.extract_strided_slice %288 {offsets = [0, 0], sizes = [8, 128], strides = [1, 1]} : vector<8x512xf32> to vector<8x128xf32>
    %290 = arith.negf %289 : vector<8x128xf32>
    %291 = math.exp %290 : vector<8x128xf32>
    %cst_96 = arith.constant 1.000000e+00 : f32
    %292 = vector.broadcast %cst_96 : f32 to vector<8x128xf32>
    %293 = arith.addf %292, %291 : vector<8x128xf32>
    %294 = arith.divf %292, %293 : vector<8x128xf32>
    %295 = vector.extract_strided_slice %288 {offsets = [0, 128], sizes = [8, 128], strides = [1, 1]} : vector<8x512xf32> to vector<8x128xf32>
    %296 = arith.negf %295 : vector<8x128xf32>
    %297 = math.exp %296 : vector<8x128xf32>
    %cst_97 = arith.constant 1.000000e+00 : f32
    %298 = vector.broadcast %cst_97 : f32 to vector<8x128xf32>
    %299 = arith.addf %298, %297 : vector<8x128xf32>
    %300 = arith.divf %298, %299 : vector<8x128xf32>
    %301 = vector.extract_strided_slice %288 {offsets = [0, 256], sizes = [8, 128], strides = [1, 1]} : vector<8x512xf32> to vector<8x128xf32>
    %302 = math.tanh %301 : vector<8x128xf32>
    %303 = vector.extract_strided_slice %288 {offsets = [0, 384], sizes = [8, 128], strides = [1, 1]} : vector<8x512xf32> to vector<8x128xf32>
    %304 = arith.negf %303 : vector<8x128xf32>
    %305 = math.exp %304 : vector<8x128xf32>
    %cst_98 = arith.constant 1.000000e+00 : f32
    %306 = vector.broadcast %cst_98 : f32 to vector<8x128xf32>
    %307 = arith.addf %306, %305 : vector<8x128xf32>
    %308 = arith.divf %306, %307 : vector<8x128xf32>
    %309 = arith.mulf %300, %282 : vector<8x128xf32>
    %310 = arith.mulf %294, %302 : vector<8x128xf32>
    %311 = arith.addf %309, %310 : vector<8x128xf32>
    %312 = math.tanh %311 : vector<8x128xf32>
    %313 = arith.mulf %308, %312 : vector<8x128xf32>
    %c8_99 = arith.constant 8 : index
    %c0_100 = arith.constant 0 : index
    %314 = vector.load %arg8[%c8_99, %c0_100] : memref<64x128xf32, #tpu.memory_space<vmem>>, vector<8x128xf32>
    tpu.vector_store %arg8[%c8_99, %c0_100], %313 {strides = array<i32>} : memref<64x128xf32, #tpu.memory_space<vmem>>, vector<8x128xf32>,
    %c16_101 = arith.constant 16 : index
    %c0_102 = arith.constant 0 : index
    %315 = vector.load %arg9[%c16_101, %c0_102] : memref<64x512xf32, #tpu.memory_space<vmem>>, vector<8x512xf32>
    %cst_103 = arith.constant dense<0.000000e+00> : vector<8x512xf32>
    %316 = tpu.matmul %313, %256, %cst_103 {dimension_numbers = #tpu.dot_dimension_numbers<[1], [0], [0], [1], [0, 0, 1, 1], [], []>} : vector<8x128xf32>, vector<128x512xf32>, vector<8x512xf32> -> vector<8x512xf32>
    %317 = arith.addf %315, %316 : vector<8x512xf32>
    %318 = vector.extract_strided_slice %317 {offsets = [0, 0], sizes = [8, 128], strides = [1, 1]} : vector<8x512xf32> to vector<8x128xf32>
    %319 = arith.negf %318 : vector<8x128xf32>
    %320 = math.exp %319 : vector<8x128xf32>
    %cst_104 = arith.constant 1.000000e+00 : f32
    %321 = vector.broadcast %cst_104 : f32 to vector<8x128xf32>
    %322 = arith.addf %321, %320 : vector<8x128xf32>
    %323 = arith.divf %321, %322 : vector<8x128xf32>
    %324 = vector.extract_strided_slice %317 {offsets = [0, 128], sizes = [8, 128], strides = [1, 1]} : vector<8x512xf32> to vector<8x128xf32>
    %325 = arith.negf %324 : vector<8x128xf32>
    %326 = math.exp %325 : vector<8x128xf32>
    %cst_105 = arith.constant 1.000000e+00 : f32
    %327 = vector.broadcast %cst_105 : f32 to vector<8x128xf32>
    %328 = arith.addf %327, %326 : vector<8x128xf32>
    %329 = arith.divf %327, %328 : vector<8x128xf32>
    %330 = vector.extract_strided_slice %317 {offsets = [0, 256], sizes = [8, 128], strides = [1, 1]} : vector<8x512xf32> to vector<8x128xf32>
    %331 = math.tanh %330 : vector<8x128xf32>
    %332 = vector.extract_strided_slice %317 {offsets = [0, 384], sizes = [8, 128], strides = [1, 1]} : vector<8x512xf32> to vector<8x128xf32>
    %333 = arith.negf %332 : vector<8x128xf32>
    %334 = math.exp %333 : vector<8x128xf32>
    %cst_106 = arith.constant 1.000000e+00 : f32
    %335 = vector.broadcast %cst_106 : f32 to vector<8x128xf32>
    %336 = arith.addf %335, %334 : vector<8x128xf32>
    %337 = arith.divf %335, %336 : vector<8x128xf32>
    %338 = arith.mulf %329, %311 : vector<8x128xf32>
    %339 = arith.mulf %323, %331 : vector<8x128xf32>
    %340 = arith.addf %338, %339 : vector<8x128xf32>
    %341 = math.tanh %340 : vector<8x128xf32>
    %342 = arith.mulf %337, %341 : vector<8x128xf32>
    %c16_107 = arith.constant 16 : index
    %c0_108 = arith.constant 0 : index
    %343 = vector.load %arg8[%c16_107, %c0_108] : memref<64x128xf32, #tpu.memory_space<vmem>>, vector<8x128xf32>
    tpu.vector_store %arg8[%c16_107, %c0_108], %342 {strides = array<i32>} : memref<64x128xf32, #tpu.memory_space<vmem>>, vector<8x128xf32>,
    %c24_109 = arith.constant 24 : index
    %c0_110 = arith.constant 0 : index
    %344 = vector.load %arg9[%c24_109, %c0_110] : memref<64x512xf32, #tpu.memory_space<vmem>>, vector<8x512xf32>
    %cst_111 = arith.constant dense<0.000000e+00> : vector<8x512xf32>
    %345 = tpu.matmul %342, %256, %cst_111 {dimension_numbers = #tpu.dot_dimension_numbers<[1], [0], [0], [1], [0, 0, 1, 1], [], []>} : vector<8x128xf32>, vector<128x512xf32>, vector<8x512xf32> -> vector<8x512xf32>
    %346 = arith.addf %344, %345 : vector<8x512xf32>
    %347 = vector.extract_strided_slice %346 {offsets = [0, 0], sizes = [8, 128], strides = [1, 1]} : vector<8x512xf32> to vector<8x128xf32>
    %348 = arith.negf %347 : vector<8x128xf32>
    %349 = math.exp %348 : vector<8x128xf32>
    %cst_112 = arith.constant 1.000000e+00 : f32
    %350 = vector.broadcast %cst_112 : f32 to vector<8x128xf32>
    %351 = arith.addf %350, %349 : vector<8x128xf32>
    %352 = arith.divf %350, %351 : vector<8x128xf32>
    %353 = vector.extract_strided_slice %346 {offsets = [0, 128], sizes = [8, 128], strides = [1, 1]} : vector<8x512xf32> to vector<8x128xf32>
    %354 = arith.negf %353 : vector<8x128xf32>
    %355 = math.exp %354 : vector<8x128xf32>
    %cst_113 = arith.constant 1.000000e+00 : f32
    %356 = vector.broadcast %cst_113 : f32 to vector<8x128xf32>
    %357 = arith.addf %356, %355 : vector<8x128xf32>
    %358 = arith.divf %356, %357 : vector<8x128xf32>
    %359 = vector.extract_strided_slice %346 {offsets = [0, 256], sizes = [8, 128], strides = [1, 1]} : vector<8x512xf32> to vector<8x128xf32>
    %360 = math.tanh %359 : vector<8x128xf32>
    %361 = vector.extract_strided_slice %346 {offsets = [0, 384], sizes = [8, 128], strides = [1, 1]} : vector<8x512xf32> to vector<8x128xf32>
    %362 = arith.negf %361 : vector<8x128xf32>
    %363 = math.exp %362 : vector<8x128xf32>
    %cst_114 = arith.constant 1.000000e+00 : f32
    %364 = vector.broadcast %cst_114 : f32 to vector<8x128xf32>
    %365 = arith.addf %364, %363 : vector<8x128xf32>
    %366 = arith.divf %364, %365 : vector<8x128xf32>
    %367 = arith.mulf %358, %340 : vector<8x128xf32>
    %368 = arith.mulf %352, %360 : vector<8x128xf32>
    %369 = arith.addf %367, %368 : vector<8x128xf32>
    %370 = math.tanh %369 : vector<8x128xf32>
    %371 = arith.mulf %366, %370 : vector<8x128xf32>
    %c24_115 = arith.constant 24 : index
    %c0_116 = arith.constant 0 : index
    %372 = vector.load %arg8[%c24_115, %c0_116] : memref<64x128xf32, #tpu.memory_space<vmem>>, vector<8x128xf32>
    tpu.vector_store %arg8[%c24_115, %c0_116], %371 {strides = array<i32>} : memref<64x128xf32, #tpu.memory_space<vmem>>, vector<8x128xf32>,
    %c32_117 = arith.constant 32 : index
    %c0_118 = arith.constant 0 : index
    %373 = vector.load %arg9[%c32_117, %c0_118] : memref<64x512xf32, #tpu.memory_space<vmem>>, vector<8x512xf32>
    %cst_119 = arith.constant dense<0.000000e+00> : vector<8x512xf32>
    %374 = tpu.matmul %371, %256, %cst_119 {dimension_numbers = #tpu.dot_dimension_numbers<[1], [0], [0], [1], [0, 0, 1, 1], [], []>} : vector<8x128xf32>, vector<128x512xf32>, vector<8x512xf32> -> vector<8x512xf32>
    %375 = arith.addf %373, %374 : vector<8x512xf32>
    %376 = vector.extract_strided_slice %375 {offsets = [0, 0], sizes = [8, 128], strides = [1, 1]} : vector<8x512xf32> to vector<8x128xf32>
    %377 = arith.negf %376 : vector<8x128xf32>
    %378 = math.exp %377 : vector<8x128xf32>
    %cst_120 = arith.constant 1.000000e+00 : f32
    %379 = vector.broadcast %cst_120 : f32 to vector<8x128xf32>
    %380 = arith.addf %379, %378 : vector<8x128xf32>
    %381 = arith.divf %379, %380 : vector<8x128xf32>
    %382 = vector.extract_strided_slice %375 {offsets = [0, 128], sizes = [8, 128], strides = [1, 1]} : vector<8x512xf32> to vector<8x128xf32>
    %383 = arith.negf %382 : vector<8x128xf32>
    %384 = math.exp %383 : vector<8x128xf32>
    %cst_121 = arith.constant 1.000000e+00 : f32
    %385 = vector.broadcast %cst_121 : f32 to vector<8x128xf32>
    %386 = arith.addf %385, %384 : vector<8x128xf32>
    %387 = arith.divf %385, %386 : vector<8x128xf32>
    %388 = vector.extract_strided_slice %375 {offsets = [0, 256], sizes = [8, 128], strides = [1, 1]} : vector<8x512xf32> to vector<8x128xf32>
    %389 = math.tanh %388 : vector<8x128xf32>
    %390 = vector.extract_strided_slice %375 {offsets = [0, 384], sizes = [8, 128], strides = [1, 1]} : vector<8x512xf32> to vector<8x128xf32>
    %391 = arith.negf %390 : vector<8x128xf32>
    %392 = math.exp %391 : vector<8x128xf32>
    %cst_122 = arith.constant 1.000000e+00 : f32
    %393 = vector.broadcast %cst_122 : f32 to vector<8x128xf32>
    %394 = arith.addf %393, %392 : vector<8x128xf32>
    %395 = arith.divf %393, %394 : vector<8x128xf32>
    %396 = arith.mulf %387, %369 : vector<8x128xf32>
    %397 = arith.mulf %381, %389 : vector<8x128xf32>
    %398 = arith.addf %396, %397 : vector<8x128xf32>
    %399 = math.tanh %398 : vector<8x128xf32>
    %400 = arith.mulf %395, %399 : vector<8x128xf32>
    %c32_123 = arith.constant 32 : index
    %c0_124 = arith.constant 0 : index
    %401 = vector.load %arg8[%c32_123, %c0_124] : memref<64x128xf32, #tpu.memory_space<vmem>>, vector<8x128xf32>
    tpu.vector_store %arg8[%c32_123, %c0_124], %400 {strides = array<i32>} : memref<64x128xf32, #tpu.memory_space<vmem>>, vector<8x128xf32>,
    %c40_125 = arith.constant 40 : index
    %c0_126 = arith.constant 0 : index
    %402 = vector.load %arg9[%c40_125, %c0_126] : memref<64x512xf32, #tpu.memory_space<vmem>>, vector<8x512xf32>
    %cst_127 = arith.constant dense<0.000000e+00> : vector<8x512xf32>
    %403 = tpu.matmul %400, %256, %cst_127 {dimension_numbers = #tpu.dot_dimension_numbers<[1], [0], [0], [1], [0, 0, 1, 1], [], []>} : vector<8x128xf32>, vector<128x512xf32>, vector<8x512xf32> -> vector<8x512xf32>
    %404 = arith.addf %402, %403 : vector<8x512xf32>
    %405 = vector.extract_strided_slice %404 {offsets = [0, 0], sizes = [8, 128], strides = [1, 1]} : vector<8x512xf32> to vector<8x128xf32>
    %406 = arith.negf %405 : vector<8x128xf32>
    %407 = math.exp %406 : vector<8x128xf32>
    %cst_128 = arith.constant 1.000000e+00 : f32
    %408 = vector.broadcast %cst_128 : f32 to vector<8x128xf32>
    %409 = arith.addf %408, %407 : vector<8x128xf32>
    %410 = arith.divf %408, %409 : vector<8x128xf32>
    %411 = vector.extract_strided_slice %404 {offsets = [0, 128], sizes = [8, 128], strides = [1, 1]} : vector<8x512xf32> to vector<8x128xf32>
    %412 = arith.negf %411 : vector<8x128xf32>
    %413 = math.exp %412 : vector<8x128xf32>
    %cst_129 = arith.constant 1.000000e+00 : f32
    %414 = vector.broadcast %cst_129 : f32 to vector<8x128xf32>
    %415 = arith.addf %414, %413 : vector<8x128xf32>
    %416 = arith.divf %414, %415 : vector<8x128xf32>
    %417 = vector.extract_strided_slice %404 {offsets = [0, 256], sizes = [8, 128], strides = [1, 1]} : vector<8x512xf32> to vector<8x128xf32>
    %418 = math.tanh %417 : vector<8x128xf32>
    %419 = vector.extract_strided_slice %404 {offsets = [0, 384], sizes = [8, 128], strides = [1, 1]} : vector<8x512xf32> to vector<8x128xf32>
    %420 = arith.negf %419 : vector<8x128xf32>
    %421 = math.exp %420 : vector<8x128xf32>
    %cst_130 = arith.constant 1.000000e+00 : f32
    %422 = vector.broadcast %cst_130 : f32 to vector<8x128xf32>
    %423 = arith.addf %422, %421 : vector<8x128xf32>
    %424 = arith.divf %422, %423 : vector<8x128xf32>
    %425 = arith.mulf %416, %398 : vector<8x128xf32>
    %426 = arith.mulf %410, %418 : vector<8x128xf32>
    %427 = arith.addf %425, %426 : vector<8x128xf32>
    %428 = math.tanh %427 : vector<8x128xf32>
    %429 = arith.mulf %424, %428 : vector<8x128xf32>
    %c40_131 = arith.constant 40 : index
    %c0_132 = arith.constant 0 : index
    %430 = vector.load %arg8[%c40_131, %c0_132] : memref<64x128xf32, #tpu.memory_space<vmem>>, vector<8x128xf32>
    tpu.vector_store %arg8[%c40_131, %c0_132], %429 {strides = array<i32>} : memref<64x128xf32, #tpu.memory_space<vmem>>, vector<8x128xf32>,
    %c48_133 = arith.constant 48 : index
    %c0_134 = arith.constant 0 : index
    %431 = vector.load %arg9[%c48_133, %c0_134] : memref<64x512xf32, #tpu.memory_space<vmem>>, vector<8x512xf32>
    %cst_135 = arith.constant dense<0.000000e+00> : vector<8x512xf32>
    %432 = tpu.matmul %429, %256, %cst_135 {dimension_numbers = #tpu.dot_dimension_numbers<[1], [0], [0], [1], [0, 0, 1, 1], [], []>} : vector<8x128xf32>, vector<128x512xf32>, vector<8x512xf32> -> vector<8x512xf32>
    %433 = arith.addf %431, %432 : vector<8x512xf32>
    %434 = vector.extract_strided_slice %433 {offsets = [0, 0], sizes = [8, 128], strides = [1, 1]} : vector<8x512xf32> to vector<8x128xf32>
    %435 = arith.negf %434 : vector<8x128xf32>
    %436 = math.exp %435 : vector<8x128xf32>
    %cst_136 = arith.constant 1.000000e+00 : f32
    %437 = vector.broadcast %cst_136 : f32 to vector<8x128xf32>
    %438 = arith.addf %437, %436 : vector<8x128xf32>
    %439 = arith.divf %437, %438 : vector<8x128xf32>
    %440 = vector.extract_strided_slice %433 {offsets = [0, 128], sizes = [8, 128], strides = [1, 1]} : vector<8x512xf32> to vector<8x128xf32>
    %441 = arith.negf %440 : vector<8x128xf32>
    %442 = math.exp %441 : vector<8x128xf32>
    %cst_137 = arith.constant 1.000000e+00 : f32
    %443 = vector.broadcast %cst_137 : f32 to vector<8x128xf32>
    %444 = arith.addf %443, %442 : vector<8x128xf32>
    %445 = arith.divf %443, %444 : vector<8x128xf32>
    %446 = vector.extract_strided_slice %433 {offsets = [0, 256], sizes = [8, 128], strides = [1, 1]} : vector<8x512xf32> to vector<8x128xf32>
    %447 = math.tanh %446 : vector<8x128xf32>
    %448 = vector.extract_strided_slice %433 {offsets = [0, 384], sizes = [8, 128], strides = [1, 1]} : vector<8x512xf32> to vector<8x128xf32>
    %449 = arith.negf %448 : vector<8x128xf32>
    %450 = math.exp %449 : vector<8x128xf32>
    %cst_138 = arith.constant 1.000000e+00 : f32
    %451 = vector.broadcast %cst_138 : f32 to vector<8x128xf32>
    %452 = arith.addf %451, %450 : vector<8x128xf32>
    %453 = arith.divf %451, %452 : vector<8x128xf32>
    %454 = arith.mulf %445, %427 : vector<8x128xf32>
    %455 = arith.mulf %439, %447 : vector<8x128xf32>
    %456 = arith.addf %454, %455 : vector<8x128xf32>
    %457 = math.tanh %456 : vector<8x128xf32>
    %458 = arith.mulf %453, %457 : vector<8x128xf32>
    %c48_139 = arith.constant 48 : index
    %c0_140 = arith.constant 0 : index
    %459 = vector.load %arg8[%c48_139, %c0_140] : memref<64x128xf32, #tpu.memory_space<vmem>>, vector<8x128xf32>
    tpu.vector_store %arg8[%c48_139, %c0_140], %458 {strides = array<i32>} : memref<64x128xf32, #tpu.memory_space<vmem>>, vector<8x128xf32>,
    %c56_141 = arith.constant 56 : index
    %c0_142 = arith.constant 0 : index
    %460 = vector.load %arg9[%c56_141, %c0_142] : memref<64x512xf32, #tpu.memory_space<vmem>>, vector<8x512xf32>
    %cst_143 = arith.constant dense<0.000000e+00> : vector<8x512xf32>
    %461 = tpu.matmul %458, %256, %cst_143 {dimension_numbers = #tpu.dot_dimension_numbers<[1], [0], [0], [1], [0, 0, 1, 1], [], []>} : vector<8x128xf32>, vector<128x512xf32>, vector<8x512xf32> -> vector<8x512xf32>
    %462 = arith.addf %460, %461 : vector<8x512xf32>
    %463 = vector.extract_strided_slice %462 {offsets = [0, 0], sizes = [8, 128], strides = [1, 1]} : vector<8x512xf32> to vector<8x128xf32>
    %464 = arith.negf %463 : vector<8x128xf32>
    %465 = math.exp %464 : vector<8x128xf32>
    %cst_144 = arith.constant 1.000000e+00 : f32
    %466 = vector.broadcast %cst_144 : f32 to vector<8x128xf32>
    %467 = arith.addf %466, %465 : vector<8x128xf32>
    %468 = arith.divf %466, %467 : vector<8x128xf32>
    %469 = vector.extract_strided_slice %462 {offsets = [0, 128], sizes = [8, 128], strides = [1, 1]} : vector<8x512xf32> to vector<8x128xf32>
    %470 = arith.negf %469 : vector<8x128xf32>
    %471 = math.exp %470 : vector<8x128xf32>
    %cst_145 = arith.constant 1.000000e+00 : f32
    %472 = vector.broadcast %cst_145 : f32 to vector<8x128xf32>
    %473 = arith.addf %472, %471 : vector<8x128xf32>
    %474 = arith.divf %472, %473 : vector<8x128xf32>
    %475 = vector.extract_strided_slice %462 {offsets = [0, 256], sizes = [8, 128], strides = [1, 1]} : vector<8x512xf32> to vector<8x128xf32>
    %476 = math.tanh %475 : vector<8x128xf32>
    %477 = vector.extract_strided_slice %462 {offsets = [0, 384], sizes = [8, 128], strides = [1, 1]} : vector<8x512xf32> to vector<8x128xf32>
    %478 = arith.negf %477 : vector<8x128xf32>
    %479 = math.exp %478 : vector<8x128xf32>
    %cst_146 = arith.constant 1.000000e+00 : f32
    %480 = vector.broadcast %cst_146 : f32 to vector<8x128xf32>
    %481 = arith.addf %480, %479 : vector<8x128xf32>
    %482 = arith.divf %480, %481 : vector<8x128xf32>
    %483 = arith.mulf %474, %456 : vector<8x128xf32>
    %484 = arith.mulf %468, %476 : vector<8x128xf32>
    %485 = arith.addf %483, %484 : vector<8x128xf32>
    %486 = math.tanh %485 : vector<8x128xf32>
    %487 = arith.mulf %482, %486 : vector<8x128xf32>
    %c56_147 = arith.constant 56 : index
    %c0_148 = arith.constant 0 : index
    %488 = vector.load %arg8[%c56_147, %c0_148] : memref<64x128xf32, #tpu.memory_space<vmem>>, vector<8x128xf32>
    tpu.vector_store %arg8[%c56_147, %c0_148], %487 {strides = array<i32>} : memref<64x128xf32, #tpu.memory_space<vmem>>, vector<8x128xf32>,
    %c0_149 = arith.constant 0 : index
    %c0_150 = arith.constant 0 : index
    %489 = vector.load %arg8[%c0_149, %c0_150] : memref<64x128xf32, #tpu.memory_space<vmem>>, vector<64x128xf32>
    %c1_151 = arith.constant 1 : index
    %c0_152 = arith.constant 0 : index
    %c0_153 = arith.constant 0 : index
    %490 = vector.load %arg3[%c1_151, %c0_152, %c0_153] : memref<4x128x512xf32, #tpu.memory_space<vmem>>, vector<1x128x512xf32>
    %491 = vector.shape_cast %490 : vector<1x128x512xf32> to vector<128x512xf32>
    %cst_154 = arith.constant dense<0.000000e+00> : vector<64x512xf32>
    %492 = tpu.matmul %489, %491, %cst_154 {dimension_numbers = #tpu.dot_dimension_numbers<[1], [0], [0], [1], [0, 0, 1, 1], [], []>} : vector<64x128xf32>, vector<128x512xf32>, vector<64x512xf32> -> vector<64x512xf32>
    %c2 = arith.constant 2 : index
    %c0_155 = arith.constant 0 : index
    %c0_156 = arith.constant 0 : index
    %493 = vector.load %arg4[%c2, %c0_155, %c0_156] : memref<5x1x512xf32, #tpu.memory_space<vmem>>, vector<1x1x512xf32>
    %494 = vector.shape_cast %493 : vector<1x1x512xf32> to vector<1x512xf32>
    %495 = vector.broadcast %494 : vector<1x512xf32> to vector<64x512xf32>
    %496 = arith.addf %492, %495 : vector<64x512xf32>
    %c0_157 = arith.constant 0 : index
    %c0_158 = arith.constant 0 : index
    %497 = vector.load %arg9[%c0_157, %c0_158] : memref<64x512xf32, #tpu.memory_space<vmem>>, vector<64x512xf32>
    tpu.vector_store %arg9[%c0_157, %c0_158], %496 {strides = array<i32>} : memref<64x512xf32, #tpu.memory_space<vmem>>, vector<64x512xf32>,
    %cst_159 = arith.constant 0.000000e+00 : f32
    %498 = vector.broadcast %cst_159 : f32 to vector<8x128xf32>
    %cst_160 = arith.constant 0.000000e+00 : f32
    %499 = vector.broadcast %cst_160 : f32 to vector<8x128xf32>
    %c2_161 = arith.constant 2 : index
    %c0_162 = arith.constant 0 : index
    %c0_163 = arith.constant 0 : index
    %500 = vector.load %arg2[%c2_161, %c0_162, %c0_163] : memref<5x128x512xf32, #tpu.memory_space<vmem>>, vector<1x128x512xf32>
    %501 = vector.shape_cast %500 : vector<1x128x512xf32> to vector<128x512xf32>
    %c0_164 = arith.constant 0 : index
    %c0_165 = arith.constant 0 : index
    %502 = vector.load %arg9[%c0_164, %c0_165] : memref<64x512xf32, #tpu.memory_space<vmem>>, vector<8x512xf32>
    %cst_166 = arith.constant dense<0.000000e+00> : vector<8x512xf32>
    %503 = tpu.matmul %498, %501, %cst_166 {dimension_numbers = #tpu.dot_dimension_numbers<[1], [0], [0], [1], [0, 0, 1, 1], [], []>} : vector<8x128xf32>, vector<128x512xf32>, vector<8x512xf32> -> vector<8x512xf32>
    %504 = arith.addf %502, %503 : vector<8x512xf32>
    %505 = vector.extract_strided_slice %504 {offsets = [0, 0], sizes = [8, 128], strides = [1, 1]} : vector<8x512xf32> to vector<8x128xf32>
    %506 = arith.negf %505 : vector<8x128xf32>
    %507 = math.exp %506 : vector<8x128xf32>
    %cst_167 = arith.constant 1.000000e+00 : f32
    %508 = vector.broadcast %cst_167 : f32 to vector<8x128xf32>
    %509 = arith.addf %508, %507 : vector<8x128xf32>
    %510 = arith.divf %508, %509 : vector<8x128xf32>
    %511 = vector.extract_strided_slice %504 {offsets = [0, 128], sizes = [8, 128], strides = [1, 1]} : vector<8x512xf32> to vector<8x128xf32>
    %512 = arith.negf %511 : vector<8x128xf32>
    %513 = math.exp %512 : vector<8x128xf32>
    %cst_168 = arith.constant 1.000000e+00 : f32
    %514 = vector.broadcast %cst_168 : f32 to vector<8x128xf32>
    %515 = arith.addf %514, %513 : vector<8x128xf32>
    %516 = arith.divf %514, %515 : vector<8x128xf32>
    %517 = vector.extract_strided_slice %504 {offsets = [0, 256], sizes = [8, 128], strides = [1, 1]} : vector<8x512xf32> to vector<8x128xf32>
    %518 = math.tanh %517 : vector<8x128xf32>
    %519 = vector.extract_strided_slice %504 {offsets = [0, 384], sizes = [8, 128], strides = [1, 1]} : vector<8x512xf32> to vector<8x128xf32>
    %520 = arith.negf %519 : vector<8x128xf32>
    %521 = math.exp %520 : vector<8x128xf32>
    %cst_169 = arith.constant 1.000000e+00 : f32
    %522 = vector.broadcast %cst_169 : f32 to vector<8x128xf32>
    %523 = arith.addf %522, %521 : vector<8x128xf32>
    %524 = arith.divf %522, %523 : vector<8x128xf32>
    %525 = arith.mulf %516, %499 : vector<8x128xf32>
    %526 = arith.mulf %510, %518 : vector<8x128xf32>
    %527 = arith.addf %525, %526 : vector<8x128xf32>
    %528 = math.tanh %527 : vector<8x128xf32>
    %529 = arith.mulf %524, %528 : vector<8x128xf32>
    %c0_170 = arith.constant 0 : index
    %c0_171 = arith.constant 0 : index
    %530 = vector.load %arg8[%c0_170, %c0_171] : memref<64x128xf32, #tpu.memory_space<vmem>>, vector<8x128xf32>
    tpu.vector_store %arg8[%c0_170, %c0_171], %529 {strides = array<i32>} : memref<64x128xf32, #tpu.memory_space<vmem>>, vector<8x128xf32>,
    %c8_172 = arith.constant 8 : index
    %c0_173 = arith.constant 0 : index
    %531 = vector.load %arg9[%c8_172, %c0_173] : memref<64x512xf32, #tpu.memory_space<vmem>>, vector<8x512xf32>
    %cst_174 = arith.constant dense<0.000000e+00> : vector<8x512xf32>
    %532 = tpu.matmul %529, %501, %cst_174 {dimension_numbers = #tpu.dot_dimension_numbers<[1], [0], [0], [1], [0, 0, 1, 1], [], []>} : vector<8x128xf32>, vector<128x512xf32>, vector<8x512xf32> -> vector<8x512xf32>
    %533 = arith.addf %531, %532 : vector<8x512xf32>
    %534 = vector.extract_strided_slice %533 {offsets = [0, 0], sizes = [8, 128], strides = [1, 1]} : vector<8x512xf32> to vector<8x128xf32>
    %535 = arith.negf %534 : vector<8x128xf32>
    %536 = math.exp %535 : vector<8x128xf32>
    %cst_175 = arith.constant 1.000000e+00 : f32
    %537 = vector.broadcast %cst_175 : f32 to vector<8x128xf32>
    %538 = arith.addf %537, %536 : vector<8x128xf32>
    %539 = arith.divf %537, %538 : vector<8x128xf32>
    %540 = vector.extract_strided_slice %533 {offsets = [0, 128], sizes = [8, 128], strides = [1, 1]} : vector<8x512xf32> to vector<8x128xf32>
    %541 = arith.negf %540 : vector<8x128xf32>
    %542 = math.exp %541 : vector<8x128xf32>
    %cst_176 = arith.constant 1.000000e+00 : f32
    %543 = vector.broadcast %cst_176 : f32 to vector<8x128xf32>
    %544 = arith.addf %543, %542 : vector<8x128xf32>
    %545 = arith.divf %543, %544 : vector<8x128xf32>
    %546 = vector.extract_strided_slice %533 {offsets = [0, 256], sizes = [8, 128], strides = [1, 1]} : vector<8x512xf32> to vector<8x128xf32>
    %547 = math.tanh %546 : vector<8x128xf32>
    %548 = vector.extract_strided_slice %533 {offsets = [0, 384], sizes = [8, 128], strides = [1, 1]} : vector<8x512xf32> to vector<8x128xf32>
    %549 = arith.negf %548 : vector<8x128xf32>
    %550 = math.exp %549 : vector<8x128xf32>
    %cst_177 = arith.constant 1.000000e+00 : f32
    %551 = vector.broadcast %cst_177 : f32 to vector<8x128xf32>
    %552 = arith.addf %551, %550 : vector<8x128xf32>
    %553 = arith.divf %551, %552 : vector<8x128xf32>
    %554 = arith.mulf %545, %527 : vector<8x128xf32>
    %555 = arith.mulf %539, %547 : vector<8x128xf32>
    %556 = arith.addf %554, %555 : vector<8x128xf32>
    %557 = math.tanh %556 : vector<8x128xf32>
    %558 = arith.mulf %553, %557 : vector<8x128xf32>
    %c8_178 = arith.constant 8 : index
    %c0_179 = arith.constant 0 : index
    %559 = vector.load %arg8[%c8_178, %c0_179] : memref<64x128xf32, #tpu.memory_space<vmem>>, vector<8x128xf32>
    tpu.vector_store %arg8[%c8_178, %c0_179], %558 {strides = array<i32>} : memref<64x128xf32, #tpu.memory_space<vmem>>, vector<8x128xf32>,
    %c16_180 = arith.constant 16 : index
    %c0_181 = arith.constant 0 : index
    %560 = vector.load %arg9[%c16_180, %c0_181] : memref<64x512xf32, #tpu.memory_space<vmem>>, vector<8x512xf32>
    %cst_182 = arith.constant dense<0.000000e+00> : vector<8x512xf32>
    %561 = tpu.matmul %558, %501, %cst_182 {dimension_numbers = #tpu.dot_dimension_numbers<[1], [0], [0], [1], [0, 0, 1, 1], [], []>} : vector<8x128xf32>, vector<128x512xf32>, vector<8x512xf32> -> vector<8x512xf32>
    %562 = arith.addf %560, %561 : vector<8x512xf32>
    %563 = vector.extract_strided_slice %562 {offsets = [0, 0], sizes = [8, 128], strides = [1, 1]} : vector<8x512xf32> to vector<8x128xf32>
    %564 = arith.negf %563 : vector<8x128xf32>
    %565 = math.exp %564 : vector<8x128xf32>
    %cst_183 = arith.constant 1.000000e+00 : f32
    %566 = vector.broadcast %cst_183 : f32 to vector<8x128xf32>
    %567 = arith.addf %566, %565 : vector<8x128xf32>
    %568 = arith.divf %566, %567 : vector<8x128xf32>
    %569 = vector.extract_strided_slice %562 {offsets = [0, 128], sizes = [8, 128], strides = [1, 1]} : vector<8x512xf32> to vector<8x128xf32>
    %570 = arith.negf %569 : vector<8x128xf32>
    %571 = math.exp %570 : vector<8x128xf32>
    %cst_184 = arith.constant 1.000000e+00 : f32
    %572 = vector.broadcast %cst_184 : f32 to vector<8x128xf32>
    %573 = arith.addf %572, %571 : vector<8x128xf32>
    %574 = arith.divf %572, %573 : vector<8x128xf32>
    %575 = vector.extract_strided_slice %562 {offsets = [0, 256], sizes = [8, 128], strides = [1, 1]} : vector<8x512xf32> to vector<8x128xf32>
    %576 = math.tanh %575 : vector<8x128xf32>
    %577 = vector.extract_strided_slice %562 {offsets = [0, 384], sizes = [8, 128], strides = [1, 1]} : vector<8x512xf32> to vector<8x128xf32>
    %578 = arith.negf %577 : vector<8x128xf32>
    %579 = math.exp %578 : vector<8x128xf32>
    %cst_185 = arith.constant 1.000000e+00 : f32
    %580 = vector.broadcast %cst_185 : f32 to vector<8x128xf32>
    %581 = arith.addf %580, %579 : vector<8x128xf32>
    %582 = arith.divf %580, %581 : vector<8x128xf32>
    %583 = arith.mulf %574, %556 : vector<8x128xf32>
    %584 = arith.mulf %568, %576 : vector<8x128xf32>
    %585 = arith.addf %583, %584 : vector<8x128xf32>
    %586 = math.tanh %585 : vector<8x128xf32>
    %587 = arith.mulf %582, %586 : vector<8x128xf32>
    %c16_186 = arith.constant 16 : index
    %c0_187 = arith.constant 0 : index
    %588 = vector.load %arg8[%c16_186, %c0_187] : memref<64x128xf32, #tpu.memory_space<vmem>>, vector<8x128xf32>
    tpu.vector_store %arg8[%c16_186, %c0_187], %587 {strides = array<i32>} : memref<64x128xf32, #tpu.memory_space<vmem>>, vector<8x128xf32>,
    %c24_188 = arith.constant 24 : index
    %c0_189 = arith.constant 0 : index
    %589 = vector.load %arg9[%c24_188, %c0_189] : memref<64x512xf32, #tpu.memory_space<vmem>>, vector<8x512xf32>
    %cst_190 = arith.constant dense<0.000000e+00> : vector<8x512xf32>
    %590 = tpu.matmul %587, %501, %cst_190 {dimension_numbers = #tpu.dot_dimension_numbers<[1], [0], [0], [1], [0, 0, 1, 1], [], []>} : vector<8x128xf32>, vector<128x512xf32>, vector<8x512xf32> -> vector<8x512xf32>
    %591 = arith.addf %589, %590 : vector<8x512xf32>
    %592 = vector.extract_strided_slice %591 {offsets = [0, 0], sizes = [8, 128], strides = [1, 1]} : vector<8x512xf32> to vector<8x128xf32>
    %593 = arith.negf %592 : vector<8x128xf32>
    %594 = math.exp %593 : vector<8x128xf32>
    %cst_191 = arith.constant 1.000000e+00 : f32
    %595 = vector.broadcast %cst_191 : f32 to vector<8x128xf32>
    %596 = arith.addf %595, %594 : vector<8x128xf32>
    %597 = arith.divf %595, %596 : vector<8x128xf32>
    %598 = vector.extract_strided_slice %591 {offsets = [0, 128], sizes = [8, 128], strides = [1, 1]} : vector<8x512xf32> to vector<8x128xf32>
    %599 = arith.negf %598 : vector<8x128xf32>
    %600 = math.exp %599 : vector<8x128xf32>
    %cst_192 = arith.constant 1.000000e+00 : f32
    %601 = vector.broadcast %cst_192 : f32 to vector<8x128xf32>
    %602 = arith.addf %601, %600 : vector<8x128xf32>
    %603 = arith.divf %601, %602 : vector<8x128xf32>
    %604 = vector.extract_strided_slice %591 {offsets = [0, 256], sizes = [8, 128], strides = [1, 1]} : vector<8x512xf32> to vector<8x128xf32>
    %605 = math.tanh %604 : vector<8x128xf32>
    %606 = vector.extract_strided_slice %591 {offsets = [0, 384], sizes = [8, 128], strides = [1, 1]} : vector<8x512xf32> to vector<8x128xf32>
    %607 = arith.negf %606 : vector<8x128xf32>
    %608 = math.exp %607 : vector<8x128xf32>
    %cst_193 = arith.constant 1.000000e+00 : f32
    %609 = vector.broadcast %cst_193 : f32 to vector<8x128xf32>
    %610 = arith.addf %609, %608 : vector<8x128xf32>
    %611 = arith.divf %609, %610 : vector<8x128xf32>
    %612 = arith.mulf %603, %585 : vector<8x128xf32>
    %613 = arith.mulf %597, %605 : vector<8x128xf32>
    %614 = arith.addf %612, %613 : vector<8x128xf32>
    %615 = math.tanh %614 : vector<8x128xf32>
    %616 = arith.mulf %611, %615 : vector<8x128xf32>
    %c24_194 = arith.constant 24 : index
    %c0_195 = arith.constant 0 : index
    %617 = vector.load %arg8[%c24_194, %c0_195] : memref<64x128xf32, #tpu.memory_space<vmem>>, vector<8x128xf32>
    tpu.vector_store %arg8[%c24_194, %c0_195], %616 {strides = array<i32>} : memref<64x128xf32, #tpu.memory_space<vmem>>, vector<8x128xf32>,
    %c32_196 = arith.constant 32 : index
    %c0_197 = arith.constant 0 : index
    %618 = vector.load %arg9[%c32_196, %c0_197] : memref<64x512xf32, #tpu.memory_space<vmem>>, vector<8x512xf32>
    %cst_198 = arith.constant dense<0.000000e+00> : vector<8x512xf32>
    %619 = tpu.matmul %616, %501, %cst_198 {dimension_numbers = #tpu.dot_dimension_numbers<[1], [0], [0], [1], [0, 0, 1, 1], [], []>} : vector<8x128xf32>, vector<128x512xf32>, vector<8x512xf32> -> vector<8x512xf32>
    %620 = arith.addf %618, %619 : vector<8x512xf32>
    %621 = vector.extract_strided_slice %620 {offsets = [0, 0], sizes = [8, 128], strides = [1, 1]} : vector<8x512xf32> to vector<8x128xf32>
    %622 = arith.negf %621 : vector<8x128xf32>
    %623 = math.exp %622 : vector<8x128xf32>
    %cst_199 = arith.constant 1.000000e+00 : f32
    %624 = vector.broadcast %cst_199 : f32 to vector<8x128xf32>
    %625 = arith.addf %624, %623 : vector<8x128xf32>
    %626 = arith.divf %624, %625 : vector<8x128xf32>
    %627 = vector.extract_strided_slice %620 {offsets = [0, 128], sizes = [8, 128], strides = [1, 1]} : vector<8x512xf32> to vector<8x128xf32>
    %628 = arith.negf %627 : vector<8x128xf32>
    %629 = math.exp %628 : vector<8x128xf32>
    %cst_200 = arith.constant 1.000000e+00 : f32
    %630 = vector.broadcast %cst_200 : f32 to vector<8x128xf32>
    %631 = arith.addf %630, %629 : vector<8x128xf32>
    %632 = arith.divf %630, %631 : vector<8x128xf32>
    %633 = vector.extract_strided_slice %620 {offsets = [0, 256], sizes = [8, 128], strides = [1, 1]} : vector<8x512xf32> to vector<8x128xf32>
    %634 = math.tanh %633 : vector<8x128xf32>
    %635 = vector.extract_strided_slice %620 {offsets = [0, 384], sizes = [8, 128], strides = [1, 1]} : vector<8x512xf32> to vector<8x128xf32>
    %636 = arith.negf %635 : vector<8x128xf32>
    %637 = math.exp %636 : vector<8x128xf32>
    %cst_201 = arith.constant 1.000000e+00 : f32
    %638 = vector.broadcast %cst_201 : f32 to vector<8x128xf32>
    %639 = arith.addf %638, %637 : vector<8x128xf32>
    %640 = arith.divf %638, %639 : vector<8x128xf32>
    %641 = arith.mulf %632, %614 : vector<8x128xf32>
    %642 = arith.mulf %626, %634 : vector<8x128xf32>
    %643 = arith.addf %641, %642 : vector<8x128xf32>
    %644 = math.tanh %643 : vector<8x128xf32>
    %645 = arith.mulf %640, %644 : vector<8x128xf32>
    %c32_202 = arith.constant 32 : index
    %c0_203 = arith.constant 0 : index
    %646 = vector.load %arg8[%c32_202, %c0_203] : memref<64x128xf32, #tpu.memory_space<vmem>>, vector<8x128xf32>
    tpu.vector_store %arg8[%c32_202, %c0_203], %645 {strides = array<i32>} : memref<64x128xf32, #tpu.memory_space<vmem>>, vector<8x128xf32>,
    %c40_204 = arith.constant 40 : index
    %c0_205 = arith.constant 0 : index
    %647 = vector.load %arg9[%c40_204, %c0_205] : memref<64x512xf32, #tpu.memory_space<vmem>>, vector<8x512xf32>
    %cst_206 = arith.constant dense<0.000000e+00> : vector<8x512xf32>
    %648 = tpu.matmul %645, %501, %cst_206 {dimension_numbers = #tpu.dot_dimension_numbers<[1], [0], [0], [1], [0, 0, 1, 1], [], []>} : vector<8x128xf32>, vector<128x512xf32>, vector<8x512xf32> -> vector<8x512xf32>
    %649 = arith.addf %647, %648 : vector<8x512xf32>
    %650 = vector.extract_strided_slice %649 {offsets = [0, 0], sizes = [8, 128], strides = [1, 1]} : vector<8x512xf32> to vector<8x128xf32>
    %651 = arith.negf %650 : vector<8x128xf32>
    %652 = math.exp %651 : vector<8x128xf32>
    %cst_207 = arith.constant 1.000000e+00 : f32
    %653 = vector.broadcast %cst_207 : f32 to vector<8x128xf32>
    %654 = arith.addf %653, %652 : vector<8x128xf32>
    %655 = arith.divf %653, %654 : vector<8x128xf32>
    %656 = vector.extract_strided_slice %649 {offsets = [0, 128], sizes = [8, 128], strides = [1, 1]} : vector<8x512xf32> to vector<8x128xf32>
    %657 = arith.negf %656 : vector<8x128xf32>
    %658 = math.exp %657 : vector<8x128xf32>
    %cst_208 = arith.constant 1.000000e+00 : f32
    %659 = vector.broadcast %cst_208 : f32 to vector<8x128xf32>
    %660 = arith.addf %659, %658 : vector<8x128xf32>
    %661 = arith.divf %659, %660 : vector<8x128xf32>
    %662 = vector.extract_strided_slice %649 {offsets = [0, 256], sizes = [8, 128], strides = [1, 1]} : vector<8x512xf32> to vector<8x128xf32>
    %663 = math.tanh %662 : vector<8x128xf32>
    %664 = vector.extract_strided_slice %649 {offsets = [0, 384], sizes = [8, 128], strides = [1, 1]} : vector<8x512xf32> to vector<8x128xf32>
    %665 = arith.negf %664 : vector<8x128xf32>
    %666 = math.exp %665 : vector<8x128xf32>
    %cst_209 = arith.constant 1.000000e+00 : f32
    %667 = vector.broadcast %cst_209 : f32 to vector<8x128xf32>
    %668 = arith.addf %667, %666 : vector<8x128xf32>
    %669 = arith.divf %667, %668 : vector<8x128xf32>
    %670 = arith.mulf %661, %643 : vector<8x128xf32>
    %671 = arith.mulf %655, %663 : vector<8x128xf32>
    %672 = arith.addf %670, %671 : vector<8x128xf32>
    %673 = math.tanh %672 : vector<8x128xf32>
    %674 = arith.mulf %669, %673 : vector<8x128xf32>
    %c40_210 = arith.constant 40 : index
    %c0_211 = arith.constant 0 : index
    %675 = vector.load %arg8[%c40_210, %c0_211] : memref<64x128xf32, #tpu.memory_space<vmem>>, vector<8x128xf32>
    tpu.vector_store %arg8[%c40_210, %c0_211], %674 {strides = array<i32>} : memref<64x128xf32, #tpu.memory_space<vmem>>, vector<8x128xf32>,
    %c48_212 = arith.constant 48 : index
    %c0_213 = arith.constant 0 : index
    %676 = vector.load %arg9[%c48_212, %c0_213] : memref<64x512xf32, #tpu.memory_space<vmem>>, vector<8x512xf32>
    %cst_214 = arith.constant dense<0.000000e+00> : vector<8x512xf32>
    %677 = tpu.matmul %674, %501, %cst_214 {dimension_numbers = #tpu.dot_dimension_numbers<[1], [0], [0], [1], [0, 0, 1, 1], [], []>} : vector<8x128xf32>, vector<128x512xf32>, vector<8x512xf32> -> vector<8x512xf32>
    %678 = arith.addf %676, %677 : vector<8x512xf32>
    %679 = vector.extract_strided_slice %678 {offsets = [0, 0], sizes = [8, 128], strides = [1, 1]} : vector<8x512xf32> to vector<8x128xf32>
    %680 = arith.negf %679 : vector<8x128xf32>
    %681 = math.exp %680 : vector<8x128xf32>
    %cst_215 = arith.constant 1.000000e+00 : f32
    %682 = vector.broadcast %cst_215 : f32 to vector<8x128xf32>
    %683 = arith.addf %682, %681 : vector<8x128xf32>
    %684 = arith.divf %682, %683 : vector<8x128xf32>
    %685 = vector.extract_strided_slice %678 {offsets = [0, 128], sizes = [8, 128], strides = [1, 1]} : vector<8x512xf32> to vector<8x128xf32>
    %686 = arith.negf %685 : vector<8x128xf32>
    %687 = math.exp %686 : vector<8x128xf32>
    %cst_216 = arith.constant 1.000000e+00 : f32
    %688 = vector.broadcast %cst_216 : f32 to vector<8x128xf32>
    %689 = arith.addf %688, %687 : vector<8x128xf32>
    %690 = arith.divf %688, %689 : vector<8x128xf32>
    %691 = vector.extract_strided_slice %678 {offsets = [0, 256], sizes = [8, 128], strides = [1, 1]} : vector<8x512xf32> to vector<8x128xf32>
    %692 = math.tanh %691 : vector<8x128xf32>
    %693 = vector.extract_strided_slice %678 {offsets = [0, 384], sizes = [8, 128], strides = [1, 1]} : vector<8x512xf32> to vector<8x128xf32>
    %694 = arith.negf %693 : vector<8x128xf32>
    %695 = math.exp %694 : vector<8x128xf32>
    %cst_217 = arith.constant 1.000000e+00 : f32
    %696 = vector.broadcast %cst_217 : f32 to vector<8x128xf32>
    %697 = arith.addf %696, %695 : vector<8x128xf32>
    %698 = arith.divf %696, %697 : vector<8x128xf32>
    %699 = arith.mulf %690, %672 : vector<8x128xf32>
    %700 = arith.mulf %684, %692 : vector<8x128xf32>
    %701 = arith.addf %699, %700 : vector<8x128xf32>
    %702 = math.tanh %701 : vector<8x128xf32>
    %703 = arith.mulf %698, %702 : vector<8x128xf32>
    %c48_218 = arith.constant 48 : index
    %c0_219 = arith.constant 0 : index
    %704 = vector.load %arg8[%c48_218, %c0_219] : memref<64x128xf32, #tpu.memory_space<vmem>>, vector<8x128xf32>
    tpu.vector_store %arg8[%c48_218, %c0_219], %703 {strides = array<i32>} : memref<64x128xf32, #tpu.memory_space<vmem>>, vector<8x128xf32>,
    %c56_220 = arith.constant 56 : index
    %c0_221 = arith.constant 0 : index
    %705 = vector.load %arg9[%c56_220, %c0_221] : memref<64x512xf32, #tpu.memory_space<vmem>>, vector<8x512xf32>
    %cst_222 = arith.constant dense<0.000000e+00> : vector<8x512xf32>
    %706 = tpu.matmul %703, %501, %cst_222 {dimension_numbers = #tpu.dot_dimension_numbers<[1], [0], [0], [1], [0, 0, 1, 1], [], []>} : vector<8x128xf32>, vector<128x512xf32>, vector<8x512xf32> -> vector<8x512xf32>
    %707 = arith.addf %705, %706 : vector<8x512xf32>
    %708 = vector.extract_strided_slice %707 {offsets = [0, 0], sizes = [8, 128], strides = [1, 1]} : vector<8x512xf32> to vector<8x128xf32>
    %709 = arith.negf %708 : vector<8x128xf32>
    %710 = math.exp %709 : vector<8x128xf32>
    %cst_223 = arith.constant 1.000000e+00 : f32
    %711 = vector.broadcast %cst_223 : f32 to vector<8x128xf32>
    %712 = arith.addf %711, %710 : vector<8x128xf32>
    %713 = arith.divf %711, %712 : vector<8x128xf32>
    %714 = vector.extract_strided_slice %707 {offsets = [0, 128], sizes = [8, 128], strides = [1, 1]} : vector<8x512xf32> to vector<8x128xf32>
    %715 = arith.negf %714 : vector<8x128xf32>
    %716 = math.exp %715 : vector<8x128xf32>
    %cst_224 = arith.constant 1.000000e+00 : f32
    %717 = vector.broadcast %cst_224 : f32 to vector<8x128xf32>
    %718 = arith.addf %717, %716 : vector<8x128xf32>
    %719 = arith.divf %717, %718 : vector<8x128xf32>
    %720 = vector.extract_strided_slice %707 {offsets = [0, 256], sizes = [8, 128], strides = [1, 1]} : vector<8x512xf32> to vector<8x128xf32>
    %721 = math.tanh %720 : vector<8x128xf32>
    %722 = vector.extract_strided_slice %707 {offsets = [0, 384], sizes = [8, 128], strides = [1, 1]} : vector<8x512xf32> to vector<8x128xf32>
    %723 = arith.negf %722 : vector<8x128xf32>
    %724 = math.exp %723 : vector<8x128xf32>
    %cst_225 = arith.constant 1.000000e+00 : f32
    %725 = vector.broadcast %cst_225 : f32 to vector<8x128xf32>
    %726 = arith.addf %725, %724 : vector<8x128xf32>
    %727 = arith.divf %725, %726 : vector<8x128xf32>
    %728 = arith.mulf %719, %701 : vector<8x128xf32>
    %729 = arith.mulf %713, %721 : vector<8x128xf32>
    %730 = arith.addf %728, %729 : vector<8x128xf32>
    %731 = math.tanh %730 : vector<8x128xf32>
    %732 = arith.mulf %727, %731 : vector<8x128xf32>
    %c56_226 = arith.constant 56 : index
    %c0_227 = arith.constant 0 : index
    %733 = vector.load %arg8[%c56_226, %c0_227] : memref<64x128xf32, #tpu.memory_space<vmem>>, vector<8x128xf32>
    tpu.vector_store %arg8[%c56_226, %c0_227], %732 {strides = array<i32>} : memref<64x128xf32, #tpu.memory_space<vmem>>, vector<8x128xf32>,
    %c0_228 = arith.constant 0 : index
    %c0_229 = arith.constant 0 : index
    %734 = vector.load %arg8[%c0_228, %c0_229] : memref<64x128xf32, #tpu.memory_space<vmem>>, vector<64x128xf32>
    %c2_230 = arith.constant 2 : index
    %c0_231 = arith.constant 0 : index
    %c0_232 = arith.constant 0 : index
    %735 = vector.load %arg3[%c2_230, %c0_231, %c0_232] : memref<4x128x512xf32, #tpu.memory_space<vmem>>, vector<1x128x512xf32>
    %736 = vector.shape_cast %735 : vector<1x128x512xf32> to vector<128x512xf32>
    %cst_233 = arith.constant dense<0.000000e+00> : vector<64x512xf32>
    %737 = tpu.matmul %734, %736, %cst_233 {dimension_numbers = #tpu.dot_dimension_numbers<[1], [0], [0], [1], [0, 0, 1, 1], [], []>} : vector<64x128xf32>, vector<128x512xf32>, vector<64x512xf32> -> vector<64x512xf32>
    %c3 = arith.constant 3 : index
    %c0_234 = arith.constant 0 : index
    %c0_235 = arith.constant 0 : index
    %738 = vector.load %arg4[%c3, %c0_234, %c0_235] : memref<5x1x512xf32, #tpu.memory_space<vmem>>, vector<1x1x512xf32>
    %739 = vector.shape_cast %738 : vector<1x1x512xf32> to vector<1x512xf32>
    %740 = vector.broadcast %739 : vector<1x512xf32> to vector<64x512xf32>
    %741 = arith.addf %737, %740 : vector<64x512xf32>
    %c0_236 = arith.constant 0 : index
    %c0_237 = arith.constant 0 : index
    %742 = vector.load %arg9[%c0_236, %c0_237] : memref<64x512xf32, #tpu.memory_space<vmem>>, vector<64x512xf32>
    tpu.vector_store %arg9[%c0_236, %c0_237], %741 {strides = array<i32>} : memref<64x512xf32, #tpu.memory_space<vmem>>, vector<64x512xf32>,
    %cst_238 = arith.constant 0.000000e+00 : f32
    %743 = vector.broadcast %cst_238 : f32 to vector<8x128xf32>
    %cst_239 = arith.constant 0.000000e+00 : f32
    %744 = vector.broadcast %cst_239 : f32 to vector<8x128xf32>
    %c3_240 = arith.constant 3 : index
    %c0_241 = arith.constant 0 : index
    %c0_242 = arith.constant 0 : index
    %745 = vector.load %arg2[%c3_240, %c0_241, %c0_242] : memref<5x128x512xf32, #tpu.memory_space<vmem>>, vector<1x128x512xf32>
    %746 = vector.shape_cast %745 : vector<1x128x512xf32> to vector<128x512xf32>
    %c0_243 = arith.constant 0 : index
    %c0_244 = arith.constant 0 : index
    %747 = vector.load %arg9[%c0_243, %c0_244] : memref<64x512xf32, #tpu.memory_space<vmem>>, vector<8x512xf32>
    %cst_245 = arith.constant dense<0.000000e+00> : vector<8x512xf32>
    %748 = tpu.matmul %743, %746, %cst_245 {dimension_numbers = #tpu.dot_dimension_numbers<[1], [0], [0], [1], [0, 0, 1, 1], [], []>} : vector<8x128xf32>, vector<128x512xf32>, vector<8x512xf32> -> vector<8x512xf32>
    %749 = arith.addf %747, %748 : vector<8x512xf32>
    %750 = vector.extract_strided_slice %749 {offsets = [0, 0], sizes = [8, 128], strides = [1, 1]} : vector<8x512xf32> to vector<8x128xf32>
    %751 = arith.negf %750 : vector<8x128xf32>
    %752 = math.exp %751 : vector<8x128xf32>
    %cst_246 = arith.constant 1.000000e+00 : f32
    %753 = vector.broadcast %cst_246 : f32 to vector<8x128xf32>
    %754 = arith.addf %753, %752 : vector<8x128xf32>
    %755 = arith.divf %753, %754 : vector<8x128xf32>
    %756 = vector.extract_strided_slice %749 {offsets = [0, 128], sizes = [8, 128], strides = [1, 1]} : vector<8x512xf32> to vector<8x128xf32>
    %757 = arith.negf %756 : vector<8x128xf32>
    %758 = math.exp %757 : vector<8x128xf32>
    %cst_247 = arith.constant 1.000000e+00 : f32
    %759 = vector.broadcast %cst_247 : f32 to vector<8x128xf32>
    %760 = arith.addf %759, %758 : vector<8x128xf32>
    %761 = arith.divf %759, %760 : vector<8x128xf32>
    %762 = vector.extract_strided_slice %749 {offsets = [0, 256], sizes = [8, 128], strides = [1, 1]} : vector<8x512xf32> to vector<8x128xf32>
    %763 = math.tanh %762 : vector<8x128xf32>
    %764 = vector.extract_strided_slice %749 {offsets = [0, 384], sizes = [8, 128], strides = [1, 1]} : vector<8x512xf32> to vector<8x128xf32>
    %765 = arith.negf %764 : vector<8x128xf32>
    %766 = math.exp %765 : vector<8x128xf32>
    %cst_248 = arith.constant 1.000000e+00 : f32
    %767 = vector.broadcast %cst_248 : f32 to vector<8x128xf32>
    %768 = arith.addf %767, %766 : vector<8x128xf32>
    %769 = arith.divf %767, %768 : vector<8x128xf32>
    %770 = arith.mulf %761, %744 : vector<8x128xf32>
    %771 = arith.mulf %755, %763 : vector<8x128xf32>
    %772 = arith.addf %770, %771 : vector<8x128xf32>
    %773 = math.tanh %772 : vector<8x128xf32>
    %774 = arith.mulf %769, %773 : vector<8x128xf32>
    %c0_249 = arith.constant 0 : index
    %c0_250 = arith.constant 0 : index
    %775 = vector.load %arg8[%c0_249, %c0_250] : memref<64x128xf32, #tpu.memory_space<vmem>>, vector<8x128xf32>
    tpu.vector_store %arg8[%c0_249, %c0_250], %774 {strides = array<i32>} : memref<64x128xf32, #tpu.memory_space<vmem>>, vector<8x128xf32>,
    %c8_251 = arith.constant 8 : index
    %c0_252 = arith.constant 0 : index
    %776 = vector.load %arg9[%c8_251, %c0_252] : memref<64x512xf32, #tpu.memory_space<vmem>>, vector<8x512xf32>
    %cst_253 = arith.constant dense<0.000000e+00> : vector<8x512xf32>
    %777 = tpu.matmul %774, %746, %cst_253 {dimension_numbers = #tpu.dot_dimension_numbers<[1], [0], [0], [1], [0, 0, 1, 1], [], []>} : vector<8x128xf32>, vector<128x512xf32>, vector<8x512xf32> -> vector<8x512xf32>
    %778 = arith.addf %776, %777 : vector<8x512xf32>
    %779 = vector.extract_strided_slice %778 {offsets = [0, 0], sizes = [8, 128], strides = [1, 1]} : vector<8x512xf32> to vector<8x128xf32>
    %780 = arith.negf %779 : vector<8x128xf32>
    %781 = math.exp %780 : vector<8x128xf32>
    %cst_254 = arith.constant 1.000000e+00 : f32
    %782 = vector.broadcast %cst_254 : f32 to vector<8x128xf32>
    %783 = arith.addf %782, %781 : vector<8x128xf32>
    %784 = arith.divf %782, %783 : vector<8x128xf32>
    %785 = vector.extract_strided_slice %778 {offsets = [0, 128], sizes = [8, 128], strides = [1, 1]} : vector<8x512xf32> to vector<8x128xf32>
    %786 = arith.negf %785 : vector<8x128xf32>
    %787 = math.exp %786 : vector<8x128xf32>
    %cst_255 = arith.constant 1.000000e+00 : f32
    %788 = vector.broadcast %cst_255 : f32 to vector<8x128xf32>
    %789 = arith.addf %788, %787 : vector<8x128xf32>
    %790 = arith.divf %788, %789 : vector<8x128xf32>
    %791 = vector.extract_strided_slice %778 {offsets = [0, 256], sizes = [8, 128], strides = [1, 1]} : vector<8x512xf32> to vector<8x128xf32>
    %792 = math.tanh %791 : vector<8x128xf32>
    %793 = vector.extract_strided_slice %778 {offsets = [0, 384], sizes = [8, 128], strides = [1, 1]} : vector<8x512xf32> to vector<8x128xf32>
    %794 = arith.negf %793 : vector<8x128xf32>
    %795 = math.exp %794 : vector<8x128xf32>
    %cst_256 = arith.constant 1.000000e+00 : f32
    %796 = vector.broadcast %cst_256 : f32 to vector<8x128xf32>
    %797 = arith.addf %796, %795 : vector<8x128xf32>
    %798 = arith.divf %796, %797 : vector<8x128xf32>
    %799 = arith.mulf %790, %772 : vector<8x128xf32>
    %800 = arith.mulf %784, %792 : vector<8x128xf32>
    %801 = arith.addf %799, %800 : vector<8x128xf32>
    %802 = math.tanh %801 : vector<8x128xf32>
    %803 = arith.mulf %798, %802 : vector<8x128xf32>
    %c8_257 = arith.constant 8 : index
    %c0_258 = arith.constant 0 : index
    %804 = vector.load %arg8[%c8_257, %c0_258] : memref<64x128xf32, #tpu.memory_space<vmem>>, vector<8x128xf32>
    tpu.vector_store %arg8[%c8_257, %c0_258], %803 {strides = array<i32>} : memref<64x128xf32, #tpu.memory_space<vmem>>, vector<8x128xf32>,
    %c16_259 = arith.constant 16 : index
    %c0_260 = arith.constant 0 : index
    %805 = vector.load %arg9[%c16_259, %c0_260] : memref<64x512xf32, #tpu.memory_space<vmem>>, vector<8x512xf32>
    %cst_261 = arith.constant dense<0.000000e+00> : vector<8x512xf32>
    %806 = tpu.matmul %803, %746, %cst_261 {dimension_numbers = #tpu.dot_dimension_numbers<[1], [0], [0], [1], [0, 0, 1, 1], [], []>} : vector<8x128xf32>, vector<128x512xf32>, vector<8x512xf32> -> vector<8x512xf32>
    %807 = arith.addf %805, %806 : vector<8x512xf32>
    %808 = vector.extract_strided_slice %807 {offsets = [0, 0], sizes = [8, 128], strides = [1, 1]} : vector<8x512xf32> to vector<8x128xf32>
    %809 = arith.negf %808 : vector<8x128xf32>
    %810 = math.exp %809 : vector<8x128xf32>
    %cst_262 = arith.constant 1.000000e+00 : f32
    %811 = vector.broadcast %cst_262 : f32 to vector<8x128xf32>
    %812 = arith.addf %811, %810 : vector<8x128xf32>
    %813 = arith.divf %811, %812 : vector<8x128xf32>
    %814 = vector.extract_strided_slice %807 {offsets = [0, 128], sizes = [8, 128], strides = [1, 1]} : vector<8x512xf32> to vector<8x128xf32>
    %815 = arith.negf %814 : vector<8x128xf32>
    %816 = math.exp %815 : vector<8x128xf32>
    %cst_263 = arith.constant 1.000000e+00 : f32
    %817 = vector.broadcast %cst_263 : f32 to vector<8x128xf32>
    %818 = arith.addf %817, %816 : vector<8x128xf32>
    %819 = arith.divf %817, %818 : vector<8x128xf32>
    %820 = vector.extract_strided_slice %807 {offsets = [0, 256], sizes = [8, 128], strides = [1, 1]} : vector<8x512xf32> to vector<8x128xf32>
    %821 = math.tanh %820 : vector<8x128xf32>
    %822 = vector.extract_strided_slice %807 {offsets = [0, 384], sizes = [8, 128], strides = [1, 1]} : vector<8x512xf32> to vector<8x128xf32>
    %823 = arith.negf %822 : vector<8x128xf32>
    %824 = math.exp %823 : vector<8x128xf32>
    %cst_264 = arith.constant 1.000000e+00 : f32
    %825 = vector.broadcast %cst_264 : f32 to vector<8x128xf32>
    %826 = arith.addf %825, %824 : vector<8x128xf32>
    %827 = arith.divf %825, %826 : vector<8x128xf32>
    %828 = arith.mulf %819, %801 : vector<8x128xf32>
    %829 = arith.mulf %813, %821 : vector<8x128xf32>
    %830 = arith.addf %828, %829 : vector<8x128xf32>
    %831 = math.tanh %830 : vector<8x128xf32>
    %832 = arith.mulf %827, %831 : vector<8x128xf32>
    %c16_265 = arith.constant 16 : index
    %c0_266 = arith.constant 0 : index
    %833 = vector.load %arg8[%c16_265, %c0_266] : memref<64x128xf32, #tpu.memory_space<vmem>>, vector<8x128xf32>
    tpu.vector_store %arg8[%c16_265, %c0_266], %832 {strides = array<i32>} : memref<64x128xf32, #tpu.memory_space<vmem>>, vector<8x128xf32>,
    %c24_267 = arith.constant 24 : index
    %c0_268 = arith.constant 0 : index
    %834 = vector.load %arg9[%c24_267, %c0_268] : memref<64x512xf32, #tpu.memory_space<vmem>>, vector<8x512xf32>
    %cst_269 = arith.constant dense<0.000000e+00> : vector<8x512xf32>
    %835 = tpu.matmul %832, %746, %cst_269 {dimension_numbers = #tpu.dot_dimension_numbers<[1], [0], [0], [1], [0, 0, 1, 1], [], []>} : vector<8x128xf32>, vector<128x512xf32>, vector<8x512xf32> -> vector<8x512xf32>
    %836 = arith.addf %834, %835 : vector<8x512xf32>
    %837 = vector.extract_strided_slice %836 {offsets = [0, 0], sizes = [8, 128], strides = [1, 1]} : vector<8x512xf32> to vector<8x128xf32>
    %838 = arith.negf %837 : vector<8x128xf32>
    %839 = math.exp %838 : vector<8x128xf32>
    %cst_270 = arith.constant 1.000000e+00 : f32
    %840 = vector.broadcast %cst_270 : f32 to vector<8x128xf32>
    %841 = arith.addf %840, %839 : vector<8x128xf32>
    %842 = arith.divf %840, %841 : vector<8x128xf32>
    %843 = vector.extract_strided_slice %836 {offsets = [0, 128], sizes = [8, 128], strides = [1, 1]} : vector<8x512xf32> to vector<8x128xf32>
    %844 = arith.negf %843 : vector<8x128xf32>
    %845 = math.exp %844 : vector<8x128xf32>
    %cst_271 = arith.constant 1.000000e+00 : f32
    %846 = vector.broadcast %cst_271 : f32 to vector<8x128xf32>
    %847 = arith.addf %846, %845 : vector<8x128xf32>
    %848 = arith.divf %846, %847 : vector<8x128xf32>
    %849 = vector.extract_strided_slice %836 {offsets = [0, 256], sizes = [8, 128], strides = [1, 1]} : vector<8x512xf32> to vector<8x128xf32>
    %850 = math.tanh %849 : vector<8x128xf32>
    %851 = vector.extract_strided_slice %836 {offsets = [0, 384], sizes = [8, 128], strides = [1, 1]} : vector<8x512xf32> to vector<8x128xf32>
    %852 = arith.negf %851 : vector<8x128xf32>
    %853 = math.exp %852 : vector<8x128xf32>
    %cst_272 = arith.constant 1.000000e+00 : f32
    %854 = vector.broadcast %cst_272 : f32 to vector<8x128xf32>
    %855 = arith.addf %854, %853 : vector<8x128xf32>
    %856 = arith.divf %854, %855 : vector<8x128xf32>
    %857 = arith.mulf %848, %830 : vector<8x128xf32>
    %858 = arith.mulf %842, %850 : vector<8x128xf32>
    %859 = arith.addf %857, %858 : vector<8x128xf32>
    %860 = math.tanh %859 : vector<8x128xf32>
    %861 = arith.mulf %856, %860 : vector<8x128xf32>
    %c24_273 = arith.constant 24 : index
    %c0_274 = arith.constant 0 : index
    %862 = vector.load %arg8[%c24_273, %c0_274] : memref<64x128xf32, #tpu.memory_space<vmem>>, vector<8x128xf32>
    tpu.vector_store %arg8[%c24_273, %c0_274], %861 {strides = array<i32>} : memref<64x128xf32, #tpu.memory_space<vmem>>, vector<8x128xf32>,
    %c32_275 = arith.constant 32 : index
    %c0_276 = arith.constant 0 : index
    %863 = vector.load %arg9[%c32_275, %c0_276] : memref<64x512xf32, #tpu.memory_space<vmem>>, vector<8x512xf32>
    %cst_277 = arith.constant dense<0.000000e+00> : vector<8x512xf32>
    %864 = tpu.matmul %861, %746, %cst_277 {dimension_numbers = #tpu.dot_dimension_numbers<[1], [0], [0], [1], [0, 0, 1, 1], [], []>} : vector<8x128xf32>, vector<128x512xf32>, vector<8x512xf32> -> vector<8x512xf32>
    %865 = arith.addf %863, %864 : vector<8x512xf32>
    %866 = vector.extract_strided_slice %865 {offsets = [0, 0], sizes = [8, 128], strides = [1, 1]} : vector<8x512xf32> to vector<8x128xf32>
    %867 = arith.negf %866 : vector<8x128xf32>
    %868 = math.exp %867 : vector<8x128xf32>
    %cst_278 = arith.constant 1.000000e+00 : f32
    %869 = vector.broadcast %cst_278 : f32 to vector<8x128xf32>
    %870 = arith.addf %869, %868 : vector<8x128xf32>
    %871 = arith.divf %869, %870 : vector<8x128xf32>
    %872 = vector.extract_strided_slice %865 {offsets = [0, 128], sizes = [8, 128], strides = [1, 1]} : vector<8x512xf32> to vector<8x128xf32>
    %873 = arith.negf %872 : vector<8x128xf32>
    %874 = math.exp %873 : vector<8x128xf32>
    %cst_279 = arith.constant 1.000000e+00 : f32
    %875 = vector.broadcast %cst_279 : f32 to vector<8x128xf32>
    %876 = arith.addf %875, %874 : vector<8x128xf32>
    %877 = arith.divf %875, %876 : vector<8x128xf32>
    %878 = vector.extract_strided_slice %865 {offsets = [0, 256], sizes = [8, 128], strides = [1, 1]} : vector<8x512xf32> to vector<8x128xf32>
    %879 = math.tanh %878 : vector<8x128xf32>
    %880 = vector.extract_strided_slice %865 {offsets = [0, 384], sizes = [8, 128], strides = [1, 1]} : vector<8x512xf32> to vector<8x128xf32>
    %881 = arith.negf %880 : vector<8x128xf32>
    %882 = math.exp %881 : vector<8x128xf32>
    %cst_280 = arith.constant 1.000000e+00 : f32
    %883 = vector.broadcast %cst_280 : f32 to vector<8x128xf32>
    %884 = arith.addf %883, %882 : vector<8x128xf32>
    %885 = arith.divf %883, %884 : vector<8x128xf32>
    %886 = arith.mulf %877, %859 : vector<8x128xf32>
    %887 = arith.mulf %871, %879 : vector<8x128xf32>
    %888 = arith.addf %886, %887 : vector<8x128xf32>
    %889 = math.tanh %888 : vector<8x128xf32>
    %890 = arith.mulf %885, %889 : vector<8x128xf32>
    %c32_281 = arith.constant 32 : index
    %c0_282 = arith.constant 0 : index
    %891 = vector.load %arg8[%c32_281, %c0_282] : memref<64x128xf32, #tpu.memory_space<vmem>>, vector<8x128xf32>
    tpu.vector_store %arg8[%c32_281, %c0_282], %890 {strides = array<i32>} : memref<64x128xf32, #tpu.memory_space<vmem>>, vector<8x128xf32>,
    %c40_283 = arith.constant 40 : index
    %c0_284 = arith.constant 0 : index
    %892 = vector.load %arg9[%c40_283, %c0_284] : memref<64x512xf32, #tpu.memory_space<vmem>>, vector<8x512xf32>
    %cst_285 = arith.constant dense<0.000000e+00> : vector<8x512xf32>
    %893 = tpu.matmul %890, %746, %cst_285 {dimension_numbers = #tpu.dot_dimension_numbers<[1], [0], [0], [1], [0, 0, 1, 1], [], []>} : vector<8x128xf32>, vector<128x512xf32>, vector<8x512xf32> -> vector<8x512xf32>
    %894 = arith.addf %892, %893 : vector<8x512xf32>
    %895 = vector.extract_strided_slice %894 {offsets = [0, 0], sizes = [8, 128], strides = [1, 1]} : vector<8x512xf32> to vector<8x128xf32>
    %896 = arith.negf %895 : vector<8x128xf32>
    %897 = math.exp %896 : vector<8x128xf32>
    %cst_286 = arith.constant 1.000000e+00 : f32
    %898 = vector.broadcast %cst_286 : f32 to vector<8x128xf32>
    %899 = arith.addf %898, %897 : vector<8x128xf32>
    %900 = arith.divf %898, %899 : vector<8x128xf32>
    %901 = vector.extract_strided_slice %894 {offsets = [0, 128], sizes = [8, 128], strides = [1, 1]} : vector<8x512xf32> to vector<8x128xf32>
    %902 = arith.negf %901 : vector<8x128xf32>
    %903 = math.exp %902 : vector<8x128xf32>
    %cst_287 = arith.constant 1.000000e+00 : f32
    %904 = vector.broadcast %cst_287 : f32 to vector<8x128xf32>
    %905 = arith.addf %904, %903 : vector<8x128xf32>
    %906 = arith.divf %904, %905 : vector<8x128xf32>
    %907 = vector.extract_strided_slice %894 {offsets = [0, 256], sizes = [8, 128], strides = [1, 1]} : vector<8x512xf32> to vector<8x128xf32>
    %908 = math.tanh %907 : vector<8x128xf32>
    %909 = vector.extract_strided_slice %894 {offsets = [0, 384], sizes = [8, 128], strides = [1, 1]} : vector<8x512xf32> to vector<8x128xf32>
    %910 = arith.negf %909 : vector<8x128xf32>
    %911 = math.exp %910 : vector<8x128xf32>
    %cst_288 = arith.constant 1.000000e+00 : f32
    %912 = vector.broadcast %cst_288 : f32 to vector<8x128xf32>
    %913 = arith.addf %912, %911 : vector<8x128xf32>
    %914 = arith.divf %912, %913 : vector<8x128xf32>
    %915 = arith.mulf %906, %888 : vector<8x128xf32>
    %916 = arith.mulf %900, %908 : vector<8x128xf32>
    %917 = arith.addf %915, %916 : vector<8x128xf32>
    %918 = math.tanh %917 : vector<8x128xf32>
    %919 = arith.mulf %914, %918 : vector<8x128xf32>
    %c40_289 = arith.constant 40 : index
    %c0_290 = arith.constant 0 : index
    %920 = vector.load %arg8[%c40_289, %c0_290] : memref<64x128xf32, #tpu.memory_space<vmem>>, vector<8x128xf32>
    tpu.vector_store %arg8[%c40_289, %c0_290], %919 {strides = array<i32>} : memref<64x128xf32, #tpu.memory_space<vmem>>, vector<8x128xf32>,
    %c48_291 = arith.constant 48 : index
    %c0_292 = arith.constant 0 : index
    %921 = vector.load %arg9[%c48_291, %c0_292] : memref<64x512xf32, #tpu.memory_space<vmem>>, vector<8x512xf32>
    %cst_293 = arith.constant dense<0.000000e+00> : vector<8x512xf32>
    %922 = tpu.matmul %919, %746, %cst_293 {dimension_numbers = #tpu.dot_dimension_numbers<[1], [0], [0], [1], [0, 0, 1, 1], [], []>} : vector<8x128xf32>, vector<128x512xf32>, vector<8x512xf32> -> vector<8x512xf32>
    %923 = arith.addf %921, %922 : vector<8x512xf32>
    %924 = vector.extract_strided_slice %923 {offsets = [0, 0], sizes = [8, 128], strides = [1, 1]} : vector<8x512xf32> to vector<8x128xf32>
    %925 = arith.negf %924 : vector<8x128xf32>
    %926 = math.exp %925 : vector<8x128xf32>
    %cst_294 = arith.constant 1.000000e+00 : f32
    %927 = vector.broadcast %cst_294 : f32 to vector<8x128xf32>
    %928 = arith.addf %927, %926 : vector<8x128xf32>
    %929 = arith.divf %927, %928 : vector<8x128xf32>
    %930 = vector.extract_strided_slice %923 {offsets = [0, 128], sizes = [8, 128], strides = [1, 1]} : vector<8x512xf32> to vector<8x128xf32>
    %931 = arith.negf %930 : vector<8x128xf32>
    %932 = math.exp %931 : vector<8x128xf32>
    %cst_295 = arith.constant 1.000000e+00 : f32
    %933 = vector.broadcast %cst_295 : f32 to vector<8x128xf32>
    %934 = arith.addf %933, %932 : vector<8x128xf32>
    %935 = arith.divf %933, %934 : vector<8x128xf32>
    %936 = vector.extract_strided_slice %923 {offsets = [0, 256], sizes = [8, 128], strides = [1, 1]} : vector<8x512xf32> to vector<8x128xf32>
    %937 = math.tanh %936 : vector<8x128xf32>
    %938 = vector.extract_strided_slice %923 {offsets = [0, 384], sizes = [8, 128], strides = [1, 1]} : vector<8x512xf32> to vector<8x128xf32>
    %939 = arith.negf %938 : vector<8x128xf32>
    %940 = math.exp %939 : vector<8x128xf32>
    %cst_296 = arith.constant 1.000000e+00 : f32
    %941 = vector.broadcast %cst_296 : f32 to vector<8x128xf32>
    %942 = arith.addf %941, %940 : vector<8x128xf32>
    %943 = arith.divf %941, %942 : vector<8x128xf32>
    %944 = arith.mulf %935, %917 : vector<8x128xf32>
    %945 = arith.mulf %929, %937 : vector<8x128xf32>
    %946 = arith.addf %944, %945 : vector<8x128xf32>
    %947 = math.tanh %946 : vector<8x128xf32>
    %948 = arith.mulf %943, %947 : vector<8x128xf32>
    %c48_297 = arith.constant 48 : index
    %c0_298 = arith.constant 0 : index
    %949 = vector.load %arg8[%c48_297, %c0_298] : memref<64x128xf32, #tpu.memory_space<vmem>>, vector<8x128xf32>
    tpu.vector_store %arg8[%c48_297, %c0_298], %948 {strides = array<i32>} : memref<64x128xf32, #tpu.memory_space<vmem>>, vector<8x128xf32>,
    %c56_299 = arith.constant 56 : index
    %c0_300 = arith.constant 0 : index
    %950 = vector.load %arg9[%c56_299, %c0_300] : memref<64x512xf32, #tpu.memory_space<vmem>>, vector<8x512xf32>
    %cst_301 = arith.constant dense<0.000000e+00> : vector<8x512xf32>
    %951 = tpu.matmul %948, %746, %cst_301 {dimension_numbers = #tpu.dot_dimension_numbers<[1], [0], [0], [1], [0, 0, 1, 1], [], []>} : vector<8x128xf32>, vector<128x512xf32>, vector<8x512xf32> -> vector<8x512xf32>
    %952 = arith.addf %950, %951 : vector<8x512xf32>
    %953 = vector.extract_strided_slice %952 {offsets = [0, 0], sizes = [8, 128], strides = [1, 1]} : vector<8x512xf32> to vector<8x128xf32>
    %954 = arith.negf %953 : vector<8x128xf32>
    %955 = math.exp %954 : vector<8x128xf32>
    %cst_302 = arith.constant 1.000000e+00 : f32
    %956 = vector.broadcast %cst_302 : f32 to vector<8x128xf32>
    %957 = arith.addf %956, %955 : vector<8x128xf32>
    %958 = arith.divf %956, %957 : vector<8x128xf32>
    %959 = vector.extract_strided_slice %952 {offsets = [0, 128], sizes = [8, 128], strides = [1, 1]} : vector<8x512xf32> to vector<8x128xf32>
    %960 = arith.negf %959 : vector<8x128xf32>
    %961 = math.exp %960 : vector<8x128xf32>
    %cst_303 = arith.constant 1.000000e+00 : f32
    %962 = vector.broadcast %cst_303 : f32 to vector<8x128xf32>
    %963 = arith.addf %962, %961 : vector<8x128xf32>
    %964 = arith.divf %962, %963 : vector<8x128xf32>
    %965 = vector.extract_strided_slice %952 {offsets = [0, 256], sizes = [8, 128], strides = [1, 1]} : vector<8x512xf32> to vector<8x128xf32>
    %966 = math.tanh %965 : vector<8x128xf32>
    %967 = vector.extract_strided_slice %952 {offsets = [0, 384], sizes = [8, 128], strides = [1, 1]} : vector<8x512xf32> to vector<8x128xf32>
    %968 = arith.negf %967 : vector<8x128xf32>
    %969 = math.exp %968 : vector<8x128xf32>
    %cst_304 = arith.constant 1.000000e+00 : f32
    %970 = vector.broadcast %cst_304 : f32 to vector<8x128xf32>
    %971 = arith.addf %970, %969 : vector<8x128xf32>
    %972 = arith.divf %970, %971 : vector<8x128xf32>
    %973 = arith.mulf %964, %946 : vector<8x128xf32>
    %974 = arith.mulf %958, %966 : vector<8x128xf32>
    %975 = arith.addf %973, %974 : vector<8x128xf32>
    %976 = math.tanh %975 : vector<8x128xf32>
    %977 = arith.mulf %972, %976 : vector<8x128xf32>
    %c56_305 = arith.constant 56 : index
    %c0_306 = arith.constant 0 : index
    %978 = vector.load %arg8[%c56_305, %c0_306] : memref<64x128xf32, #tpu.memory_space<vmem>>, vector<8x128xf32>
    tpu.vector_store %arg8[%c56_305, %c0_306], %977 {strides = array<i32>} : memref<64x128xf32, #tpu.memory_space<vmem>>, vector<8x128xf32>,
    %c0_307 = arith.constant 0 : index
    %c0_308 = arith.constant 0 : index
    %979 = vector.load %arg8[%c0_307, %c0_308] : memref<64x128xf32, #tpu.memory_space<vmem>>, vector<64x128xf32>
    %c3_309 = arith.constant 3 : index
    %c0_310 = arith.constant 0 : index
    %c0_311 = arith.constant 0 : index
    %980 = vector.load %arg3[%c3_309, %c0_310, %c0_311] : memref<4x128x512xf32, #tpu.memory_space<vmem>>, vector<1x128x512xf32>
    %981 = vector.shape_cast %980 : vector<1x128x512xf32> to vector<128x512xf32>
    %cst_312 = arith.constant dense<0.000000e+00> : vector<64x512xf32>
    %982 = tpu.matmul %979, %981, %cst_312 {dimension_numbers = #tpu.dot_dimension_numbers<[1], [0], [0], [1], [0, 0, 1, 1], [], []>} : vector<64x128xf32>, vector<128x512xf32>, vector<64x512xf32> -> vector<64x512xf32>
    %c4 = arith.constant 4 : index
    %c0_313 = arith.constant 0 : index
    %c0_314 = arith.constant 0 : index
    %983 = vector.load %arg4[%c4, %c0_313, %c0_314] : memref<5x1x512xf32, #tpu.memory_space<vmem>>, vector<1x1x512xf32>
    %984 = vector.shape_cast %983 : vector<1x1x512xf32> to vector<1x512xf32>
    %985 = vector.broadcast %984 : vector<1x512xf32> to vector<64x512xf32>
    %986 = arith.addf %982, %985 : vector<64x512xf32>
    %c0_315 = arith.constant 0 : index
    %c0_316 = arith.constant 0 : index
    %987 = vector.load %arg9[%c0_315, %c0_316] : memref<64x512xf32, #tpu.memory_space<vmem>>, vector<64x512xf32>
    tpu.vector_store %arg9[%c0_315, %c0_316], %986 {strides = array<i32>} : memref<64x512xf32, #tpu.memory_space<vmem>>, vector<64x512xf32>,
    %cst_317 = arith.constant 0.000000e+00 : f32
    %988 = vector.broadcast %cst_317 : f32 to vector<8x128xf32>
    %cst_318 = arith.constant 0.000000e+00 : f32
    %989 = vector.broadcast %cst_318 : f32 to vector<8x128xf32>
    %c4_319 = arith.constant 4 : index
    %c0_320 = arith.constant 0 : index
    %c0_321 = arith.constant 0 : index
    %990 = vector.load %arg2[%c4_319, %c0_320, %c0_321] : memref<5x128x512xf32, #tpu.memory_space<vmem>>, vector<1x128x512xf32>
    %991 = vector.shape_cast %990 : vector<1x128x512xf32> to vector<128x512xf32>
    %c0_322 = arith.constant 0 : index
    %c0_323 = arith.constant 0 : index
    %992 = vector.load %arg9[%c0_322, %c0_323] : memref<64x512xf32, #tpu.memory_space<vmem>>, vector<8x512xf32>
    %cst_324 = arith.constant dense<0.000000e+00> : vector<8x512xf32>
    %993 = tpu.matmul %988, %991, %cst_324 {dimension_numbers = #tpu.dot_dimension_numbers<[1], [0], [0], [1], [0, 0, 1, 1], [], []>} : vector<8x128xf32>, vector<128x512xf32>, vector<8x512xf32> -> vector<8x512xf32>
    %994 = arith.addf %992, %993 : vector<8x512xf32>
    %995 = vector.extract_strided_slice %994 {offsets = [0, 0], sizes = [8, 128], strides = [1, 1]} : vector<8x512xf32> to vector<8x128xf32>
    %996 = arith.negf %995 : vector<8x128xf32>
    %997 = math.exp %996 : vector<8x128xf32>
    %cst_325 = arith.constant 1.000000e+00 : f32
    %998 = vector.broadcast %cst_325 : f32 to vector<8x128xf32>
    %999 = arith.addf %998, %997 : vector<8x128xf32>
    %1000 = arith.divf %998, %999 : vector<8x128xf32>
    %1001 = vector.extract_strided_slice %994 {offsets = [0, 128], sizes = [8, 128], strides = [1, 1]} : vector<8x512xf32> to vector<8x128xf32>
    %1002 = arith.negf %1001 : vector<8x128xf32>
    %1003 = math.exp %1002 : vector<8x128xf32>
    %cst_326 = arith.constant 1.000000e+00 : f32
    %1004 = vector.broadcast %cst_326 : f32 to vector<8x128xf32>
    %1005 = arith.addf %1004, %1003 : vector<8x128xf32>
    %1006 = arith.divf %1004, %1005 : vector<8x128xf32>
    %1007 = vector.extract_strided_slice %994 {offsets = [0, 256], sizes = [8, 128], strides = [1, 1]} : vector<8x512xf32> to vector<8x128xf32>
    %1008 = math.tanh %1007 : vector<8x128xf32>
    %1009 = vector.extract_strided_slice %994 {offsets = [0, 384], sizes = [8, 128], strides = [1, 1]} : vector<8x512xf32> to vector<8x128xf32>
    %1010 = arith.negf %1009 : vector<8x128xf32>
    %1011 = math.exp %1010 : vector<8x128xf32>
    %cst_327 = arith.constant 1.000000e+00 : f32
    %1012 = vector.broadcast %cst_327 : f32 to vector<8x128xf32>
    %1013 = arith.addf %1012, %1011 : vector<8x128xf32>
    %1014 = arith.divf %1012, %1013 : vector<8x128xf32>
    %1015 = arith.mulf %1006, %989 : vector<8x128xf32>
    %1016 = arith.mulf %1000, %1008 : vector<8x128xf32>
    %1017 = arith.addf %1015, %1016 : vector<8x128xf32>
    %1018 = math.tanh %1017 : vector<8x128xf32>
    %1019 = arith.mulf %1014, %1018 : vector<8x128xf32>
    %c8_328 = arith.constant 8 : index
    %c0_329 = arith.constant 0 : index
    %1020 = vector.load %arg9[%c8_328, %c0_329] : memref<64x512xf32, #tpu.memory_space<vmem>>, vector<8x512xf32>
    %cst_330 = arith.constant dense<0.000000e+00> : vector<8x512xf32>
    %1021 = tpu.matmul %1019, %991, %cst_330 {dimension_numbers = #tpu.dot_dimension_numbers<[1], [0], [0], [1], [0, 0, 1, 1], [], []>} : vector<8x128xf32>, vector<128x512xf32>, vector<8x512xf32> -> vector<8x512xf32>
    %1022 = arith.addf %1020, %1021 : vector<8x512xf32>
    %1023 = vector.extract_strided_slice %1022 {offsets = [0, 0], sizes = [8, 128], strides = [1, 1]} : vector<8x512xf32> to vector<8x128xf32>
    %1024 = arith.negf %1023 : vector<8x128xf32>
    %1025 = math.exp %1024 : vector<8x128xf32>
    %cst_331 = arith.constant 1.000000e+00 : f32
    %1026 = vector.broadcast %cst_331 : f32 to vector<8x128xf32>
    %1027 = arith.addf %1026, %1025 : vector<8x128xf32>
    %1028 = arith.divf %1026, %1027 : vector<8x128xf32>
    %1029 = vector.extract_strided_slice %1022 {offsets = [0, 128], sizes = [8, 128], strides = [1, 1]} : vector<8x512xf32> to vector<8x128xf32>
    %1030 = arith.negf %1029 : vector<8x128xf32>
    %1031 = math.exp %1030 : vector<8x128xf32>
    %cst_332 = arith.constant 1.000000e+00 : f32
    %1032 = vector.broadcast %cst_332 : f32 to vector<8x128xf32>
    %1033 = arith.addf %1032, %1031 : vector<8x128xf32>
    %1034 = arith.divf %1032, %1033 : vector<8x128xf32>
    %1035 = vector.extract_strided_slice %1022 {offsets = [0, 256], sizes = [8, 128], strides = [1, 1]} : vector<8x512xf32> to vector<8x128xf32>
    %1036 = math.tanh %1035 : vector<8x128xf32>
    %1037 = vector.extract_strided_slice %1022 {offsets = [0, 384], sizes = [8, 128], strides = [1, 1]} : vector<8x512xf32> to vector<8x128xf32>
    %1038 = arith.negf %1037 : vector<8x128xf32>
    %1039 = math.exp %1038 : vector<8x128xf32>
    %cst_333 = arith.constant 1.000000e+00 : f32
    %1040 = vector.broadcast %cst_333 : f32 to vector<8x128xf32>
    %1041 = arith.addf %1040, %1039 : vector<8x128xf32>
    %1042 = arith.divf %1040, %1041 : vector<8x128xf32>
    %1043 = arith.mulf %1034, %1017 : vector<8x128xf32>
    %1044 = arith.mulf %1028, %1036 : vector<8x128xf32>
    %1045 = arith.addf %1043, %1044 : vector<8x128xf32>
    %1046 = math.tanh %1045 : vector<8x128xf32>
    %1047 = arith.mulf %1042, %1046 : vector<8x128xf32>
    %c16_334 = arith.constant 16 : index
    %c0_335 = arith.constant 0 : index
    %1048 = vector.load %arg9[%c16_334, %c0_335] : memref<64x512xf32, #tpu.memory_space<vmem>>, vector<8x512xf32>
    %cst_336 = arith.constant dense<0.000000e+00> : vector<8x512xf32>
    %1049 = tpu.matmul %1047, %991, %cst_336 {dimension_numbers = #tpu.dot_dimension_numbers<[1], [0], [0], [1], [0, 0, 1, 1], [], []>} : vector<8x128xf32>, vector<128x512xf32>, vector<8x512xf32> -> vector<8x512xf32>
    %1050 = arith.addf %1048, %1049 : vector<8x512xf32>
    %1051 = vector.extract_strided_slice %1050 {offsets = [0, 0], sizes = [8, 128], strides = [1, 1]} : vector<8x512xf32> to vector<8x128xf32>
    %1052 = arith.negf %1051 : vector<8x128xf32>
    %1053 = math.exp %1052 : vector<8x128xf32>
    %cst_337 = arith.constant 1.000000e+00 : f32
    %1054 = vector.broadcast %cst_337 : f32 to vector<8x128xf32>
    %1055 = arith.addf %1054, %1053 : vector<8x128xf32>
    %1056 = arith.divf %1054, %1055 : vector<8x128xf32>
    %1057 = vector.extract_strided_slice %1050 {offsets = [0, 128], sizes = [8, 128], strides = [1, 1]} : vector<8x512xf32> to vector<8x128xf32>
    %1058 = arith.negf %1057 : vector<8x128xf32>
    %1059 = math.exp %1058 : vector<8x128xf32>
    %cst_338 = arith.constant 1.000000e+00 : f32
    %1060 = vector.broadcast %cst_338 : f32 to vector<8x128xf32>
    %1061 = arith.addf %1060, %1059 : vector<8x128xf32>
    %1062 = arith.divf %1060, %1061 : vector<8x128xf32>
    %1063 = vector.extract_strided_slice %1050 {offsets = [0, 256], sizes = [8, 128], strides = [1, 1]} : vector<8x512xf32> to vector<8x128xf32>
    %1064 = math.tanh %1063 : vector<8x128xf32>
    %1065 = vector.extract_strided_slice %1050 {offsets = [0, 384], sizes = [8, 128], strides = [1, 1]} : vector<8x512xf32> to vector<8x128xf32>
    %1066 = arith.negf %1065 : vector<8x128xf32>
    %1067 = math.exp %1066 : vector<8x128xf32>
    %cst_339 = arith.constant 1.000000e+00 : f32
    %1068 = vector.broadcast %cst_339 : f32 to vector<8x128xf32>
    %1069 = arith.addf %1068, %1067 : vector<8x128xf32>
    %1070 = arith.divf %1068, %1069 : vector<8x128xf32>
    %1071 = arith.mulf %1062, %1045 : vector<8x128xf32>
    %1072 = arith.mulf %1056, %1064 : vector<8x128xf32>
    %1073 = arith.addf %1071, %1072 : vector<8x128xf32>
    %1074 = math.tanh %1073 : vector<8x128xf32>
    %1075 = arith.mulf %1070, %1074 : vector<8x128xf32>
    %c24_340 = arith.constant 24 : index
    %c0_341 = arith.constant 0 : index
    %1076 = vector.load %arg9[%c24_340, %c0_341] : memref<64x512xf32, #tpu.memory_space<vmem>>, vector<8x512xf32>
    %cst_342 = arith.constant dense<0.000000e+00> : vector<8x512xf32>
    %1077 = tpu.matmul %1075, %991, %cst_342 {dimension_numbers = #tpu.dot_dimension_numbers<[1], [0], [0], [1], [0, 0, 1, 1], [], []>} : vector<8x128xf32>, vector<128x512xf32>, vector<8x512xf32> -> vector<8x512xf32>
    %1078 = arith.addf %1076, %1077 : vector<8x512xf32>
    %1079 = vector.extract_strided_slice %1078 {offsets = [0, 0], sizes = [8, 128], strides = [1, 1]} : vector<8x512xf32> to vector<8x128xf32>
    %1080 = arith.negf %1079 : vector<8x128xf32>
    %1081 = math.exp %1080 : vector<8x128xf32>
    %cst_343 = arith.constant 1.000000e+00 : f32
    %1082 = vector.broadcast %cst_343 : f32 to vector<8x128xf32>
    %1083 = arith.addf %1082, %1081 : vector<8x128xf32>
    %1084 = arith.divf %1082, %1083 : vector<8x128xf32>
    %1085 = vector.extract_strided_slice %1078 {offsets = [0, 128], sizes = [8, 128], strides = [1, 1]} : vector<8x512xf32> to vector<8x128xf32>
    %1086 = arith.negf %1085 : vector<8x128xf32>
    %1087 = math.exp %1086 : vector<8x128xf32>
    %cst_344 = arith.constant 1.000000e+00 : f32
    %1088 = vector.broadcast %cst_344 : f32 to vector<8x128xf32>
    %1089 = arith.addf %1088, %1087 : vector<8x128xf32>
    %1090 = arith.divf %1088, %1089 : vector<8x128xf32>
    %1091 = vector.extract_strided_slice %1078 {offsets = [0, 256], sizes = [8, 128], strides = [1, 1]} : vector<8x512xf32> to vector<8x128xf32>
    %1092 = math.tanh %1091 : vector<8x128xf32>
    %1093 = vector.extract_strided_slice %1078 {offsets = [0, 384], sizes = [8, 128], strides = [1, 1]} : vector<8x512xf32> to vector<8x128xf32>
    %1094 = arith.negf %1093 : vector<8x128xf32>
    %1095 = math.exp %1094 : vector<8x128xf32>
    %cst_345 = arith.constant 1.000000e+00 : f32
    %1096 = vector.broadcast %cst_345 : f32 to vector<8x128xf32>
    %1097 = arith.addf %1096, %1095 : vector<8x128xf32>
    %1098 = arith.divf %1096, %1097 : vector<8x128xf32>
    %1099 = arith.mulf %1090, %1073 : vector<8x128xf32>
    %1100 = arith.mulf %1084, %1092 : vector<8x128xf32>
    %1101 = arith.addf %1099, %1100 : vector<8x128xf32>
    %1102 = math.tanh %1101 : vector<8x128xf32>
    %1103 = arith.mulf %1098, %1102 : vector<8x128xf32>
    %c32_346 = arith.constant 32 : index
    %c0_347 = arith.constant 0 : index
    %1104 = vector.load %arg9[%c32_346, %c0_347] : memref<64x512xf32, #tpu.memory_space<vmem>>, vector<8x512xf32>
    %cst_348 = arith.constant dense<0.000000e+00> : vector<8x512xf32>
    %1105 = tpu.matmul %1103, %991, %cst_348 {dimension_numbers = #tpu.dot_dimension_numbers<[1], [0], [0], [1], [0, 0, 1, 1], [], []>} : vector<8x128xf32>, vector<128x512xf32>, vector<8x512xf32> -> vector<8x512xf32>
    %1106 = arith.addf %1104, %1105 : vector<8x512xf32>
    %1107 = vector.extract_strided_slice %1106 {offsets = [0, 0], sizes = [8, 128], strides = [1, 1]} : vector<8x512xf32> to vector<8x128xf32>
    %1108 = arith.negf %1107 : vector<8x128xf32>
    %1109 = math.exp %1108 : vector<8x128xf32>
    %cst_349 = arith.constant 1.000000e+00 : f32
    %1110 = vector.broadcast %cst_349 : f32 to vector<8x128xf32>
    %1111 = arith.addf %1110, %1109 : vector<8x128xf32>
    %1112 = arith.divf %1110, %1111 : vector<8x128xf32>
    %1113 = vector.extract_strided_slice %1106 {offsets = [0, 128], sizes = [8, 128], strides = [1, 1]} : vector<8x512xf32> to vector<8x128xf32>
    %1114 = arith.negf %1113 : vector<8x128xf32>
    %1115 = math.exp %1114 : vector<8x128xf32>
    %cst_350 = arith.constant 1.000000e+00 : f32
    %1116 = vector.broadcast %cst_350 : f32 to vector<8x128xf32>
    %1117 = arith.addf %1116, %1115 : vector<8x128xf32>
    %1118 = arith.divf %1116, %1117 : vector<8x128xf32>
    %1119 = vector.extract_strided_slice %1106 {offsets = [0, 256], sizes = [8, 128], strides = [1, 1]} : vector<8x512xf32> to vector<8x128xf32>
    %1120 = math.tanh %1119 : vector<8x128xf32>
    %1121 = vector.extract_strided_slice %1106 {offsets = [0, 384], sizes = [8, 128], strides = [1, 1]} : vector<8x512xf32> to vector<8x128xf32>
    %1122 = arith.negf %1121 : vector<8x128xf32>
    %1123 = math.exp %1122 : vector<8x128xf32>
    %cst_351 = arith.constant 1.000000e+00 : f32
    %1124 = vector.broadcast %cst_351 : f32 to vector<8x128xf32>
    %1125 = arith.addf %1124, %1123 : vector<8x128xf32>
    %1126 = arith.divf %1124, %1125 : vector<8x128xf32>
    %1127 = arith.mulf %1118, %1101 : vector<8x128xf32>
    %1128 = arith.mulf %1112, %1120 : vector<8x128xf32>
    %1129 = arith.addf %1127, %1128 : vector<8x128xf32>
    %1130 = math.tanh %1129 : vector<8x128xf32>
    %1131 = arith.mulf %1126, %1130 : vector<8x128xf32>
    %c40_352 = arith.constant 40 : index
    %c0_353 = arith.constant 0 : index
    %1132 = vector.load %arg9[%c40_352, %c0_353] : memref<64x512xf32, #tpu.memory_space<vmem>>, vector<8x512xf32>
    %cst_354 = arith.constant dense<0.000000e+00> : vector<8x512xf32>
    %1133 = tpu.matmul %1131, %991, %cst_354 {dimension_numbers = #tpu.dot_dimension_numbers<[1], [0], [0], [1], [0, 0, 1, 1], [], []>} : vector<8x128xf32>, vector<128x512xf32>, vector<8x512xf32> -> vector<8x512xf32>
    %1134 = arith.addf %1132, %1133 : vector<8x512xf32>
    %1135 = vector.extract_strided_slice %1134 {offsets = [0, 0], sizes = [8, 128], strides = [1, 1]} : vector<8x512xf32> to vector<8x128xf32>
    %1136 = arith.negf %1135 : vector<8x128xf32>
    %1137 = math.exp %1136 : vector<8x128xf32>
    %cst_355 = arith.constant 1.000000e+00 : f32
    %1138 = vector.broadcast %cst_355 : f32 to vector<8x128xf32>
    %1139 = arith.addf %1138, %1137 : vector<8x128xf32>
    %1140 = arith.divf %1138, %1139 : vector<8x128xf32>
    %1141 = vector.extract_strided_slice %1134 {offsets = [0, 128], sizes = [8, 128], strides = [1, 1]} : vector<8x512xf32> to vector<8x128xf32>
    %1142 = arith.negf %1141 : vector<8x128xf32>
    %1143 = math.exp %1142 : vector<8x128xf32>
    %cst_356 = arith.constant 1.000000e+00 : f32
    %1144 = vector.broadcast %cst_356 : f32 to vector<8x128xf32>
    %1145 = arith.addf %1144, %1143 : vector<8x128xf32>
    %1146 = arith.divf %1144, %1145 : vector<8x128xf32>
    %1147 = vector.extract_strided_slice %1134 {offsets = [0, 256], sizes = [8, 128], strides = [1, 1]} : vector<8x512xf32> to vector<8x128xf32>
    %1148 = math.tanh %1147 : vector<8x128xf32>
    %1149 = vector.extract_strided_slice %1134 {offsets = [0, 384], sizes = [8, 128], strides = [1, 1]} : vector<8x512xf32> to vector<8x128xf32>
    %1150 = arith.negf %1149 : vector<8x128xf32>
    %1151 = math.exp %1150 : vector<8x128xf32>
    %cst_357 = arith.constant 1.000000e+00 : f32
    %1152 = vector.broadcast %cst_357 : f32 to vector<8x128xf32>
    %1153 = arith.addf %1152, %1151 : vector<8x128xf32>
    %1154 = arith.divf %1152, %1153 : vector<8x128xf32>
    %1155 = arith.mulf %1146, %1129 : vector<8x128xf32>
    %1156 = arith.mulf %1140, %1148 : vector<8x128xf32>
    %1157 = arith.addf %1155, %1156 : vector<8x128xf32>
    %1158 = math.tanh %1157 : vector<8x128xf32>
    %1159 = arith.mulf %1154, %1158 : vector<8x128xf32>
    %c48_358 = arith.constant 48 : index
    %c0_359 = arith.constant 0 : index
    %1160 = vector.load %arg9[%c48_358, %c0_359] : memref<64x512xf32, #tpu.memory_space<vmem>>, vector<8x512xf32>
    %cst_360 = arith.constant dense<0.000000e+00> : vector<8x512xf32>
    %1161 = tpu.matmul %1159, %991, %cst_360 {dimension_numbers = #tpu.dot_dimension_numbers<[1], [0], [0], [1], [0, 0, 1, 1], [], []>} : vector<8x128xf32>, vector<128x512xf32>, vector<8x512xf32> -> vector<8x512xf32>
    %1162 = arith.addf %1160, %1161 : vector<8x512xf32>
    %1163 = vector.extract_strided_slice %1162 {offsets = [0, 0], sizes = [8, 128], strides = [1, 1]} : vector<8x512xf32> to vector<8x128xf32>
    %1164 = arith.negf %1163 : vector<8x128xf32>
    %1165 = math.exp %1164 : vector<8x128xf32>
    %cst_361 = arith.constant 1.000000e+00 : f32
    %1166 = vector.broadcast %cst_361 : f32 to vector<8x128xf32>
    %1167 = arith.addf %1166, %1165 : vector<8x128xf32>
    %1168 = arith.divf %1166, %1167 : vector<8x128xf32>
    %1169 = vector.extract_strided_slice %1162 {offsets = [0, 128], sizes = [8, 128], strides = [1, 1]} : vector<8x512xf32> to vector<8x128xf32>
    %1170 = arith.negf %1169 : vector<8x128xf32>
    %1171 = math.exp %1170 : vector<8x128xf32>
    %cst_362 = arith.constant 1.000000e+00 : f32
    %1172 = vector.broadcast %cst_362 : f32 to vector<8x128xf32>
    %1173 = arith.addf %1172, %1171 : vector<8x128xf32>
    %1174 = arith.divf %1172, %1173 : vector<8x128xf32>
    %1175 = vector.extract_strided_slice %1162 {offsets = [0, 256], sizes = [8, 128], strides = [1, 1]} : vector<8x512xf32> to vector<8x128xf32>
    %1176 = math.tanh %1175 : vector<8x128xf32>
    %1177 = vector.extract_strided_slice %1162 {offsets = [0, 384], sizes = [8, 128], strides = [1, 1]} : vector<8x512xf32> to vector<8x128xf32>
    %1178 = arith.negf %1177 : vector<8x128xf32>
    %1179 = math.exp %1178 : vector<8x128xf32>
    %cst_363 = arith.constant 1.000000e+00 : f32
    %1180 = vector.broadcast %cst_363 : f32 to vector<8x128xf32>
    %1181 = arith.addf %1180, %1179 : vector<8x128xf32>
    %1182 = arith.divf %1180, %1181 : vector<8x128xf32>
    %1183 = arith.mulf %1174, %1157 : vector<8x128xf32>
    %1184 = arith.mulf %1168, %1176 : vector<8x128xf32>
    %1185 = arith.addf %1183, %1184 : vector<8x128xf32>
    %1186 = math.tanh %1185 : vector<8x128xf32>
    %1187 = arith.mulf %1182, %1186 : vector<8x128xf32>
    %c56_364 = arith.constant 56 : index
    %c0_365 = arith.constant 0 : index
    %1188 = vector.load %arg9[%c56_364, %c0_365] : memref<64x512xf32, #tpu.memory_space<vmem>>, vector<8x512xf32>
    %cst_366 = arith.constant dense<0.000000e+00> : vector<8x512xf32>
    %1189 = tpu.matmul %1187, %991, %cst_366 {dimension_numbers = #tpu.dot_dimension_numbers<[1], [0], [0], [1], [0, 0, 1, 1], [], []>} : vector<8x128xf32>, vector<128x512xf32>, vector<8x512xf32> -> vector<8x512xf32>
    %1190 = arith.addf %1188, %1189 : vector<8x512xf32>
    %1191 = vector.extract_strided_slice %1190 {offsets = [0, 0], sizes = [8, 128], strides = [1, 1]} : vector<8x512xf32> to vector<8x128xf32>
    %1192 = arith.negf %1191 : vector<8x128xf32>
    %1193 = math.exp %1192 : vector<8x128xf32>
    %cst_367 = arith.constant 1.000000e+00 : f32
    %1194 = vector.broadcast %cst_367 : f32 to vector<8x128xf32>
    %1195 = arith.addf %1194, %1193 : vector<8x128xf32>
    %1196 = arith.divf %1194, %1195 : vector<8x128xf32>
    %1197 = vector.extract_strided_slice %1190 {offsets = [0, 128], sizes = [8, 128], strides = [1, 1]} : vector<8x512xf32> to vector<8x128xf32>
    %1198 = arith.negf %1197 : vector<8x128xf32>
    %1199 = math.exp %1198 : vector<8x128xf32>
    %cst_368 = arith.constant 1.000000e+00 : f32
    %1200 = vector.broadcast %cst_368 : f32 to vector<8x128xf32>
    %1201 = arith.addf %1200, %1199 : vector<8x128xf32>
    %1202 = arith.divf %1200, %1201 : vector<8x128xf32>
    %1203 = vector.extract_strided_slice %1190 {offsets = [0, 256], sizes = [8, 128], strides = [1, 1]} : vector<8x512xf32> to vector<8x128xf32>
    %1204 = math.tanh %1203 : vector<8x128xf32>
    %1205 = vector.extract_strided_slice %1190 {offsets = [0, 384], sizes = [8, 128], strides = [1, 1]} : vector<8x512xf32> to vector<8x128xf32>
    %1206 = arith.negf %1205 : vector<8x128xf32>
    %1207 = math.exp %1206 : vector<8x128xf32>
    %cst_369 = arith.constant 1.000000e+00 : f32
    %1208 = vector.broadcast %cst_369 : f32 to vector<8x128xf32>
    %1209 = arith.addf %1208, %1207 : vector<8x128xf32>
    %1210 = arith.divf %1208, %1209 : vector<8x128xf32>
    %1211 = arith.mulf %1202, %1185 : vector<8x128xf32>
    %1212 = arith.mulf %1196, %1204 : vector<8x128xf32>
    %1213 = arith.addf %1211, %1212 : vector<8x128xf32>
    %1214 = math.tanh %1213 : vector<8x128xf32>
    %1215 = arith.mulf %1210, %1214 : vector<8x128xf32>
    %c0_370 = arith.constant 0 : index
    %c0_371 = arith.constant 0 : index
    %1216 = vector.load %arg5[%c0_370, %c0_371] : memref<128x128xf32, #tpu.memory_space<vmem>>, vector<128x128xf32>
    %cst_372 = arith.constant dense<0.000000e+00> : vector<8x128xf32>
    %1217 = tpu.matmul %1215, %1216, %cst_372 {dimension_numbers = #tpu.dot_dimension_numbers<[1], [0], [0], [1], [0, 0, 1, 1], [], []>} : vector<8x128xf32>, vector<128x128xf32>, vector<8x128xf32> -> vector<8x128xf32>
    %c0_373 = arith.constant 0 : index
    %c0_374 = arith.constant 0 : index
    %1218 = vector.load %arg6[%c0_373, %c0_374] : memref<1x128xf32, #tpu.memory_space<vmem>>, vector<1x128xf32>
    %1219 = vector.broadcast %1218 : vector<1x128xf32> to vector<8x128xf32>
    %1220 = arith.addf %1217, %1219 : vector<8x128xf32>
    %c0_375 = arith.constant 0 : index
    %c0_376 = arith.constant 0 : index
    %1221 = vector.load %arg7[%c0_375, %c0_376] : memref<8x128xf32, #tpu.memory_space<vmem>>, vector<8x128xf32>
    tpu.vector_store %arg7[%c0_375, %c0_376], %1220 {strides = array<i32>} : memref<8x128xf32, #tpu.memory_space<vmem>>, vector<8x128xf32>,
    return
  }
}

</mosaic_0001>

<bundles_post_ra>
// kernel: model_lstm_forward.1
= control target key start
LH: loop header
LB: loop body
LE: loop exit
PB: predicated region body
PF: predicated region fallthrough
CT: control target
= control target key end

     0   :  { %12 = vsyncpa [#allocation5], 0  ;;  %s16545_s0 = inlined_call_operand.vmem [shape: f32[64,384], index: 0, kind: input, shape index: {}]   ;;  %s16546_s1 = inlined_call_operand.hbm [shape: f32[384,512], index: 1, kind: input, shape index: {}]   ;;  %s16547_s2 = inlined_call_operand.hbm [shape: f32[5,128,512], index: 2, kind: input, shape index: {}]   ;;  %s16548_s3 = inlined_call_operand.hbm [shape: f32[4,128,512], index: 3, kind: input, shape index: {}]   ;;  %s16549_s4 = inlined_call_operand.hbm [shape: f32[5,1,512], index: 4, kind: input, shape index: {}]   ;;  %s16550_s5 = inlined_call_operand.hbm [shape: f32[128,128], index: 5, kind: input, shape index: {}]   ;;  %s16551_s6 = inlined_call_operand.hbm [shape: f32[1,128], index: 6, kind: input, shape index: {}]   ;;  %s16552_s7 = inlined_call_operand.vmem [shape: f32[8,128], index: 7, kind: output, shape index: {}]  }
   0x1   :  { %13 = vsyncpa [#allocation7], 0 }
   0x2   :  { %14 = vsyncpa [#allocation10], 0 }
   0x3   :  { %15 = vsyncpa [#allocation13], 0  ;;  %s14013_s24 = smov [#allocation6]   ;;  %s14014_s26 = smov [#allocation9]  }
   0x4   :  { %s35_s25 = sshll.u32 %s14013_s24, 4  ;;  %s59_s27 = sshll.u32 %s14014_s26, 4  ;;  %s36_s25 = int_to_ptr.vmem [resolvable:$true] %s35_s25  ;;  %s14068_s27 = int_to_ptr.vmem [resolvable:$true] %s59_s27 }
   0x5   :  { %s13873_s30 = scalar_lea.hbm %s16547_s2, 40960 }
   0x6   :  { %p13874_p0 = scmp.ne.s32.totalorder %s16547_s2, %s13873_s30  ;;  %p13877_p1 = scmp.lt.u32.totalorder %s13873_s30, %s16547_s2 }
   0x8   :  { %p13879_p2 = pnand %p13877_p1, %p13874_p0 }
   0xa   :  { %13882 = shalt.err (!%p13879_p2)
}
   0xb   :  { %s13883_s12 = scalar_lea.vmem %s36_s25, 40960  ;;  %p13888_p4 = scmp.lt.s32.totalorder %s36_s25, %s36_s25 }
   0xc   :  { %p13884_p3 = scmp.ne.s32.totalorder %s36_s25, %s13883_s12  ;;  %p13889_p5 = scmp.lt.s32.totalorder %s13883_s12, %s13883_s12 }
   0xe   :  { %p13890_p6 = por %p13889_p5, %p13888_p4 }
  0x10   :  { %p13891_p7 = pnand %p13890_p6, %p13884_p3 }
  0x12   :  { %13894 = shalt.err (!%p13891_p7)
}
  0x13   :  { %s14015_s13 = smov 512   ;;  %s14016_s14 = smov 32  }
  0x14   :  { %41 = dma.hbm_to_vmem [thread:$0]  %s16547_s2, 40960, %s36_s25, [#allocation7], %s14015_s13, %s14015_s13, %s14016_s14  }
  0x15   :  { %s13895_s19 = scalar_lea.hbm %s16549_s4, 320 }
  0x16   :  { %p13896_p8 = scmp.ne.s32.totalorder %s16549_s4, %s13895_s19  ;;  %p13899_p9 = scmp.lt.u32.totalorder %s13895_s19, %s16549_s4 }
  0x18   :  { %p13901_p10 = pnand %p13899_p9, %p13896_p8 }
  0x1a   :  { %13904 = shalt.err (!%p13901_p10)
}
  0x1b   :  { %s13905_s24 = scalar_lea.vmem %s14068_s27, 320  ;;  %p13910_p12 = scmp.lt.s32.totalorder %s14068_s27, %s14068_s27 }
  0x1c   :  { %p13906_p11 = scmp.ne.s32.totalorder %s14068_s27, %s13905_s24  ;;  %p13911_p13 = scmp.lt.s32.totalorder %s13905_s24, %s13905_s24 }
  0x1e   :  { %p13912_p0 = por %p13911_p13, %p13910_p12 }
  0x20   :  { %p13913_p1 = pnand %p13912_p0, %p13906_p11 }
  0x22   :  { %13916 = shalt.err (!%p13913_p1)
}
  0x23   :  { %s14017_s2 = smov 64   ;;  %s14018_s25 = smov 4  }
  0x24   :  { %65 = dma.hbm_to_vmem [thread:$0]  %s16549_s4, 320, %s14068_s27, [#allocation10], %s14017_s2, %s14017_s2, %s14018_s25  }
  0x25   :  { %s14019_s29 = smov [#allocation4]   ;;  %s14020_s8 = smov [#allocation8]  }
  0x26   :  { %s23_s30 = sshll.u32 %s14019_s29, 4  ;;  %s47_s9 = sshll.u32 %s14020_s8, 4  ;;  %s24_s30 = int_to_ptr.vmem [resolvable:$true] %s23_s30  ;;  %s14102_s9 = int_to_ptr.vmem [resolvable:$true] %s47_s9 }
  0x27   :  { %s13917_s12 = scalar_lea.hbm %s16546_s1, 24576 }
  0x28   :  { %p13918_p2 = scmp.ne.s32.totalorder %s16546_s1, %s13917_s12  ;;  %p13921_p3 = scmp.lt.u32.totalorder %s13917_s12, %s16546_s1 }
  0x2a   :  { %p13923_p4 = pnand %p13921_p3, %p13918_p2 }
  0x2c   :  { %13926 = shalt.err (!%p13923_p4)
}
  0x2d   :  { %s13927_s4 = scalar_lea.vmem %s24_s30, 24576  ;;  %p13932_p6 = scmp.lt.s32.totalorder %s24_s30, %s24_s30 }
  0x2e   :  { %p13928_p5 = scmp.ne.s32.totalorder %s24_s30, %s13927_s4  ;;  %p13933_p7 = scmp.lt.s32.totalorder %s13927_s4, %s13927_s4 }
  0x30   :  { %p13934_p8 = por %p13933_p7, %p13932_p6 }
  0x32   :  { %p13935_p9 = pnand %p13934_p8, %p13928_p5 }
  0x34   :  { %13938 = shalt.err (!%p13935_p9)
}
  0x35   :  { %29 = dma.hbm_to_vmem [thread:$0]  %s16546_s1, 24576, %s24_s30, [#allocation5], %s14015_s13, %s14015_s13, %s14016_s14  }
  0x36   :  { %s13939_s22 = scalar_lea.hbm %s16548_s3, 32768 }
  0x37   :  { %p13940_p10 = scmp.ne.s32.totalorder %s16548_s3, %s13939_s22  ;;  %p13943_p11 = scmp.lt.u32.totalorder %s13939_s22, %s16548_s3 }
  0x39   :  { %p13945_p12 = pnand %p13943_p11, %p13940_p10 }
  0x3b   :  { %13948 = shalt.err (!%p13945_p12)
}
  0x3c   :  { %s13949_s26 = scalar_lea.vmem %s14102_s9, 32768  ;;  %p13954_p0 = scmp.lt.s32.totalorder %s14102_s9, %s14102_s9 }
  0x3d   :  { %p13950_p13 = scmp.ne.s32.totalorder %s14102_s9, %s13949_s26  ;;  %p13955_p1 = scmp.lt.s32.totalorder %s13949_s26, %s13949_s26 }
  0x3f   :  { %p13956_p2 = por %p13955_p1, %p13954_p0 }
  0x41   :  { %p13957_p3 = pnand %p13956_p2, %p13950_p13 }
  0x43   :  { %13960 = shalt.err (!%p13957_p3)
}
  0x44   :  { %53 = dma.hbm_to_vmem [thread:$0]  %s16548_s3, 32768, %s14102_s9, [#allocation7], %s14015_s13, %s14015_s13, %s14016_s14  }
  0x45   :  { %s14021_s29 = smov [#allocation11]   ;;  %s13961_s11 = scalar_lea.hbm %s16550_s5, 2048 }
  0x46   :  { %s71_s30 = sshll.u32 %s14021_s29, 4  ;;  %p13962_p4 = scmp.ne.s32.totalorder %s16550_s5, %s13961_s11  ;;  %s72_s30 = int_to_ptr.vmem [resolvable:$true] %s71_s30 }
  0x47   :  { %p13965_p5 = scmp.lt.u32.totalorder %s13961_s11, %s16550_s5 }
  0x49   :  { %p13967_p6 = pnand %p13965_p5, %p13962_p4 }
  0x4b   :  { %13970 = shalt.err (!%p13967_p6)
}
  0x4c   :  { %s13971_s18 = scalar_lea.vmem %s72_s30, 2048  ;;  %p13976_p8 = scmp.lt.s32.totalorder %s72_s30, %s72_s30 }
  0x4d   :  { %p13972_p7 = scmp.ne.s32.totalorder %s72_s30, %s13971_s18  ;;  %p13977_p9 = scmp.lt.s32.totalorder %s13971_s18, %s13971_s18 }
  0x4f   :  { %p13978_p10 = por %p13977_p9, %p13976_p8 }
  0x51   :  { %p13979_p11 = pnand %p13978_p10, %p13972_p7 }
  0x53   :  { %13982 = shalt.err (!%p13979_p11)
}
  0x54   :  { %s14022_s3 = smov 128   ;;  %s14023_s13 = smov 8  }
  0x55   :  { %77 = dma.hbm_to_vmem [thread:$0]  %s16550_s5, 2048, %s72_s30, [#allocation10], %s14022_s3, %s14022_s3, %s14023_s13  }
  0x56   :  { %s14024_s4 = smov [#allocation12]   ;;  %s13983_s21 = scalar_lea.hbm %s16551_s6, 16 }
  0x57   :  { %s84_s27 = sshll.u32 %s14024_s4, 4  ;;  %p13984_p12 = scmp.ne.s32.totalorder %s16551_s6, %s13983_s21  ;;  %s85_s27 = int_to_ptr.vmem [resolvable:$true] %s84_s27 }
  0x58   :  { %p13987_p13 = scmp.lt.u32.totalorder %s13983_s21, %s16551_s6 }
  0x5a   :  { %p13989_p0 = pnand %p13987_p13, %p13984_p12 }
  0x5c   :  { %13992 = shalt.err (!%p13989_p0)
}
  0x5d   :  { %s13993_s25 = scalar_lea.vmem %s85_s27, 16  ;;  %s13997_s5 = scalar_lea.vmem %s85_s27, 32 }
  0x5e   :  { %p13994_p1 = scmp.ne.s32.totalorder %s85_s27, %s13993_s25  ;;  %p13998_p2 = scmp.lt.s32.totalorder %s85_s27, %s85_s27 }
  0x5f   :  { %p13999_p3 = scmp.lt.s32.totalorder %s13997_s5, %s13993_s25 }
  0x61   :  { %p14000_p4 = por %p13999_p3, %p13998_p2 }
  0x63   :  { %p14001_p5 = pnand %p14000_p4, %p13994_p1 }
  0x65   :  { %14004 = shalt.err (!%p14001_p5)
}
  0x66   :  { %87 = dma.hbm_to_vmem [thread:$0]  %s16551_s6, 16, %s85_s27, [#allocation13]  }
  0x67   :  { %14005 = dma.done.wait [#allocation5], 24576  }
  0x68   :  { %14006 = vsyncadd [#allocation5], 4294942720 }
  0x69   :  { %14007 = dma.done.wait [#allocation7], 73728  }
  0x6a   :  { %14008 = vsyncadd [#allocation7], 4294893568 }
  0x6b   :  { %14009 = dma.done.wait [#allocation10], 2368  }
  0x6c   :  { %14010 = vsyncadd [#allocation10], 4294964928 }
  0x6d   :  { %14011 = dma.done.wait [#allocation13], 16  }
  0x6e   :  { %14012 = vsyncadd [#allocation13], 4294967280  ;;  %v131_v0 = vld [vmem:[#allocation4 + $0x8] sm:$0xff]  ;;  %v133_v2 = vld [vmem:[#allocation4 + $0x18] sm:$0xff]  ;;  %vm14027_vm0 = vmmov 0  }
  0x6f   :  { %v135_v1 = vld [vmem:[#allocation4 + $0x28] sm:$0xff]  ;;  %v137_v4 = vld [vmem:[#allocation4 + $0x38] sm:$0xff]  ;;  %v130_v5 = vld [vmem:[#allocation4] sm:$0xff] }
  0x70   :  { %v9834_v3 = vpack.c.bf16 %v135_v1, %v131_v0  ;;  %v134_v6 = vld [vmem:[#allocation4 + $0x20] sm:$0xff]  ;;  %v9930_v7 = vpack.c.bf16 %v137_v4, %v133_v2  ;;  %v132_v9 = vld [vmem:[#allocation4 + $0x10] sm:$0xff]  ;;  %v139_v11 = vld [vmem:[#allocation4 + $0x48] sm:$0xff] }
  0x71   :  { %v9836_v8 = vpack.c.bf16 %v134_v6, %v130_v5  ;;  %v136_v10 = vld [vmem:[#allocation4 + $0x30] sm:$0xff]  ;;  %v143_v13 = vld [vmem:[#allocation4 + $0x68] sm:$0xff]  ;;  %v141_v14 = vld [vmem:[#allocation4 + $0x58] sm:$0xff] }
  0x72   :  { %9835 = vmatprep.subr.bf16.mxu0 %v9834_v3  ;;  %v9932_v12 = vpack.c.bf16 %v136_v10, %v132_v9  ;;  %v145_v15 = vld [vmem:[#allocation4 + $0x78] sm:$0xff]  ;;  %9931 = vmatprep.subr.bf16.mxu1 %v9930_v7  ;;  %v9838_v16 = vpack.c.bf16 %v143_v13, %v139_v11  ;;  %v138_v18 = vld [vmem:[#allocation4 + $0x40] sm:$0xff]  ;;  %v140_v20 = vld [vmem:[#allocation4 + $0x50] sm:$0xff] }
  0x73   :  { %9837 = vmatpush1.bf16.msra.mxu0 %v9836_v8  ;;  %v9934_v17 = vpack.c.bf16 %v145_v15, %v141_v14  ;;  %v142_v19 = vld [vmem:[#allocation4 + $0x60] sm:$0xff]  ;;  %v144_v22 = vld [vmem:[#allocation4 + $0x70] sm:$0xff]  ;;  %v147_v23 = vld [vmem:[#allocation4 + $0x88] sm:$0xff] }
  0x74   :  { %9933 = vmatpush1.bf16.msra.mxu1 %v9932_v12  ;;  %v9840_v21 = vpack.c.bf16 %v142_v19, %v138_v18  ;;  %v151_v24 = vld [vmem:[#allocation4 + $0xa8] sm:$0xff]  ;;  %9839 = vmatprep.subr.bf16.mxu0 %v9838_v16  ;;  %v9936_v25 = vpack.c.bf16 %v144_v22, %v140_v20  ;;  %v149_v27 = vld [vmem:[#allocation4 + $0x98] sm:$0xff]  ;;  %v146_v29 = vld [vmem:[#allocation4 + $0x80] sm:$0xff] }
  0x75   :  { %9935 = vmatprep.subr.bf16.mxu1 %v9934_v17  ;;  %v9842_v26 = vpack.c.bf16 %v151_v24, %v147_v23  ;;  %v153_v28 = vld [vmem:[#allocation4 + $0xb8] sm:$0xff]  ;;  %v150_v31 = vld [vmem:[#allocation4 + $0xa0] sm:$0xff]  ;;  %v148_v32 = vld [vmem:[#allocation4 + $0x90] sm:$0xff] }
  0x76   :  { %v9938_v30 = vpack.c.bf16 %v153_v28, %v149_v27  ;;  %v152_v33 = vld [vmem:[#allocation4 + $0xb0] sm:$0xff]  ;;  %v9844_v34 = vpack.c.bf16 %v150_v31, %v146_v29  ;;  %v155_v35 = vld [vmem:[#allocation4 + $0xc8] sm:$0xff]  ;;  %v157_v37 = vld [vmem:[#allocation4 + $0xd8] sm:$0xff] }
  0x77   :  { %9841 = vmatpush1.bf16.msra.mxu0 %v9840_v21  ;;  %v159_v36 = vld [vmem:[#allocation4 + $0xe8] sm:$0xff]  ;;  %v9940_v38 = vpack.c.bf16 %v152_v33, %v148_v32  ;;  %v161_v40 = vld [vmem:[#allocation4 + $0xf8] sm:$0xff]  ;;  %v154_v41 = vld [vmem:[#allocation4 + $0xc0] sm:$0xff] }
  0x78   :  { %9937 = vmatpush1.bf16.msra.mxu1 %v9936_v25  ;;  %9843 = vmatprep.subr.bf16.mxu0 %v9842_v26  ;;  %v9846_v39 = vpack.c.bf16 %v159_v36, %v155_v35  ;;  %v158_v42 = vld [vmem:[#allocation4 + $0xe0] sm:$0xff]  ;;  %v9942_v43 = vpack.c.bf16 %v161_v40, %v157_v37  ;;  %v156_v44 = vld [vmem:[#allocation4 + $0xd0] sm:$0xff]  ;;  %v163_v46 = vld [vmem:[#allocation4 + $0x108] sm:$0xff] }
  0x79   :  { %9939 = vmatprep.subr.bf16.mxu1 %v9938_v30  ;;  %v160_v45 = vld [vmem:[#allocation4 + $0xf0] sm:$0xff]  ;;  %v167_v47 = vld [vmem:[#allocation4 + $0x128] sm:$0xff]  ;;  %v165_v48 = vld [vmem:[#allocation4 + $0x118] sm:$0xff]  ;;  %v9848_v50 = vpack.c.bf16 %v158_v42, %v154_v41 }
  0x7a   :  { %v169_v49 = vld [vmem:[#allocation4 + $0x138] sm:$0xff]  ;;  %v9944_v51 = vpack.c.bf16 %v160_v45, %v156_v44  ;;  %v9850_v52 = vpack.c.bf16 %v167_v47, %v163_v46  ;;  %v162_v53 = vld [vmem:[#allocation4 + $0x100] sm:$0xff]  ;;  %v164_v55 = vld [vmem:[#allocation4 + $0x110] sm:$0xff] }
  0x7b   :  { %9845 = vmatpush1.bf16.msra.mxu0 %v9844_v34  ;;  %v166_v54 = vld [vmem:[#allocation4 + $0x120] sm:$0xff]  ;;  %v9946_v56 = vpack.c.bf16 %v169_v49, %v165_v48  ;;  %v168_v57 = vld [vmem:[#allocation4 + $0x130] sm:$0xff]  ;;  %v171_v58 = vld [vmem:[#allocation4 + $0x148] sm:$0xff] }
  0x7c   :  { %9941 = vmatpush1.bf16.msra.mxu1 %v9940_v38  ;;  %9847 = vmatprep.subr.bf16.mxu0 %v9846_v39  ;;  %v175_v59 = vld [vmem:[#allocation4 + $0x168] sm:$0xff]  ;;  %v173_v60 = vld [vmem:[#allocation4 + $0x158] sm:$0xff]  ;;  %v9852_v62 = vpack.c.bf16 %v166_v54, %v162_v53  ;;  %v9948_v63 = vpack.c.bf16 %v168_v57, %v164_v55  ;;  %v170_v1 = vld [vmem:[#allocation4 + $0x140] sm:$0xff] }
  0x7d   :  { %9943 = vmatprep.subr.bf16.mxu1 %v9942_v43  ;;  %v177_v61 = vld [vmem:[#allocation4 + $0x178] sm:$0xff]  ;;  %v9854_v0 = vpack.c.bf16 %v175_v59, %v171_v58  ;;  %v174_v2 = vld [vmem:[#allocation4 + $0x160] sm:$0xff]  ;;  %v172_v3 = vld [vmem:[#allocation4 + $0x150] sm:$0xff] }
  0x7e   :  { %v9950_v4 = vpack.c.bf16 %v177_v61, %v173_v60  ;;  %v176_v5 = vld [vmem:[#allocation4 + $0x170] sm:$0xff]  ;;  %v179_v6 = vld [vmem:[#allocation4 + $0x188] sm:$0xff]  ;;  %v181_v8 = vld [vmem:[#allocation4 + $0x198] sm:$0xff]  ;;  %v9856_v10 = vpack.c.bf16 %v174_v2, %v170_v1 }
  0x7f   :  { %9849 = vmatpush1.bf16.msra.mxu0 %v9848_v50  ;;  %v183_v7 = vld [vmem:[#allocation4 + $0x1a8] sm:$0xff]  ;;  %v185_v9 = vld [vmem:[#allocation4 + $0x1b8] sm:$0xff]  ;;  %v9952_v11 = vpack.c.bf16 %v176_v5, %v172_v3  ;;  %v178_v13 = vld [vmem:[#allocation4 + $0x180] sm:$0xff] }
  0x80   :  { %9945 = vmatpush1.bf16.msra.mxu1 %v9944_v51  ;;  %9851 = vmatprep.subr.bf16.mxu0 %v9850_v52  ;;  %v9858_v12 = vpack.c.bf16 %v183_v7, %v179_v6  ;;  %v182_v14 = vld [vmem:[#allocation4 + $0x1a0] sm:$0xff]  ;;  %v180_v15 = vld [vmem:[#allocation4 + $0x190] sm:$0xff]  ;;  %v9954_v16 = vpack.c.bf16 %v185_v9, %v181_v8  ;;  %v187_v18 = vld [vmem:[#allocation4 + $0x1c8] sm:$0xff] }
  0x81   :  { %9947 = vmatprep.subr.bf16.mxu1 %v9946_v56  ;;  %v184_v17 = vld [vmem:[#allocation4 + $0x1b0] sm:$0xff]  ;;  %v191_v19 = vld [vmem:[#allocation4 + $0x1e8] sm:$0xff]  ;;  %v189_v20 = vld [vmem:[#allocation4 + $0x1d8] sm:$0xff]  ;;  %v9860_v22 = vpack.c.bf16 %v182_v14, %v178_v13 }
  0x82   :  { %v193_v21 = vld [vmem:[#allocation4 + $0x1f8] sm:$0xff]  ;;  %v9956_v23 = vpack.c.bf16 %v184_v17, %v180_v15  ;;  %v9862_v24 = vpack.c.bf16 %v191_v19, %v187_v18  ;;  %v186_v25 = vld [vmem:[#allocation4 + $0x1c0] sm:$0xff]  ;;  %v188_v27 = vld [vmem:[#allocation4 + $0x1d0] sm:$0xff] }
  0x83   :  { %9853 = vmatpush1.bf16.msra.mxu0 %v9852_v62  ;;  %v190_v26 = vld [vmem:[#allocation4 + $0x1e0] sm:$0xff]  ;;  %v9958_v28 = vpack.c.bf16 %v193_v21, %v189_v20  ;;  %v192_v29 = vld [vmem:[#allocation4 + $0x1f0] sm:$0xff]  ;;  %v195_v30 = vld [vmem:[#allocation4 + $0x208] sm:$0xff] }
  0x84   :  { %9949 = vmatpush1.bf16.msra.mxu1 %v9948_v63  ;;  %9855 = vmatprep.subr.bf16.mxu0 %v9854_v0  ;;  %v199_v31 = vld [vmem:[#allocation4 + $0x228] sm:$0xff]  ;;  %v197_v32 = vld [vmem:[#allocation4 + $0x218] sm:$0xff]  ;;  %v9864_v34 = vpack.c.bf16 %v190_v26, %v186_v25  ;;  %v9960_v35 = vpack.c.bf16 %v192_v29, %v188_v27  ;;  %v194_v37 = vld [vmem:[#allocation4 + $0x200] sm:$0xff] }
  0x85   :  { %9951 = vmatprep.subr.bf16.mxu1 %v9950_v4  ;;  %v201_v33 = vld [vmem:[#allocation4 + $0x238] sm:$0xff]  ;;  %v9866_v36 = vpack.c.bf16 %v199_v31, %v195_v30  ;;  %v198_v38 = vld [vmem:[#allocation4 + $0x220] sm:$0xff]  ;;  %v196_v39 = vld [vmem:[#allocation4 + $0x210] sm:$0xff] }
  0x86   :  { %v9962_v40 = vpack.c.bf16 %v201_v33, %v197_v32  ;;  %v200_v41 = vld [vmem:[#allocation4 + $0x230] sm:$0xff]  ;;  %v203_v42 = vld [vmem:[#allocation4 + $0x248] sm:$0xff]  ;;  %v205_v44 = vld [vmem:[#allocation4 + $0x258] sm:$0xff]  ;;  %v9868_v46 = vpack.c.bf16 %v198_v38, %v194_v37 }
  0x87   :  { %9857 = vmatpush1.bf16.msra.mxu0 %v9856_v10  ;;  %v207_v43 = vld [vmem:[#allocation4 + $0x268] sm:$0xff]  ;;  %v209_v45 = vld [vmem:[#allocation4 + $0x278] sm:$0xff]  ;;  %v9964_v47 = vpack.c.bf16 %v200_v41, %v196_v39  ;;  %v202_v49 = vld [vmem:[#allocation4 + $0x240] sm:$0xff] }
  0x88   :  { %9953 = vmatpush1.bf16.msra.mxu1 %v9952_v11  ;;  %9859 = vmatprep.subr.bf16.mxu0 %v9858_v12  ;;  %v9870_v48 = vpack.c.bf16 %v207_v43, %v203_v42  ;;  %v206_v50 = vld [vmem:[#allocation4 + $0x260] sm:$0xff]  ;;  %v204_v51 = vld [vmem:[#allocation4 + $0x250] sm:$0xff]  ;;  %v9966_v52 = vpack.c.bf16 %v209_v45, %v205_v44  ;;  %v211_v54 = vld [vmem:[#allocation4 + $0x288] sm:$0xff] }
  0x89   :  { %9955 = vmatprep.subr.bf16.mxu1 %v9954_v16  ;;  %v208_v53 = vld [vmem:[#allocation4 + $0x270] sm:$0xff]  ;;  %v215_v55 = vld [vmem:[#allocation4 + $0x2a8] sm:$0xff]  ;;  %v213_v56 = vld [vmem:[#allocation4 + $0x298] sm:$0xff]  ;;  %v9872_v58 = vpack.c.bf16 %v206_v50, %v202_v49 }
  0x8a   :  { %v217_v57 = vld [vmem:[#allocation4 + $0x2b8] sm:$0xff]  ;;  %v9968_v59 = vpack.c.bf16 %v208_v53, %v204_v51  ;;  %v9874_v60 = vpack.c.bf16 %v215_v55, %v211_v54  ;;  %v210_v61 = vld [vmem:[#allocation4 + $0x280] sm:$0xff]  ;;  %v212_v63 = vld [vmem:[#allocation4 + $0x290] sm:$0xff] }
  0x8b   :  { %9861 = vmatpush1.bf16.msra.mxu0 %v9860_v22  ;;  %v214_v62 = vld [vmem:[#allocation4 + $0x2a0] sm:$0xff]  ;;  %v9970_v0 = vpack.c.bf16 %v217_v57, %v213_v56  ;;  %v216_v1 = vld [vmem:[#allocation4 + $0x2b0] sm:$0xff]  ;;  %v219_v2 = vld [vmem:[#allocation4 + $0x2c8] sm:$0xff] }
  0x8c   :  { %9957 = vmatpush1.bf16.msra.mxu1 %v9956_v23  ;;  %9863 = vmatprep.subr.bf16.mxu0 %v9862_v24  ;;  %v223_v3 = vld [vmem:[#allocation4 + $0x2e8] sm:$0xff]  ;;  %v221_v4 = vld [vmem:[#allocation4 + $0x2d8] sm:$0xff]  ;;  %v9876_v6 = vpack.c.bf16 %v214_v62, %v210_v61  ;;  %v218_v7 = vld [vmem:[#allocation4 + $0x2c0] sm:$0xff]  ;;  %v9972_v8 = vpack.c.bf16 %v216_v1, %v212_v63 }
  0x8d   :  { %9959 = vmatprep.subr.bf16.mxu1 %v9958_v28  ;;  %v225_v5 = vld [vmem:[#allocation4 + $0x2f8] sm:$0xff]  ;;  %v9878_v9 = vpack.c.bf16 %v223_v3, %v219_v2  ;;  %v222_v10 = vld [vmem:[#allocation4 + $0x2e0] sm:$0xff]  ;;  %v220_v11 = vld [vmem:[#allocation4 + $0x2d0] sm:$0xff] }
  0x8e   :  { %v224_v12 = vld [vmem:[#allocation4 + $0x2f0] sm:$0xff]  ;;  %v9974_v13 = vpack.c.bf16 %v225_v5, %v221_v4  ;;  %v227_v14 = vld [vmem:[#allocation4 + $0x308] sm:$0xff]  ;;  %v229_v17 = vld [vmem:[#allocation4 + $0x318] sm:$0xff]  ;;  %v9880_v19 = vpack.c.bf16 %v222_v10, %v218_v7 }
  0x8f   :  { %9865 = vmatpush1.bf16.msra.mxu0 %v9864_v34  ;;  %v231_v15 = vld [vmem:[#allocation4 + $0x328] sm:$0xff]  ;;  %v233_v18 = vld [vmem:[#allocation4 + $0x338] sm:$0xff]  ;;  %v9976_v20 = vpack.c.bf16 %v224_v12, %v220_v11  ;;  %v226_v22 = vld [vmem:[#allocation4 + $0x300] sm:$0xff] }
  0x90   :  { %9961 = vmatpush1.bf16.msra.mxu1 %v9960_v35  ;;  %9867 = vmatprep.subr.bf16.mxu0 %v9866_v36  ;;  %v107_v16 = vld [vmem:[%s16545_s0 + $0x8] sm:$0xff]  ;;  %v9882_v21 = vpack.c.bf16 %v231_v15, %v227_v14  ;;  %v230_v23 = vld [vmem:[#allocation4 + $0x320] sm:$0xff]  ;;  %v228_v24 = vld [vmem:[#allocation4 + $0x310] sm:$0xff]  ;;  %v9978_v25 = vpack.c.bf16 %v233_v18, %v229_v17 }
  0x91   :  { %9963 = vmatprep.subr.bf16.mxu1 %v9962_v40  ;;  %408 = vmatprep.mubr.f32.mxu0 %v107_v16  ;;  %v232_v26 = vld [vmem:[#allocation4 + $0x330] sm:$0xff]  ;;  %v235_v27 = vld [vmem:[#allocation4 + $0x348] sm:$0xff]  ;;  %v237_v29 = vld [vmem:[#allocation4 + $0x358] sm:$0xff]  ;;  %v9884_v31 = vpack.c.bf16 %v230_v23, %v226_v22 }
  0x92   :  { %634 = vmatprep.mubr.f32.mxu1 %v107_v16  ;;  %v239_v28 = vld [vmem:[#allocation4 + $0x368] sm:$0xff]  ;;  %v241_v30 = vld [vmem:[#allocation4 + $0x378] sm:$0xff]  ;;  %v9980_v32 = vpack.c.bf16 %v232_v26, %v228_v24  ;;  %v234_v34 = vld [vmem:[#allocation4 + $0x340] sm:$0xff] }
  0x93   :  { %9869 = vmatpush1.bf16.msra.mxu0 %v9868_v46  ;;  %v9886_v33 = vpack.c.bf16 %v239_v28, %v235_v27  ;;  %v238_v35 = vld [vmem:[#allocation4 + $0x360] sm:$0xff]  ;;  %v236_v36 = vld [vmem:[#allocation4 + $0x350] sm:$0xff]  ;;  %v9982_v37 = vpack.c.bf16 %v241_v30, %v237_v29  ;;  %v243_v39 = vld [vmem:[#allocation4 + $0x388] sm:$0xff] }
  0x94   :  { %9965 = vmatpush1.bf16.msra.mxu1 %v9964_v47  ;;  %9871 = vmatprep.subr.bf16.mxu0 %v9870_v48  ;;  %v240_v38 = vld [vmem:[#allocation4 + $0x370] sm:$0xff]  ;;  %v247_v40 = vld [vmem:[#allocation4 + $0x3a8] sm:$0xff]  ;;  %v245_v41 = vld [vmem:[#allocation4 + $0x398] sm:$0xff]  ;;  %v9888_v43 = vpack.c.bf16 %v238_v35, %v234_v34 }
  0x95   :  { %9967 = vmatprep.subr.bf16.mxu1 %v9966_v52  ;;  %v249_v42 = vld [vmem:[#allocation4 + $0x3b8] sm:$0xff]  ;;  %v9984_v44 = vpack.c.bf16 %v240_v38, %v236_v36  ;;  %v9890_v45 = vpack.c.bf16 %v247_v40, %v243_v39  ;;  %v242_v46 = vld [vmem:[#allocation4 + $0x380] sm:$0xff]  ;;  %v244_v48 = vld [vmem:[#allocation4 + $0x390] sm:$0xff] }
  0x96   :  { %v246_v47 = vld [vmem:[#allocation4 + $0x3a0] sm:$0xff]  ;;  %v9986_v49 = vpack.c.bf16 %v249_v42, %v245_v41  ;;  %v248_v50 = vld [vmem:[#allocation4 + $0x3b0] sm:$0xff]  ;;  %v251_v51 = vld [vmem:[#allocation4 + $0x3c8] sm:$0xff] }
  0x97   :  { %9873 = vmatpush1.bf16.msra.mxu0 %v9872_v58  ;;  %v255_v52 = vld [vmem:[#allocation4 + $0x3e8] sm:$0xff]  ;;  %v253_v53 = vld [vmem:[#allocation4 + $0x3d8] sm:$0xff]  ;;  %v9892_v55 = vpack.c.bf16 %v246_v47, %v242_v46  ;;  %v9988_v56 = vpack.c.bf16 %v248_v50, %v244_v48  ;;  %v250_v58 = vld [vmem:[#allocation4 + $0x3c0] sm:$0xff] }
  0x98   :  { %9969 = vmatpush1.bf16.msra.mxu1 %v9968_v59  ;;  %9875 = vmatprep.subr.bf16.mxu0 %v9874_v60  ;;  %v257_v54 = vld [vmem:[#allocation4 + $0x3f8] sm:$0xff]  ;;  %v9894_v57 = vpack.c.bf16 %v255_v52, %v251_v51  ;;  %v254_v59 = vld [vmem:[#allocation4 + $0x3e0] sm:$0xff]  ;;  %v252_v60 = vld [vmem:[#allocation4 + $0x3d0] sm:$0xff] }
  0x99   :  { %9971 = vmatprep.subr.bf16.mxu1 %v9970_v0  ;;  %v9990_v61 = vpack.c.bf16 %v257_v54, %v253_v53  ;;  %v256_v62 = vld [vmem:[#allocation4 + $0x3f0] sm:$0xff]  ;;  %v259_v63 = vld [vmem:[#allocation4 + $0x408] sm:$0xff]  ;;  %v261_v1 = vld [vmem:[#allocation4 + $0x418] sm:$0xff]  ;;  %v9896_v3 = vpack.c.bf16 %v254_v59, %v250_v58 }
  0x9a   :  { %v263_v0 = vld [vmem:[#allocation4 + $0x428] sm:$0xff]  ;;  %v265_v2 = vld [vmem:[#allocation4 + $0x438] sm:$0xff]  ;;  %v9992_v4 = vpack.c.bf16 %v256_v62, %v252_v60  ;;  %v262_v7 = vld [vmem:[#allocation4 + $0x420] sm:$0xff] }
  0x9b   :  { %9877 = vmatpush1.bf16.msra.mxu0 %v9876_v6  ;;  %v9898_v5 = vpack.c.bf16 %v263_v0, %v259_v63  ;;  %v258_v6 = vld [vmem:[#allocation4 + $0x400] sm:$0xff]  ;;  %v264_v10 = vld [vmem:[#allocation4 + $0x430] sm:$0xff]  ;;  %v267_v11 = vld [vmem:[#allocation4 + $0x448] sm:$0xff] }
  0x9c   :  { %9973 = vmatpush1.bf16.msra.mxu1 %v9972_v8  ;;  %9879 = vmatprep.subr.bf16.mxu0 %v9878_v9  ;;  %v9994_v8 = vpack.c.bf16 %v265_v2, %v261_v1  ;;  %v260_v9 = vld [vmem:[#allocation4 + $0x410] sm:$0xff]  ;;  %v271_v12 = vld [vmem:[#allocation4 + $0x468] sm:$0xff]  ;;  %v9900_v14 = vpack.c.bf16 %v262_v7, %v258_v6  ;;  %v269_v15 = vld [vmem:[#allocation4 + $0x458] sm:$0xff] }
  0x9d   :  { %9975 = vmatprep.subr.bf16.mxu1 %v9974_v13  ;;  %v106_v13 = vld [vmem:[%s16545_s0] sm:$0xff]  ;;  %v273_v16 = vld [vmem:[#allocation4 + $0x478] sm:$0xff]  ;;  %v9996_v17 = vpack.c.bf16 %v264_v10, %v260_v9  ;;  %v268_v22 = vld [vmem:[#allocation4 + $0x450] sm:$0xff] }
  0x9e   :  { %v266_v18 = vld [vmem:[#allocation4 + $0x440] sm:$0xff]  ;;  %v272_v23 = vld [vmem:[#allocation4 + $0x470] sm:$0xff]  ;;  %v9998_v24 = vpack.c.bf16 %v273_v16, %v269_v15  ;;  %v279_v26 = vld [vmem:[#allocation4 + $0x4a8] sm:$0xff] }
  0x9f   :  { %9881 = vmatpush1.bf16.msra.mxu0 %v9880_v19  ;;  %v270_v19 = vld [vmem:[#allocation4 + $0x460] sm:$0xff]  ;;  %v109_v27 = vld [vmem:[%s16545_s0 + $0x18] sm:$0xff]  ;;  %v276_v36 = vld [vmem:[#allocation4 + $0x490] sm:$0xff] }
  0xa0   :  { %9977 = vmatpush1.bf16.msra.mxu1 %v9976_v20  ;;  %9883 = vmatprep.subr.bf16.mxu0 %v9882_v21  ;;  %v110_v20 = vld [vmem:[%s16545_s0 + $0x20] sm:$0xff]  ;;  %v9902_v21 = vpack.c.bf16 %v271_v12, %v267_v11  ;;  %v9904_v28 = vpack.c.bf16 %v270_v19, %v266_v18  ;;  %v277_v29 = vld [vmem:[#allocation4 + $0x498] sm:$0xff]  ;;  %v283_v39 = vld [vmem:[#allocation4 + $0x4c8] sm:$0xff] }
  0xa1   :  { %9979 = vmatprep.subr.bf16.mxu1 %v9978_v25  ;;  %v275_v25 = vld [vmem:[#allocation4 + $0x488] sm:$0xff]  ;;  %v281_v30 = vld [vmem:[#allocation4 + $0x4b8] sm:$0xff]  ;;  %v112_v41 = vld [vmem:[%s16545_s0 + $0x30] sm:$0xff] }
  0xa2   :  { %v113_v34 = vld [vmem:[%s16545_s0 + $0x38] sm:$0xff]  ;;  %v9906_v35 = vpack.c.bf16 %v279_v26, %v275_v25  ;;  %v10002_v38 = vpack.c.bf16 %v281_v30, %v277_v29  ;;  %v287_v40 = vld [vmem:[#allocation4 + $0x4e8] sm:$0xff]  ;;  %v282_v46 = vld [vmem:[#allocation4 + $0x4c0] sm:$0xff] }
  0xa3   :  { %9885 = vmatpush1.bf16.msra.mxu0 %v9884_v31  ;;  %v10000_v31 = vpack.c.bf16 %v272_v23, %v268_v22  ;;  %v286_v47 = vld [vmem:[#allocation4 + $0x4e0] sm:$0xff]  ;;  %v116_v48 = vld [vmem:[%s16545_s0 + $0x50] sm:$0xff]  ;;  %v291_v53 = vld [vmem:[#allocation4 + $0x508] sm:$0xff] }
  0xa4   :  { %9981 = vmatpush1.bf16.msra.mxu1 %v9980_v32  ;;  %9887 = vmatprep.subr.bf16.mxu0 %v9886_v33  ;;  %v274_v32 = vld [vmem:[#allocation4 + $0x480] sm:$0xff]  ;;  %v284_v50 = vld [vmem:[#allocation4 + $0x4d0] sm:$0xff]  ;;  %v295_v54 = vld [vmem:[#allocation4 + $0x528] sm:$0xff] }
  0xa5   :  { %9983 = vmatprep.subr.bf16.mxu1 %v9982_v37  ;;  %v278_v33 = vld [vmem:[#allocation4 + $0x4a0] sm:$0xff]  ;;  %v280_v37 = vld [vmem:[#allocation4 + $0x4b0] sm:$0xff]  ;;  %v297_v58 = vld [vmem:[#allocation4 + $0x538] sm:$0xff]  ;;  %v9914_v63 = vpack.c.bf16 %v295_v54, %v291_v53 }
  0xa6   :  { %v9908_v42 = vpack.c.bf16 %v278_v33, %v274_v32  ;;  %v288_v51 = vld [vmem:[#allocation4 + $0x4f0] sm:$0xff]  ;;  %v290_v60 = vld [vmem:[#allocation4 + $0x500] sm:$0xff]  ;;  %v119_v62 = vld [vmem:[%s16545_s0 + $0x68] sm:$0xff] }
  0xa7   :  { %9889 = vmatpush1.bf16.msra.mxu0 %v9888_v43  ;;  %v285_v43 = vld [vmem:[#allocation4 + $0x4d8] sm:$0xff]  ;;  %v10008_v59 = vpack.c.bf16 %v288_v51, %v284_v50  ;;  %v292_v0 = vld [vmem:[#allocation4 + $0x510] sm:$0xff]  ;;  %v298_v10 = vld [vmem:[#allocation4 + $0x540] sm:$0xff] }
  0xa8   :  { %9985 = vmatpush1.bf16.msra.mxu1 %v9984_v44  ;;  %9891 = vmatprep.subr.bf16.mxu0 %v9890_v45  ;;  %v289_v44 = vld [vmem:[#allocation4 + $0x4f8] sm:$0xff]  ;;  %v10004_v45 = vpack.c.bf16 %v280_v37, %v276_v36  ;;  %v296_v1 = vld [vmem:[#allocation4 + $0x530] sm:$0xff]  ;;  %v302_v11 = vld [vmem:[#allocation4 + $0x560] sm:$0xff] }
  0xa9   :  { %9987 = vmatprep.subr.bf16.mxu1 %v9986_v49  ;;  %v9910_v49 = vpack.c.bf16 %v287_v40, %v283_v39  ;;  %v10006_v52 = vpack.c.bf16 %v289_v44, %v285_v43  ;;  %v301_v7 = vld [vmem:[#allocation4 + $0x558] sm:$0xff]  ;;  %v10012_v9 = vpack.c.bf16 %v296_v1, %v292_v0  ;;  %v122_v12 = vld [vmem:[%s16545_s0 + $0x80] sm:$0xff]  ;;  %v304_v15 = vld [vmem:[#allocation4 + $0x570] sm:$0xff]  ;;  %v14025_v0 = vmov 0.0  }
  0xaa   :  { %v311_v18 = vld [vmem:[#allocation4 + $0x5a8] sm:$0xff]  ;;  %v121_v19 = vld [vmem:[%s16545_s0 + $0x78] sm:$0xff]  ;;  %v310_v25 = vld [vmem:[#allocation4 + $0x5a0] sm:$0xff] }
  0xab   :  { %9893 = vmatpush1.bf16.msra.mxu0 %v9892_v55  ;;  %v115_v55 = vld [vmem:[%s16545_s0 + $0x48] sm:$0xff]  ;;  %v313_v22 = vld [vmem:[#allocation4 + $0x5b8] sm:$0xff]  ;;  %v312_v29 = vld [vmem:[#allocation4 + $0x5b0] sm:$0xff] }
  0xac   :  { %9989 = vmatpush1.bf16.msra.mxu1 %v9988_v56  ;;  %9895 = vmatprep.subr.bf16.mxu0 %v9894_v57  ;;  %v9912_v56 = vpack.c.bf16 %v286_v47, %v282_v46  ;;  %v293_v57 = vld [vmem:[#allocation4 + $0x518] sm:$0xff]  ;;  %v319_v32 = vld [vmem:[#allocation4 + $0x5e8] sm:$0xff]  ;;  %v124_v33 = vld [vmem:[%s16545_s0 + $0x90] sm:$0xff] }
  0xad   :  { %9991 = vmatprep.subr.bf16.mxu1 %v9990_v61  ;;  %v294_v61 = vld [vmem:[#allocation4 + $0x520] sm:$0xff]  ;;  %v10010_v2 = vpack.c.bf16 %v297_v58, %v293_v57  ;;  %v125_v26 = vld [vmem:[%s16545_s0 + $0x98] sm:$0xff]  ;;  %v128_v40 = vld [vmem:[%s16545_s0 + $0xb0] sm:$0xff] }
  0xae   :  { %v9916_v6 = vpack.c.bf16 %v294_v61, %v290_v60  ;;  %v321_v36 = vld [vmem:[#allocation4 + $0x5f8] sm:$0xff]  ;;  %v318_v39 = vld [vmem:[#allocation4 + $0x5e0] sm:$0xff]  ;;  %v320_v43 = vld [vmem:[#allocation4 + $0x5f0] sm:$0xff] }
  0xaf   :  { %9897 = vmatpush1.bf16.msra.mxu0 %v9896_v3  ;;  %v299_v3 = vld [vmem:[#allocation4 + $0x548] sm:$0xff]  ;;  %v835_v50 = vld [vmem:[#allocation6 + $0x38] sm:$0xff]  ;;  %v832_v53 = vld [vmem:[#allocation6 + $0x20] sm:$0xff] }
  0xb0   :  { %9993 = vmatpush1.bf16.msra.mxu1 %v9992_v4  ;;  %9899 = vmatprep.subr.bf16.mxu0 %v9898_v5  ;;  %v303_v4 = vld [vmem:[#allocation4 + $0x568] sm:$0xff]  ;;  %v118_v5 = vld [vmem:[%s16545_s0 + $0x60] sm:$0xff]  ;;  %v108_v60 = vld [vmem:[%s16545_s0 + $0x10] sm:$0xff] }
  0xb1   :  { %9995 = vmatprep.subr.bf16.mxu1 %v9994_v8  ;;  %v305_v8 = vld [vmem:[#allocation4 + $0x578] sm:$0xff]  ;;  %v833_v46 = vld [vmem:[#allocation6 + $0x28] sm:$0xff] }
  0xb2   :  { %409 = vmatmul.mubr.f32.vlgmr.msra.gmra.mrb[0].mxu0 %v106_v13  ;;  %v10014_v16 = vpack.c.bf16 %v305_v8, %v301_v7  ;;  %v127_v47 = vld [vmem:[%s16545_s0 + $0xa8] sm:$0xff] }
  0xb3   :  { %635 = vmatmul.mubr.f32.vlgmr.msra.gmra.mrb[0].mxu1 %v106_v13  ;;  %9901 = vmatpush1.bf16.msra.mxu0 %v9900_v14  ;;  %v9918_v13 = vpack.c.bf16 %v303_v4, %v299_v3  ;;  %v300_v14 = vld [vmem:[#allocation4 + $0x550] sm:$0xff]  ;;  %v837_v58 = vld [vmem:[#allocation6 + $0x48] sm:$0xff]  ;;  %v840_v3 = vld [vmem:[#allocation6 + $0x60] sm:$0xff] }
  0xb4   :  { %9997 = vmatpush1.bf16.msra.mxu1 %v9996_v17  ;;  %414 = vmatprep.mubr.f32.mxu0 %v110_v20  ;;  %v307_v17 = vld [vmem:[#allocation4 + $0x588] sm:$0xff]  ;;  %v10016_v23 = vpack.c.bf16 %v304_v15, %v300_v14  ;;  %v844_v15 = vld [vmem:[#allocation6 + $0x80] sm:$0xff] }
  0xb5   :  { %640 = vmatprep.mubr.f32.mxu1 %v110_v20  ;;  %9903 = vmatprep.subr.bf16.mxu0 %v9902_v21  ;;  %v9920_v20 = vpack.c.bf16 %v302_v11, %v298_v10  ;;  %v309_v21 = vld [vmem:[#allocation4 + $0x598] sm:$0xff]  ;;  %v845_v8 = vld [vmem:[#allocation6 + $0x88] sm:$0xff] }
  0xb6   :  { %415 = vmatmul.mubr.f32.gmra.mrb[2].mxu0 %v109_v27  ;;  %9999 = vmatprep.subr.bf16.mxu1 %v9998_v24  ;;  %v306_v24 = vld [vmem:[#allocation4 + $0x580] sm:$0xff]  ;;  %v10018_v30 = vpack.c.bf16 %v313_v22, %v309_v21  ;;  %v111_v10 = vld [vmem:[%s16545_s0 + $0x28] sm:$0xff] }
  0xb7   :  { %641 = vmatmul.mubr.f32.gmra.mrb[2].mxu1 %v109_v27  ;;  %9905 = vmatpush1.bf16.msra.mxu0 %v9904_v28  ;;  %v9922_v27 = vpack.c.bf16 %v311_v18, %v307_v17  ;;  %v308_v28 = vld [vmem:[#allocation4 + $0x590] sm:$0xff]  ;;  %v853_v21 = vld [vmem:[#allocation6 + $0xc8] sm:$0xff] }
  0xb8   :  { %10001 = vmatpush1.bf16.msra.mxu1 %v10000_v31  ;;  %420 = vmatprep.mubr.f32.mxu0 %v113_v34  ;;  %v315_v31 = vld [vmem:[#allocation4 + $0x5c8] sm:$0xff]  ;;  %v10020_v37 = vpack.c.bf16 %v312_v29, %v308_v28  ;;  %v846_v18 = vld [vmem:[#allocation6 + $0x90] sm:$0xff]  ;;  %v852_v28 = vld [vmem:[#allocation6 + $0xc0] sm:$0xff] }
  0xb9   :  { %646 = vmatprep.mubr.f32.mxu1 %v113_v34  ;;  %9907 = vmatprep.subr.bf16.mxu0 %v9906_v35  ;;  %v9924_v34 = vpack.c.bf16 %v310_v25, %v306_v24  ;;  %v317_v35 = vld [vmem:[#allocation4 + $0x5d8] sm:$0xff]  ;;  %v857_v22 = vld [vmem:[#allocation6 + $0xe8] sm:$0xff]  ;;  %v856_v29 = vld [vmem:[#allocation6 + $0xe0] sm:$0xff] }
  0xba   :  { %421 = vmatmul.mubr.f32.gmra.mrb[4].mxu0 %v112_v41  ;;  %10003 = vmatprep.subr.bf16.mxu1 %v10002_v38  ;;  %v314_v38 = vld [vmem:[#allocation4 + $0x5c0] sm:$0xff]  ;;  %v10022_v44 = vpack.c.bf16 %v321_v36, %v317_v35  ;;  %v855_v25 = vld [vmem:[#allocation6 + $0xd8] sm:$0xff]  ;;  %v865_v35 = vld [vmem:[#allocation6 + $0x128] sm:$0xff] }
  0xbb   :  { %647 = vmatmul.mubr.f32.gmra.mrb[4].mxu1 %v112_v41  ;;  %9909 = vmatpush1.bf16.msra.mxu0 %v9908_v42  ;;  %v9926_v41 = vpack.c.bf16 %v319_v32, %v315_v31  ;;  %v316_v42 = vld [vmem:[#allocation4 + $0x5d0] sm:$0xff]  ;;  %v117_v36 = vld [vmem:[%s16545_s0 + $0x58] sm:$0xff] }
  0xbc   :  { %10005 = vmatpush1.bf16.msra.mxu1 %v10004_v45  ;;  %426 = vmatprep.mubr.f32.mxu0 %v116_v48  ;;  %v829_v45 = vld [vmem:[#allocation6 + $0x8] sm:$0xff]  ;;  %v10024_v51 = vpack.c.bf16 %v320_v43, %v316_v42  ;;  %v854_v31 = vld [vmem:[#allocation6 + $0xd0] sm:$0xff]  ;;  %v864_v42 = vld [vmem:[#allocation6 + $0x120] sm:$0xff] }
  0xbd   :  { %652 = vmatprep.mubr.f32.mxu1 %v116_v48  ;;  %9911 = vmatprep.subr.bf16.mxu0 %v9910_v49  ;;  %v9928_v48 = vpack.c.bf16 %v318_v39, %v314_v38  ;;  %v831_v49 = vld [vmem:[#allocation6 + $0x18] sm:$0xff]  ;;  %v14211_v54 = vpack.c.bf16 %v833_v46, %v829_v45  ;;  %v858_v32 = vld [vmem:[#allocation6 + $0xf0] sm:$0xff] }
  0xbe   :  { %427 = vmatmul.mubr.f32.gmra.mrb[6].mxu0 %v115_v55  ;;  %10007 = vmatprep.subr.bf16.mxu1 %v10006_v52  ;;  %v828_v52 = vld [vmem:[#allocation6] sm:$0xff]  ;;  %v14213_v57 = vpack.c.bf16 %v835_v50, %v831_v49  ;;  %v863_v38 = vld [vmem:[#allocation6 + $0x118] sm:$0xff]  ;;  %v866_v45 = vld [vmem:[#allocation6 + $0x130] sm:$0xff] }
  0xbf   :  { %653 = vmatmul.mubr.f32.gmra.mrb[6].mxu1 %v115_v55  ;;  %9913 = vmatpush1.bf16.msra.mxu0 %v9912_v56  ;;  %v830_v55 = vld [vmem:[#allocation6 + $0x10] sm:$0xff]  ;;  %v14218_v61 = vpack.c.bf16 %v832_v53, %v828_v52  ;;  %v867_v39 = vld [vmem:[#allocation6 + $0x138] sm:$0xff] }
  0xc0   :  { %10009 = vmatpush1.bf16.msra.mxu1 %v10008_v59  ;;  %432 = vmatprep.mubr.f32.mxu0 %v119_v62  ;;  %v834_v56 = vld [vmem:[#allocation6 + $0x30] sm:$0xff]  ;;  %v841_v59 = vld [vmem:[#allocation6 + $0x68] sm:$0xff]  ;;  %v14279_v46 = vpack.c.bf16 %v867_v39, %v863_v38  ;;  %v875_v52 = vld [vmem:[#allocation6 + $0x178] sm:$0xff] }
  0xc1   :  { %658 = vmatprep.mubr.f32.mxu1 %v119_v62  ;;  %9915 = vmatprep.subr.bf16.mxu0 %v9914_v63  ;;  %v839_v62 = vld [vmem:[#allocation6 + $0x58] sm:$0xff]  ;;  %v14221_v1 = vpack.c.bf16 %v834_v56, %v830_v55  ;;  %v14225_v4 = vpack.c.bf16 %v841_v59, %v837_v58  ;;  %v120_v49 = vld [vmem:[%s16545_s0 + $0x70] sm:$0xff]  ;;  %v868_v55 = vld [vmem:[#allocation6 + $0x140] sm:$0xff] }
  0xc2   :  { %433 = vmatmul.mubr.f32.gmra.mrb[8].mxu0 %v118_v5  ;;  %10011 = vmatprep.subr.bf16.mxu1 %v10010_v2  ;;  %v843_v63 = vld [vmem:[#allocation6 + $0x78] sm:$0xff]  ;;  %v836_v2 = vld [vmem:[#allocation6 + $0x40] sm:$0xff]  ;;  %v870_v59 = vld [vmem:[#allocation6 + $0x150] sm:$0xff] }
  0xc3   :  { %659 = vmatmul.mubr.f32.gmra.mrb[8].mxu1 %v118_v5  ;;  %9917 = vmatpush1.bf16.msra.mxu0 %v9916_v6  ;;  %v838_v5 = vld [vmem:[#allocation6 + $0x50] sm:$0xff]  ;;  %v14228_v7 = vpack.c.bf16 %v843_v63, %v839_v62  ;;  %v14234_v11 = vpack.c.bf16 %v840_v3, %v836_v2  ;;  %v872_v56 = vld [vmem:[#allocation6 + $0x160] sm:$0xff]  ;;  %v877_v63 = vld [vmem:[#allocation6 + $0x188] sm:$0xff] }
  0xc4   :  { %10013 = vmatpush1.bf16.msra.mxu1 %v10012_v9  ;;  %438 = vmatprep.mubr.f32.mxu0 %v122_v12  ;;  %v842_v6 = vld [vmem:[#allocation6 + $0x70] sm:$0xff]  ;;  %v849_v9 = vld [vmem:[#allocation6 + $0xa8] sm:$0xff]  ;;  %v129_v38 = vld [vmem:[%s16545_s0 + $0xb8] sm:$0xff] }
  0xc5   :  { %664 = vmatprep.mubr.f32.mxu1 %v122_v12  ;;  %9919 = vmatprep.subr.bf16.mxu0 %v9918_v13  ;;  %v847_v12 = vld [vmem:[#allocation6 + $0x98] sm:$0xff]  ;;  %v14238_v14 = vpack.c.bf16 %v842_v6, %v838_v5  ;;  %v14242_v17 = vpack.c.bf16 %v849_v9, %v845_v8  ;;  %v881_v2 = vld [vmem:[#allocation6 + $0x1a8] sm:$0xff]  ;;  %v14302_v5 = vpack.c.bf16 %v872_v56, %v868_v55 }
  0xc6   :  { %439 = vmatmul.mubr.f32.gmra.mrb[10].mxu0 %v121_v19  ;;  %10015 = vmatprep.subr.bf16.mxu1 %v10014_v16  ;;  %v851_v13 = vld [vmem:[#allocation6 + $0xb8] sm:$0xff]  ;;  %v848_v16 = vld [vmem:[#allocation6 + $0xa0] sm:$0xff]  ;;  %v123_v3 = vld [vmem:[%s16545_s0 + $0x88] sm:$0xff] }
  0xc7   :  { %665 = vmatmul.mubr.f32.gmra.mrb[10].mxu1 %v121_v19  ;;  %9921 = vmatpush1.bf16.msra.mxu0 %v9920_v20  ;;  %v850_v19 = vld [vmem:[#allocation6 + $0xb0] sm:$0xff]  ;;  %v14245_v20 = vpack.c.bf16 %v851_v13, %v847_v12  ;;  %v14251_v24 = vpack.c.bf16 %v848_v16, %v844_v15  ;;  %v879_v6 = vld [vmem:[#allocation6 + $0x198] sm:$0xff]  ;;  %v880_v12 = vld [vmem:[#allocation6 + $0x1a0] sm:$0xff]  ;;  %v14310_v13 = vpack.c.bf16 %v881_v2, %v877_v63 }
  0xc8   :  { %10017 = vmatpush1.bf16.msra.mxu1 %v10016_v23  ;;  %444 = vmatprep.mubr.f32.mxu0 %v125_v26  ;;  %v114_v23 = vld [vmem:[%s16545_s0 + $0x40] sm:$0xff]  ;;  %v883_v8 = vld [vmem:[#allocation6 + $0x1b8] sm:$0xff]  ;;  %v878_v15 = vld [vmem:[#allocation6 + $0x190] sm:$0xff] }
  0xc9   :  { %670 = vmatprep.mubr.f32.mxu1 %v125_v26  ;;  %9923 = vmatprep.subr.bf16.mxu0 %v9922_v27  ;;  %v859_v26 = vld [vmem:[#allocation6 + $0xf8] sm:$0xff]  ;;  %v14255_v27 = vpack.c.bf16 %v850_v19, %v846_v18  ;;  %v882_v16 = vld [vmem:[#allocation6 + $0x1b0] sm:$0xff]  ;;  %v14313_v18 = vpack.c.bf16 %v883_v8, %v879_v6  ;;  %v885_v19 = vld [vmem:[#allocation6 + $0x1c8] sm:$0xff] }
  0xca   :  { %445 = vmatmul.mubr.f32.gmra.mrb[12].mxu0 %v124_v33  ;;  %10019 = vmatprep.subr.bf16.mxu1 %v10018_v30  ;;  %v14259_v30 = vpack.c.bf16 %v857_v22, %v853_v21  ;;  %v889_v21 = vld [vmem:[#allocation6 + $0x1e8] sm:$0xff]  ;;  %v126_v22 = vld [vmem:[%s16545_s0 + $0xa0] sm:$0xff] }
  0xcb   :  { %671 = vmatmul.mubr.f32.gmra.mrb[12].mxu1 %v124_v33  ;;  %9925 = vmatpush1.bf16.msra.mxu0 %v9924_v34  ;;  %v14262_v33 = vpack.c.bf16 %v859_v26, %v855_v25  ;;  %v861_v34 = vld [vmem:[#allocation6 + $0x108] sm:$0xff]  ;;  %v887_v25 = vld [vmem:[#allocation6 + $0x1d8] sm:$0xff] }
  0xcc   :  { %10021 = vmatpush1.bf16.msra.mxu1 %v10020_v37  ;;  %450 = vmatprep.mubr.f32.mxu0 %v128_v40  ;;  %v14268_v37 = vpack.c.bf16 %v856_v29, %v852_v28  ;;  %v14276_v43 = vpack.c.bf16 %v865_v35, %v861_v34  ;;  %v891_v26 = vld [vmem:[#allocation6 + $0x1f8] sm:$0xff]  ;;  %v14323_v28 = vpack.c.bf16 %v882_v16, %v878_v15  ;;  %v884_v29 = vld [vmem:[#allocation6 + $0x1c0] sm:$0xff]  ;;  %v886_v34 = vld [vmem:[#allocation6 + $0x1d0] sm:$0xff] }
  0xcd   :  { %676 = vmatprep.mubr.f32.mxu1 %v128_v40  ;;  %9927 = vmatprep.subr.bf16.mxu0 %v9926_v41  ;;  %v14272_v40 = vpack.c.bf16 %v858_v32, %v854_v31  ;;  %v860_v41 = vld [vmem:[#allocation6 + $0x100] sm:$0xff]  ;;  %v14327_v32 = vpack.c.bf16 %v889_v21, %v885_v19  ;;  %v890_v35 = vld [vmem:[#allocation6 + $0x1f0] sm:$0xff] }
  0xce   :  { %451 = vmatmul.mubr.f32.gmra.mrb[14].mxu0 %v127_v47  ;;  %10023 = vmatprep.subr.bf16.mxu1 %v10022_v44  ;;  %v862_v44 = vld [vmem:[#allocation6 + $0x110] sm:$0xff]  ;;  %v14285_v50 = vpack.c.bf16 %v864_v42, %v860_v41  ;;  %v888_v31 = vld [vmem:[#allocation6 + $0x1e0] sm:$0xff]  ;;  %v14340_v41 = vpack.c.bf16 %v890_v35, %v886_v34  ;;  %v324_v42 = vlaneseq }
  0xcf   :  { %677 = vmatmul.mubr.f32.gmra.mrb[14].mxu1 %v127_v47  ;;  %9929 = vmatpush1.bf16.msra.mxu0 %v9928_v48  ;;  %v869_v47 = vld [vmem:[#allocation6 + $0x148] sm:$0xff]  ;;  %v14289_v53 = vpack.c.bf16 %v866_v45, %v862_v44  ;;  %v14336_v39 = vpack.c.bf16 %v888_v31, %v884_v29 }
  0xd0   :  { %10025 = vmatpush1.bf16.msra.mxu1 %v10024_v51  ;;  %521 = vmatprep.mubr.f32.mxu0 %v14025_v0  ;;  %v873_v48 = vld [vmem:[#allocation6 + $0x168] sm:$0xff]  ;;  %v871_v51 = vld [vmem:[#allocation6 + $0x158] sm:$0xff]  ;;  %v325_v44 = vshrl.u32 %v324_v42, 7 }
  0xd1   :  { %747 = vmatprep.mubr.f32.mxu1 %v14025_v0  ;;  %10027 = vmatprep.subr.bf16.mxu0 %v14211_v54  ;;  %v14293_v58 = vpack.c.bf16 %v873_v48, %v869_v47  ;;  %v14296_v62 = vpack.c.bf16 %v875_v52, %v871_v51  ;;  %v322_v47 = vld [vmem:[#allocation9] sm:$0xf] }
  0xd2   :  { %522 = vmatmul.mubr.f32.vlgmr.msra.gmra.mrb[0].mxu0 %v108_v60  ;;  %10059 = vmatprep.subr.bf16.mxu1 %v14213_v57  ;;  %v14387_v45 = vsub.s32 0, %v325_v44  ;;  %v14389_v48 = vsub.s32 1, %v325_v44  ;;  %v14397_v55 = vsub.s32 3, %v325_v44 }
  0xd3   :  { %748 = vmatmul.mubr.f32.vlgmr.msra.gmra.mrb[0].mxu1 %v108_v60  ;;  %10029 = vmatpush1.bf16.msra.mxu0 %v14218_v61  ;;  %v874_v60 = vld [vmem:[#allocation6 + $0x170] sm:$0xff] }
  0xd4   :  { %10061 = vmatpush1.bf16.msra.mxu1 %v14221_v1  ;;  %527 = vmatprep.mubr.f32.mxu0 %v14025_v0  ;;  %v14306_v9 = vpack.c.bf16 %v874_v60, %v870_v59  ;;  %v14395_v51 = vrot.slane %v322_v47, %v14389_v48  ;;  %v14402_v8 = vrot.slane %v322_v47, %v14397_v55 }
  0xd5   :  { %753 = vmatprep.mubr.f32.mxu1 %v14025_v0  ;;  %10031 = vmatprep.subr.bf16.mxu0 %v14225_v4 }
  0xd6   :  { %528 = vmatmul.mubr.f32.gmra.mrb[2].mxu0 %v111_v10  ;;  %10063 = vmatprep.subr.bf16.mxu1 %v14228_v7 }
  0xd7   :  { %754 = vmatmul.mubr.f32.gmra.mrb[2].mxu1 %v111_v10  ;;  %10033 = vmatpush1.bf16.msra.mxu0 %v14234_v11  ;;  %v876_v10 = vld [vmem:[#allocation6 + $0x180] sm:$0xff] }
  0xd8   :  { %10065 = vmatpush1.bf16.msra.mxu1 %v14238_v14  ;;  %533 = vmatprep.mubr.f32.mxu0 %v14025_v0 }
  0xd9   :  { %759 = vmatprep.mubr.f32.mxu1 %v14025_v0  ;;  %10035 = vmatprep.subr.bf16.mxu0 %v14242_v17 }
  0xda   :  { %534 = vmatmul.mubr.f32.gmra.mrb[4].mxu0 %v114_v23  ;;  %10067 = vmatprep.subr.bf16.mxu1 %v14245_v20 }
  0xdb   :  { %760 = vmatmul.mubr.f32.gmra.mrb[4].mxu1 %v114_v23  ;;  %10037 = vmatpush1.bf16.msra.mxu0 %v14251_v24  ;;  %v14319_v23 = vpack.c.bf16 %v880_v12, %v876_v10  ;;  %v14404_v10 = vsub.s32 2, %v325_v44 }
  0xdc   :  { %10069 = vmatpush1.bf16.msra.mxu1 %v14255_v27  ;;  %539 = vmatprep.mubr.f32.mxu0 %v14025_v0 }
  0xdd   :  { %765 = vmatprep.mubr.f32.mxu1 %v14025_v0  ;;  %10039 = vmatprep.subr.bf16.mxu0 %v14259_v30  ;;  %v14408_v15 = vrot.slane %v322_v47, %v14404_v10 }
  0xde   :  { %540 = vmatmul.mubr.f32.gmra.mrb[6].mxu0 %v117_v36  ;;  %10071 = vmatprep.subr.bf16.mxu1 %v14262_v33 }
  0xdf   :  { %766 = vmatmul.mubr.f32.gmra.mrb[6].mxu1 %v117_v36  ;;  %10041 = vmatpush1.bf16.msra.mxu0 %v14268_v37  ;;  %v14330_v36 = vpack.c.bf16 %v891_v26, %v887_v25 }
  0xe0   :  { %10073 = vmatpush1.bf16.msra.mxu1 %v14272_v40  ;;  %545 = vmatprep.mubr.f32.mxu0 %v14025_v0 }
  0xe1   :  { %771 = vmatprep.mubr.f32.mxu1 %v14025_v0  ;;  %10043 = vmatprep.subr.bf16.mxu0 %v14276_v43 }
  0xe2   :  { %546 = vmatmul.mubr.f32.gmra.mrb[8].mxu0 %v120_v49  ;;  %10075 = vmatprep.subr.bf16.mxu1 %v14279_v46 }
  0xe3   :  { %772 = vmatmul.mubr.f32.gmra.mrb[8].mxu1 %v120_v49  ;;  %10045 = vmatpush1.bf16.msra.mxu0 %v14285_v50  ;;  %v14392_v49 = vrot.slane %v322_v47, %v14387_v45 }
  0xe4   :  { %10077 = vmatpush1.bf16.msra.mxu1 %v14289_v53  ;;  %551 = vmatprep.mubr.f32.mxu0 %v14025_v0 }
  0xe5   :  { %777 = vmatprep.mubr.f32.mxu1 %v14025_v0  ;;  %10047 = vmatprep.subr.bf16.mxu0 %v14293_v58 }
  0xe6   :  { %552 = vmatmul.mubr.f32.gmra.mrb[10].mxu0 %v123_v3  ;;  %10079 = vmatprep.subr.bf16.mxu1 %v14296_v62 }
  0xe7   :  { %778 = vmatmul.mubr.f32.gmra.mrb[10].mxu1 %v123_v3  ;;  %10049 = vmatpush1.bf16.msra.mxu0 %v14302_v5 }
  0xe8   :  { %10081 = vmatpush1.bf16.msra.mxu1 %v14306_v9  ;;  %557 = vmatprep.mubr.f32.mxu0 %v14025_v0 }
  0xe9   :  { %783 = vmatprep.mubr.f32.mxu1 %v14025_v0  ;;  %10051 = vmatprep.subr.bf16.mxu0 %v14310_v13 }
  0xea   :  { %558 = vmatmul.mubr.f32.gmra.mrb[12].mxu0 %v126_v22  ;;  %10083 = vmatprep.subr.bf16.mxu1 %v14313_v18 }
  0xeb   :  { %784 = vmatmul.mubr.f32.gmra.mrb[12].mxu1 %v126_v22  ;;  %10053 = vmatpush1.bf16.msra.mxu0 %v14319_v23 }
  0xec   :  { %10085 = vmatpush1.bf16.msra.mxu1 %v14323_v28  ;;  %563 = vmatprep.mubr.f32.mxu0 %v14025_v0 }
  0xed   :  { %789 = vmatprep.mubr.f32.mxu1 %v14025_v0  ;;  %10055 = vmatprep.subr.bf16.mxu0 %v14327_v32 }
  0xee   :  { %564 = vmatmul.mubr.f32.gmra.mrb[14].mxu0 %v129_v38  ;;  %10087 = vmatprep.subr.bf16.mxu1 %v14330_v36 }
  0xef   :  { %790 = vmatmul.mubr.f32.gmra.mrb[14].mxu1 %v129_v38  ;;  %10057 = vmatpush1.bf16.msra.mxu0 %v14336_v39 }
  0xf0   :  { %10089 = vmatpush1.bf16.msra.mxu1 %v14340_v41  ;;  %960 = vmatprep.mubr.f32.mxu0 %v14025_v0 }
  0xf1   :  { %1031 = vmatprep.mubr.f32.mxu1 %v14025_v0  ;;  %10091 = vmatprep.subr.bf16.mxu0 %v14211_v54 }
  0xf2   :  { %961 = vmatmul.mubr.f32.vlgmr.msra.gmra.mrb[0].mxu0 %v14025_v0  ;;  %10123 = vmatprep.subr.bf16.mxu1 %v14213_v57 }
  0xf3   :  { %1032 = vmatmul.mubr.f32.vlgmr.msra.gmra.mrb[0].mxu1 %v14025_v0  ;;  %10093 = vmatpush1.bf16.msra.mxu0 %v14218_v61 }
  0xf4   :  { %10125 = vmatpush1.bf16.msra.mxu1 %v14221_v1  ;;  %10095 = vmatprep.subr.bf16.mxu0 %v14225_v4 }
  0xf5   :  { %10127 = vmatprep.subr.bf16.mxu1 %v14228_v7  ;;  %1135 = vmatprep.mubr.f32.mxu0 %v14025_v0 }
  0xf6   :  { %1206 = vmatprep.mubr.f32.mxu1 %v14025_v0 }
  0xf7   :  { %10097 = vmatpush1.bf16.msra.mxu0 %v14234_v11 }
  0xf8   :  { %10129 = vmatpush1.bf16.msra.mxu1 %v14238_v14  ;;  %10099 = vmatprep.subr.bf16.mxu0 %v14242_v17 }
  0xf9   :  { %10131 = vmatprep.subr.bf16.mxu1 %v14245_v20 }
  0xfb   :  { %10101 = vmatpush1.bf16.msra.mxu0 %v14251_v24 }
  0xfc   :  { %10133 = vmatpush1.bf16.msra.mxu1 %v14255_v27  ;;  %10103 = vmatprep.subr.bf16.mxu0 %v14259_v30 }
  0xfd   :  { %10135 = vmatprep.subr.bf16.mxu1 %v14262_v33 }
  0xff   :  { %10105 = vmatpush1.bf16.msra.mxu0 %v14268_v37 }
 0x100   :  { %10137 = vmatpush1.bf16.msra.mxu1 %v14272_v40  ;;  %10107 = vmatprep.subr.bf16.mxu0 %v14276_v43 }
 0x101   :  { %10139 = vmatprep.subr.bf16.mxu1 %v14279_v46 }
 0x103   :  { %10109 = vmatpush1.bf16.msra.mxu0 %v14285_v50 }
 0x104   :  { %10141 = vmatpush1.bf16.msra.mxu1 %v14289_v53  ;;  %10111 = vmatprep.subr.bf16.mxu0 %v14293_v58 }
 0x105   :  { %10143 = vmatprep.subr.bf16.mxu1 %v14296_v62 }
 0x107   :  { %10113 = vmatpush1.bf16.msra.mxu0 %v14302_v5 }
 0x108   :  { %10145 = vmatpush1.bf16.msra.mxu1 %v14306_v9  ;;  %10115 = vmatprep.subr.bf16.mxu0 %v14310_v13 }
 0x109   :  { %10147 = vmatprep.subr.bf16.mxu1 %v14313_v18 }
 0x10b   :  { %10117 = vmatpush1.bf16.msra.mxu0 %v14319_v23 }
 0x10c   :  { %10149 = vmatpush1.bf16.msra.mxu1 %v14323_v28  ;;  %10119 = vmatprep.subr.bf16.mxu0 %v14327_v32 }
 0x10d   :  { %10151 = vmatprep.subr.bf16.mxu1 %v14330_v36 }
 0x10f   :  { %10121 = vmatpush1.bf16.msra.mxu0 %v14336_v39 }
 0x110   :  { %10153 = vmatpush1.bf16.msra.mxu1 %v14340_v41  ;;  %10155 = vmatprep.subr.bf16.mxu0 %v14211_v54 }
 0x111   :  { %10187 = vmatprep.subr.bf16.mxu1 %v14213_v57 }
 0x1c5   :  { %v962_v52 = vpop.f32.mrb[0].mxu0 }
 0x1c6   :  { %v12866_v56 = vadd.f32 %v962_v52, %v14392_v49  ;;  %v1033_v59 = vpop.f32.mrb[0].mxu1  ;;  %v964_v60 = vpop.f32.mrb[1].mxu0 }
 0x1c7   :  { %v12867_v63 = vadd.f32 %v964_v60, %v14395_v51  ;;  %v1035_v2 = vpop.f32.mrb[1].mxu1  ;;  %v12882_v19 = vadd.f32 %v1033_v59, %v14408_v15 }
 0x1c8   :  { %v9661_v3 = vmul.f32 -1.442695, %v12866_v56  ;;  %v12883_v12 = vadd.f32 %v1035_v2, %v14402_v8 }
 0x1c9   :  { %v9662_v6 = vmul.f32 -1.442695, %v12867_v63 }
 0x1ca   :  { %13233 = vpow2.f32 %v9661_v3  ;;  %v9663_v16 = vmul.f32 -1.442695, %v12883_v12 }
 0x1cb   :  { %13235 = vpow2.f32 %v9662_v6 }
 0x1cc   :  { %13237 = vpow2.f32 %v9663_v16 }
 0x1cd   :  { %13239 = vtanh.f32 %v12882_v19 }
 0x1d4   :  { %v13234_v21 = vpop.eup %13233 }
 0x1d5   :  { %v13236_v22 = vpop.eup %13235  ;;  %v1045_v25 = vadd.f32 1.0, %v13234_v21 }
 0x1d6   :  { %v1051_v26 = vadd.f32 1.0, %v13236_v22  ;;  %v13238_v29 = vpop.eup %13237 }
 0x1d7   :  { %13241 = vrcp.f32 %v1045_v25  ;;  %v13240_v31 = vpop.eup %13239  ;;  %v1058_v42 = vadd.f32 1.0, %v13238_v29 }
 0x1d8   :  { %13243 = vrcp.f32 %v1051_v26 }
 0x1d9   :  { %13245 = vrcp.f32 %v1058_v42 }
 0x1e1   :  { %v13242_v34 = vpop.eup %13241 }
 0x1e2   :  { %v13244_v35 = vpop.eup %13243  ;;  %v1062_v38 = vmul.f32 %v13242_v34, %v13240_v31 }
 0x1e3   :  { %v1061_v44 = vmul.f32 0.0, %v13244_v35  ;;  %v13246_v52 = vpop.eup %13245 }
 0x1e5   :  { %v14411_v47 = vadd.f32 %v1062_v38, %v1061_v44 }
 0x1e7   :  { %13247 = vtanh.f32 %v14411_v47 }
 0x1f1   :  { %v13248_v56 = vpop.eup %13247 }
 0x1f2   :  { %v14414_v59 = vmul.f32 %v13248_v56, %v13246_v52 }
 0x1f4   :  { %1136 = vmatmul.mubr.f32.vlgmr.msra.gmra.mrb[2].mxu0 %v14414_v59  ;;  %1207 = vmatmul.mubr.f32.vlgmr.msra.gmra.mrb[2].mxu1 %v14414_v59 }
 0x1f5   :  { %10157 = vmatpush1.bf16.msra.mxu0 %v14218_v61  ;;  %10189 = vmatpush1.bf16.msra.mxu1 %v14221_v1 }
 0x1f6   :  { %10159 = vmatprep.subr.bf16.mxu0 %v14225_v4  ;;  %10191 = vmatprep.subr.bf16.mxu1 %v14228_v7 }
 0x1f7   :  { %1310 = vmatprep.mubr.f32.mxu0 %v14025_v0  ;;  %1381 = vmatprep.mubr.f32.mxu1 %v14025_v0 }
 0x1f9   :  { %10161 = vmatpush1.bf16.msra.mxu0 %v14234_v11  ;;  %10193 = vmatpush1.bf16.msra.mxu1 %v14238_v14 }
 0x1fa   :  { %10163 = vmatprep.subr.bf16.mxu0 %v14242_v17  ;;  %10195 = vmatprep.subr.bf16.mxu1 %v14245_v20 }
 0x1fd   :  { %10165 = vmatpush1.bf16.msra.mxu0 %v14251_v24  ;;  %10197 = vmatpush1.bf16.msra.mxu1 %v14255_v27 }
 0x1fe   :  { %10167 = vmatprep.subr.bf16.mxu0 %v14259_v30  ;;  %10199 = vmatprep.subr.bf16.mxu1 %v14262_v33 }
 0x201   :  { %10169 = vmatpush1.bf16.msra.mxu0 %v14268_v37  ;;  %10201 = vmatpush1.bf16.msra.mxu1 %v14272_v40 }
 0x202   :  { %10171 = vmatprep.subr.bf16.mxu0 %v14276_v43  ;;  %10203 = vmatprep.subr.bf16.mxu1 %v14279_v46 }
 0x205   :  { %10173 = vmatpush1.bf16.msra.mxu0 %v14285_v50  ;;  %10205 = vmatpush1.bf16.msra.mxu1 %v14289_v53 }
 0x206   :  { %10175 = vmatprep.subr.bf16.mxu0 %v14293_v58  ;;  %10207 = vmatprep.subr.bf16.mxu1 %v14296_v62 }
 0x209   :  { %10177 = vmatpush1.bf16.msra.mxu0 %v14302_v5  ;;  %10209 = vmatpush1.bf16.msra.mxu1 %v14306_v9 }
 0x20a   :  { %10179 = vmatprep.subr.bf16.mxu0 %v14310_v13  ;;  %10211 = vmatprep.subr.bf16.mxu1 %v14313_v18 }
 0x20d   :  { %10181 = vmatpush1.bf16.msra.mxu0 %v14319_v23  ;;  %10213 = vmatpush1.bf16.msra.mxu1 %v14323_v28 }
 0x20e   :  { %10183 = vmatprep.subr.bf16.mxu0 %v14327_v32  ;;  %10215 = vmatprep.subr.bf16.mxu1 %v14330_v36 }
 0x211   :  { %10185 = vmatpush1.bf16.msra.mxu0 %v14336_v39  ;;  %10217 = vmatpush1.bf16.msra.mxu1 %v14340_v41 }
 0x212   :  { %10219 = vmatprep.subr.bf16.mxu0 %v14211_v54  ;;  %10251 = vmatprep.subr.bf16.mxu1 %v14213_v57 }
 0x2c7   :  { %v1137_v60 = vpop.f32.mrb[2].mxu0  ;;  %v1208_v63 = vpop.f32.mrb[2].mxu1 }
 0x2c8   :  { %v12868_v2 = vadd.f32 %v1137_v60, %v14392_v49  ;;  %v1139_v3 = vpop.f32.mrb[3].mxu0  ;;  %v1210_v6 = vpop.f32.mrb[3].mxu1  ;;  %v12884_v25 = vadd.f32 %v1208_v63, %v14408_v15 }
 0x2c9   :  { %v12869_v12 = vadd.f32 %v1139_v3, %v14395_v51  ;;  %v12885_v21 = vadd.f32 %v1210_v6, %v14402_v8 }
 0x2ca   :  { %v9664_v16 = vmul.f32 -1.442695, %v12868_v2 }
 0x2cb   :  { %v9665_v19 = vmul.f32 -1.442695, %v12869_v12  ;;  %v9666_v22 = vmul.f32 -1.442695, %v12885_v21 }
 0x2cc   :  { %13249 = vpow2.f32 %v9664_v16 }
 0x2cd   :  { %13251 = vpow2.f32 %v9665_v19 }
 0x2ce   :  { %13253 = vpow2.f32 %v9666_v22 }
 0x2cf   :  { %13255 = vtanh.f32 %v12884_v25 }
 0x2d6   :  { %v13250_v26 = vpop.eup %13249 }
 0x2d7   :  { %v13252_v29 = vpop.eup %13251  ;;  %v1220_v31 = vadd.f32 1.0, %v13250_v26 }
 0x2d8   :  { %v1226_v34 = vadd.f32 1.0, %v13252_v29  ;;  %v13254_v35 = vpop.eup %13253 }
 0x2d9   :  { %13257 = vrcp.f32 %v1220_v31  ;;  %v13256_v38 = vpop.eup %13255  ;;  %v1233_v56 = vadd.f32 1.0, %v13254_v35 }
 0x2da   :  { %13259 = vrcp.f32 %v1226_v34 }
 0x2db   :  { %13261 = vrcp.f32 %v1233_v56 }
 0x2e3   :  { %v13258_v42 = vpop.eup %13257 }
 0x2e4   :  { %v13260_v44 = vpop.eup %13259  ;;  %v1237_v52 = vmul.f32 %v13258_v42, %v13256_v38 }
 0x2e5   :  { %v1236_v60 = vmul.f32 %v13260_v44, %v14411_v47  ;;  %v13262_v63 = vpop.eup %13261 }
 0x2e7   :  { %v14457_v2 = vadd.f32 %v1237_v52, %v1236_v60 }
 0x2e9   :  { %13263 = vtanh.f32 %v14457_v2 }
 0x2f3   :  { %v13264_v3 = vpop.eup %13263 }
 0x2f4   :  { %v14460_v6 = vmul.f32 %v13264_v3, %v13262_v63 }
 0x2f6   :  { %1311 = vmatmul.mubr.f32.vlgmr.msra.gmra.mrb[4].mxu0 %v14460_v6  ;;  %1382 = vmatmul.mubr.f32.vlgmr.msra.gmra.mrb[4].mxu1 %v14460_v6 }
 0x2f7   :  { %10221 = vmatpush1.bf16.msra.mxu0 %v14218_v61  ;;  %10253 = vmatpush1.bf16.msra.mxu1 %v14221_v1 }
 0x2f8   :  { %10223 = vmatprep.subr.bf16.mxu0 %v14225_v4  ;;  %10255 = vmatprep.subr.bf16.mxu1 %v14228_v7 }
 0x2f9   :  { %1485 = vmatprep.mubr.f32.mxu0 %v14025_v0  ;;  %1556 = vmatprep.mubr.f32.mxu1 %v14025_v0 }
 0x2fb   :  { %10225 = vmatpush1.bf16.msra.mxu0 %v14234_v11  ;;  %10257 = vmatpush1.bf16.msra.mxu1 %v14238_v14 }
 0x2fc   :  { %10227 = vmatprep.subr.bf16.mxu0 %v14242_v17  ;;  %10259 = vmatprep.subr.bf16.mxu1 %v14245_v20 }
 0x2ff   :  { %10229 = vmatpush1.bf16.msra.mxu0 %v14251_v24  ;;  %10261 = vmatpush1.bf16.msra.mxu1 %v14255_v27 }
 0x300   :  { %10231 = vmatprep.subr.bf16.mxu0 %v14259_v30  ;;  %10263 = vmatprep.subr.bf16.mxu1 %v14262_v33 }
 0x303   :  { %10233 = vmatpush1.bf16.msra.mxu0 %v14268_v37  ;;  %10265 = vmatpush1.bf16.msra.mxu1 %v14272_v40 }
 0x304   :  { %10235 = vmatprep.subr.bf16.mxu0 %v14276_v43  ;;  %10267 = vmatprep.subr.bf16.mxu1 %v14279_v46 }
 0x307   :  { %10237 = vmatpush1.bf16.msra.mxu0 %v14285_v50  ;;  %10269 = vmatpush1.bf16.msra.mxu1 %v14289_v53 }
 0x308   :  { %10239 = vmatprep.subr.bf16.mxu0 %v14293_v58  ;;  %10271 = vmatprep.subr.bf16.mxu1 %v14296_v62 }
 0x30b   :  { %10241 = vmatpush1.bf16.msra.mxu0 %v14302_v5  ;;  %10273 = vmatpush1.bf16.msra.mxu1 %v14306_v9 }
 0x30c   :  { %10243 = vmatprep.subr.bf16.mxu0 %v14310_v13  ;;  %10275 = vmatprep.subr.bf16.mxu1 %v14313_v18 }
 0x30f   :  { %10245 = vmatpush1.bf16.msra.mxu0 %v14319_v23  ;;  %10277 = vmatpush1.bf16.msra.mxu1 %v14323_v28 }
 0x310   :  { %10247 = vmatprep.subr.bf16.mxu0 %v14327_v32  ;;  %10279 = vmatprep.subr.bf16.mxu1 %v14330_v36 }
 0x313   :  { %10249 = vmatpush1.bf16.msra.mxu0 %v14336_v39  ;;  %10281 = vmatpush1.bf16.msra.mxu1 %v14340_v41 }
 0x314   :  { %10283 = vmatprep.subr.bf16.mxu0 %v14211_v54  ;;  %10315 = vmatprep.subr.bf16.mxu1 %v14213_v57 }
 0x3c9   :  { %v1312_v47 = vpop.f32.mrb[4].mxu0  ;;  %v1383_v12 = vpop.f32.mrb[4].mxu1 }
 0x3ca   :  { %v12870_v16 = vadd.f32 %v1312_v47, %v14392_v49  ;;  %v1314_v19 = vpop.f32.mrb[5].mxu0  ;;  %v1385_v21 = vpop.f32.mrb[5].mxu1  ;;  %v12886_v34 = vadd.f32 %v1383_v12, %v14408_v15 }
 0x3cb   :  { %v12871_v22 = vadd.f32 %v1314_v19, %v14395_v51  ;;  %v12887_v29 = vadd.f32 %v1385_v21, %v14402_v8 }
 0x3cc   :  { %v9667_v25 = vmul.f32 -1.442695, %v12870_v16 }
 0x3cd   :  { %v9668_v26 = vmul.f32 -1.442695, %v12871_v22  ;;  %v9669_v31 = vmul.f32 -1.442695, %v12887_v29 }
 0x3ce   :  { %13265 = vpow2.f32 %v9667_v25 }
 0x3cf   :  { %13267 = vpow2.f32 %v9668_v26 }
 0x3d0   :  { %13269 = vpow2.f32 %v9669_v31 }
 0x3d1   :  { %13271 = vtanh.f32 %v12886_v34 }
 0x3d8   :  { %v13266_v35 = vpop.eup %13265 }
 0x3d9   :  { %v13268_v38 = vpop.eup %13267  ;;  %v1395_v42 = vadd.f32 1.0, %v13266_v35 }
 0x3da   :  { %v1401_v44 = vadd.f32 1.0, %v13268_v38  ;;  %v13270_v52 = vpop.eup %13269 }
 0x3db   :  { %13273 = vrcp.f32 %v1395_v42  ;;  %v13272_v56 = vpop.eup %13271  ;;  %v1408_v47 = vadd.f32 1.0, %v13270_v52 }
 0x3dc   :  { %13275 = vrcp.f32 %v1401_v44 }
 0x3dd   :  { %13277 = vrcp.f32 %v1408_v47 }
 0x3e5   :  { %v13274_v60 = vpop.eup %13273 }
 0x3e6   :  { %v13276_v63 = vpop.eup %13275  ;;  %v1412_v3 = vmul.f32 %v13274_v60, %v13272_v56 }
 0x3e7   :  { %v1411_v16 = vmul.f32 %v13276_v63, %v14457_v2  ;;  %v13278_v12 = vpop.eup %13277 }
 0x3e9   :  { %v14503_v19 = vadd.f32 %v1412_v3, %v1411_v16 }
 0x3eb   :  { %13279 = vtanh.f32 %v14503_v19 }
 0x3f5   :  { %v13280_v21 = vpop.eup %13279 }
 0x3f6   :  { %v14506_v22 = vmul.f32 %v13280_v21, %v13278_v12 }
 0x3f8   :  { %1486 = vmatmul.mubr.f32.vlgmr.msra.gmra.mrb[6].mxu0 %v14506_v22  ;;  %1557 = vmatmul.mubr.f32.vlgmr.msra.gmra.mrb[6].mxu1 %v14506_v22 }
 0x3f9   :  { %10285 = vmatpush1.bf16.msra.mxu0 %v14218_v61  ;;  %10317 = vmatpush1.bf16.msra.mxu1 %v14221_v1 }
 0x3fa   :  { %10287 = vmatprep.subr.bf16.mxu0 %v14225_v4  ;;  %10319 = vmatprep.subr.bf16.mxu1 %v14228_v7 }
 0x3fb   :  { %1660 = vmatprep.mubr.f32.mxu0 %v14025_v0  ;;  %1731 = vmatprep.mubr.f32.mxu1 %v14025_v0 }
 0x3fd   :  { %10289 = vmatpush1.bf16.msra.mxu0 %v14234_v11  ;;  %10321 = vmatpush1.bf16.msra.mxu1 %v14238_v14 }
 0x3fe   :  { %10291 = vmatprep.subr.bf16.mxu0 %v14242_v17  ;;  %10323 = vmatprep.subr.bf16.mxu1 %v14245_v20 }
 0x401   :  { %10293 = vmatpush1.bf16.msra.mxu0 %v14251_v24  ;;  %10325 = vmatpush1.bf16.msra.mxu1 %v14255_v27 }
 0x402   :  { %10295 = vmatprep.subr.bf16.mxu0 %v14259_v30  ;;  %10327 = vmatprep.subr.bf16.mxu1 %v14262_v33 }
 0x405   :  { %10297 = vmatpush1.bf16.msra.mxu0 %v14268_v37  ;;  %10329 = vmatpush1.bf16.msra.mxu1 %v14272_v40 }
 0x406   :  { %10299 = vmatprep.subr.bf16.mxu0 %v14276_v43  ;;  %10331 = vmatprep.subr.bf16.mxu1 %v14279_v46 }
 0x409   :  { %10301 = vmatpush1.bf16.msra.mxu0 %v14285_v50  ;;  %10333 = vmatpush1.bf16.msra.mxu1 %v14289_v53 }
 0x40a   :  { %10303 = vmatprep.subr.bf16.mxu0 %v14293_v58  ;;  %10335 = vmatprep.subr.bf16.mxu1 %v14296_v62 }
 0x40d   :  { %10305 = vmatpush1.bf16.msra.mxu0 %v14302_v5  ;;  %10337 = vmatpush1.bf16.msra.mxu1 %v14306_v9 }
 0x40e   :  { %10307 = vmatprep.subr.bf16.mxu0 %v14310_v13  ;;  %10339 = vmatprep.subr.bf16.mxu1 %v14313_v18 }
 0x411   :  { %10309 = vmatpush1.bf16.msra.mxu0 %v14319_v23  ;;  %10341 = vmatpush1.bf16.msra.mxu1 %v14323_v28 }
 0x412   :  { %10311 = vmatprep.subr.bf16.mxu0 %v14327_v32  ;;  %10343 = vmatprep.subr.bf16.mxu1 %v14330_v36 }
 0x415   :  { %10313 = vmatpush1.bf16.msra.mxu0 %v14336_v39  ;;  %10345 = vmatpush1.bf16.msra.mxu1 %v14340_v41 }
 0x416   :  { %10347 = vmatprep.subr.bf16.mxu0 %v14211_v54  ;;  %10379 = vmatprep.subr.bf16.mxu1 %v14213_v57 }
 0x4cb   :  { %v1487_v2 = vpop.f32.mrb[6].mxu0  ;;  %v1558_v25 = vpop.f32.mrb[6].mxu1 }
 0x4cc   :  { %v12872_v26 = vadd.f32 %v1487_v2, %v14392_v49  ;;  %v1489_v29 = vpop.f32.mrb[7].mxu0  ;;  %v1560_v31 = vpop.f32.mrb[7].mxu1  ;;  %v12888_v52 = vadd.f32 %v1558_v25, %v14408_v15 }
 0x4cd   :  { %v12873_v34 = vadd.f32 %v1489_v29, %v14395_v51  ;;  %v12889_v42 = vadd.f32 %v1560_v31, %v14402_v8 }
 0x4ce   :  { %v9670_v35 = vmul.f32 -1.442695, %v12872_v26 }
 0x4cf   :  { %v9671_v38 = vmul.f32 -1.442695, %v12873_v34  ;;  %v9672_v44 = vmul.f32 -1.442695, %v12889_v42 }
 0x4d0   :  { %13281 = vpow2.f32 %v9670_v35 }
 0x4d1   :  { %13283 = vpow2.f32 %v9671_v38 }
 0x4d2   :  { %13285 = vpow2.f32 %v9672_v44 }
 0x4d3   :  { %13287 = vtanh.f32 %v12888_v52 }
 0x4da   :  { %v13282_v56 = vpop.eup %13281 }
 0x4db   :  { %v13284_v60 = vpop.eup %13283  ;;  %v1570_v63 = vadd.f32 1.0, %v13282_v56 }
 0x4dc   :  { %v1576_v3 = vadd.f32 1.0, %v13284_v60  ;;  %v13286_v47 = vpop.eup %13285 }
 0x4dd   :  { %13289 = vrcp.f32 %v1570_v63  ;;  %v13288_v16 = vpop.eup %13287  ;;  %v1583_v26 = vadd.f32 1.0, %v13286_v47 }
 0x4de   :  { %13291 = vrcp.f32 %v1576_v3 }
 0x4df   :  { %13293 = vrcp.f32 %v1583_v26 }
 0x4e7   :  { %v13290_v12 = vpop.eup %13289 }
 0x4e8   :  { %v13292_v21 = vpop.eup %13291  ;;  %v1587_v2 = vmul.f32 %v13290_v12, %v13288_v16 }
 0x4e9   :  { %v1586_v29 = vmul.f32 %v13292_v21, %v14503_v19  ;;  %v13294_v25 = vpop.eup %13293 }
 0x4eb   :  { %v14549_v31 = vadd.f32 %v1587_v2, %v1586_v29 }
 0x4ed   :  { %13295 = vtanh.f32 %v14549_v31 }
 0x4f7   :  { %v13296_v34 = vpop.eup %13295 }
 0x4f8   :  { %v14552_v35 = vmul.f32 %v13296_v34, %v13294_v25 }
 0x4fa   :  { %1661 = vmatmul.mubr.f32.vlgmr.msra.gmra.mrb[8].mxu0 %v14552_v35  ;;  %1732 = vmatmul.mubr.f32.vlgmr.msra.gmra.mrb[8].mxu1 %v14552_v35 }
 0x4fb   :  { %10349 = vmatpush1.bf16.msra.mxu0 %v14218_v61  ;;  %10381 = vmatpush1.bf16.msra.mxu1 %v14221_v1 }
 0x4fc   :  { %10351 = vmatprep.subr.bf16.mxu0 %v14225_v4  ;;  %10383 = vmatprep.subr.bf16.mxu1 %v14228_v7 }
 0x4fd   :  { %1835 = vmatprep.mubr.f32.mxu0 %v14025_v0  ;;  %1906 = vmatprep.mubr.f32.mxu1 %v14025_v0 }
 0x4ff   :  { %10353 = vmatpush1.bf16.msra.mxu0 %v14234_v11  ;;  %10385 = vmatpush1.bf16.msra.mxu1 %v14238_v14 }
 0x500   :  { %10355 = vmatprep.subr.bf16.mxu0 %v14242_v17  ;;  %10387 = vmatprep.subr.bf16.mxu1 %v14245_v20 }
 0x503   :  { %10357 = vmatpush1.bf16.msra.mxu0 %v14251_v24  ;;  %10389 = vmatpush1.bf16.msra.mxu1 %v14255_v27 }
 0x504   :  { %10359 = vmatprep.subr.bf16.mxu0 %v14259_v30  ;;  %10391 = vmatprep.subr.bf16.mxu1 %v14262_v33 }
 0x507   :  { %10361 = vmatpush1.bf16.msra.mxu0 %v14268_v37  ;;  %10393 = vmatpush1.bf16.msra.mxu1 %v14272_v40 }
 0x508   :  { %10363 = vmatprep.subr.bf16.mxu0 %v14276_v43  ;;  %10395 = vmatprep.subr.bf16.mxu1 %v14279_v46 }
 0x50b   :  { %10365 = vmatpush1.bf16.msra.mxu0 %v14285_v50  ;;  %10397 = vmatpush1.bf16.msra.mxu1 %v14289_v53 }
 0x50c   :  { %10367 = vmatprep.subr.bf16.mxu0 %v14293_v58  ;;  %10399 = vmatprep.subr.bf16.mxu1 %v14296_v62 }
 0x50f   :  { %10369 = vmatpush1.bf16.msra.mxu0 %v14302_v5  ;;  %10401 = vmatpush1.bf16.msra.mxu1 %v14306_v9 }
 0x510   :  { %10371 = vmatprep.subr.bf16.mxu0 %v14310_v13  ;;  %10403 = vmatprep.subr.bf16.mxu1 %v14313_v18 }
 0x513   :  { %10373 = vmatpush1.bf16.msra.mxu0 %v14319_v23  ;;  %10405 = vmatpush1.bf16.msra.mxu1 %v14323_v28 }
 0x514   :  { %10375 = vmatprep.subr.bf16.mxu0 %v14327_v32  ;;  %10407 = vmatprep.subr.bf16.mxu1 %v14330_v36 }
 0x517   :  { %10377 = vmatpush1.bf16.msra.mxu0 %v14336_v39  ;;  %10409 = vmatpush1.bf16.msra.mxu1 %v14340_v41 }
 0x518   :  { %10411 = vmatprep.subr.bf16.mxu0 %v14211_v54  ;;  %10443 = vmatprep.subr.bf16.mxu1 %v14213_v57 }
 0x5cd   :  { %v1662_v19 = vpop.f32.mrb[8].mxu0  ;;  %v1733_v38 = vpop.f32.mrb[8].mxu1 }
 0x5ce   :  { %v12874_v42 = vadd.f32 %v1662_v19, %v14392_v49  ;;  %v1664_v44 = vpop.f32.mrb[9].mxu0  ;;  %v1735_v52 = vpop.f32.mrb[9].mxu1  ;;  %v12890_v16 = vadd.f32 %v1733_v38, %v14408_v15 }
 0x5cf   :  { %v12875_v56 = vadd.f32 %v1664_v44, %v14395_v51  ;;  %v12891_v3 = vadd.f32 %v1735_v52, %v14402_v8 }
 0x5d0   :  { %v9673_v60 = vmul.f32 -1.442695, %v12874_v42 }
 0x5d1   :  { %v9674_v63 = vmul.f32 -1.442695, %v12875_v56  ;;  %v9675_v47 = vmul.f32 -1.442695, %v12891_v3 }
 0x5d2   :  { %13297 = vpow2.f32 %v9673_v60 }
 0x5d3   :  { %13299 = vpow2.f32 %v9674_v63 }
 0x5d4   :  { %13301 = vpow2.f32 %v9675_v47 }
 0x5d5   :  { %13303 = vtanh.f32 %v12890_v16 }
 0x5dc   :  { %v13298_v12 = vpop.eup %13297 }
 0x5dd   :  { %v13300_v21 = vpop.eup %13299  ;;  %v1745_v2 = vadd.f32 1.0, %v13298_v12 }
 0x5de   :  { %v1751_v26 = vadd.f32 1.0, %v13300_v21  ;;  %v13302_v29 = vpop.eup %13301 }
 0x5df   :  { %13305 = vrcp.f32 %v1745_v2  ;;  %v13304_v25 = vpop.eup %13303  ;;  %v1758_v44 = vadd.f32 1.0, %v13302_v29 }
 0x5e0   :  { %13307 = vrcp.f32 %v1751_v26 }
 0x5e1   :  { %13309 = vrcp.f32 %v1758_v44 }
 0x5e9   :  { %v13306_v34 = vpop.eup %13305 }
 0x5ea   :  { %v13308_v19 = vpop.eup %13307  ;;  %v1762_v42 = vmul.f32 %v13306_v34, %v13304_v25 }
 0x5eb   :  { %v1761_v56 = vmul.f32 %v13308_v19, %v14549_v31  ;;  %v13310_v38 = vpop.eup %13309 }
 0x5ed   :  { %v14595_v52 = vadd.f32 %v1762_v42, %v1761_v56 }
 0x5ef   :  { %13311 = vtanh.f32 %v14595_v52 }
 0x5f9   :  { %v13312_v60 = vpop.eup %13311 }
 0x5fa   :  { %v14598_v63 = vmul.f32 %v13312_v60, %v13310_v38 }
 0x5fc   :  { %1836 = vmatmul.mubr.f32.vlgmr.msra.gmra.mrb[10].mxu0 %v14598_v63  ;;  %1907 = vmatmul.mubr.f32.vlgmr.msra.gmra.mrb[10].mxu1 %v14598_v63 }
 0x5fd   :  { %10413 = vmatpush1.bf16.msra.mxu0 %v14218_v61  ;;  %10445 = vmatpush1.bf16.msra.mxu1 %v14221_v1 }
 0x5fe   :  { %10415 = vmatprep.subr.bf16.mxu0 %v14225_v4  ;;  %10447 = vmatprep.subr.bf16.mxu1 %v14228_v7 }
 0x5ff   :  { %2010 = vmatprep.mubr.f32.mxu0 %v14025_v0  ;;  %2081 = vmatprep.mubr.f32.mxu1 %v14025_v0 }
 0x601   :  { %10417 = vmatpush1.bf16.msra.mxu0 %v14234_v11  ;;  %10449 = vmatpush1.bf16.msra.mxu1 %v14238_v14 }
 0x602   :  { %10419 = vmatprep.subr.bf16.mxu0 %v14242_v17  ;;  %10451 = vmatprep.subr.bf16.mxu1 %v14245_v20 }
 0x605   :  { %10421 = vmatpush1.bf16.msra.mxu0 %v14251_v24  ;;  %10453 = vmatpush1.bf16.msra.mxu1 %v14255_v27 }
 0x606   :  { %10423 = vmatprep.subr.bf16.mxu0 %v14259_v30  ;;  %10455 = vmatprep.subr.bf16.mxu1 %v14262_v33 }
 0x609   :  { %10425 = vmatpush1.bf16.msra.mxu0 %v14268_v37  ;;  %10457 = vmatpush1.bf16.msra.mxu1 %v14272_v40 }
 0x60a   :  { %10427 = vmatprep.subr.bf16.mxu0 %v14276_v43  ;;  %10459 = vmatprep.subr.bf16.mxu1 %v14279_v46 }
 0x60d   :  { %10429 = vmatpush1.bf16.msra.mxu0 %v14285_v50  ;;  %10461 = vmatpush1.bf16.msra.mxu1 %v14289_v53 }
 0x60e   :  { %10431 = vmatprep.subr.bf16.mxu0 %v14293_v58  ;;  %10463 = vmatprep.subr.bf16.mxu1 %v14296_v62 }
 0x611   :  { %10433 = vmatpush1.bf16.msra.mxu0 %v14302_v5  ;;  %10465 = vmatpush1.bf16.msra.mxu1 %v14306_v9 }
 0x612   :  { %10435 = vmatprep.subr.bf16.mxu0 %v14310_v13  ;;  %10467 = vmatprep.subr.bf16.mxu1 %v14313_v18 }
 0x615   :  { %10437 = vmatpush1.bf16.msra.mxu0 %v14319_v23  ;;  %10469 = vmatpush1.bf16.msra.mxu1 %v14323_v28 }
 0x616   :  { %10439 = vmatprep.subr.bf16.mxu0 %v14327_v32  ;;  %10471 = vmatprep.subr.bf16.mxu1 %v14330_v36 }
 0x619   :  { %10441 = vmatpush1.bf16.msra.mxu0 %v14336_v39  ;;  %10473 = vmatpush1.bf16.msra.mxu1 %v14340_v41 }
 0x61a   :  { %10475 = vmatprep.subr.bf16.mxu0 %v14211_v54  ;;  %10507 = vmatprep.subr.bf16.mxu1 %v14213_v57 }
 0x6cf   :  { %v1837_v31 = vpop.f32.mrb[10].mxu0  ;;  %v1908_v3 = vpop.f32.mrb[10].mxu1 }
 0x6d0   :  { %v12876_v47 = vadd.f32 %v1837_v31, %v14392_v49  ;;  %v1839_v16 = vpop.f32.mrb[11].mxu0  ;;  %v1910_v12 = vpop.f32.mrb[11].mxu1  ;;  %v12892_v34 = vadd.f32 %v1908_v3, %v14408_v15 }
 0x6d1   :  { %v12877_v21 = vadd.f32 %v1839_v16, %v14395_v51  ;;  %v12893_v29 = vadd.f32 %v1910_v12, %v14402_v8 }
 0x6d2   :  { %v9676_v2 = vmul.f32 -1.442695, %v12876_v47 }
 0x6d3   :  { %v9677_v26 = vmul.f32 -1.442695, %v12877_v21  ;;  %v9678_v25 = vmul.f32 -1.442695, %v12893_v29  ;;  %v2306_v29 = vld [vmem:[#allocation8 + $0x30] sm:$0xff] }
 0x6d4   :  { %13313 = vpow2.f32 %v9676_v2 }
 0x6d5   :  { %13315 = vpow2.f32 %v9677_v26  ;;  %v2302_v26 = vld [vmem:[#allocation8 + $0x10] sm:$0xff] }
 0x6d6   :  { %13317 = vpow2.f32 %v9678_v25  ;;  %v2309_v25 = vld [vmem:[#allocation8 + $0x48] sm:$0xff] }
 0x6d7   :  { %13319 = vtanh.f32 %v12892_v34  ;;  %v2313_v34 = vld [vmem:[#allocation8 + $0x68] sm:$0xff] }
 0x6de   :  { %v13314_v54 = vpop.eup %13313 }
 0x6df   :  { %v13316_v19 = vpop.eup %13315  ;;  %v1920_v57 = vadd.f32 1.0, %v13314_v54  ;;  %v2311_v54 = vld [vmem:[#allocation8 + $0x58] sm:$0xff] }
 0x6e0   :  { %v1926_v42 = vadd.f32 1.0, %v13316_v19  ;;  %v13318_v44 = vpop.eup %13317  ;;  %v2315_v19 = vld [vmem:[#allocation8 + $0x78] sm:$0xff] }
 0x6e1   :  { %13321 = vrcp.f32 %v1920_v57  ;;  %v13320_v56 = vpop.eup %13319  ;;  %v1933_v47 = vadd.f32 1.0, %v13318_v44 }
 0x6e2   :  { %13323 = vrcp.f32 %v1926_v42 }
 0x6e3   :  { %13325 = vrcp.f32 %v1933_v47  ;;  %v10542_v47 = vpack.c.bf16 %v2313_v34, %v2309_v25  ;;  %v2334_v34 = vld [vmem:[#allocation8 + $0x110] sm:$0xff] }
 0x6eb   :  { %v13322_v38 = vpop.eup %13321 }
 0x6ec   :  { %v13324_v60 = vpop.eup %13323  ;;  %v1937_v31 = vmul.f32 %v13322_v38, %v13320_v56  ;;  %v10572_v56 = vpack.c.bf16 %v2306_v29, %v2302_v26  ;;  %v2308_v38 = vld [vmem:[#allocation8 + $0x40] sm:$0xff] }
 0x6ed   :  { %v1936_v16 = vmul.f32 %v13324_v60, %v14595_v52  ;;  %v13326_v3 = vpop.eup %13325  ;;  %v2304_v52 = vld [vmem:[#allocation8 + $0x20] sm:$0xff] }
 0x6ee   :  { %v2312_v60 = vld [vmem:[#allocation8 + $0x60] sm:$0xff] }
 0x6ef   :  { %v14641_v12 = vadd.f32 %v1937_v31, %v1936_v16  ;;  %v10574_v16 = vpack.c.bf16 %v2315_v19, %v2311_v54  ;;  %v2336_v26 = vld [vmem:[#allocation8 + $0x120] sm:$0xff]  ;;  %v2338_v54 = vld [vmem:[#allocation8 + $0x130] sm:$0xff]  ;;  %v2341_v19 = vld [vmem:[#allocation8 + $0x148] sm:$0xff] }
 0x6f1   :  { %13327 = vtanh.f32 %v14641_v12 }
 0x6fb   :  { %v13328_v21 = vpop.eup %13327 }
 0x6fc   :  { %v14644_v2 = vmul.f32 %v13328_v21, %v13326_v3  ;;  %v2314_v3 = vld [vmem:[#allocation8 + $0x70] sm:$0xff]  ;;  %v2317_v21 = vld [vmem:[#allocation8 + $0x88] sm:$0xff] }
 0x6fe   :  { %2011 = vmatmul.mubr.f32.vlgmr.msra.gmra.mrb[12].mxu0 %v14644_v2  ;;  %2082 = vmatmul.mubr.f32.vlgmr.msra.gmra.mrb[12].mxu1 %v14644_v2 }
 0x6ff   :  { %10477 = vmatpush1.bf16.msra.mxu0 %v14218_v61  ;;  %10509 = vmatpush1.bf16.msra.mxu1 %v14221_v1  ;;  %v2301_v61 = vld [vmem:[#allocation8 + $0x8] sm:$0xff] }
 0x700   :  { %10479 = vmatprep.subr.bf16.mxu0 %v14225_v4  ;;  %10511 = vmatprep.subr.bf16.mxu1 %v14228_v7  ;;  %v2305_v1 = vld [vmem:[#allocation8 + $0x28] sm:$0xff]  ;;  %v2303_v4 = vld [vmem:[#allocation8 + $0x18] sm:$0xff] }
 0x701   :  { %2185 = vmatprep.mubr.f32.mxu0 %v14025_v0  ;;  %2256 = vmatprep.mubr.f32.mxu1 %v14025_v0  ;;  %v10538_v7 = vpack.c.bf16 %v2305_v1, %v2301_v61  ;;  %v2321_v61 = vld [vmem:[#allocation8 + $0xa8] sm:$0xff]  ;;  %v2319_v1 = vld [vmem:[#allocation8 + $0x98] sm:$0xff] }
 0x703   :  { %10481 = vmatpush1.bf16.msra.mxu0 %v14234_v11  ;;  %10513 = vmatpush1.bf16.msra.mxu1 %v14238_v14  ;;  %v2307_v11 = vld [vmem:[#allocation8 + $0x38] sm:$0xff] }
 0x704   :  { %10483 = vmatprep.subr.bf16.mxu0 %v14242_v17  ;;  %10515 = vmatprep.subr.bf16.mxu1 %v14245_v20  ;;  %v10570_v14 = vpack.c.bf16 %v2307_v11, %v2303_v4  ;;  %v2323_v4 = vld [vmem:[#allocation8 + $0xb8] sm:$0xff] }
 0x707   :  { %10485 = vmatpush1.bf16.msra.mxu0 %v14251_v24  ;;  %10517 = vmatpush1.bf16.msra.mxu1 %v14255_v27 }
 0x708   :  { %10487 = vmatprep.subr.bf16.mxu0 %v14259_v30  ;;  %10519 = vmatprep.subr.bf16.mxu1 %v14262_v33 }
 0x70b   :  { %10489 = vmatpush1.bf16.msra.mxu0 %v14268_v37  ;;  %10521 = vmatpush1.bf16.msra.mxu1 %v14272_v40 }
 0x70c   :  { %10491 = vmatprep.subr.bf16.mxu0 %v14276_v43  ;;  %10523 = vmatprep.subr.bf16.mxu1 %v14279_v46 }
 0x70f   :  { %10493 = vmatpush1.bf16.msra.mxu0 %v14285_v50  ;;  %10525 = vmatpush1.bf16.msra.mxu1 %v14289_v53 }
 0x710   :  { %10495 = vmatprep.subr.bf16.mxu0 %v14293_v58  ;;  %10527 = vmatprep.subr.bf16.mxu1 %v14296_v62 }
 0x713   :  { %10497 = vmatpush1.bf16.msra.mxu0 %v14302_v5  ;;  %10529 = vmatpush1.bf16.msra.mxu1 %v14306_v9 }
 0x714   :  { %10499 = vmatprep.subr.bf16.mxu0 %v14310_v13  ;;  %10531 = vmatprep.subr.bf16.mxu1 %v14313_v18 }
 0x717   :  { %10501 = vmatpush1.bf16.msra.mxu0 %v14319_v23  ;;  %10533 = vmatpush1.bf16.msra.mxu1 %v14323_v28 }
 0x718   :  { %10503 = vmatprep.subr.bf16.mxu0 %v14327_v32  ;;  %10535 = vmatprep.subr.bf16.mxu1 %v14330_v36 }
 0x71b   :  { %10505 = vmatpush1.bf16.msra.mxu0 %v14336_v39  ;;  %10537 = vmatpush1.bf16.msra.mxu1 %v14340_v41  ;;  %v2300_v41 = vld [vmem:[#allocation8] sm:$0xff] }
 0x71c   :  { %10539 = vmatprep.subr.bf16.mxu0 %v10538_v7  ;;  %10571 = vmatprep.subr.bf16.mxu1 %v10570_v14  ;;  %v10540_v44 = vpack.c.bf16 %v2304_v52, %v2300_v41  ;;  %v10544_v7 = vpack.c.bf16 %v2312_v60, %v2308_v38  ;;  %v2316_v14 = vld [vmem:[#allocation8 + $0x80] sm:$0xff]  ;;  %v10588_v38 = vpack.c.bf16 %v2338_v54, %v2334_v34  ;;  %v2657_v34 = vld [vmem:[#allocation6 + $0x258] sm:$0xff] }
 0x71d   :  { %v2332_v52 = vld [vmem:[#allocation8 + $0x100] sm:$0xff] }
 0x71e   :  { %v2340_v60 = vld [vmem:[#allocation8 + $0x140] sm:$0xff] }
 0x7d1   :  { %v2012_v17 = vpop.f32.mrb[12].mxu0  ;;  %v2083_v20 = vpop.f32.mrb[12].mxu1 }
 0x7d2   :  { %v12878_v24 = vadd.f32 %v2012_v17, %v14392_v49  ;;  %v2014_v27 = vpop.f32.mrb[13].mxu0  ;;  %v2085_v30 = vpop.f32.mrb[13].mxu1  ;;  %v12894_v50 = vadd.f32 %v2083_v20, %v14408_v15  ;;  %v2320_v17 = vld [vmem:[#allocation8 + $0xa0] sm:$0xff]  ;;  %v10546_v20 = vpack.c.bf16 %v2321_v61, %v2317_v21  ;;  %v2346_v21 = vld [vmem:[#allocation8 + $0x170] sm:$0xff]  ;;  %v2349_v61 = vld [vmem:[#allocation8 + $0x188] sm:$0xff] }
 0x7d3   :  { %v12879_v33 = vadd.f32 %v2014_v27, %v14395_v51  ;;  %v12895_v43 = vadd.f32 %v2085_v30, %v14402_v8  ;;  %v2318_v27 = vld [vmem:[#allocation8 + $0x90] sm:$0xff] }
 0x7d4   :  { %v9679_v37 = vmul.f32 -1.442695, %v12878_v24  ;;  %v10578_v24 = vpack.c.bf16 %v2323_v4, %v2319_v1  ;;  %v2322_v30 = vld [vmem:[#allocation8 + $0xb0] sm:$0xff]  ;;  %v2353_v1 = vld [vmem:[#allocation8 + $0x1a8] sm:$0xff]  ;;  %v2351_v4 = vld [vmem:[#allocation8 + $0x198] sm:$0xff] }
 0x7d5   :  { %v9680_v40 = vmul.f32 -1.442695, %v12879_v33  ;;  %v9681_v46 = vmul.f32 -1.442695, %v12895_v43  ;;  %v2325_v33 = vld [vmem:[#allocation8 + $0xc8] sm:$0xff]  ;;  %v2331_v43 = vld [vmem:[#allocation8 + $0xf8] sm:$0xff] }
 0x7d6   :  { %13329 = vpow2.f32 %v9679_v37  ;;  %v2329_v37 = vld [vmem:[#allocation8 + $0xe8] sm:$0xff] }
 0x7d7   :  { %13331 = vpow2.f32 %v9680_v40  ;;  %v2327_v40 = vld [vmem:[#allocation8 + $0xd8] sm:$0xff] }
 0x7d8   :  { %13333 = vpow2.f32 %v9681_v46  ;;  %v10548_v46 = vpack.c.bf16 %v2320_v17, %v2316_v14  ;;  %v2348_v17 = vld [vmem:[#allocation8 + $0x180] sm:$0xff] }
 0x7d9   :  { %13335 = vtanh.f32 %v12894_v50  ;;  %v10580_v50 = vpack.c.bf16 %v2322_v30, %v2318_v27  ;;  %v2350_v30 = vld [vmem:[#allocation8 + $0x190] sm:$0xff] }
 0x7e0   :  { %v13330_v53 = vpop.eup %13329 }
 0x7e1   :  { %v13332_v58 = vpop.eup %13331  ;;  %v2095_v62 = vadd.f32 1.0, %v13330_v53  ;;  %v2324_v53 = vld [vmem:[#allocation8 + $0xc0] sm:$0xff] }
 0x7e2   :  { %v2101_v5 = vadd.f32 1.0, %v13332_v58  ;;  %v13334_v9 = vpop.eup %13333  ;;  %v2328_v58 = vld [vmem:[#allocation8 + $0xe0] sm:$0xff] }
 0x7e3   :  { %13337 = vrcp.f32 %v2095_v62  ;;  %v13336_v13 = vpop.eup %13335  ;;  %v2108_v32 = vadd.f32 1.0, %v13334_v9  ;;  %v10550_v62 = vpack.c.bf16 %v2329_v37, %v2325_v33  ;;  %v2326_v9 = vld [vmem:[#allocation8 + $0xd0] sm:$0xff]  ;;  %v2357_v37 = vld [vmem:[#allocation8 + $0x1c8] sm:$0xff] }
 0x7e4   :  { %13339 = vrcp.f32 %v2101_v5  ;;  %v10582_v5 = vpack.c.bf16 %v2331_v43, %v2327_v40  ;;  %v2354_v33 = vld [vmem:[#allocation8 + $0x1b0] sm:$0xff]  ;;  %v2361_v40 = vld [vmem:[#allocation8 + $0x1e8] sm:$0xff]  ;;  %v2359_v43 = vld [vmem:[#allocation8 + $0x1d8] sm:$0xff] }
 0x7e5   :  { %13341 = vrcp.f32 %v2108_v32  ;;  %v2339_v32 = vld [vmem:[#allocation8 + $0x138] sm:$0xff] }
 0x7ed   :  { %v13338_v18 = vpop.eup %13337 }
 0x7ee   :  { %v13340_v23 = vpop.eup %13339  ;;  %v2112_v28 = vmul.f32 %v13338_v18, %v13336_v13  ;;  %v2330_v13 = vld [vmem:[#allocation8 + $0xf0] sm:$0xff]  ;;  %v2333_v18 = vld [vmem:[#allocation8 + $0x108] sm:$0xff] }
 0x7ef   :  { %v2111_v36 = vmul.f32 %v13340_v23, %v14641_v12  ;;  %v13342_v57 = vpop.eup %13341  ;;  %v2310_v12 = vld [vmem:[#allocation8 + $0x50] sm:$0xff]  ;;  %v2337_v23 = vld [vmem:[#allocation8 + $0x128] sm:$0xff]  ;;  %v10584_v41 = vpack.c.bf16 %v2330_v13, %v2326_v9  ;;  %v2360_v9 = vld [vmem:[#allocation8 + $0x1e0] sm:$0xff] }
 0x7f0   :  { %v10576_v11 = vpack.c.bf16 %v2314_v3, %v2310_v12  ;;  %v10554_v29 = vpack.c.bf16 %v2337_v23, %v2333_v18  ;;  %v2342_v3 = vld [vmem:[#allocation8 + $0x150] sm:$0xff] }
 0x7f1   :  { %v14685_v39 = vadd.f32 %v2112_v28, %v2111_v36  ;;  %v2335_v28 = vld [vmem:[#allocation8 + $0x118] sm:$0xff]  ;;  %v10552_v36 = vpack.c.bf16 %v2328_v58, %v2324_v53  ;;  %v10592_v14 = vpack.c.bf16 %v2346_v21, %v2342_v3  ;;  %v10596_v53 = vpack.c.bf16 %v2354_v33, %v2350_v30  ;;  %v2356_v58 = vld [vmem:[#allocation8 + $0x1c0] sm:$0xff]  ;;  %v2358_v13 = vld [vmem:[#allocation8 + $0x1d0] sm:$0xff] }
 0x7f2   :  { %v10586_v25 = vpack.c.bf16 %v2339_v32, %v2335_v28  ;;  %v2362_v18 = vld [vmem:[#allocation8 + $0x1f0] sm:$0xff]  ;;  %v10568_v23 = vpack.c.bf16 %v2360_v9, %v2356_v58  ;;  %v2646_v32 = vld [vmem:[#allocation6 + $0x200] sm:$0xff]  ;;  %v2665_v3 = vld [vmem:[#allocation6 + $0x298] sm:$0xff] }
 0x7f3   :  { %13343 = vtanh.f32 %v14685_v39  ;;  %v10600_v28 = vpack.c.bf16 %v2362_v18, %v2358_v13  ;;  %v2673_v30 = vld [vmem:[#allocation6 + $0x2d8] sm:$0xff]  ;;  %v2676_v58 = vld [vmem:[#allocation6 + $0x2f0] sm:$0xff]  ;;  %v2683_v9 = vld [vmem:[#allocation6 + $0x328] sm:$0xff] }
 0x7f4   :  { %v2681_v13 = vld [vmem:[#allocation6 + $0x318] sm:$0xff] }
 0x7f5   :  { %v2685_v18 = vld [vmem:[#allocation6 + $0x338] sm:$0xff] }
 0x7fd   :  { %v13344_v42 = vpop.eup %13343 }
 0x7fe   :  { %v14688_v31 = vmul.f32 %v13344_v42, %v13342_v57  ;;  %v2345_v57 = vld [vmem:[#allocation8 + $0x168] sm:$0xff]  ;;  %v2343_v42 = vld [vmem:[#allocation8 + $0x158] sm:$0xff] }
 0x800   :  { %2186 = vmatmul.mubr.f32.vlgmr.msra.gmra.mrb[14].mxu0 %v14688_v31  ;;  %2257 = vmatmul.mubr.f32.vlgmr.msra.gmra.mrb[14].mxu1 %v14688_v31 }
 0x801   :  { %10541 = vmatpush1.bf16.msra.mxu0 %v10540_v44  ;;  %10573 = vmatpush1.bf16.msra.mxu1 %v10572_v56  ;;  %v2347_v44 = vld [vmem:[#allocation8 + $0x178] sm:$0xff]  ;;  %v10556_v56 = vpack.c.bf16 %v2336_v26, %v2332_v52  ;;  %v2648_v52 = vld [vmem:[#allocation6 + $0x210] sm:$0xff] }
 0x802   :  { %10543 = vmatprep.subr.bf16.mxu0 %v10542_v47  ;;  %10575 = vmatprep.subr.bf16.mxu1 %v10574_v16  ;;  %v2344_v47 = vld [vmem:[#allocation8 + $0x160] sm:$0xff]  ;;  %v10558_v16 = vpack.c.bf16 %v2345_v57, %v2341_v19  ;;  %v10590_v12 = vpack.c.bf16 %v2347_v44, %v2343_v42  ;;  %v2652_v26 = vld [vmem:[#allocation6 + $0x230] sm:$0xff]  ;;  %v2661_v19 = vld [vmem:[#allocation6 + $0x278] sm:$0xff] }
 0x803   :  { %2451 = vmatprep.mubr.f32.mxu0 %v14025_v0  ;;  %2564 = vmatprep.mubr.f32.mxu1 %v14025_v0  ;;  %v2654_v57 = vld [vmem:[#allocation6 + $0x240] sm:$0xff]  ;;  %v14736_v44 = vpack.c.bf16 %v2661_v19, %v2657_v34  ;;  %v2693_v34 = vld [vmem:[#allocation6 + $0x378] sm:$0xff] }
 0x804   :  { %v2658_v42 = vld [vmem:[#allocation6 + $0x260] sm:$0xff] }
 0x805   :  { %10545 = vmatpush1.bf16.msra.mxu0 %v10544_v7  ;;  %10577 = vmatpush1.bf16.msra.mxu1 %v10576_v11  ;;  %v2355_v7 = vld [vmem:[#allocation8 + $0x1b8] sm:$0xff]  ;;  %v10560_v11 = vpack.c.bf16 %v2344_v47, %v2340_v60  ;;  %v2660_v60 = vld [vmem:[#allocation6 + $0x270] sm:$0xff]  ;;  %v2686_v19 = vld [vmem:[#allocation6 + $0x340] sm:$0xff] }
 0x806   :  { %10547 = vmatprep.subr.bf16.mxu0 %v10546_v20  ;;  %10579 = vmatprep.subr.bf16.mxu1 %v10578_v24  ;;  %v2352_v20 = vld [vmem:[#allocation8 + $0x1a0] sm:$0xff]  ;;  %v10562_v24 = vpack.c.bf16 %v2353_v1, %v2349_v61  ;;  %v10594_v27 = vpack.c.bf16 %v2355_v7, %v2351_v4  ;;  %v2669_v61 = vld [vmem:[#allocation6 + $0x2b8] sm:$0xff] }
 0x807   :  { %v2662_v1 = vld [vmem:[#allocation6 + $0x280] sm:$0xff]  ;;  %v14748_v7 = vpack.c.bf16 %v2669_v61, %v2665_v3  ;;  %v2699_v3 = vld [vmem:[#allocation6 + $0x3a8] sm:$0xff]  ;;  %v2697_v61 = vld [vmem:[#allocation6 + $0x398] sm:$0xff] }
 0x808   :  { %v2666_v4 = vld [vmem:[#allocation6 + $0x2a0] sm:$0xff] }
 0x809   :  { %10549 = vmatpush1.bf16.msra.mxu0 %v10548_v46  ;;  %10581 = vmatpush1.bf16.msra.mxu1 %v10580_v50  ;;  %v2363_v46 = vld [vmem:[#allocation8 + $0x1f8] sm:$0xff]  ;;  %v10564_v50 = vpack.c.bf16 %v2352_v20, %v2348_v17  ;;  %v2668_v17 = vld [vmem:[#allocation6 + $0x2b0] sm:$0xff] }
 0x80a   :  { %10551 = vmatprep.subr.bf16.mxu0 %v10550_v62  ;;  %10583 = vmatprep.subr.bf16.mxu1 %v10582_v5  ;;  %v10566_v62 = vpack.c.bf16 %v2361_v40, %v2357_v37  ;;  %v10598_v5 = vpack.c.bf16 %v2363_v46, %v2359_v43  ;;  %v2677_v37 = vld [vmem:[#allocation6 + $0x2f8] sm:$0xff]  ;;  %v2670_v40 = vld [vmem:[#allocation6 + $0x2c0] sm:$0xff] }
 0x80b   :  { %v2674_v43 = vld [vmem:[#allocation6 + $0x2e0] sm:$0xff]  ;;  %v14760_v46 = vpack.c.bf16 %v2677_v37, %v2673_v30  ;;  %v2696_v30 = vld [vmem:[#allocation6 + $0x390] sm:$0xff] }
 0x80c   :  { %v2700_v37 = vld [vmem:[#allocation6 + $0x3b0] sm:$0xff] }
 0x80d   :  { %10553 = vmatpush1.bf16.msra.mxu0 %v10552_v36  ;;  %10585 = vmatpush1.bf16.msra.mxu1 %v10584_v41 }
 0x80e   :  { %10555 = vmatprep.subr.bf16.mxu0 %v10554_v29  ;;  %10587 = vmatprep.subr.bf16.mxu1 %v10586_v25  ;;  %v2655_v29 = vld [vmem:[#allocation6 + $0x248] sm:$0xff] }
 0x80f   :  { %v2659_v25 = vld [vmem:[#allocation6 + $0x268] sm:$0xff] }
 0x810   :  { %v14734_v54 = vpack.c.bf16 %v2659_v25, %v2655_v29  ;;  %v2689_v25 = vld [vmem:[#allocation6 + $0x358] sm:$0xff] }
 0x811   :  { %10557 = vmatpush1.bf16.msra.mxu0 %v10556_v56  ;;  %10589 = vmatpush1.bf16.msra.mxu1 %v10588_v38  ;;  %v14738_v56 = vpack.c.bf16 %v2658_v42, %v2654_v57  ;;  %v2656_v38 = vld [vmem:[#allocation6 + $0x250] sm:$0xff]  ;;  %v14782_v57 = vpack.c.bf16 %v2693_v34, %v2689_v25  ;;  %v2690_v42 = vld [vmem:[#allocation6 + $0x360] sm:$0xff] }
 0x812   :  { %10559 = vmatprep.subr.bf16.mxu0 %v10558_v16  ;;  %10591 = vmatprep.subr.bf16.mxu1 %v10590_v12  ;;  %v14741_v47 = vpack.c.bf16 %v2660_v60, %v2656_v38  ;;  %v2663_v16 = vld [vmem:[#allocation6 + $0x288] sm:$0xff]  ;;  %v2688_v38 = vld [vmem:[#allocation6 + $0x350] sm:$0xff] }
 0x813   :  { %v2667_v12 = vld [vmem:[#allocation6 + $0x2a8] sm:$0xff]  ;;  %v2692_v60 = vld [vmem:[#allocation6 + $0x370] sm:$0xff] }
 0x814   :  { %v14746_v21 = vpack.c.bf16 %v2667_v12, %v2663_v16  ;;  %v14785_v16 = vpack.c.bf16 %v2690_v42, %v2686_v19  ;;  %v2695_v12 = vld [vmem:[#allocation6 + $0x388] sm:$0xff] }
 0x815   :  { %10561 = vmatpush1.bf16.msra.mxu0 %v10560_v11  ;;  %10593 = vmatpush1.bf16.msra.mxu1 %v10592_v14  ;;  %v14750_v11 = vpack.c.bf16 %v2666_v4, %v2662_v1  ;;  %v2664_v14 = vld [vmem:[#allocation6 + $0x290] sm:$0xff]  ;;  %v14789_v1 = vpack.c.bf16 %v2692_v60, %v2688_v38  ;;  %v14791_v4 = vpack.c.bf16 %v2699_v3, %v2695_v12 }
 0x816   :  { %10563 = vmatprep.subr.bf16.mxu0 %v10562_v24  ;;  %10595 = vmatprep.subr.bf16.mxu1 %v10594_v27  ;;  %v14753_v20 = vpack.c.bf16 %v2668_v17, %v2664_v14  ;;  %v2671_v24 = vld [vmem:[#allocation6 + $0x2c8] sm:$0xff]  ;;  %v2701_v14 = vld [vmem:[#allocation6 + $0x3b8] sm:$0xff]  ;;  %v2694_v17 = vld [vmem:[#allocation6 + $0x380] sm:$0xff] }
 0x817   :  { %v2675_v27 = vld [vmem:[#allocation6 + $0x2e8] sm:$0xff] }
 0x818   :  { %v14758_v33 = vpack.c.bf16 %v2675_v27, %v2671_v24  ;;  %v2698_v24 = vld [vmem:[#allocation6 + $0x3a0] sm:$0xff]  ;;  %v14794_v27 = vpack.c.bf16 %v2701_v14, %v2697_v61 }
 0x819   :  { %10565 = vmatpush1.bf16.msra.mxu0 %v10564_v50  ;;  %10597 = vmatpush1.bf16.msra.mxu1 %v10596_v53  ;;  %v14762_v50 = vpack.c.bf16 %v2674_v43, %v2670_v40  ;;  %v2672_v53 = vld [vmem:[#allocation6 + $0x2d0] sm:$0xff]  ;;  %v14797_v40 = vpack.c.bf16 %v2698_v24, %v2694_v17  ;;  %v14801_v43 = vpack.c.bf16 %v2700_v37, %v2696_v30 }
 0x81a   :  { %10567 = vmatprep.subr.bf16.mxu0 %v10566_v62  ;;  %10599 = vmatprep.subr.bf16.mxu1 %v10598_v5  ;;  %v2679_v62 = vld [vmem:[#allocation6 + $0x308] sm:$0xff]  ;;  %v14765_v5 = vpack.c.bf16 %v2676_v58, %v2672_v53 }
 0x81b   :  { %v2703_v53 = vld [vmem:[#allocation6 + $0x3c8] sm:$0xff] }
 0x81c   :  { %v2707_v58 = vld [vmem:[#allocation6 + $0x3e8] sm:$0xff] }
 0x81d   :  { %10569 = vmatpush1.bf16.msra.mxu0 %v10568_v23  ;;  %10601 = vmatpush1.bf16.msra.mxu1 %v10600_v28  ;;  %v14769_v23 = vpack.c.bf16 %v2683_v9, %v2679_v62  ;;  %v14771_v28 = vpack.c.bf16 %v2685_v18, %v2681_v13  ;;  %v2705_v62 = vld [vmem:[#allocation6 + $0x3d8] sm:$0xff]  ;;  %v14806_v9 = vpack.c.bf16 %v2707_v58, %v2703_v53  ;;  %v2702_v18 = vld [vmem:[#allocation6 + $0x3c0] sm:$0xff] }
 0x81e   :  { %v2709_v13 = vld [vmem:[#allocation6 + $0x3f8] sm:$0xff] }
 0x820   :  { %2452 = vmatmul.mubr.f32.vlgmr.msra.gmra.mrb[16].mxu0 %v14414_v59  ;;  %2565 = vmatmul.mubr.f32.vlgmr.msra.gmra.mrb[16].mxu1 %v14414_v59  ;;  %v2647_v59 = vld [vmem:[#allocation6 + $0x208] sm:$0xff] }
 0x821   :  { %2457 = vmatprep.mubr.f32.mxu0 %v14025_v0  ;;  %2570 = vmatprep.mubr.f32.mxu1 %v14025_v0 }
 0x824   :  { %2458 = vmatmul.mubr.f32.gmra.mrb[18].mxu0 %v14460_v6  ;;  %2571 = vmatmul.mubr.f32.gmra.mrb[18].mxu1 %v14460_v6  ;;  %v2651_v6 = vld [vmem:[#allocation6 + $0x228] sm:$0xff] }
 0x825   :  { %2463 = vmatprep.mubr.f32.mxu0 %v14025_v0  ;;  %2576 = vmatprep.mubr.f32.mxu1 %v14025_v0 }
 0x828   :  { %2464 = vmatmul.mubr.f32.gmra.mrb[20].mxu0 %v14506_v22  ;;  %2577 = vmatmul.mubr.f32.gmra.mrb[20].mxu1 %v14506_v22  ;;  %v2649_v22 = vld [vmem:[#allocation6 + $0x218] sm:$0xff] }
 0x829   :  { %2469 = vmatprep.mubr.f32.mxu0 %v14025_v0  ;;  %2582 = vmatprep.mubr.f32.mxu1 %v14025_v0 }
 0x82c   :  { %2470 = vmatmul.mubr.f32.gmra.mrb[22].mxu0 %v14552_v35  ;;  %2583 = vmatmul.mubr.f32.gmra.mrb[22].mxu1 %v14552_v35  ;;  %v14722_v35 = vpack.c.bf16 %v2651_v6, %v2647_v59  ;;  %v2678_v59 = vld [vmem:[#allocation6 + $0x300] sm:$0xff] }
 0x82d   :  { %2475 = vmatprep.mubr.f32.mxu0 %v14025_v0  ;;  %2588 = vmatprep.mubr.f32.mxu1 %v14025_v0  ;;  %v2682_v6 = vld [vmem:[#allocation6 + $0x320] sm:$0xff] }
 0x82e   :  { %10603 = vmatprep.subr.bf16.mxu0 %v14722_v35 }
 0x830   :  { %2476 = vmatmul.mubr.f32.gmra.mrb[24].mxu0 %v14598_v63  ;;  %2589 = vmatmul.mubr.f32.gmra.mrb[24].mxu1 %v14598_v63  ;;  %v2653_v63 = vld [vmem:[#allocation6 + $0x238] sm:$0xff] }
 0x831   :  { %2481 = vmatprep.mubr.f32.mxu0 %v14025_v0  ;;  %2594 = vmatprep.mubr.f32.mxu1 %v14025_v0  ;;  %v14724_v36 = vpack.c.bf16 %v2653_v63, %v2649_v22  ;;  %v2680_v22 = vld [vmem:[#allocation6 + $0x310] sm:$0xff]  ;;  %v14774_v63 = vpack.c.bf16 %v2682_v6, %v2678_v59  ;;  %v2706_v59 = vld [vmem:[#allocation6 + $0x3e0] sm:$0xff]  ;;  %v14808_v6 = vpack.c.bf16 %v2709_v13, %v2705_v62 }
 0x833   :  { %10635 = vmatprep.subr.bf16.mxu1 %v14724_v36 }
 0x834   :  { %2482 = vmatmul.mubr.f32.gmra.mrb[26].mxu0 %v14644_v2  ;;  %2595 = vmatmul.mubr.f32.gmra.mrb[26].mxu1 %v14644_v2  ;;  %v2650_v2 = vld [vmem:[#allocation6 + $0x220] sm:$0xff] }
 0x835   :  { %2487 = vmatprep.mubr.f32.mxu0 %v14025_v0  ;;  %2600 = vmatprep.mubr.f32.mxu1 %v14025_v0  ;;  %v14726_v41 = vpack.c.bf16 %v2650_v2, %v2646_v32  ;;  %v2684_v32 = vld [vmem:[#allocation6 + $0x330] sm:$0xff]  ;;  %v2687_v2 = vld [vmem:[#allocation6 + $0x348] sm:$0xff] }
 0x837   :  { %10605 = vmatpush1.bf16.msra.mxu0 %v14726_v41 }
 0x838   :  { %2488 = vmatmul.mubr.f32.gmra.mrb[28].mxu0 %v14688_v31  ;;  %2601 = vmatmul.mubr.f32.gmra.mrb[28].mxu1 %v14688_v31  ;;  %v14729_v31 = vpack.c.bf16 %v2652_v26, %v2648_v52  ;;  %v2691_v52 = vld [vmem:[#allocation6 + $0x368] sm:$0xff]  ;;  %v14778_v26 = vpack.c.bf16 %v2684_v32, %v2680_v22  ;;  %v14810_v22 = vpack.c.bf16 %v2706_v59, %v2702_v18  ;;  %v2704_v32 = vld [vmem:[#allocation6 + $0x3d0] sm:$0xff] }
 0x839   :  { %2493 = vmatprep.mubr.f32.mxu0 %v14025_v0  ;;  %2606 = vmatprep.mubr.f32.mxu1 %v14025_v0  ;;  %v14780_v29 = vpack.c.bf16 %v2691_v52, %v2687_v2  ;;  %v2708_v2 = vld [vmem:[#allocation6 + $0x3f0] sm:$0xff] }
 0x83a   :  { %10637 = vmatpush1.bf16.msra.mxu1 %v14729_v31  ;;  %10607 = vmatprep.subr.bf16.mxu0 %v14734_v54  ;;  %v14813_v52 = vpack.c.bf16 %v2708_v2, %v2704_v32 }
 0x83b   :  { %10639 = vmatprep.subr.bf16.mxu1 %v14736_v44  ;;  %10609 = vmatpush1.bf16.msra.mxu0 %v14738_v56 }
 0x83c   :  { %10611 = vmatprep.subr.bf16.mxu0 %v14746_v21 }
 0x83e   :  { %10641 = vmatpush1.bf16.msra.mxu1 %v14741_v47 }
 0x83f   :  { %10643 = vmatprep.subr.bf16.mxu1 %v14748_v7  ;;  %10613 = vmatpush1.bf16.msra.mxu0 %v14750_v11 }
 0x840   :  { %10615 = vmatprep.subr.bf16.mxu0 %v14758_v33 }
 0x842   :  { %10645 = vmatpush1.bf16.msra.mxu1 %v14753_v20 }
 0x843   :  { %10647 = vmatprep.subr.bf16.mxu1 %v14760_v46  ;;  %10617 = vmatpush1.bf16.msra.mxu0 %v14762_v50 }
 0x844   :  { %10619 = vmatprep.subr.bf16.mxu0 %v14769_v23 }
 0x846   :  { %10649 = vmatpush1.bf16.msra.mxu1 %v14765_v5 }
 0x847   :  { %10651 = vmatprep.subr.bf16.mxu1 %v14771_v28  ;;  %10621 = vmatpush1.bf16.msra.mxu0 %v14774_v63 }
 0x848   :  { %10623 = vmatprep.subr.bf16.mxu0 %v14780_v29 }
 0x84a   :  { %10653 = vmatpush1.bf16.msra.mxu1 %v14778_v26 }
 0x84b   :  { %10655 = vmatprep.subr.bf16.mxu1 %v14782_v57  ;;  %10625 = vmatpush1.bf16.msra.mxu0 %v14785_v16 }
 0x84c   :  { %10627 = vmatprep.subr.bf16.mxu0 %v14791_v4 }
 0x84e   :  { %10657 = vmatpush1.bf16.msra.mxu1 %v14789_v1 }
 0x84f   :  { %10659 = vmatprep.subr.bf16.mxu1 %v14794_v27  ;;  %10629 = vmatpush1.bf16.msra.mxu0 %v14797_v40 }
 0x850   :  { %10631 = vmatprep.subr.bf16.mxu0 %v14806_v9 }
 0x852   :  { %10661 = vmatpush1.bf16.msra.mxu1 %v14801_v43 }
 0x853   :  { %10663 = vmatprep.subr.bf16.mxu1 %v14808_v6  ;;  %10633 = vmatpush1.bf16.msra.mxu0 %v14810_v22 }
 0x854   :  { %10667 = vmatprep.subr.bf16.mxu0 %v14722_v35 }
 0x856   :  { %10665 = vmatpush1.bf16.msra.mxu1 %v14813_v52 }
 0x857   :  { %10699 = vmatprep.subr.bf16.mxu1 %v14724_v36 }
 0x8d3   :  { %v2187_v25 = vpop.f32.mrb[14].mxu0  ;;  %v2258_v34 = vpop.f32.mrb[14].mxu1 }
 0x8d4   :  { %v12880_v19 = vadd.f32 %v2187_v25, %v14392_v49  ;;  %v2189_v42 = vpop.f32.mrb[15].mxu0  ;;  %v2260_v38 = vpop.f32.mrb[15].mxu1  ;;  %v12896_v17 = vadd.f32 %v2258_v34, %v14408_v15 }
 0x8d5   :  { %v12881_v60 = vadd.f32 %v2189_v42, %v14395_v51  ;;  %v12897_v61 = vadd.f32 %v2260_v38, %v14402_v8 }
 0x8d6   :  { %v9682_v12 = vmul.f32 -1.442695, %v12880_v19 }
 0x8d7   :  { %v9683_v3 = vmul.f32 -1.442695, %v12881_v60  ;;  %v9684_v14 = vmul.f32 -1.442695, %v12897_v61 }
 0x8d8   :  { %13345 = vpow2.f32 %v9682_v12 }
 0x8d9   :  { %13347 = vpow2.f32 %v9683_v3 }
 0x8da   :  { %13349 = vpow2.f32 %v9684_v14 }
 0x8db   :  { %13351 = vtanh.f32 %v12896_v17 }
 0x8e2   :  { %v13346_v24 = vpop.eup %13345 }
 0x8e3   :  { %v13348_v30 = vpop.eup %13347  ;;  %v2270_v37 = vadd.f32 1.0, %v13346_v24 }
 0x8e4   :  { %v2276_v53 = vadd.f32 1.0, %v13348_v30  ;;  %v13350_v49 = vpop.eup %13349 }
 0x8e5   :  { %13353 = vrcp.f32 %v2270_v37  ;;  %v13352_v58 = vpop.eup %13351  ;;  %v2283_v18 = vadd.f32 1.0, %v13350_v49 }
 0x8e6   :  { %13355 = vrcp.f32 %v2276_v53 }
 0x8e7   :  { %13357 = vrcp.f32 %v2283_v18 }
 0x8ef   :  { %v13354_v51 = vpop.eup %13353 }
 0x8f0   :  { %v13356_v62 = vpop.eup %13355  ;;  %v2287_v13 = vmul.f32 %v13354_v51, %v13352_v58 }
 0x8f1   :  { %v2286_v59 = vmul.f32 %v13356_v62, %v14685_v39  ;;  %v13358_v15 = vpop.eup %13357  ;;  %v2365_v39 = vld [vmem:[#allocation9 + $0x4] sm:$0xf] }
 0x8f2   :  { %v14864_v25 = vrot.slane %v2365_v39, %v14387_v45  ;;  %v14867_v34 = vrot.slane %v2365_v39, %v14389_v48  ;;  %v14872_v17 = vrot.slane %v2365_v39, %v14397_v55  ;;  %v14876_v30 = vrot.slane %v2365_v39, %v14404_v10 }
 0x8f3   :  { %v2288_v8 = vadd.f32 %v2287_v13, %v2286_v59 }
 0x8f5   :  { %13359 = vtanh.f32 %v2288_v8 }
 0x8ff   :  { %v13360_v32 = vpop.eup %13359 }
 0x900   :  { %v2290_v2 = vmul.f32 %v13360_v32, %v13358_v15 }
 0x902   :  { %2494 = vmatmul.mubr.f32.gmra.mrb[30].mxu0 %v2290_v2  ;;  %2607 = vmatmul.mubr.f32.gmra.mrb[30].mxu1 %v2290_v2 }
 0x903   :  { %2778 = vmatprep.mubr.f32.mxu0 %v14025_v0  ;;  %2849 = vmatprep.mubr.f32.mxu1 %v14025_v0 }
 0x906   :  { %2779 = vmatmul.mubr.f32.vlgmr.msra.gmra.mrb[16].mxu0 %v14025_v0  ;;  %2850 = vmatmul.mubr.f32.vlgmr.msra.gmra.mrb[16].mxu1 %v14025_v0 }
 0x907   :  { %10669 = vmatpush1.bf16.msra.mxu0 %v14726_v41  ;;  %10701 = vmatpush1.bf16.msra.mxu1 %v14729_v31 }
 0x908   :  { %10671 = vmatprep.subr.bf16.mxu0 %v14734_v54  ;;  %10703 = vmatprep.subr.bf16.mxu1 %v14736_v44 }
 0x909   :  { %2953 = vmatprep.mubr.f32.mxu0 %v14025_v0  ;;  %3024 = vmatprep.mubr.f32.mxu1 %v14025_v0 }
 0x90b   :  { %10673 = vmatpush1.bf16.msra.mxu0 %v14738_v56  ;;  %10705 = vmatpush1.bf16.msra.mxu1 %v14741_v47 }
 0x90c   :  { %10675 = vmatprep.subr.bf16.mxu0 %v14746_v21  ;;  %10707 = vmatprep.subr.bf16.mxu1 %v14748_v7 }
 0x90f   :  { %10677 = vmatpush1.bf16.msra.mxu0 %v14750_v11  ;;  %10709 = vmatpush1.bf16.msra.mxu1 %v14753_v20 }
 0x910   :  { %10679 = vmatprep.subr.bf16.mxu0 %v14758_v33  ;;  %10711 = vmatprep.subr.bf16.mxu1 %v14760_v46 }
 0x913   :  { %10681 = vmatpush1.bf16.msra.mxu0 %v14762_v50  ;;  %10713 = vmatpush1.bf16.msra.mxu1 %v14765_v5 }
 0x914   :  { %10683 = vmatprep.subr.bf16.mxu0 %v14769_v23  ;;  %10715 = vmatprep.subr.bf16.mxu1 %v14771_v28 }
 0x917   :  { %10685 = vmatpush1.bf16.msra.mxu0 %v14774_v63  ;;  %10717 = vmatpush1.bf16.msra.mxu1 %v14778_v26 }
 0x918   :  { %10687 = vmatprep.subr.bf16.mxu0 %v14780_v29  ;;  %10719 = vmatprep.subr.bf16.mxu1 %v14782_v57 }
 0x91b   :  { %10689 = vmatpush1.bf16.msra.mxu0 %v14785_v16  ;;  %10721 = vmatpush1.bf16.msra.mxu1 %v14789_v1 }
 0x91c   :  { %10691 = vmatprep.subr.bf16.mxu0 %v14791_v4  ;;  %10723 = vmatprep.subr.bf16.mxu1 %v14794_v27 }
 0x91f   :  { %10693 = vmatpush1.bf16.msra.mxu0 %v14797_v40  ;;  %10725 = vmatpush1.bf16.msra.mxu1 %v14801_v43 }
 0x920   :  { %10695 = vmatprep.subr.bf16.mxu0 %v14806_v9  ;;  %10727 = vmatprep.subr.bf16.mxu1 %v14808_v6 }
 0x923   :  { %10697 = vmatpush1.bf16.msra.mxu0 %v14810_v22  ;;  %10729 = vmatpush1.bf16.msra.mxu1 %v14813_v52 }
 0x924   :  { %10731 = vmatprep.subr.bf16.mxu0 %v14722_v35  ;;  %10763 = vmatprep.subr.bf16.mxu1 %v14724_v36 }
 0x9d9   :  { %v2780_v19 = vpop.f32.mrb[16].mxu0  ;;  %v2851_v42 = vpop.f32.mrb[16].mxu1 }
 0x9da   :  { %v12898_v38 = vadd.f32 %v2780_v19, %v14864_v25  ;;  %v2782_v60 = vpop.f32.mrb[17].mxu0  ;;  %v2853_v12 = vpop.f32.mrb[17].mxu1  ;;  %v12914_v53 = vadd.f32 %v2851_v42, %v14876_v30 }
 0x9db   :  { %v12899_v3 = vadd.f32 %v2782_v60, %v14867_v34  ;;  %v12915_v24 = vadd.f32 %v2853_v12, %v14872_v17 }
 0x9dc   :  { %v9685_v61 = vmul.f32 -1.442695, %v12898_v38 }
 0x9dd   :  { %v9686_v14 = vmul.f32 -1.442695, %v12899_v3  ;;  %v9687_v37 = vmul.f32 -1.442695, %v12915_v24 }
 0x9de   :  { %13361 = vpow2.f32 %v9685_v61 }
 0x9df   :  { %13363 = vpow2.f32 %v9686_v14 }
 0x9e0   :  { %13365 = vpow2.f32 %v9687_v37 }
 0x9e1   :  { %13367 = vtanh.f32 %v12914_v53 }
 0x9e8   :  { %v13362_v49 = vpop.eup %13361 }
 0x9e9   :  { %v13364_v58 = vpop.eup %13363  ;;  %v2863_v51 = vadd.f32 1.0, %v13362_v49 }
 0x9ea   :  { %v2869_v62 = vadd.f32 1.0, %v13364_v58  ;;  %v13366_v13 = vpop.eup %13365 }
 0x9eb   :  { %13369 = vrcp.f32 %v2863_v51  ;;  %v13368_v18 = vpop.eup %13367  ;;  %v2876_v32 = vadd.f32 1.0, %v13366_v13 }
 0x9ec   :  { %13371 = vrcp.f32 %v2869_v62 }
 0x9ed   :  { %13373 = vrcp.f32 %v2876_v32 }
 0x9f5   :  { %v13370_v59 = vpop.eup %13369 }
 0x9f6   :  { %v13372_v8 = vpop.eup %13371  ;;  %v2880_v15 = vmul.f32 %v13370_v59, %v13368_v18 }
 0x9f7   :  { %v2879_v2 = vmul.f32 0.0, %v13372_v8  ;;  %v13374_v19 = vpop.eup %13373 }
 0x9f9   :  { %v14879_v39 = vadd.f32 %v2880_v15, %v2879_v2 }
 0x9fb   :  { %13375 = vtanh.f32 %v14879_v39 }
 0xa05   :  { %v13376_v42 = vpop.eup %13375 }
 0xa06   :  { %v14882_v38 = vmul.f32 %v13376_v42, %v13374_v19 }
 0xa08   :  { %2954 = vmatmul.mubr.f32.vlgmr.msra.gmra.mrb[18].mxu0 %v14882_v38  ;;  %3025 = vmatmul.mubr.f32.vlgmr.msra.gmra.mrb[18].mxu1 %v14882_v38 }
 0xa09   :  { %10733 = vmatpush1.bf16.msra.mxu0 %v14726_v41  ;;  %10765 = vmatpush1.bf16.msra.mxu1 %v14729_v31 }
 0xa0a   :  { %10735 = vmatprep.subr.bf16.mxu0 %v14734_v54  ;;  %10767 = vmatprep.subr.bf16.mxu1 %v14736_v44 }
 0xa0b   :  { %3128 = vmatprep.mubr.f32.mxu0 %v14025_v0  ;;  %3199 = vmatprep.mubr.f32.mxu1 %v14025_v0 }
 0xa0d   :  { %10737 = vmatpush1.bf16.msra.mxu0 %v14738_v56  ;;  %10769 = vmatpush1.bf16.msra.mxu1 %v14741_v47 }
 0xa0e   :  { %10739 = vmatprep.subr.bf16.mxu0 %v14746_v21  ;;  %10771 = vmatprep.subr.bf16.mxu1 %v14748_v7 }
 0xa11   :  { %10741 = vmatpush1.bf16.msra.mxu0 %v14750_v11  ;;  %10773 = vmatpush1.bf16.msra.mxu1 %v14753_v20 }
 0xa12   :  { %10743 = vmatprep.subr.bf16.mxu0 %v14758_v33  ;;  %10775 = vmatprep.subr.bf16.mxu1 %v14760_v46 }
 0xa15   :  { %10745 = vmatpush1.bf16.msra.mxu0 %v14762_v50  ;;  %10777 = vmatpush1.bf16.msra.mxu1 %v14765_v5 }
 0xa16   :  { %10747 = vmatprep.subr.bf16.mxu0 %v14769_v23  ;;  %10779 = vmatprep.subr.bf16.mxu1 %v14771_v28 }
 0xa19   :  { %10749 = vmatpush1.bf16.msra.mxu0 %v14774_v63  ;;  %10781 = vmatpush1.bf16.msra.mxu1 %v14778_v26 }
 0xa1a   :  { %10751 = vmatprep.subr.bf16.mxu0 %v14780_v29  ;;  %10783 = vmatprep.subr.bf16.mxu1 %v14782_v57 }
 0xa1d   :  { %10753 = vmatpush1.bf16.msra.mxu0 %v14785_v16  ;;  %10785 = vmatpush1.bf16.msra.mxu1 %v14789_v1 }
 0xa1e   :  { %10755 = vmatprep.subr.bf16.mxu0 %v14791_v4  ;;  %10787 = vmatprep.subr.bf16.mxu1 %v14794_v27 }
 0xa21   :  { %10757 = vmatpush1.bf16.msra.mxu0 %v14797_v40  ;;  %10789 = vmatpush1.bf16.msra.mxu1 %v14801_v43 }
 0xa22   :  { %10759 = vmatprep.subr.bf16.mxu0 %v14806_v9  ;;  %10791 = vmatprep.subr.bf16.mxu1 %v14808_v6 }
 0xa25   :  { %10761 = vmatpush1.bf16.msra.mxu0 %v14810_v22  ;;  %10793 = vmatpush1.bf16.msra.mxu1 %v14813_v52 }
 0xa26   :  { %10795 = vmatprep.subr.bf16.mxu0 %v14722_v35  ;;  %10827 = vmatprep.subr.bf16.mxu1 %v14724_v36 }
 0xadb   :  { %v2955_v60 = vpop.f32.mrb[18].mxu0  ;;  %v3026_v12 = vpop.f32.mrb[18].mxu1 }
 0xadc   :  { %v12900_v3 = vadd.f32 %v2955_v60, %v14864_v25  ;;  %v2957_v61 = vpop.f32.mrb[19].mxu0  ;;  %v3028_v14 = vpop.f32.mrb[19].mxu1  ;;  %v12916_v51 = vadd.f32 %v3026_v12, %v14876_v30 }
 0xadd   :  { %v12901_v24 = vadd.f32 %v2957_v61, %v14867_v34  ;;  %v12917_v49 = vadd.f32 %v3028_v14, %v14872_v17 }
 0xade   :  { %v9688_v37 = vmul.f32 -1.442695, %v12900_v3 }
 0xadf   :  { %v9689_v53 = vmul.f32 -1.442695, %v12901_v24  ;;  %v9690_v58 = vmul.f32 -1.442695, %v12917_v49 }
 0xae0   :  { %13377 = vpow2.f32 %v9688_v37 }
 0xae1   :  { %13379 = vpow2.f32 %v9689_v53 }
 0xae2   :  { %13381 = vpow2.f32 %v9690_v58 }
 0xae3   :  { %13383 = vtanh.f32 %v12916_v51 }
 0xaea   :  { %v13378_v62 = vpop.eup %13377 }
 0xaeb   :  { %v13380_v13 = vpop.eup %13379  ;;  %v3038_v18 = vadd.f32 1.0, %v13378_v62 }
 0xaec   :  { %v3044_v59 = vadd.f32 1.0, %v13380_v13  ;;  %v13382_v8 = vpop.eup %13381 }
 0xaed   :  { %13385 = vrcp.f32 %v3038_v18  ;;  %v13384_v15 = vpop.eup %13383  ;;  %v3051_v42 = vadd.f32 1.0, %v13382_v8 }
 0xaee   :  { %13387 = vrcp.f32 %v3044_v59 }
 0xaef   :  { %13389 = vrcp.f32 %v3051_v42 }
 0xaf7   :  { %v13386_v32 = vpop.eup %13385 }
 0xaf8   :  { %v13388_v2 = vpop.eup %13387  ;;  %v3055_v19 = vmul.f32 %v13386_v32, %v13384_v15 }
 0xaf9   :  { %v3054_v60 = vmul.f32 %v13388_v2, %v14879_v39  ;;  %v13390_v12 = vpop.eup %13389 }
 0xafb   :  { %v14925_v3 = vadd.f32 %v3055_v19, %v3054_v60 }
 0xafd   :  { %13391 = vtanh.f32 %v14925_v3 }
 0xb07   :  { %v13392_v61 = vpop.eup %13391 }
 0xb08   :  { %v14928_v14 = vmul.f32 %v13392_v61, %v13390_v12 }
 0xb0a   :  { %3129 = vmatmul.mubr.f32.vlgmr.msra.gmra.mrb[20].mxu0 %v14928_v14  ;;  %3200 = vmatmul.mubr.f32.vlgmr.msra.gmra.mrb[20].mxu1 %v14928_v14 }
 0xb0b   :  { %10797 = vmatpush1.bf16.msra.mxu0 %v14726_v41  ;;  %10829 = vmatpush1.bf16.msra.mxu1 %v14729_v31 }
 0xb0c   :  { %10799 = vmatprep.subr.bf16.mxu0 %v14734_v54  ;;  %10831 = vmatprep.subr.bf16.mxu1 %v14736_v44 }
 0xb0d   :  { %3303 = vmatprep.mubr.f32.mxu0 %v14025_v0  ;;  %3374 = vmatprep.mubr.f32.mxu1 %v14025_v0 }
 0xb0f   :  { %10801 = vmatpush1.bf16.msra.mxu0 %v14738_v56  ;;  %10833 = vmatpush1.bf16.msra.mxu1 %v14741_v47 }
 0xb10   :  { %10803 = vmatprep.subr.bf16.mxu0 %v14746_v21  ;;  %10835 = vmatprep.subr.bf16.mxu1 %v14748_v7 }
 0xb13   :  { %10805 = vmatpush1.bf16.msra.mxu0 %v14750_v11  ;;  %10837 = vmatpush1.bf16.msra.mxu1 %v14753_v20 }
 0xb14   :  { %10807 = vmatprep.subr.bf16.mxu0 %v14758_v33  ;;  %10839 = vmatprep.subr.bf16.mxu1 %v14760_v46 }
 0xb17   :  { %10809 = vmatpush1.bf16.msra.mxu0 %v14762_v50  ;;  %10841 = vmatpush1.bf16.msra.mxu1 %v14765_v5 }
 0xb18   :  { %10811 = vmatprep.subr.bf16.mxu0 %v14769_v23  ;;  %10843 = vmatprep.subr.bf16.mxu1 %v14771_v28 }
 0xb1b   :  { %10813 = vmatpush1.bf16.msra.mxu0 %v14774_v63  ;;  %10845 = vmatpush1.bf16.msra.mxu1 %v14778_v26 }
 0xb1c   :  { %10815 = vmatprep.subr.bf16.mxu0 %v14780_v29  ;;  %10847 = vmatprep.subr.bf16.mxu1 %v14782_v57 }
 0xb1f   :  { %10817 = vmatpush1.bf16.msra.mxu0 %v14785_v16  ;;  %10849 = vmatpush1.bf16.msra.mxu1 %v14789_v1 }
 0xb20   :  { %10819 = vmatprep.subr.bf16.mxu0 %v14791_v4  ;;  %10851 = vmatprep.subr.bf16.mxu1 %v14794_v27 }
 0xb23   :  { %10821 = vmatpush1.bf16.msra.mxu0 %v14797_v40  ;;  %10853 = vmatpush1.bf16.msra.mxu1 %v14801_v43 }
 0xb24   :  { %10823 = vmatprep.subr.bf16.mxu0 %v14806_v9  ;;  %10855 = vmatprep.subr.bf16.mxu1 %v14808_v6 }
 0xb27   :  { %10825 = vmatpush1.bf16.msra.mxu0 %v14810_v22  ;;  %10857 = vmatpush1.bf16.msra.mxu1 %v14813_v52 }
 0xb28   :  { %10859 = vmatprep.subr.bf16.mxu0 %v14722_v35  ;;  %10891 = vmatprep.subr.bf16.mxu1 %v14724_v36 }
 0xbdd   :  { %v3130_v39 = vpop.f32.mrb[20].mxu0  ;;  %v3201_v24 = vpop.f32.mrb[20].mxu1 }
 0xbde   :  { %v12902_v37 = vadd.f32 %v3130_v39, %v14864_v25  ;;  %v3132_v53 = vpop.f32.mrb[21].mxu0  ;;  %v3203_v49 = vpop.f32.mrb[21].mxu1  ;;  %v12918_v59 = vadd.f32 %v3201_v24, %v14876_v30 }
 0xbdf   :  { %v12903_v58 = vadd.f32 %v3132_v53, %v14867_v34  ;;  %v12919_v13 = vadd.f32 %v3203_v49, %v14872_v17 }
 0xbe0   :  { %v9691_v51 = vmul.f32 -1.442695, %v12902_v37 }
 0xbe1   :  { %v9692_v62 = vmul.f32 -1.442695, %v12903_v58  ;;  %v9693_v18 = vmul.f32 -1.442695, %v12919_v13 }
 0xbe2   :  { %13393 = vpow2.f32 %v9691_v51 }
 0xbe3   :  { %13395 = vpow2.f32 %v9692_v62 }
 0xbe4   :  { %13397 = vpow2.f32 %v9693_v18 }
 0xbe5   :  { %13399 = vtanh.f32 %v12918_v59 }
 0xbec   :  { %v13394_v8 = vpop.eup %13393 }
 0xbed   :  { %v13396_v15 = vpop.eup %13395  ;;  %v3213_v32 = vadd.f32 1.0, %v13394_v8 }
 0xbee   :  { %v3219_v2 = vadd.f32 1.0, %v13396_v15  ;;  %v13398_v19 = vpop.eup %13397 }
 0xbef   :  { %13401 = vrcp.f32 %v3213_v32  ;;  %v13400_v42 = vpop.eup %13399  ;;  %v3226_v39 = vadd.f32 1.0, %v13398_v19 }
 0xbf0   :  { %13403 = vrcp.f32 %v3219_v2 }
 0xbf1   :  { %13405 = vrcp.f32 %v3226_v39 }
 0xbf9   :  { %v13402_v60 = vpop.eup %13401 }
 0xbfa   :  { %v13404_v12 = vpop.eup %13403  ;;  %v3230_v61 = vmul.f32 %v13402_v60, %v13400_v42 }
 0xbfb   :  { %v3229_v37 = vmul.f32 %v13404_v12, %v14925_v3  ;;  %v13406_v24 = vpop.eup %13405 }
 0xbfd   :  { %v14971_v53 = vadd.f32 %v3230_v61, %v3229_v37 }
 0xbff   :  { %13407 = vtanh.f32 %v14971_v53 }
 0xc09   :  { %v13408_v49 = vpop.eup %13407 }
 0xc0a   :  { %v14974_v58 = vmul.f32 %v13408_v49, %v13406_v24 }
 0xc0c   :  { %3304 = vmatmul.mubr.f32.vlgmr.msra.gmra.mrb[22].mxu0 %v14974_v58  ;;  %3375 = vmatmul.mubr.f32.vlgmr.msra.gmra.mrb[22].mxu1 %v14974_v58 }
 0xc0d   :  { %10861 = vmatpush1.bf16.msra.mxu0 %v14726_v41  ;;  %10893 = vmatpush1.bf16.msra.mxu1 %v14729_v31 }
 0xc0e   :  { %10863 = vmatprep.subr.bf16.mxu0 %v14734_v54  ;;  %10895 = vmatprep.subr.bf16.mxu1 %v14736_v44 }
 0xc0f   :  { %3478 = vmatprep.mubr.f32.mxu0 %v14025_v0  ;;  %3549 = vmatprep.mubr.f32.mxu1 %v14025_v0 }
 0xc11   :  { %10865 = vmatpush1.bf16.msra.mxu0 %v14738_v56  ;;  %10897 = vmatpush1.bf16.msra.mxu1 %v14741_v47 }
 0xc12   :  { %10867 = vmatprep.subr.bf16.mxu0 %v14746_v21  ;;  %10899 = vmatprep.subr.bf16.mxu1 %v14748_v7 }
 0xc15   :  { %10869 = vmatpush1.bf16.msra.mxu0 %v14750_v11  ;;  %10901 = vmatpush1.bf16.msra.mxu1 %v14753_v20 }
 0xc16   :  { %10871 = vmatprep.subr.bf16.mxu0 %v14758_v33  ;;  %10903 = vmatprep.subr.bf16.mxu1 %v14760_v46 }
 0xc19   :  { %10873 = vmatpush1.bf16.msra.mxu0 %v14762_v50  ;;  %10905 = vmatpush1.bf16.msra.mxu1 %v14765_v5 }
 0xc1a   :  { %10875 = vmatprep.subr.bf16.mxu0 %v14769_v23  ;;  %10907 = vmatprep.subr.bf16.mxu1 %v14771_v28 }
 0xc1d   :  { %10877 = vmatpush1.bf16.msra.mxu0 %v14774_v63  ;;  %10909 = vmatpush1.bf16.msra.mxu1 %v14778_v26 }
 0xc1e   :  { %10879 = vmatprep.subr.bf16.mxu0 %v14780_v29  ;;  %10911 = vmatprep.subr.bf16.mxu1 %v14782_v57 }
 0xc21   :  { %10881 = vmatpush1.bf16.msra.mxu0 %v14785_v16  ;;  %10913 = vmatpush1.bf16.msra.mxu1 %v14789_v1 }
 0xc22   :  { %10883 = vmatprep.subr.bf16.mxu0 %v14791_v4  ;;  %10915 = vmatprep.subr.bf16.mxu1 %v14794_v27 }
 0xc25   :  { %10885 = vmatpush1.bf16.msra.mxu0 %v14797_v40  ;;  %10917 = vmatpush1.bf16.msra.mxu1 %v14801_v43 }
 0xc26   :  { %10887 = vmatprep.subr.bf16.mxu0 %v14806_v9  ;;  %10919 = vmatprep.subr.bf16.mxu1 %v14808_v6 }
 0xc29   :  { %10889 = vmatpush1.bf16.msra.mxu0 %v14810_v22  ;;  %10921 = vmatpush1.bf16.msra.mxu1 %v14813_v52 }
 0xc2a   :  { %10923 = vmatprep.subr.bf16.mxu0 %v14722_v35  ;;  %10955 = vmatprep.subr.bf16.mxu1 %v14724_v36 }
 0xcdf   :  { %v3305_v3 = vpop.f32.mrb[22].mxu0  ;;  %v3376_v51 = vpop.f32.mrb[22].mxu1 }
 0xce0   :  { %v12904_v62 = vadd.f32 %v3305_v3, %v14864_v25  ;;  %v3307_v13 = vpop.f32.mrb[23].mxu0  ;;  %v3378_v18 = vpop.f32.mrb[23].mxu1  ;;  %v12920_v19 = vadd.f32 %v3376_v51, %v14876_v30 }
 0xce1   :  { %v12905_v59 = vadd.f32 %v3307_v13, %v14867_v34  ;;  %v12921_v32 = vadd.f32 %v3378_v18, %v14872_v17 }
 0xce2   :  { %v9694_v8 = vmul.f32 -1.442695, %v12904_v62 }
 0xce3   :  { %v9695_v15 = vmul.f32 -1.442695, %v12905_v59  ;;  %v9696_v2 = vmul.f32 -1.442695, %v12921_v32 }
 0xce4   :  { %13409 = vpow2.f32 %v9694_v8 }
 0xce5   :  { %13411 = vpow2.f32 %v9695_v15 }
 0xce6   :  { %13413 = vpow2.f32 %v9696_v2 }
 0xce7   :  { %13415 = vtanh.f32 %v12920_v19 }
 0xcee   :  { %v13410_v42 = vpop.eup %13409 }
 0xcef   :  { %v13412_v60 = vpop.eup %13411  ;;  %v3388_v12 = vadd.f32 1.0, %v13410_v42 }
 0xcf0   :  { %v3394_v61 = vadd.f32 1.0, %v13412_v60  ;;  %v13414_v39 = vpop.eup %13413 }
 0xcf1   :  { %13417 = vrcp.f32 %v3388_v12  ;;  %v13416_v37 = vpop.eup %13415  ;;  %v3401_v62 = vadd.f32 1.0, %v13414_v39 }
 0xcf2   :  { %13419 = vrcp.f32 %v3394_v61 }
 0xcf3   :  { %13421 = vrcp.f32 %v3401_v62 }
 0xcfb   :  { %v13418_v24 = vpop.eup %13417 }
 0xcfc   :  { %v13420_v49 = vpop.eup %13419  ;;  %v3405_v3 = vmul.f32 %v13418_v24, %v13416_v37 }
 0xcfd   :  { %v3404_v13 = vmul.f32 %v13420_v49, %v14971_v53  ;;  %v13422_v51 = vpop.eup %13421 }
 0xcff   :  { %v15017_v18 = vadd.f32 %v3405_v3, %v3404_v13 }
 0xd01   :  { %13423 = vtanh.f32 %v15017_v18 }
 0xd0b   :  { %v13424_v59 = vpop.eup %13423 }
 0xd0c   :  { %v15020_v8 = vmul.f32 %v13424_v59, %v13422_v51 }
 0xd0e   :  { %3479 = vmatmul.mubr.f32.vlgmr.msra.gmra.mrb[24].mxu0 %v15020_v8  ;;  %3550 = vmatmul.mubr.f32.vlgmr.msra.gmra.mrb[24].mxu1 %v15020_v8 }
 0xd0f   :  { %10925 = vmatpush1.bf16.msra.mxu0 %v14726_v41  ;;  %10957 = vmatpush1.bf16.msra.mxu1 %v14729_v31 }
 0xd10   :  { %10927 = vmatprep.subr.bf16.mxu0 %v14734_v54  ;;  %10959 = vmatprep.subr.bf16.mxu1 %v14736_v44 }
 0xd11   :  { %3653 = vmatprep.mubr.f32.mxu0 %v14025_v0  ;;  %3724 = vmatprep.mubr.f32.mxu1 %v14025_v0 }
 0xd13   :  { %10929 = vmatpush1.bf16.msra.mxu0 %v14738_v56  ;;  %10961 = vmatpush1.bf16.msra.mxu1 %v14741_v47 }
 0xd14   :  { %10931 = vmatprep.subr.bf16.mxu0 %v14746_v21  ;;  %10963 = vmatprep.subr.bf16.mxu1 %v14748_v7 }
 0xd17   :  { %10933 = vmatpush1.bf16.msra.mxu0 %v14750_v11  ;;  %10965 = vmatpush1.bf16.msra.mxu1 %v14753_v20 }
 0xd18   :  { %10935 = vmatprep.subr.bf16.mxu0 %v14758_v33  ;;  %10967 = vmatprep.subr.bf16.mxu1 %v14760_v46 }
 0xd1b   :  { %10937 = vmatpush1.bf16.msra.mxu0 %v14762_v50  ;;  %10969 = vmatpush1.bf16.msra.mxu1 %v14765_v5 }
 0xd1c   :  { %10939 = vmatprep.subr.bf16.mxu0 %v14769_v23  ;;  %10971 = vmatprep.subr.bf16.mxu1 %v14771_v28 }
 0xd1f   :  { %10941 = vmatpush1.bf16.msra.mxu0 %v14774_v63  ;;  %10973 = vmatpush1.bf16.msra.mxu1 %v14778_v26 }
 0xd20   :  { %10943 = vmatprep.subr.bf16.mxu0 %v14780_v29  ;;  %10975 = vmatprep.subr.bf16.mxu1 %v14782_v57 }
 0xd23   :  { %10945 = vmatpush1.bf16.msra.mxu0 %v14785_v16  ;;  %10977 = vmatpush1.bf16.msra.mxu1 %v14789_v1 }
 0xd24   :  { %10947 = vmatprep.subr.bf16.mxu0 %v14791_v4  ;;  %10979 = vmatprep.subr.bf16.mxu1 %v14794_v27 }
 0xd27   :  { %10949 = vmatpush1.bf16.msra.mxu0 %v14797_v40  ;;  %10981 = vmatpush1.bf16.msra.mxu1 %v14801_v43 }
 0xd28   :  { %10951 = vmatprep.subr.bf16.mxu0 %v14806_v9  ;;  %10983 = vmatprep.subr.bf16.mxu1 %v14808_v6 }
 0xd2b   :  { %10953 = vmatpush1.bf16.msra.mxu0 %v14810_v22  ;;  %10985 = vmatpush1.bf16.msra.mxu1 %v14813_v52 }
 0xd2c   :  { %10987 = vmatprep.subr.bf16.mxu0 %v14722_v35  ;;  %11019 = vmatprep.subr.bf16.mxu1 %v14724_v36 }
 0xde1   :  { %v3480_v53 = vpop.f32.mrb[24].mxu0  ;;  %v3551_v15 = vpop.f32.mrb[24].mxu1 }
 0xde2   :  { %v12906_v32 = vadd.f32 %v3480_v53, %v14864_v25  ;;  %v3482_v2 = vpop.f32.mrb[25].mxu0  ;;  %v3553_v19 = vpop.f32.mrb[25].mxu1  ;;  %v12922_v37 = vadd.f32 %v3551_v15, %v14876_v30 }
 0xde3   :  { %v12907_v42 = vadd.f32 %v3482_v2, %v14867_v34  ;;  %v12923_v61 = vadd.f32 %v3553_v19, %v14872_v17 }
 0xde4   :  { %v9697_v60 = vmul.f32 -1.442695, %v12906_v32 }
 0xde5   :  { %v9698_v12 = vmul.f32 -1.442695, %v12907_v42  ;;  %v9699_v39 = vmul.f32 -1.442695, %v12923_v61 }
 0xde6   :  { %13425 = vpow2.f32 %v9697_v60 }
 0xde7   :  { %13427 = vpow2.f32 %v9698_v12 }
 0xde8   :  { %13429 = vpow2.f32 %v9699_v39 }
 0xde9   :  { %13431 = vtanh.f32 %v12922_v37 }
 0xdf0   :  { %v13426_v24 = vpop.eup %13425 }
 0xdf1   :  { %v13428_v49 = vpop.eup %13427  ;;  %v3563_v3 = vadd.f32 1.0, %v13426_v24 }
 0xdf2   :  { %v3569_v62 = vadd.f32 1.0, %v13428_v49  ;;  %v13430_v13 = vpop.eup %13429 }
 0xdf3   :  { %13433 = vrcp.f32 %v3563_v3  ;;  %v13432_v51 = vpop.eup %13431  ;;  %v3576_v2 = vadd.f32 1.0, %v13430_v13 }
 0xdf4   :  { %13435 = vrcp.f32 %v3569_v62 }
 0xdf5   :  { %13437 = vrcp.f32 %v3576_v2 }
 0xdfd   :  { %v13434_v59 = vpop.eup %13433 }
 0xdfe   :  { %v13436_v53 = vpop.eup %13435  ;;  %v3580_v32 = vmul.f32 %v13434_v59, %v13432_v51 }
 0xdff   :  { %v3579_v42 = vmul.f32 %v13436_v53, %v15017_v18  ;;  %v13438_v15 = vpop.eup %13437 }
 0xe01   :  { %v15063_v19 = vadd.f32 %v3580_v32, %v3579_v42 }
 0xe03   :  { %13439 = vtanh.f32 %v15063_v19 }
 0xe0d   :  { %v13440_v60 = vpop.eup %13439 }
 0xe0e   :  { %v15066_v12 = vmul.f32 %v13440_v60, %v13438_v15 }
 0xe10   :  { %3654 = vmatmul.mubr.f32.vlgmr.msra.gmra.mrb[26].mxu0 %v15066_v12  ;;  %3725 = vmatmul.mubr.f32.vlgmr.msra.gmra.mrb[26].mxu1 %v15066_v12 }
 0xe11   :  { %10989 = vmatpush1.bf16.msra.mxu0 %v14726_v41  ;;  %11021 = vmatpush1.bf16.msra.mxu1 %v14729_v31 }
 0xe12   :  { %10991 = vmatprep.subr.bf16.mxu0 %v14734_v54  ;;  %11023 = vmatprep.subr.bf16.mxu1 %v14736_v44 }
 0xe13   :  { %3828 = vmatprep.mubr.f32.mxu0 %v14025_v0  ;;  %3899 = vmatprep.mubr.f32.mxu1 %v14025_v0 }
 0xe15   :  { %10993 = vmatpush1.bf16.msra.mxu0 %v14738_v56  ;;  %11025 = vmatpush1.bf16.msra.mxu1 %v14741_v47 }
 0xe16   :  { %10995 = vmatprep.subr.bf16.mxu0 %v14746_v21  ;;  %11027 = vmatprep.subr.bf16.mxu1 %v14748_v7 }
 0xe19   :  { %10997 = vmatpush1.bf16.msra.mxu0 %v14750_v11  ;;  %11029 = vmatpush1.bf16.msra.mxu1 %v14753_v20 }
 0xe1a   :  { %10999 = vmatprep.subr.bf16.mxu0 %v14758_v33  ;;  %11031 = vmatprep.subr.bf16.mxu1 %v14760_v46 }
 0xe1d   :  { %11001 = vmatpush1.bf16.msra.mxu0 %v14762_v50  ;;  %11033 = vmatpush1.bf16.msra.mxu1 %v14765_v5 }
 0xe1e   :  { %11003 = vmatprep.subr.bf16.mxu0 %v14769_v23  ;;  %11035 = vmatprep.subr.bf16.mxu1 %v14771_v28 }
 0xe21   :  { %11005 = vmatpush1.bf16.msra.mxu0 %v14774_v63  ;;  %11037 = vmatpush1.bf16.msra.mxu1 %v14778_v26 }
 0xe22   :  { %11007 = vmatprep.subr.bf16.mxu0 %v14780_v29  ;;  %11039 = vmatprep.subr.bf16.mxu1 %v14782_v57 }
 0xe25   :  { %11009 = vmatpush1.bf16.msra.mxu0 %v14785_v16  ;;  %11041 = vmatpush1.bf16.msra.mxu1 %v14789_v1 }
 0xe26   :  { %11011 = vmatprep.subr.bf16.mxu0 %v14791_v4  ;;  %11043 = vmatprep.subr.bf16.mxu1 %v14794_v27 }
 0xe29   :  { %11013 = vmatpush1.bf16.msra.mxu0 %v14797_v40  ;;  %11045 = vmatpush1.bf16.msra.mxu1 %v14801_v43 }
 0xe2a   :  { %11015 = vmatprep.subr.bf16.mxu0 %v14806_v9  ;;  %11047 = vmatprep.subr.bf16.mxu1 %v14808_v6 }
 0xe2d   :  { %11017 = vmatpush1.bf16.msra.mxu0 %v14810_v22  ;;  %11049 = vmatpush1.bf16.msra.mxu1 %v14813_v52 }
 0xe2e   :  { %11051 = vmatprep.subr.bf16.mxu0 %v14722_v35  ;;  %11083 = vmatprep.subr.bf16.mxu1 %v14724_v36 }
 0xee3   :  { %v3655_v18 = vpop.f32.mrb[26].mxu0  ;;  %v3726_v61 = vpop.f32.mrb[26].mxu1 }
 0xee4   :  { %v12908_v39 = vadd.f32 %v3655_v18, %v14864_v25  ;;  %v3657_v37 = vpop.f32.mrb[27].mxu0  ;;  %v3728_v24 = vpop.f32.mrb[27].mxu1  ;;  %v12924_v59 = vadd.f32 %v3726_v61, %v14876_v30 }
 0xee5   :  { %v12909_v49 = vadd.f32 %v3657_v37, %v14867_v34  ;;  %v12925_v13 = vadd.f32 %v3728_v24, %v14872_v17 }
 0xee6   :  { %v9700_v3 = vmul.f32 -1.442695, %v12908_v39 }
 0xee7   :  { %v9701_v62 = vmul.f32 -1.442695, %v12909_v49  ;;  %v9702_v51 = vmul.f32 -1.442695, %v12925_v13  ;;  %v4125_v13 = vld [vmem:[#allocation8 + $0x230] sm:$0xff] }
 0xee8   :  { %13441 = vpow2.f32 %v9700_v3 }
 0xee9   :  { %13443 = vpow2.f32 %v9701_v62  ;;  %v4121_v62 = vld [vmem:[#allocation8 + $0x210] sm:$0xff] }
 0xeea   :  { %13445 = vpow2.f32 %v9702_v51  ;;  %v4128_v51 = vld [vmem:[#allocation8 + $0x248] sm:$0xff] }
 0xeeb   :  { %13447 = vtanh.f32 %v12924_v59  ;;  %v4132_v59 = vld [vmem:[#allocation8 + $0x268] sm:$0xff] }
 0xef2   :  { %v13442_v35 = vpop.eup %13441 }
 0xef3   :  { %v13444_v53 = vpop.eup %13443  ;;  %v3738_v36 = vadd.f32 1.0, %v13442_v35  ;;  %v4130_v35 = vld [vmem:[#allocation8 + $0x258] sm:$0xff] }
 0xef4   :  { %v3744_v32 = vadd.f32 1.0, %v13444_v53  ;;  %v13446_v2 = vpop.eup %13445  ;;  %v4134_v53 = vld [vmem:[#allocation8 + $0x278] sm:$0xff] }
 0xef5   :  { %13449 = vrcp.f32 %v3738_v36  ;;  %v13448_v42 = vpop.eup %13447  ;;  %v3751_v39 = vadd.f32 1.0, %v13446_v2 }
 0xef6   :  { %13451 = vrcp.f32 %v3744_v32 }
 0xef7   :  { %13453 = vrcp.f32 %v3751_v39  ;;  %v11118_v39 = vpack.c.bf16 %v4132_v59, %v4128_v51  ;;  %v4153_v59 = vld [vmem:[#allocation8 + $0x310] sm:$0xff] }
 0xeff   :  { %v13450_v15 = vpop.eup %13449 }
 0xf00   :  { %v13452_v60 = vpop.eup %13451  ;;  %v3755_v18 = vmul.f32 %v13450_v15, %v13448_v42  ;;  %v11148_v42 = vpack.c.bf16 %v4125_v13, %v4121_v62  ;;  %v4127_v15 = vld [vmem:[#allocation8 + $0x240] sm:$0xff] }
 0xf01   :  { %v3754_v37 = vmul.f32 %v13452_v60, %v15063_v19  ;;  %v13454_v61 = vpop.eup %13453  ;;  %v4123_v19 = vld [vmem:[#allocation8 + $0x220] sm:$0xff] }
 0xf02   :  { %v4131_v60 = vld [vmem:[#allocation8 + $0x260] sm:$0xff] }
 0xf03   :  { %v15109_v24 = vadd.f32 %v3755_v18, %v3754_v37  ;;  %v11150_v37 = vpack.c.bf16 %v4134_v53, %v4130_v35  ;;  %v4155_v62 = vld [vmem:[#allocation8 + $0x320] sm:$0xff]  ;;  %v4157_v35 = vld [vmem:[#allocation8 + $0x330] sm:$0xff]  ;;  %v4160_v53 = vld [vmem:[#allocation8 + $0x348] sm:$0xff] }
 0xf05   :  { %13455 = vtanh.f32 %v15109_v24 }
 0xf0f   :  { %v13456_v49 = vpop.eup %13455 }
 0xf10   :  { %v15112_v3 = vmul.f32 %v13456_v49, %v13454_v61  ;;  %v4133_v61 = vld [vmem:[#allocation8 + $0x270] sm:$0xff]  ;;  %v4136_v49 = vld [vmem:[#allocation8 + $0x288] sm:$0xff] }
 0xf12   :  { %3829 = vmatmul.mubr.f32.vlgmr.msra.gmra.mrb[28].mxu0 %v15112_v3  ;;  %3900 = vmatmul.mubr.f32.vlgmr.msra.gmra.mrb[28].mxu1 %v15112_v3 }
 0xf13   :  { %11053 = vmatpush1.bf16.msra.mxu0 %v14726_v41  ;;  %11085 = vmatpush1.bf16.msra.mxu1 %v14729_v31  ;;  %v4120_v41 = vld [vmem:[#allocation8 + $0x208] sm:$0xff] }
 0xf14   :  { %11055 = vmatprep.subr.bf16.mxu0 %v14734_v54  ;;  %11087 = vmatprep.subr.bf16.mxu1 %v14736_v44  ;;  %v4124_v31 = vld [vmem:[#allocation8 + $0x228] sm:$0xff]  ;;  %v4122_v54 = vld [vmem:[#allocation8 + $0x218] sm:$0xff] }
 0xf15   :  { %4003 = vmatprep.mubr.f32.mxu0 %v14025_v0  ;;  %4074 = vmatprep.mubr.f32.mxu1 %v14025_v0  ;;  %v11114_v44 = vpack.c.bf16 %v4124_v31, %v4120_v41  ;;  %v4140_v41 = vld [vmem:[#allocation8 + $0x2a8] sm:$0xff]  ;;  %v4138_v31 = vld [vmem:[#allocation8 + $0x298] sm:$0xff] }
 0xf17   :  { %11057 = vmatpush1.bf16.msra.mxu0 %v14738_v56  ;;  %11089 = vmatpush1.bf16.msra.mxu1 %v14741_v47  ;;  %v4126_v56 = vld [vmem:[#allocation8 + $0x238] sm:$0xff] }
 0xf18   :  { %11059 = vmatprep.subr.bf16.mxu0 %v14746_v21  ;;  %11091 = vmatprep.subr.bf16.mxu1 %v14748_v7  ;;  %v11146_v47 = vpack.c.bf16 %v4126_v56, %v4122_v54  ;;  %v4142_v54 = vld [vmem:[#allocation8 + $0x2b8] sm:$0xff] }
 0xf1b   :  { %11061 = vmatpush1.bf16.msra.mxu0 %v14750_v11  ;;  %11093 = vmatpush1.bf16.msra.mxu1 %v14753_v20 }
 0xf1c   :  { %11063 = vmatprep.subr.bf16.mxu0 %v14758_v33  ;;  %11095 = vmatprep.subr.bf16.mxu1 %v14760_v46 }
 0xf1f   :  { %11065 = vmatpush1.bf16.msra.mxu0 %v14762_v50  ;;  %11097 = vmatpush1.bf16.msra.mxu1 %v14765_v5 }
 0xf20   :  { %11067 = vmatprep.subr.bf16.mxu0 %v14769_v23  ;;  %11099 = vmatprep.subr.bf16.mxu1 %v14771_v28 }
 0xf23   :  { %11069 = vmatpush1.bf16.msra.mxu0 %v14774_v63  ;;  %11101 = vmatpush1.bf16.msra.mxu1 %v14778_v26 }
 0xf24   :  { %11071 = vmatprep.subr.bf16.mxu0 %v14780_v29  ;;  %11103 = vmatprep.subr.bf16.mxu1 %v14782_v57 }
 0xf27   :  { %11073 = vmatpush1.bf16.msra.mxu0 %v14785_v16  ;;  %11105 = vmatpush1.bf16.msra.mxu1 %v14789_v1 }
 0xf28   :  { %11075 = vmatprep.subr.bf16.mxu0 %v14791_v4  ;;  %11107 = vmatprep.subr.bf16.mxu1 %v14794_v27 }
 0xf2b   :  { %11077 = vmatpush1.bf16.msra.mxu0 %v14797_v40  ;;  %11109 = vmatpush1.bf16.msra.mxu1 %v14801_v43 }
 0xf2c   :  { %11079 = vmatprep.subr.bf16.mxu0 %v14806_v9  ;;  %11111 = vmatprep.subr.bf16.mxu1 %v14808_v6 }
 0xf2f   :  { %11081 = vmatpush1.bf16.msra.mxu0 %v14810_v22  ;;  %11113 = vmatpush1.bf16.msra.mxu1 %v14813_v52  ;;  %v4119_v52 = vld [vmem:[#allocation8 + $0x200] sm:$0xff] }
 0xf30   :  { %11115 = vmatprep.subr.bf16.mxu0 %v11114_v44  ;;  %11147 = vmatprep.subr.bf16.mxu1 %v11146_v47  ;;  %v11116_v2 = vpack.c.bf16 %v4123_v19, %v4119_v52  ;;  %v11120_v44 = vpack.c.bf16 %v4131_v60, %v4127_v15  ;;  %v4135_v47 = vld [vmem:[#allocation8 + $0x280] sm:$0xff]  ;;  %v11164_v15 = vpack.c.bf16 %v4157_v35, %v4153_v59  ;;  %v4476_v59 = vld [vmem:[#allocation6 + $0x458] sm:$0xff] }
 0xf31   :  { %v4151_v19 = vld [vmem:[#allocation8 + $0x300] sm:$0xff] }
 0xf32   :  { %v4159_v60 = vld [vmem:[#allocation8 + $0x340] sm:$0xff] }
 0xfe5   :  { %v3830_v21 = vpop.f32.mrb[28].mxu0  ;;  %v3901_v7 = vpop.f32.mrb[28].mxu1 }
 0xfe6   :  { %v12910_v11 = vadd.f32 %v3830_v21, %v14864_v25  ;;  %v3832_v20 = vpop.f32.mrb[29].mxu0  ;;  %v3903_v33 = vpop.f32.mrb[29].mxu1  ;;  %v12926_v63 = vadd.f32 %v3901_v7, %v14876_v30  ;;  %v4139_v21 = vld [vmem:[#allocation8 + $0x2a0] sm:$0xff]  ;;  %v11122_v7 = vpack.c.bf16 %v4140_v41, %v4136_v49  ;;  %v4165_v49 = vld [vmem:[#allocation8 + $0x370] sm:$0xff]  ;;  %v4168_v41 = vld [vmem:[#allocation8 + $0x388] sm:$0xff] }
 0xfe7   :  { %v12911_v46 = vadd.f32 %v3832_v20, %v14867_v34  ;;  %v12927_v23 = vadd.f32 %v3903_v33, %v14872_v17  ;;  %v4137_v20 = vld [vmem:[#allocation8 + $0x290] sm:$0xff] }
 0xfe8   :  { %v9703_v50 = vmul.f32 -1.442695, %v12910_v11  ;;  %v11154_v11 = vpack.c.bf16 %v4142_v54, %v4138_v31  ;;  %v4141_v33 = vld [vmem:[#allocation8 + $0x2b0] sm:$0xff]  ;;  %v4172_v31 = vld [vmem:[#allocation8 + $0x3a8] sm:$0xff]  ;;  %v4170_v54 = vld [vmem:[#allocation8 + $0x398] sm:$0xff] }
 0xfe9   :  { %v9704_v5 = vmul.f32 -1.442695, %v12911_v46  ;;  %v9705_v28 = vmul.f32 -1.442695, %v12927_v23  ;;  %v4144_v46 = vld [vmem:[#allocation8 + $0x2c8] sm:$0xff]  ;;  %v4150_v23 = vld [vmem:[#allocation8 + $0x2f8] sm:$0xff] }
 0xfea   :  { %13457 = vpow2.f32 %v9703_v50  ;;  %v4148_v50 = vld [vmem:[#allocation8 + $0x2e8] sm:$0xff] }
 0xfeb   :  { %13459 = vpow2.f32 %v9704_v5  ;;  %v4146_v5 = vld [vmem:[#allocation8 + $0x2d8] sm:$0xff] }
 0xfec   :  { %13461 = vpow2.f32 %v9705_v28  ;;  %v11124_v28 = vpack.c.bf16 %v4139_v21, %v4135_v47  ;;  %v4167_v21 = vld [vmem:[#allocation8 + $0x380] sm:$0xff] }
 0xfed   :  { %13463 = vtanh.f32 %v12926_v63  ;;  %v11156_v63 = vpack.c.bf16 %v4141_v33, %v4137_v20  ;;  %v4169_v33 = vld [vmem:[#allocation8 + $0x390] sm:$0xff] }
 0xff4   :  { %v13458_v26 = vpop.eup %13457 }
 0xff5   :  { %v13460_v29 = vpop.eup %13459  ;;  %v3913_v57 = vadd.f32 1.0, %v13458_v26  ;;  %v4143_v26 = vld [vmem:[#allocation8 + $0x2c0] sm:$0xff] }
 0xff6   :  { %v3919_v16 = vadd.f32 1.0, %v13460_v29  ;;  %v13462_v1 = vpop.eup %13461  ;;  %v4147_v29 = vld [vmem:[#allocation8 + $0x2e0] sm:$0xff] }
 0xff7   :  { %13465 = vrcp.f32 %v3913_v57  ;;  %v13464_v4 = vpop.eup %13463  ;;  %v3926_v9 = vadd.f32 1.0, %v13462_v1  ;;  %v11126_v57 = vpack.c.bf16 %v4148_v50, %v4144_v46  ;;  %v4145_v1 = vld [vmem:[#allocation8 + $0x2d0] sm:$0xff]  ;;  %v4176_v50 = vld [vmem:[#allocation8 + $0x3c8] sm:$0xff] }
 0xff8   :  { %13467 = vrcp.f32 %v3919_v16  ;;  %v11158_v16 = vpack.c.bf16 %v4150_v23, %v4146_v5  ;;  %v4173_v46 = vld [vmem:[#allocation8 + $0x3b0] sm:$0xff]  ;;  %v4180_v5 = vld [vmem:[#allocation8 + $0x3e8] sm:$0xff]  ;;  %v4178_v23 = vld [vmem:[#allocation8 + $0x3d8] sm:$0xff] }
 0xff9   :  { %13469 = vrcp.f32 %v3926_v9  ;;  %v4158_v9 = vld [vmem:[#allocation8 + $0x338] sm:$0xff] }
0x1001   :  { %v13466_v27 = vpop.eup %13465 }
0x1002   :  { %v13468_v40 = vpop.eup %13467  ;;  %v3930_v43 = vmul.f32 %v13466_v27, %v13464_v4  ;;  %v4149_v4 = vld [vmem:[#allocation8 + $0x2f0] sm:$0xff]  ;;  %v4152_v27 = vld [vmem:[#allocation8 + $0x308] sm:$0xff] }
0x1003   :  { %v3929_v6 = vmul.f32 %v13468_v40, %v15109_v24  ;;  %v13470_v36 = vpop.eup %13469  ;;  %v4129_v24 = vld [vmem:[#allocation8 + $0x250] sm:$0xff]  ;;  %v4156_v40 = vld [vmem:[#allocation8 + $0x328] sm:$0xff]  ;;  %v11160_v52 = vpack.c.bf16 %v4149_v4, %v4145_v1  ;;  %v4179_v1 = vld [vmem:[#allocation8 + $0x3e0] sm:$0xff] }
0x1004   :  { %v11152_v56 = vpack.c.bf16 %v4133_v61, %v4129_v24  ;;  %v11130_v13 = vpack.c.bf16 %v4156_v40, %v4152_v27  ;;  %v4161_v61 = vld [vmem:[#allocation8 + $0x350] sm:$0xff] }
0x1005   :  { %v15153_v22 = vadd.f32 %v3930_v43, %v3929_v6  ;;  %v4154_v43 = vld [vmem:[#allocation8 + $0x318] sm:$0xff]  ;;  %v11128_v6 = vpack.c.bf16 %v4147_v29, %v4143_v26  ;;  %v11168_v47 = vpack.c.bf16 %v4165_v49, %v4161_v61  ;;  %v11172_v26 = vpack.c.bf16 %v4173_v46, %v4169_v33  ;;  %v4175_v29 = vld [vmem:[#allocation8 + $0x3c0] sm:$0xff]  ;;  %v4177_v4 = vld [vmem:[#allocation8 + $0x3d0] sm:$0xff] }
0x1006   :  { %v11162_v51 = vpack.c.bf16 %v4158_v9, %v4154_v43  ;;  %v4181_v27 = vld [vmem:[#allocation8 + $0x3f0] sm:$0xff]  ;;  %v11144_v40 = vpack.c.bf16 %v4179_v1, %v4175_v29  ;;  %v4465_v9 = vld [vmem:[#allocation6 + $0x400] sm:$0xff]  ;;  %v4484_v61 = vld [vmem:[#allocation6 + $0x498] sm:$0xff] }
0x1007   :  { %13471 = vtanh.f32 %v15153_v22  ;;  %v11176_v43 = vpack.c.bf16 %v4181_v27, %v4177_v4  ;;  %v4492_v33 = vld [vmem:[#allocation6 + $0x4d8] sm:$0xff]  ;;  %v4495_v29 = vld [vmem:[#allocation6 + $0x4f0] sm:$0xff]  ;;  %v4502_v1 = vld [vmem:[#allocation6 + $0x528] sm:$0xff] }
0x1008   :  { %v4500_v4 = vld [vmem:[#allocation6 + $0x518] sm:$0xff] }
0x1009   :  { %v4504_v27 = vld [vmem:[#allocation6 + $0x538] sm:$0xff] }
0x1011   :  { %v13472_v32 = vpop.eup %13471 }
0x1012   :  { %v15156_v18 = vmul.f32 %v13472_v32, %v13470_v36  ;;  %v4164_v36 = vld [vmem:[#allocation8 + $0x368] sm:$0xff]  ;;  %v4162_v32 = vld [vmem:[#allocation8 + $0x358] sm:$0xff] }
0x1014   :  { %4004 = vmatmul.mubr.f32.vlgmr.msra.gmra.mrb[30].mxu0 %v15156_v18  ;;  %4075 = vmatmul.mubr.f32.vlgmr.msra.gmra.mrb[30].mxu1 %v15156_v18 }
0x1015   :  { %11117 = vmatpush1.bf16.msra.mxu0 %v11116_v2  ;;  %11149 = vmatpush1.bf16.msra.mxu1 %v11148_v42  ;;  %v4166_v2 = vld [vmem:[#allocation8 + $0x378] sm:$0xff]  ;;  %v11132_v42 = vpack.c.bf16 %v4155_v62, %v4151_v19  ;;  %v4467_v19 = vld [vmem:[#allocation6 + $0x410] sm:$0xff] }
0x1016   :  { %11119 = vmatprep.subr.bf16.mxu0 %v11118_v39  ;;  %11151 = vmatprep.subr.bf16.mxu1 %v11150_v37  ;;  %v4163_v39 = vld [vmem:[#allocation8 + $0x360] sm:$0xff]  ;;  %v11134_v37 = vpack.c.bf16 %v4164_v36, %v4160_v53  ;;  %v11166_v24 = vpack.c.bf16 %v4166_v2, %v4162_v32  ;;  %v4471_v62 = vld [vmem:[#allocation6 + $0x430] sm:$0xff]  ;;  %v4480_v53 = vld [vmem:[#allocation6 + $0x478] sm:$0xff] }
0x1017   :  { %4270 = vmatprep.mubr.f32.mxu0 %v14025_v0  ;;  %4383 = vmatprep.mubr.f32.mxu1 %v14025_v0  ;;  %v4473_v36 = vld [vmem:[#allocation6 + $0x440] sm:$0xff]  ;;  %v15204_v2 = vpack.c.bf16 %v4480_v53, %v4476_v59  ;;  %v4512_v59 = vld [vmem:[#allocation6 + $0x578] sm:$0xff] }
0x1018   :  { %v4477_v32 = vld [vmem:[#allocation6 + $0x460] sm:$0xff] }
0x1019   :  { %11121 = vmatpush1.bf16.msra.mxu0 %v11120_v44  ;;  %11153 = vmatpush1.bf16.msra.mxu1 %v11152_v56  ;;  %v4174_v44 = vld [vmem:[#allocation8 + $0x3b8] sm:$0xff]  ;;  %v11136_v56 = vpack.c.bf16 %v4163_v39, %v4159_v60  ;;  %v4479_v60 = vld [vmem:[#allocation6 + $0x470] sm:$0xff]  ;;  %v4505_v53 = vld [vmem:[#allocation6 + $0x540] sm:$0xff] }
0x101a   :  { %11123 = vmatprep.subr.bf16.mxu0 %v11122_v7  ;;  %11155 = vmatprep.subr.bf16.mxu1 %v11154_v11  ;;  %v4171_v7 = vld [vmem:[#allocation8 + $0x3a0] sm:$0xff]  ;;  %v11138_v11 = vpack.c.bf16 %v4172_v31, %v4168_v41  ;;  %v11170_v20 = vpack.c.bf16 %v4174_v44, %v4170_v54  ;;  %v4488_v41 = vld [vmem:[#allocation6 + $0x4b8] sm:$0xff] }
0x101b   :  { %v4481_v31 = vld [vmem:[#allocation6 + $0x480] sm:$0xff]  ;;  %v15216_v44 = vpack.c.bf16 %v4488_v41, %v4484_v61  ;;  %v4518_v61 = vld [vmem:[#allocation6 + $0x5a8] sm:$0xff]  ;;  %v4516_v41 = vld [vmem:[#allocation6 + $0x598] sm:$0xff] }
0x101c   :  { %v4485_v54 = vld [vmem:[#allocation6 + $0x4a0] sm:$0xff] }
0x101d   :  { %11125 = vmatpush1.bf16.msra.mxu0 %v11124_v28  ;;  %11157 = vmatpush1.bf16.msra.mxu1 %v11156_v63  ;;  %v4182_v28 = vld [vmem:[#allocation8 + $0x3f8] sm:$0xff]  ;;  %v11140_v63 = vpack.c.bf16 %v4171_v7, %v4167_v21  ;;  %v4487_v21 = vld [vmem:[#allocation6 + $0x4b0] sm:$0xff] }
0x101e   :  { %11127 = vmatprep.subr.bf16.mxu0 %v11126_v57  ;;  %11159 = vmatprep.subr.bf16.mxu1 %v11158_v16  ;;  %v11142_v57 = vpack.c.bf16 %v4180_v5, %v4176_v50  ;;  %v11174_v16 = vpack.c.bf16 %v4182_v28, %v4178_v23  ;;  %v4496_v50 = vld [vmem:[#allocation6 + $0x4f8] sm:$0xff]  ;;  %v4489_v5 = vld [vmem:[#allocation6 + $0x4c0] sm:$0xff] }
0x101f   :  { %v4493_v23 = vld [vmem:[#allocation6 + $0x4e0] sm:$0xff]  ;;  %v15228_v28 = vpack.c.bf16 %v4496_v50, %v4492_v33  ;;  %v4515_v33 = vld [vmem:[#allocation6 + $0x590] sm:$0xff] }
0x1020   :  { %v4519_v50 = vld [vmem:[#allocation6 + $0x5b0] sm:$0xff] }
0x1021   :  { %11129 = vmatpush1.bf16.msra.mxu0 %v11128_v6  ;;  %11161 = vmatpush1.bf16.msra.mxu1 %v11160_v52 }
0x1022   :  { %11131 = vmatprep.subr.bf16.mxu0 %v11130_v13  ;;  %11163 = vmatprep.subr.bf16.mxu1 %v11162_v51  ;;  %v4474_v13 = vld [vmem:[#allocation6 + $0x448] sm:$0xff] }
0x1023   :  { %v4478_v51 = vld [vmem:[#allocation6 + $0x468] sm:$0xff] }
0x1024   :  { %v15202_v35 = vpack.c.bf16 %v4478_v51, %v4474_v13  ;;  %v4508_v51 = vld [vmem:[#allocation6 + $0x558] sm:$0xff] }
0x1025   :  { %11133 = vmatpush1.bf16.msra.mxu0 %v11132_v42  ;;  %11165 = vmatpush1.bf16.msra.mxu1 %v11164_v15  ;;  %v15206_v42 = vpack.c.bf16 %v4477_v32, %v4473_v36  ;;  %v4475_v15 = vld [vmem:[#allocation6 + $0x450] sm:$0xff]  ;;  %v15250_v36 = vpack.c.bf16 %v4512_v59, %v4508_v51  ;;  %v4509_v32 = vld [vmem:[#allocation6 + $0x560] sm:$0xff] }
0x1026   :  { %11135 = vmatprep.subr.bf16.mxu0 %v11134_v37  ;;  %11167 = vmatprep.subr.bf16.mxu1 %v11166_v24  ;;  %v15209_v39 = vpack.c.bf16 %v4479_v60, %v4475_v15  ;;  %v4482_v37 = vld [vmem:[#allocation6 + $0x488] sm:$0xff]  ;;  %v4507_v15 = vld [vmem:[#allocation6 + $0x550] sm:$0xff] }
0x1027   :  { %v4486_v24 = vld [vmem:[#allocation6 + $0x4a8] sm:$0xff]  ;;  %v4511_v60 = vld [vmem:[#allocation6 + $0x570] sm:$0xff] }
0x1028   :  { %v15214_v49 = vpack.c.bf16 %v4486_v24, %v4482_v37  ;;  %v15253_v37 = vpack.c.bf16 %v4509_v32, %v4505_v53  ;;  %v4514_v24 = vld [vmem:[#allocation6 + $0x588] sm:$0xff] }
0x1029   :  { %11137 = vmatpush1.bf16.msra.mxu0 %v11136_v56  ;;  %11169 = vmatpush1.bf16.msra.mxu1 %v11168_v47  ;;  %v15218_v56 = vpack.c.bf16 %v4485_v54, %v4481_v31  ;;  %v4483_v47 = vld [vmem:[#allocation6 + $0x490] sm:$0xff]  ;;  %v15257_v31 = vpack.c.bf16 %v4511_v60, %v4507_v15  ;;  %v15259_v54 = vpack.c.bf16 %v4518_v61, %v4514_v24 }
0x102a   :  { %11139 = vmatprep.subr.bf16.mxu0 %v11138_v11  ;;  %11171 = vmatprep.subr.bf16.mxu1 %v11170_v20  ;;  %v15221_v7 = vpack.c.bf16 %v4487_v21, %v4483_v47  ;;  %v4490_v11 = vld [vmem:[#allocation6 + $0x4c8] sm:$0xff]  ;;  %v4520_v47 = vld [vmem:[#allocation6 + $0x5b8] sm:$0xff]  ;;  %v4513_v21 = vld [vmem:[#allocation6 + $0x580] sm:$0xff] }
0x102b   :  { %v4494_v20 = vld [vmem:[#allocation6 + $0x4e8] sm:$0xff] }
0x102c   :  { %v15226_v46 = vpack.c.bf16 %v4494_v20, %v4490_v11  ;;  %v4517_v11 = vld [vmem:[#allocation6 + $0x5a0] sm:$0xff]  ;;  %v15262_v20 = vpack.c.bf16 %v4520_v47, %v4516_v41 }
0x102d   :  { %11141 = vmatpush1.bf16.msra.mxu0 %v11140_v63  ;;  %11173 = vmatpush1.bf16.msra.mxu1 %v11172_v26  ;;  %v15230_v63 = vpack.c.bf16 %v4493_v23, %v4489_v5  ;;  %v4491_v26 = vld [vmem:[#allocation6 + $0x4d0] sm:$0xff]  ;;  %v15265_v5 = vpack.c.bf16 %v4517_v11, %v4513_v21  ;;  %v15269_v23 = vpack.c.bf16 %v4519_v50, %v4515_v33 }
0x102e   :  { %11143 = vmatprep.subr.bf16.mxu0 %v11142_v57  ;;  %11175 = vmatprep.subr.bf16.mxu1 %v11174_v16  ;;  %v4498_v57 = vld [vmem:[#allocation6 + $0x508] sm:$0xff]  ;;  %v15233_v16 = vpack.c.bf16 %v4495_v29, %v4491_v26 }
0x102f   :  { %v4522_v26 = vld [vmem:[#allocation6 + $0x5c8] sm:$0xff] }
0x1030   :  { %v4526_v29 = vld [vmem:[#allocation6 + $0x5e8] sm:$0xff] }
0x1031   :  { %11145 = vmatpush1.bf16.msra.mxu0 %v11144_v40  ;;  %11177 = vmatpush1.bf16.msra.mxu1 %v11176_v43  ;;  %v15237_v40 = vpack.c.bf16 %v4502_v1, %v4498_v57  ;;  %v15239_v43 = vpack.c.bf16 %v4504_v27, %v4500_v4  ;;  %v4524_v57 = vld [vmem:[#allocation6 + $0x5d8] sm:$0xff]  ;;  %v15274_v1 = vpack.c.bf16 %v4526_v29, %v4522_v26  ;;  %v4521_v27 = vld [vmem:[#allocation6 + $0x5c0] sm:$0xff] }
0x1032   :  { %v4528_v4 = vld [vmem:[#allocation6 + $0x5f8] sm:$0xff] }
0x1034   :  { %4271 = vmatmul.mubr.f32.vlgmr.msra.gmra.mrb[32].mxu0 %v14882_v38  ;;  %4384 = vmatmul.mubr.f32.vlgmr.msra.gmra.mrb[32].mxu1 %v14882_v38  ;;  %v4466_v38 = vld [vmem:[#allocation6 + $0x408] sm:$0xff] }
0x1035   :  { %4276 = vmatprep.mubr.f32.mxu0 %v14025_v0  ;;  %4389 = vmatprep.mubr.f32.mxu1 %v14025_v0 }
0x1038   :  { %4277 = vmatmul.mubr.f32.gmra.mrb[34].mxu0 %v14928_v14  ;;  %4390 = vmatmul.mubr.f32.gmra.mrb[34].mxu1 %v14928_v14  ;;  %v4470_v14 = vld [vmem:[#allocation6 + $0x428] sm:$0xff] }
0x1039   :  { %4282 = vmatprep.mubr.f32.mxu0 %v14025_v0  ;;  %4395 = vmatprep.mubr.f32.mxu1 %v14025_v0 }
0x103c   :  { %4283 = vmatmul.mubr.f32.gmra.mrb[36].mxu0 %v14974_v58  ;;  %4396 = vmatmul.mubr.f32.gmra.mrb[36].mxu1 %v14974_v58  ;;  %v4468_v58 = vld [vmem:[#allocation6 + $0x418] sm:$0xff] }
0x103d   :  { %4288 = vmatprep.mubr.f32.mxu0 %v14025_v0  ;;  %4401 = vmatprep.mubr.f32.mxu1 %v14025_v0 }
0x1040   :  { %4289 = vmatmul.mubr.f32.gmra.mrb[38].mxu0 %v15020_v8  ;;  %4402 = vmatmul.mubr.f32.gmra.mrb[38].mxu1 %v15020_v8  ;;  %v15190_v8 = vpack.c.bf16 %v4470_v14, %v4466_v38  ;;  %v4497_v38 = vld [vmem:[#allocation6 + $0x500] sm:$0xff] }
0x1041   :  { %4294 = vmatprep.mubr.f32.mxu0 %v14025_v0  ;;  %4407 = vmatprep.mubr.f32.mxu1 %v14025_v0  ;;  %v4501_v14 = vld [vmem:[#allocation6 + $0x520] sm:$0xff] }
0x1042   :  { %11179 = vmatprep.subr.bf16.mxu0 %v15190_v8 }
0x1044   :  { %4295 = vmatmul.mubr.f32.gmra.mrb[40].mxu0 %v15066_v12  ;;  %4408 = vmatmul.mubr.f32.gmra.mrb[40].mxu1 %v15066_v12  ;;  %v4472_v12 = vld [vmem:[#allocation6 + $0x438] sm:$0xff] }
0x1045   :  { %4300 = vmatprep.mubr.f32.mxu0 %v14025_v0  ;;  %4413 = vmatprep.mubr.f32.mxu1 %v14025_v0  ;;  %v15192_v6 = vpack.c.bf16 %v4472_v12, %v4468_v58  ;;  %v4499_v58 = vld [vmem:[#allocation6 + $0x510] sm:$0xff]  ;;  %v15242_v12 = vpack.c.bf16 %v4501_v14, %v4497_v38  ;;  %v4525_v38 = vld [vmem:[#allocation6 + $0x5e0] sm:$0xff]  ;;  %v15276_v14 = vpack.c.bf16 %v4528_v4, %v4524_v57 }
0x1047   :  { %11211 = vmatprep.subr.bf16.mxu1 %v15192_v6 }
0x1048   :  { %4301 = vmatmul.mubr.f32.gmra.mrb[42].mxu0 %v15112_v3  ;;  %4414 = vmatmul.mubr.f32.gmra.mrb[42].mxu1 %v15112_v3  ;;  %v4469_v3 = vld [vmem:[#allocation6 + $0x420] sm:$0xff] }
0x1049   :  { %4306 = vmatprep.mubr.f32.mxu0 %v14025_v0  ;;  %4419 = vmatprep.mubr.f32.mxu1 %v14025_v0  ;;  %v15194_v52 = vpack.c.bf16 %v4469_v3, %v4465_v9  ;;  %v4503_v9 = vld [vmem:[#allocation6 + $0x530] sm:$0xff]  ;;  %v4506_v3 = vld [vmem:[#allocation6 + $0x548] sm:$0xff] }
0x104b   :  { %11181 = vmatpush1.bf16.msra.mxu0 %v15194_v52 }
0x104c   :  { %4307 = vmatmul.mubr.f32.gmra.mrb[44].mxu0 %v15156_v18  ;;  %4420 = vmatmul.mubr.f32.gmra.mrb[44].mxu1 %v15156_v18  ;;  %v15197_v18 = vpack.c.bf16 %v4471_v62, %v4467_v19  ;;  %v4510_v19 = vld [vmem:[#allocation6 + $0x568] sm:$0xff]  ;;  %v15246_v62 = vpack.c.bf16 %v4503_v9, %v4499_v58  ;;  %v15278_v58 = vpack.c.bf16 %v4525_v38, %v4521_v27  ;;  %v4523_v9 = vld [vmem:[#allocation6 + $0x5d0] sm:$0xff] }
0x104d   :  { %4312 = vmatprep.mubr.f32.mxu0 %v14025_v0  ;;  %4425 = vmatprep.mubr.f32.mxu1 %v14025_v0  ;;  %v15248_v13 = vpack.c.bf16 %v4510_v19, %v4506_v3  ;;  %v4527_v3 = vld [vmem:[#allocation6 + $0x5f0] sm:$0xff] }
0x104e   :  { %11213 = vmatpush1.bf16.msra.mxu1 %v15197_v18  ;;  %11183 = vmatprep.subr.bf16.mxu0 %v15202_v35  ;;  %v15281_v19 = vpack.c.bf16 %v4527_v3, %v4523_v9 }
0x104f   :  { %11215 = vmatprep.subr.bf16.mxu1 %v15204_v2  ;;  %11185 = vmatpush1.bf16.msra.mxu0 %v15206_v42 }
0x1050   :  { %11187 = vmatprep.subr.bf16.mxu0 %v15214_v49 }
0x1052   :  { %11217 = vmatpush1.bf16.msra.mxu1 %v15209_v39 }
0x1053   :  { %11219 = vmatprep.subr.bf16.mxu1 %v15216_v44  ;;  %11189 = vmatpush1.bf16.msra.mxu0 %v15218_v56 }
0x1054   :  { %11191 = vmatprep.subr.bf16.mxu0 %v15226_v46 }
0x1056   :  { %11221 = vmatpush1.bf16.msra.mxu1 %v15221_v7 }
0x1057   :  { %11223 = vmatprep.subr.bf16.mxu1 %v15228_v28  ;;  %11193 = vmatpush1.bf16.msra.mxu0 %v15230_v63 }
0x1058   :  { %11195 = vmatprep.subr.bf16.mxu0 %v15237_v40 }
0x105a   :  { %11225 = vmatpush1.bf16.msra.mxu1 %v15233_v16 }
0x105b   :  { %11227 = vmatprep.subr.bf16.mxu1 %v15239_v43  ;;  %11197 = vmatpush1.bf16.msra.mxu0 %v15242_v12 }
0x105c   :  { %11199 = vmatprep.subr.bf16.mxu0 %v15248_v13 }
0x105e   :  { %11229 = vmatpush1.bf16.msra.mxu1 %v15246_v62 }
0x105f   :  { %11231 = vmatprep.subr.bf16.mxu1 %v15250_v36  ;;  %11201 = vmatpush1.bf16.msra.mxu0 %v15253_v37 }
0x1060   :  { %11203 = vmatprep.subr.bf16.mxu0 %v15259_v54 }
0x1062   :  { %11233 = vmatpush1.bf16.msra.mxu1 %v15257_v31 }
0x1063   :  { %11235 = vmatprep.subr.bf16.mxu1 %v15262_v20  ;;  %11205 = vmatpush1.bf16.msra.mxu0 %v15265_v5 }
0x1064   :  { %11207 = vmatprep.subr.bf16.mxu0 %v15274_v1 }
0x1066   :  { %11237 = vmatpush1.bf16.msra.mxu1 %v15269_v23 }
0x1067   :  { %11239 = vmatprep.subr.bf16.mxu1 %v15276_v14  ;;  %11209 = vmatpush1.bf16.msra.mxu0 %v15278_v58 }
0x1068   :  { %11243 = vmatprep.subr.bf16.mxu0 %v15190_v8 }
0x106a   :  { %11241 = vmatpush1.bf16.msra.mxu1 %v15281_v19 }
0x106b   :  { %11275 = vmatprep.subr.bf16.mxu1 %v15192_v6 }
0x10e7   :  { %v4005_v51 = vpop.f32.mrb[30].mxu0  ;;  %v4076_v59 = vpop.f32.mrb[30].mxu1 }
0x10e8   :  { %v12912_v53 = vadd.f32 %v4005_v51, %v14864_v25  ;;  %v4007_v32 = vpop.f32.mrb[31].mxu0  ;;  %v4078_v15 = vpop.f32.mrb[31].mxu1  ;;  %v12928_v21 = vadd.f32 %v4076_v59, %v14876_v30 }
0x10e9   :  { %v12913_v60 = vadd.f32 %v4007_v32, %v14867_v34  ;;  %v12929_v41 = vadd.f32 %v4078_v15, %v14872_v17 }
0x10ea   :  { %v9706_v24 = vmul.f32 -1.442695, %v12912_v53 }
0x10eb   :  { %v9707_v61 = vmul.f32 -1.442695, %v12913_v60  ;;  %v9708_v47 = vmul.f32 -1.442695, %v12929_v41 }
0x10ec   :  { %13473 = vpow2.f32 %v9706_v24 }
0x10ed   :  { %13475 = vpow2.f32 %v9707_v61 }
0x10ee   :  { %13477 = vpow2.f32 %v9708_v47 }
0x10ef   :  { %13479 = vtanh.f32 %v12928_v21 }
0x10f6   :  { %v13474_v11 = vpop.eup %13473 }
0x10f7   :  { %v13476_v33 = vpop.eup %13475  ;;  %v4088_v50 = vadd.f32 1.0, %v13474_v11 }
0x10f8   :  { %v4094_v26 = vadd.f32 1.0, %v13476_v33  ;;  %v13478_v25 = vpop.eup %13477 }
0x10f9   :  { %13481 = vrcp.f32 %v4088_v50  ;;  %v13480_v29 = vpop.eup %13479  ;;  %v4101_v27 = vadd.f32 1.0, %v13478_v25 }
0x10fa   :  { %13483 = vrcp.f32 %v4094_v26 }
0x10fb   :  { %13485 = vrcp.f32 %v4101_v27 }
0x1103   :  { %v13482_v34 = vpop.eup %13481 }
0x1104   :  { %v13484_v57 = vpop.eup %13483  ;;  %v4105_v4 = vmul.f32 %v13482_v34, %v13480_v29 }
0x1105   :  { %v4104_v38 = vmul.f32 %v13484_v57, %v15153_v22  ;;  %v13486_v30 = vpop.eup %13485  ;;  %v4184_v22 = vld [vmem:[#allocation9 + $0x8] sm:$0xf] }
0x1106   :  { %v15332_v51 = vrot.slane %v4184_v22, %v14387_v45  ;;  %v15335_v59 = vrot.slane %v4184_v22, %v14389_v48  ;;  %v15340_v21 = vrot.slane %v4184_v22, %v14397_v55  ;;  %v15344_v33 = vrot.slane %v4184_v22, %v14404_v10 }
0x1107   :  { %v4106_v17 = vadd.f32 %v4105_v4, %v4104_v38 }
0x1109   :  { %13487 = vtanh.f32 %v4106_v17 }
0x1113   :  { %v13488_v9 = vpop.eup %13487 }
0x1114   :  { %v4108_v3 = vmul.f32 %v13488_v9, %v13486_v30 }
0x1116   :  { %4313 = vmatmul.mubr.f32.gmra.mrb[46].mxu0 %v4108_v3  ;;  %4426 = vmatmul.mubr.f32.gmra.mrb[46].mxu1 %v4108_v3 }
0x1117   :  { %4597 = vmatprep.mubr.f32.mxu0 %v14025_v0  ;;  %4668 = vmatprep.mubr.f32.mxu1 %v14025_v0 }
0x111a   :  { %4598 = vmatmul.mubr.f32.vlgmr.msra.gmra.mrb[32].mxu0 %v14025_v0  ;;  %4669 = vmatmul.mubr.f32.vlgmr.msra.gmra.mrb[32].mxu1 %v14025_v0 }
0x111b   :  { %11245 = vmatpush1.bf16.msra.mxu0 %v15194_v52  ;;  %11277 = vmatpush1.bf16.msra.mxu1 %v15197_v18 }
0x111c   :  { %11247 = vmatprep.subr.bf16.mxu0 %v15202_v35  ;;  %11279 = vmatprep.subr.bf16.mxu1 %v15204_v2 }
0x111d   :  { %4772 = vmatprep.mubr.f32.mxu0 %v14025_v0  ;;  %4843 = vmatprep.mubr.f32.mxu1 %v14025_v0 }
0x111f   :  { %11249 = vmatpush1.bf16.msra.mxu0 %v15206_v42  ;;  %11281 = vmatpush1.bf16.msra.mxu1 %v15209_v39 }
0x1120   :  { %11251 = vmatprep.subr.bf16.mxu0 %v15214_v49  ;;  %11283 = vmatprep.subr.bf16.mxu1 %v15216_v44 }
0x1123   :  { %11253 = vmatpush1.bf16.msra.mxu0 %v15218_v56  ;;  %11285 = vmatpush1.bf16.msra.mxu1 %v15221_v7 }
0x1124   :  { %11255 = vmatprep.subr.bf16.mxu0 %v15226_v46  ;;  %11287 = vmatprep.subr.bf16.mxu1 %v15228_v28 }
0x1127   :  { %11257 = vmatpush1.bf16.msra.mxu0 %v15230_v63  ;;  %11289 = vmatpush1.bf16.msra.mxu1 %v15233_v16 }
0x1128   :  { %11259 = vmatprep.subr.bf16.mxu0 %v15237_v40  ;;  %11291 = vmatprep.subr.bf16.mxu1 %v15239_v43 }
0x112b   :  { %11261 = vmatpush1.bf16.msra.mxu0 %v15242_v12  ;;  %11293 = vmatpush1.bf16.msra.mxu1 %v15246_v62 }
0x112c   :  { %11263 = vmatprep.subr.bf16.mxu0 %v15248_v13  ;;  %11295 = vmatprep.subr.bf16.mxu1 %v15250_v36 }
0x112f   :  { %11265 = vmatpush1.bf16.msra.mxu0 %v15253_v37  ;;  %11297 = vmatpush1.bf16.msra.mxu1 %v15257_v31 }
0x1130   :  { %11267 = vmatprep.subr.bf16.mxu0 %v15259_v54  ;;  %11299 = vmatprep.subr.bf16.mxu1 %v15262_v20 }
0x1133   :  { %11269 = vmatpush1.bf16.msra.mxu0 %v15265_v5  ;;  %11301 = vmatpush1.bf16.msra.mxu1 %v15269_v23 }
0x1134   :  { %11271 = vmatprep.subr.bf16.mxu0 %v15274_v1  ;;  %11303 = vmatprep.subr.bf16.mxu1 %v15276_v14 }
0x1137   :  { %11273 = vmatpush1.bf16.msra.mxu0 %v15278_v58  ;;  %11305 = vmatpush1.bf16.msra.mxu1 %v15281_v19 }
0x1138   :  { %11307 = vmatprep.subr.bf16.mxu0 %v15190_v8  ;;  %11339 = vmatprep.subr.bf16.mxu1 %v15192_v6 }
0x11ed   :  { %v4599_v53 = vpop.f32.mrb[32].mxu0  ;;  %v4670_v32 = vpop.f32.mrb[32].mxu1 }
0x11ee   :  { %v12930_v15 = vadd.f32 %v4599_v53, %v15332_v51  ;;  %v4601_v60 = vpop.f32.mrb[33].mxu0  ;;  %v4672_v24 = vpop.f32.mrb[33].mxu1  ;;  %v12946_v26 = vadd.f32 %v4670_v32, %v15344_v33 }
0x11ef   :  { %v12931_v61 = vadd.f32 %v4601_v60, %v15335_v59  ;;  %v12947_v11 = vadd.f32 %v4672_v24, %v15340_v21 }
0x11f0   :  { %v9709_v41 = vmul.f32 -1.442695, %v12930_v15 }
0x11f1   :  { %v9710_v47 = vmul.f32 -1.442695, %v12931_v61  ;;  %v9711_v50 = vmul.f32 -1.442695, %v12947_v11 }
0x11f2   :  { %13489 = vpow2.f32 %v9709_v41 }
0x11f3   :  { %13491 = vpow2.f32 %v9710_v47 }
0x11f4   :  { %13493 = vpow2.f32 %v9711_v50 }
0x11f5   :  { %13495 = vtanh.f32 %v12946_v26 }
0x11fc   :  { %v13490_v25 = vpop.eup %13489 }
0x11fd   :  { %v13492_v29 = vpop.eup %13491  ;;  %v4682_v34 = vadd.f32 1.0, %v13490_v25 }
0x11fe   :  { %v4688_v57 = vadd.f32 1.0, %v13492_v29  ;;  %v13494_v4 = vpop.eup %13493 }
0x11ff   :  { %13497 = vrcp.f32 %v4682_v34  ;;  %v13496_v27 = vpop.eup %13495  ;;  %v4695_v9 = vadd.f32 1.0, %v13494_v4 }
0x1200   :  { %13499 = vrcp.f32 %v4688_v57 }
0x1201   :  { %13501 = vrcp.f32 %v4695_v9 }
0x1209   :  { %v13498_v38 = vpop.eup %13497 }
0x120a   :  { %v13500_v17 = vpop.eup %13499  ;;  %v4699_v30 = vmul.f32 %v13498_v38, %v13496_v27 }
0x120b   :  { %v4698_v3 = vmul.f32 0.0, %v13500_v17  ;;  %v13502_v53 = vpop.eup %13501 }
0x120d   :  { %v15347_v22 = vadd.f32 %v4699_v30, %v4698_v3 }
0x120f   :  { %13503 = vtanh.f32 %v15347_v22 }
0x1219   :  { %v13504_v32 = vpop.eup %13503 }
0x121a   :  { %v15350_v15 = vmul.f32 %v13504_v32, %v13502_v53 }
0x121c   :  { %4773 = vmatmul.mubr.f32.vlgmr.msra.gmra.mrb[34].mxu0 %v15350_v15  ;;  %4844 = vmatmul.mubr.f32.vlgmr.msra.gmra.mrb[34].mxu1 %v15350_v15 }
0x121d   :  { %11309 = vmatpush1.bf16.msra.mxu0 %v15194_v52  ;;  %11341 = vmatpush1.bf16.msra.mxu1 %v15197_v18 }
0x121e   :  { %11311 = vmatprep.subr.bf16.mxu0 %v15202_v35  ;;  %11343 = vmatprep.subr.bf16.mxu1 %v15204_v2 }
0x121f   :  { %4947 = vmatprep.mubr.f32.mxu0 %v14025_v0  ;;  %5018 = vmatprep.mubr.f32.mxu1 %v14025_v0 }
0x1221   :  { %11313 = vmatpush1.bf16.msra.mxu0 %v15206_v42  ;;  %11345 = vmatpush1.bf16.msra.mxu1 %v15209_v39 }
0x1222   :  { %11315 = vmatprep.subr.bf16.mxu0 %v15214_v49  ;;  %11347 = vmatprep.subr.bf16.mxu1 %v15216_v44 }
0x1225   :  { %11317 = vmatpush1.bf16.msra.mxu0 %v15218_v56  ;;  %11349 = vmatpush1.bf16.msra.mxu1 %v15221_v7 }
0x1226   :  { %11319 = vmatprep.subr.bf16.mxu0 %v15226_v46  ;;  %11351 = vmatprep.subr.bf16.mxu1 %v15228_v28 }
0x1229   :  { %11321 = vmatpush1.bf16.msra.mxu0 %v15230_v63  ;;  %11353 = vmatpush1.bf16.msra.mxu1 %v15233_v16 }
0x122a   :  { %11323 = vmatprep.subr.bf16.mxu0 %v15237_v40  ;;  %11355 = vmatprep.subr.bf16.mxu1 %v15239_v43 }
0x122d   :  { %11325 = vmatpush1.bf16.msra.mxu0 %v15242_v12  ;;  %11357 = vmatpush1.bf16.msra.mxu1 %v15246_v62 }
0x122e   :  { %11327 = vmatprep.subr.bf16.mxu0 %v15248_v13  ;;  %11359 = vmatprep.subr.bf16.mxu1 %v15250_v36 }
0x1231   :  { %11329 = vmatpush1.bf16.msra.mxu0 %v15253_v37  ;;  %11361 = vmatpush1.bf16.msra.mxu1 %v15257_v31 }
0x1232   :  { %11331 = vmatprep.subr.bf16.mxu0 %v15259_v54  ;;  %11363 = vmatprep.subr.bf16.mxu1 %v15262_v20 }
0x1235   :  { %11333 = vmatpush1.bf16.msra.mxu0 %v15265_v5  ;;  %11365 = vmatpush1.bf16.msra.mxu1 %v15269_v23 }
0x1236   :  { %11335 = vmatprep.subr.bf16.mxu0 %v15274_v1  ;;  %11367 = vmatprep.subr.bf16.mxu1 %v15276_v14 }
0x1239   :  { %11337 = vmatpush1.bf16.msra.mxu0 %v15278_v58  ;;  %11369 = vmatpush1.bf16.msra.mxu1 %v15281_v19 }
0x123a   :  { %11371 = vmatprep.subr.bf16.mxu0 %v15190_v8  ;;  %11403 = vmatprep.subr.bf16.mxu1 %v15192_v6 }
0x12ef   :  { %v4774_v60 = vpop.f32.mrb[34].mxu0  ;;  %v4845_v24 = vpop.f32.mrb[34].mxu1 }
0x12f0   :  { %v12932_v61 = vadd.f32 %v4774_v60, %v15332_v51  ;;  %v4776_v41 = vpop.f32.mrb[35].mxu0  ;;  %v4847_v47 = vpop.f32.mrb[35].mxu1  ;;  %v12948_v34 = vadd.f32 %v4845_v24, %v15344_v33 }
0x12f1   :  { %v12933_v11 = vadd.f32 %v4776_v41, %v15335_v59  ;;  %v12949_v25 = vadd.f32 %v4847_v47, %v15340_v21 }
0x12f2   :  { %v9712_v50 = vmul.f32 -1.442695, %v12932_v61 }
0x12f3   :  { %v9713_v26 = vmul.f32 -1.442695, %v12933_v11  ;;  %v9714_v29 = vmul.f32 -1.442695, %v12949_v25 }
0x12f4   :  { %13505 = vpow2.f32 %v9712_v50 }
0x12f5   :  { %13507 = vpow2.f32 %v9713_v26 }
0x12f6   :  { %13509 = vpow2.f32 %v9714_v29 }
0x12f7   :  { %13511 = vtanh.f32 %v12948_v34 }
0x12fe   :  { %v13506_v57 = vpop.eup %13505 }
0x12ff   :  { %v13508_v4 = vpop.eup %13507  ;;  %v4857_v27 = vadd.f32 1.0, %v13506_v57 }
0x1300   :  { %v4863_v38 = vadd.f32 1.0, %v13508_v4  ;;  %v13510_v17 = vpop.eup %13509 }
0x1301   :  { %13513 = vrcp.f32 %v4857_v27  ;;  %v13512_v30 = vpop.eup %13511  ;;  %v4870_v32 = vadd.f32 1.0, %v13510_v17 }
0x1302   :  { %13515 = vrcp.f32 %v4863_v38 }
0x1303   :  { %13517 = vrcp.f32 %v4870_v32 }
0x130b   :  { %v13514_v9 = vpop.eup %13513 }
0x130c   :  { %v13516_v3 = vpop.eup %13515  ;;  %v4874_v53 = vmul.f32 %v13514_v9, %v13512_v30 }
0x130d   :  { %v4873_v60 = vmul.f32 %v13516_v3, %v15347_v22  ;;  %v13518_v24 = vpop.eup %13517 }
0x130f   :  { %v15393_v61 = vadd.f32 %v4874_v53, %v4873_v60 }
0x1311   :  { %13519 = vtanh.f32 %v15393_v61 }
0x131b   :  { %v13520_v41 = vpop.eup %13519 }
0x131c   :  { %v15396_v47 = vmul.f32 %v13520_v41, %v13518_v24 }
0x131e   :  { %4948 = vmatmul.mubr.f32.vlgmr.msra.gmra.mrb[36].mxu0 %v15396_v47  ;;  %5019 = vmatmul.mubr.f32.vlgmr.msra.gmra.mrb[36].mxu1 %v15396_v47 }
0x131f   :  { %11373 = vmatpush1.bf16.msra.mxu0 %v15194_v52  ;;  %11405 = vmatpush1.bf16.msra.mxu1 %v15197_v18 }
0x1320   :  { %11375 = vmatprep.subr.bf16.mxu0 %v15202_v35  ;;  %11407 = vmatprep.subr.bf16.mxu1 %v15204_v2 }
0x1321   :  { %5122 = vmatprep.mubr.f32.mxu0 %v14025_v0  ;;  %5193 = vmatprep.mubr.f32.mxu1 %v14025_v0 }
0x1323   :  { %11377 = vmatpush1.bf16.msra.mxu0 %v15206_v42  ;;  %11409 = vmatpush1.bf16.msra.mxu1 %v15209_v39 }
0x1324   :  { %11379 = vmatprep.subr.bf16.mxu0 %v15214_v49  ;;  %11411 = vmatprep.subr.bf16.mxu1 %v15216_v44 }
0x1327   :  { %11381 = vmatpush1.bf16.msra.mxu0 %v15218_v56  ;;  %11413 = vmatpush1.bf16.msra.mxu1 %v15221_v7 }
0x1328   :  { %11383 = vmatprep.subr.bf16.mxu0 %v15226_v46  ;;  %11415 = vmatprep.subr.bf16.mxu1 %v15228_v28 }
0x132b   :  { %11385 = vmatpush1.bf16.msra.mxu0 %v15230_v63  ;;  %11417 = vmatpush1.bf16.msra.mxu1 %v15233_v16 }
0x132c   :  { %11387 = vmatprep.subr.bf16.mxu0 %v15237_v40  ;;  %11419 = vmatprep.subr.bf16.mxu1 %v15239_v43 }
0x132f   :  { %11389 = vmatpush1.bf16.msra.mxu0 %v15242_v12  ;;  %11421 = vmatpush1.bf16.msra.mxu1 %v15246_v62 }
0x1330   :  { %11391 = vmatprep.subr.bf16.mxu0 %v15248_v13  ;;  %11423 = vmatprep.subr.bf16.mxu1 %v15250_v36 }
0x1333   :  { %11393 = vmatpush1.bf16.msra.mxu0 %v15253_v37  ;;  %11425 = vmatpush1.bf16.msra.mxu1 %v15257_v31 }
0x1334   :  { %11395 = vmatprep.subr.bf16.mxu0 %v15259_v54  ;;  %11427 = vmatprep.subr.bf16.mxu1 %v15262_v20 }
0x1337   :  { %11397 = vmatpush1.bf16.msra.mxu0 %v15265_v5  ;;  %11429 = vmatpush1.bf16.msra.mxu1 %v15269_v23 }
0x1338   :  { %11399 = vmatprep.subr.bf16.mxu0 %v15274_v1  ;;  %11431 = vmatprep.subr.bf16.mxu1 %v15276_v14 }
0x133b   :  { %11401 = vmatpush1.bf16.msra.mxu0 %v15278_v58  ;;  %11433 = vmatpush1.bf16.msra.mxu1 %v15281_v19 }
0x133c   :  { %11435 = vmatprep.subr.bf16.mxu0 %v15190_v8  ;;  %11467 = vmatprep.subr.bf16.mxu1 %v15192_v6 }
0x13f1   :  { %v4949_v22 = vpop.f32.mrb[36].mxu0  ;;  %v5020_v11 = vpop.f32.mrb[36].mxu1 }
0x13f2   :  { %v12934_v50 = vadd.f32 %v4949_v22, %v15332_v51  ;;  %v4951_v26 = vpop.f32.mrb[37].mxu0  ;;  %v5022_v25 = vpop.f32.mrb[37].mxu1  ;;  %v12950_v38 = vadd.f32 %v5020_v11, %v15344_v33 }
0x13f3   :  { %v12935_v29 = vadd.f32 %v4951_v26, %v15335_v59  ;;  %v12951_v4 = vadd.f32 %v5022_v25, %v15340_v21 }
0x13f4   :  { %v9715_v34 = vmul.f32 -1.442695, %v12934_v50 }
0x13f5   :  { %v9716_v57 = vmul.f32 -1.442695, %v12935_v29  ;;  %v9717_v27 = vmul.f32 -1.442695, %v12951_v4 }
0x13f6   :  { %13521 = vpow2.f32 %v9715_v34 }
0x13f7   :  { %13523 = vpow2.f32 %v9716_v57 }
0x13f8   :  { %13525 = vpow2.f32 %v9717_v27 }
0x13f9   :  { %13527 = vtanh.f32 %v12950_v38 }
0x1400   :  { %v13522_v17 = vpop.eup %13521 }
0x1401   :  { %v13524_v30 = vpop.eup %13523  ;;  %v5032_v9 = vadd.f32 1.0, %v13522_v17 }
0x1402   :  { %v5038_v3 = vadd.f32 1.0, %v13524_v30  ;;  %v13526_v53 = vpop.eup %13525 }
0x1403   :  { %13529 = vrcp.f32 %v5032_v9  ;;  %v13528_v32 = vpop.eup %13527  ;;  %v5045_v22 = vadd.f32 1.0, %v13526_v53 }
0x1404   :  { %13531 = vrcp.f32 %v5038_v3 }
0x1405   :  { %13533 = vrcp.f32 %v5045_v22 }
0x140d   :  { %v13530_v60 = vpop.eup %13529 }
0x140e   :  { %v13532_v24 = vpop.eup %13531  ;;  %v5049_v41 = vmul.f32 %v13530_v60, %v13528_v32 }
0x140f   :  { %v5048_v50 = vmul.f32 %v13532_v24, %v15393_v61  ;;  %v13534_v11 = vpop.eup %13533 }
0x1411   :  { %v15439_v26 = vadd.f32 %v5049_v41, %v5048_v50 }
0x1413   :  { %13535 = vtanh.f32 %v15439_v26 }
0x141d   :  { %v13536_v25 = vpop.eup %13535 }
0x141e   :  { %v15442_v29 = vmul.f32 %v13536_v25, %v13534_v11 }
0x1420   :  { %5123 = vmatmul.mubr.f32.vlgmr.msra.gmra.mrb[38].mxu0 %v15442_v29  ;;  %5194 = vmatmul.mubr.f32.vlgmr.msra.gmra.mrb[38].mxu1 %v15442_v29 }
0x1421   :  { %11437 = vmatpush1.bf16.msra.mxu0 %v15194_v52  ;;  %11469 = vmatpush1.bf16.msra.mxu1 %v15197_v18 }
0x1422   :  { %11439 = vmatprep.subr.bf16.mxu0 %v15202_v35  ;;  %11471 = vmatprep.subr.bf16.mxu1 %v15204_v2 }
0x1423   :  { %5297 = vmatprep.mubr.f32.mxu0 %v14025_v0  ;;  %5368 = vmatprep.mubr.f32.mxu1 %v14025_v0 }
0x1425   :  { %11441 = vmatpush1.bf16.msra.mxu0 %v15206_v42  ;;  %11473 = vmatpush1.bf16.msra.mxu1 %v15209_v39 }
0x1426   :  { %11443 = vmatprep.subr.bf16.mxu0 %v15214_v49  ;;  %11475 = vmatprep.subr.bf16.mxu1 %v15216_v44 }
0x1429   :  { %11445 = vmatpush1.bf16.msra.mxu0 %v15218_v56  ;;  %11477 = vmatpush1.bf16.msra.mxu1 %v15221_v7 }
0x142a   :  { %11447 = vmatprep.subr.bf16.mxu0 %v15226_v46  ;;  %11479 = vmatprep.subr.bf16.mxu1 %v15228_v28 }
0x142d   :  { %11449 = vmatpush1.bf16.msra.mxu0 %v15230_v63  ;;  %11481 = vmatpush1.bf16.msra.mxu1 %v15233_v16 }
0x142e   :  { %11451 = vmatprep.subr.bf16.mxu0 %v15237_v40  ;;  %11483 = vmatprep.subr.bf16.mxu1 %v15239_v43 }
0x1431   :  { %11453 = vmatpush1.bf16.msra.mxu0 %v15242_v12  ;;  %11485 = vmatpush1.bf16.msra.mxu1 %v15246_v62 }
0x1432   :  { %11455 = vmatprep.subr.bf16.mxu0 %v15248_v13  ;;  %11487 = vmatprep.subr.bf16.mxu1 %v15250_v36 }
0x1435   :  { %11457 = vmatpush1.bf16.msra.mxu0 %v15253_v37  ;;  %11489 = vmatpush1.bf16.msra.mxu1 %v15257_v31 }
0x1436   :  { %11459 = vmatprep.subr.bf16.mxu0 %v15259_v54  ;;  %11491 = vmatprep.subr.bf16.mxu1 %v15262_v20 }
0x1439   :  { %11461 = vmatpush1.bf16.msra.mxu0 %v15265_v5  ;;  %11493 = vmatpush1.bf16.msra.mxu1 %v15269_v23 }
0x143a   :  { %11463 = vmatprep.subr.bf16.mxu0 %v15274_v1  ;;  %11495 = vmatprep.subr.bf16.mxu1 %v15276_v14 }
0x143d   :  { %11465 = vmatpush1.bf16.msra.mxu0 %v15278_v58  ;;  %11497 = vmatpush1.bf16.msra.mxu1 %v15281_v19 }
0x143e   :  { %11499 = vmatprep.subr.bf16.mxu0 %v15190_v8  ;;  %11531 = vmatprep.subr.bf16.mxu1 %v15192_v6 }
0x14f3   :  { %v5124_v61 = vpop.f32.mrb[38].mxu0  ;;  %v5195_v34 = vpop.f32.mrb[38].mxu1 }
0x14f4   :  { %v12936_v57 = vadd.f32 %v5124_v61, %v15332_v51  ;;  %v5126_v4 = vpop.f32.mrb[39].mxu0  ;;  %v5197_v27 = vpop.f32.mrb[39].mxu1  ;;  %v12952_v53 = vadd.f32 %v5195_v34, %v15344_v33 }
0x14f5   :  { %v12937_v38 = vadd.f32 %v5126_v4, %v15335_v59  ;;  %v12953_v9 = vadd.f32 %v5197_v27, %v15340_v21 }
0x14f6   :  { %v9718_v17 = vmul.f32 -1.442695, %v12936_v57 }
0x14f7   :  { %v9719_v30 = vmul.f32 -1.442695, %v12937_v38  ;;  %v9720_v3 = vmul.f32 -1.442695, %v12953_v9 }
0x14f8   :  { %13537 = vpow2.f32 %v9718_v17 }
0x14f9   :  { %13539 = vpow2.f32 %v9719_v30 }
0x14fa   :  { %13541 = vpow2.f32 %v9720_v3 }
0x14fb   :  { %13543 = vtanh.f32 %v12952_v53 }
0x1502   :  { %v13538_v32 = vpop.eup %13537 }
0x1503   :  { %v13540_v60 = vpop.eup %13539  ;;  %v5207_v24 = vadd.f32 1.0, %v13538_v32 }
0x1504   :  { %v5213_v41 = vadd.f32 1.0, %v13540_v60  ;;  %v13542_v22 = vpop.eup %13541 }
0x1505   :  { %13545 = vrcp.f32 %v5207_v24  ;;  %v13544_v50 = vpop.eup %13543  ;;  %v5220_v57 = vadd.f32 1.0, %v13542_v22 }
0x1506   :  { %13547 = vrcp.f32 %v5213_v41 }
0x1507   :  { %13549 = vrcp.f32 %v5220_v57 }
0x150f   :  { %v13546_v11 = vpop.eup %13545 }
0x1510   :  { %v13548_v25 = vpop.eup %13547  ;;  %v5224_v61 = vmul.f32 %v13546_v11, %v13544_v50 }
0x1511   :  { %v5223_v4 = vmul.f32 %v13548_v25, %v15439_v26  ;;  %v13550_v34 = vpop.eup %13549 }
0x1513   :  { %v15485_v27 = vadd.f32 %v5224_v61, %v5223_v4 }
0x1515   :  { %13551 = vtanh.f32 %v15485_v27 }
0x151f   :  { %v13552_v38 = vpop.eup %13551 }
0x1520   :  { %v15488_v17 = vmul.f32 %v13552_v38, %v13550_v34 }
0x1522   :  { %5298 = vmatmul.mubr.f32.vlgmr.msra.gmra.mrb[40].mxu0 %v15488_v17  ;;  %5369 = vmatmul.mubr.f32.vlgmr.msra.gmra.mrb[40].mxu1 %v15488_v17 }
0x1523   :  { %11501 = vmatpush1.bf16.msra.mxu0 %v15194_v52  ;;  %11533 = vmatpush1.bf16.msra.mxu1 %v15197_v18 }
0x1524   :  { %11503 = vmatprep.subr.bf16.mxu0 %v15202_v35  ;;  %11535 = vmatprep.subr.bf16.mxu1 %v15204_v2 }
0x1525   :  { %5472 = vmatprep.mubr.f32.mxu0 %v14025_v0  ;;  %5543 = vmatprep.mubr.f32.mxu1 %v14025_v0 }
0x1527   :  { %11505 = vmatpush1.bf16.msra.mxu0 %v15206_v42  ;;  %11537 = vmatpush1.bf16.msra.mxu1 %v15209_v39 }
0x1528   :  { %11507 = vmatprep.subr.bf16.mxu0 %v15214_v49  ;;  %11539 = vmatprep.subr.bf16.mxu1 %v15216_v44 }
0x152b   :  { %11509 = vmatpush1.bf16.msra.mxu0 %v15218_v56  ;;  %11541 = vmatpush1.bf16.msra.mxu1 %v15221_v7 }
0x152c   :  { %11511 = vmatprep.subr.bf16.mxu0 %v15226_v46  ;;  %11543 = vmatprep.subr.bf16.mxu1 %v15228_v28 }
0x152f   :  { %11513 = vmatpush1.bf16.msra.mxu0 %v15230_v63  ;;  %11545 = vmatpush1.bf16.msra.mxu1 %v15233_v16 }
0x1530   :  { %11515 = vmatprep.subr.bf16.mxu0 %v15237_v40  ;;  %11547 = vmatprep.subr.bf16.mxu1 %v15239_v43 }
0x1533   :  { %11517 = vmatpush1.bf16.msra.mxu0 %v15242_v12  ;;  %11549 = vmatpush1.bf16.msra.mxu1 %v15246_v62 }
0x1534   :  { %11519 = vmatprep.subr.bf16.mxu0 %v15248_v13  ;;  %11551 = vmatprep.subr.bf16.mxu1 %v15250_v36 }
0x1537   :  { %11521 = vmatpush1.bf16.msra.mxu0 %v15253_v37  ;;  %11553 = vmatpush1.bf16.msra.mxu1 %v15257_v31 }
0x1538   :  { %11523 = vmatprep.subr.bf16.mxu0 %v15259_v54  ;;  %11555 = vmatprep.subr.bf16.mxu1 %v15262_v20 }
0x153b   :  { %11525 = vmatpush1.bf16.msra.mxu0 %v15265_v5  ;;  %11557 = vmatpush1.bf16.msra.mxu1 %v15269_v23 }
0x153c   :  { %11527 = vmatprep.subr.bf16.mxu0 %v15274_v1  ;;  %11559 = vmatprep.subr.bf16.mxu1 %v15276_v14 }
0x153f   :  { %11529 = vmatpush1.bf16.msra.mxu0 %v15278_v58  ;;  %11561 = vmatpush1.bf16.msra.mxu1 %v15281_v19 }
0x1540   :  { %11563 = vmatprep.subr.bf16.mxu0 %v15190_v8  ;;  %11595 = vmatprep.subr.bf16.mxu1 %v15192_v6 }
0x15f5   :  { %v5299_v26 = vpop.f32.mrb[40].mxu0  ;;  %v5370_v30 = vpop.f32.mrb[40].mxu1 }
0x15f6   :  { %v12938_v9 = vadd.f32 %v5299_v26, %v15332_v51  ;;  %v5301_v3 = vpop.f32.mrb[41].mxu0  ;;  %v5372_v53 = vpop.f32.mrb[41].mxu1  ;;  %v12954_v50 = vadd.f32 %v5370_v30, %v15344_v33 }
0x15f7   :  { %v12939_v32 = vadd.f32 %v5301_v3, %v15335_v59  ;;  %v12955_v41 = vadd.f32 %v5372_v53, %v15340_v21 }
0x15f8   :  { %v9721_v60 = vmul.f32 -1.442695, %v12938_v9 }
0x15f9   :  { %v9722_v24 = vmul.f32 -1.442695, %v12939_v32  ;;  %v9723_v22 = vmul.f32 -1.442695, %v12955_v41 }
0x15fa   :  { %13553 = vpow2.f32 %v9721_v60 }
0x15fb   :  { %13555 = vpow2.f32 %v9722_v24 }
0x15fc   :  { %13557 = vpow2.f32 %v9723_v22 }
0x15fd   :  { %13559 = vtanh.f32 %v12954_v50 }
0x1604   :  { %v13554_v11 = vpop.eup %13553 }
0x1605   :  { %v13556_v25 = vpop.eup %13555  ;;  %v5382_v61 = vadd.f32 1.0, %v13554_v11 }
0x1606   :  { %v5388_v57 = vadd.f32 1.0, %v13556_v25  ;;  %v13558_v4 = vpop.eup %13557 }
0x1607   :  { %13561 = vrcp.f32 %v5382_v61  ;;  %v13560_v34 = vpop.eup %13559  ;;  %v5395_v3 = vadd.f32 1.0, %v13558_v4 }
0x1608   :  { %13563 = vrcp.f32 %v5388_v57 }
0x1609   :  { %13565 = vrcp.f32 %v5395_v3 }
0x1611   :  { %v13562_v38 = vpop.eup %13561 }
0x1612   :  { %v13564_v26 = vpop.eup %13563  ;;  %v5399_v9 = vmul.f32 %v13562_v38, %v13560_v34 }
0x1613   :  { %v5398_v32 = vmul.f32 %v13564_v26, %v15485_v27  ;;  %v13566_v30 = vpop.eup %13565 }
0x1615   :  { %v15531_v53 = vadd.f32 %v5399_v9, %v5398_v32 }
0x1617   :  { %13567 = vtanh.f32 %v15531_v53 }
0x1621   :  { %v13568_v60 = vpop.eup %13567 }
0x1622   :  { %v15534_v24 = vmul.f32 %v13568_v60, %v13566_v30 }
0x1624   :  { %5473 = vmatmul.mubr.f32.vlgmr.msra.gmra.mrb[42].mxu0 %v15534_v24  ;;  %5544 = vmatmul.mubr.f32.vlgmr.msra.gmra.mrb[42].mxu1 %v15534_v24 }
0x1625   :  { %11565 = vmatpush1.bf16.msra.mxu0 %v15194_v52  ;;  %11597 = vmatpush1.bf16.msra.mxu1 %v15197_v18 }
0x1626   :  { %11567 = vmatprep.subr.bf16.mxu0 %v15202_v35  ;;  %11599 = vmatprep.subr.bf16.mxu1 %v15204_v2 }
0x1627   :  { %5647 = vmatprep.mubr.f32.mxu0 %v14025_v0  ;;  %5718 = vmatprep.mubr.f32.mxu1 %v14025_v0 }
0x1629   :  { %11569 = vmatpush1.bf16.msra.mxu0 %v15206_v42  ;;  %11601 = vmatpush1.bf16.msra.mxu1 %v15209_v39 }
0x162a   :  { %11571 = vmatprep.subr.bf16.mxu0 %v15214_v49  ;;  %11603 = vmatprep.subr.bf16.mxu1 %v15216_v44 }
0x162d   :  { %11573 = vmatpush1.bf16.msra.mxu0 %v15218_v56  ;;  %11605 = vmatpush1.bf16.msra.mxu1 %v15221_v7 }
0x162e   :  { %11575 = vmatprep.subr.bf16.mxu0 %v15226_v46  ;;  %11607 = vmatprep.subr.bf16.mxu1 %v15228_v28 }
0x1631   :  { %11577 = vmatpush1.bf16.msra.mxu0 %v15230_v63  ;;  %11609 = vmatpush1.bf16.msra.mxu1 %v15233_v16 }
0x1632   :  { %11579 = vmatprep.subr.bf16.mxu0 %v15237_v40  ;;  %11611 = vmatprep.subr.bf16.mxu1 %v15239_v43 }
0x1635   :  { %11581 = vmatpush1.bf16.msra.mxu0 %v15242_v12  ;;  %11613 = vmatpush1.bf16.msra.mxu1 %v15246_v62 }
0x1636   :  { %11583 = vmatprep.subr.bf16.mxu0 %v15248_v13  ;;  %11615 = vmatprep.subr.bf16.mxu1 %v15250_v36 }
0x1639   :  { %11585 = vmatpush1.bf16.msra.mxu0 %v15253_v37  ;;  %11617 = vmatpush1.bf16.msra.mxu1 %v15257_v31 }
0x163a   :  { %11587 = vmatprep.subr.bf16.mxu0 %v15259_v54  ;;  %11619 = vmatprep.subr.bf16.mxu1 %v15262_v20 }
0x163d   :  { %11589 = vmatpush1.bf16.msra.mxu0 %v15265_v5  ;;  %11621 = vmatpush1.bf16.msra.mxu1 %v15269_v23 }
0x163e   :  { %11591 = vmatprep.subr.bf16.mxu0 %v15274_v1  ;;  %11623 = vmatprep.subr.bf16.mxu1 %v15276_v14 }
0x1641   :  { %11593 = vmatpush1.bf16.msra.mxu0 %v15278_v58  ;;  %11625 = vmatpush1.bf16.msra.mxu1 %v15281_v19 }
0x1642   :  { %11627 = vmatprep.subr.bf16.mxu0 %v15190_v8  ;;  %11659 = vmatprep.subr.bf16.mxu1 %v15192_v6 }
0x16f7   :  { %v5474_v27 = vpop.f32.mrb[42].mxu0  ;;  %v5545_v41 = vpop.f32.mrb[42].mxu1 }
0x16f8   :  { %v12940_v22 = vadd.f32 %v5474_v27, %v15332_v51  ;;  %v5476_v50 = vpop.f32.mrb[43].mxu0  ;;  %v5547_v11 = vpop.f32.mrb[43].mxu1  ;;  %v12956_v38 = vadd.f32 %v5545_v41, %v15344_v33 }
0x16f9   :  { %v12941_v25 = vadd.f32 %v5476_v50, %v15335_v59  ;;  %v12957_v4 = vadd.f32 %v5547_v11, %v15340_v21 }
0x16fa   :  { %v9724_v61 = vmul.f32 -1.442695, %v12940_v22 }
0x16fb   :  { %v9725_v57 = vmul.f32 -1.442695, %v12941_v25  ;;  %v9726_v34 = vmul.f32 -1.442695, %v12957_v4  ;;  %v5944_v4 = vld [vmem:[#allocation8 + $0x430] sm:$0xff] }
0x16fc   :  { %13569 = vpow2.f32 %v9724_v61 }
0x16fd   :  { %13571 = vpow2.f32 %v9725_v57  ;;  %v5940_v57 = vld [vmem:[#allocation8 + $0x410] sm:$0xff] }
0x16fe   :  { %13573 = vpow2.f32 %v9726_v34  ;;  %v5947_v34 = vld [vmem:[#allocation8 + $0x448] sm:$0xff] }
0x16ff   :  { %13575 = vtanh.f32 %v12956_v38  ;;  %v5951_v38 = vld [vmem:[#allocation8 + $0x468] sm:$0xff] }
0x1706   :  { %v13570_v8 = vpop.eup %13569 }
0x1707   :  { %v13572_v26 = vpop.eup %13571  ;;  %v5557_v6 = vadd.f32 1.0, %v13570_v8  ;;  %v5949_v8 = vld [vmem:[#allocation8 + $0x458] sm:$0xff] }
0x1708   :  { %v5563_v9 = vadd.f32 1.0, %v13572_v26  ;;  %v13574_v3 = vpop.eup %13573  ;;  %v5953_v26 = vld [vmem:[#allocation8 + $0x478] sm:$0xff] }
0x1709   :  { %13577 = vrcp.f32 %v5557_v6  ;;  %v13576_v32 = vpop.eup %13575  ;;  %v5570_v22 = vadd.f32 1.0, %v13574_v3 }
0x170a   :  { %13579 = vrcp.f32 %v5563_v9 }
0x170b   :  { %13581 = vrcp.f32 %v5570_v22  ;;  %v11694_v22 = vpack.c.bf16 %v5951_v38, %v5947_v34  ;;  %v5972_v38 = vld [vmem:[#allocation8 + $0x510] sm:$0xff] }
0x1713   :  { %v13578_v30 = vpop.eup %13577 }
0x1714   :  { %v13580_v60 = vpop.eup %13579  ;;  %v5574_v27 = vmul.f32 %v13578_v30, %v13576_v32  ;;  %v11724_v32 = vpack.c.bf16 %v5944_v4, %v5940_v57  ;;  %v5946_v30 = vld [vmem:[#allocation8 + $0x440] sm:$0xff] }
0x1715   :  { %v5573_v50 = vmul.f32 %v13580_v60, %v15531_v53  ;;  %v13582_v41 = vpop.eup %13581  ;;  %v5942_v53 = vld [vmem:[#allocation8 + $0x420] sm:$0xff] }
0x1716   :  { %v5950_v60 = vld [vmem:[#allocation8 + $0x460] sm:$0xff] }
0x1717   :  { %v15577_v11 = vadd.f32 %v5574_v27, %v5573_v50  ;;  %v11726_v50 = vpack.c.bf16 %v5953_v26, %v5949_v8  ;;  %v5974_v57 = vld [vmem:[#allocation8 + $0x520] sm:$0xff]  ;;  %v5976_v8 = vld [vmem:[#allocation8 + $0x530] sm:$0xff]  ;;  %v5979_v26 = vld [vmem:[#allocation8 + $0x548] sm:$0xff] }
0x1719   :  { %13583 = vtanh.f32 %v15577_v11 }
0x1723   :  { %v13584_v25 = vpop.eup %13583 }
0x1724   :  { %v15580_v61 = vmul.f32 %v13584_v25, %v13582_v41  ;;  %v5952_v41 = vld [vmem:[#allocation8 + $0x470] sm:$0xff]  ;;  %v5955_v25 = vld [vmem:[#allocation8 + $0x488] sm:$0xff] }
0x1726   :  { %5648 = vmatmul.mubr.f32.vlgmr.msra.gmra.mrb[44].mxu0 %v15580_v61  ;;  %5719 = vmatmul.mubr.f32.vlgmr.msra.gmra.mrb[44].mxu1 %v15580_v61 }
0x1727   :  { %11629 = vmatpush1.bf16.msra.mxu0 %v15194_v52  ;;  %11661 = vmatpush1.bf16.msra.mxu1 %v15197_v18  ;;  %v5939_v52 = vld [vmem:[#allocation8 + $0x408] sm:$0xff] }
0x1728   :  { %11631 = vmatprep.subr.bf16.mxu0 %v15202_v35  ;;  %11663 = vmatprep.subr.bf16.mxu1 %v15204_v2  ;;  %v5943_v18 = vld [vmem:[#allocation8 + $0x428] sm:$0xff]  ;;  %v5941_v35 = vld [vmem:[#allocation8 + $0x418] sm:$0xff] }
0x1729   :  { %5822 = vmatprep.mubr.f32.mxu0 %v14025_v0  ;;  %5893 = vmatprep.mubr.f32.mxu1 %v14025_v0  ;;  %v11690_v2 = vpack.c.bf16 %v5943_v18, %v5939_v52  ;;  %v5959_v52 = vld [vmem:[#allocation8 + $0x4a8] sm:$0xff]  ;;  %v5957_v18 = vld [vmem:[#allocation8 + $0x498] sm:$0xff] }
0x172b   :  { %11633 = vmatpush1.bf16.msra.mxu0 %v15206_v42  ;;  %11665 = vmatpush1.bf16.msra.mxu1 %v15209_v39  ;;  %v5945_v42 = vld [vmem:[#allocation8 + $0x438] sm:$0xff] }
0x172c   :  { %11635 = vmatprep.subr.bf16.mxu0 %v15214_v49  ;;  %11667 = vmatprep.subr.bf16.mxu1 %v15216_v44  ;;  %v11722_v39 = vpack.c.bf16 %v5945_v42, %v5941_v35  ;;  %v5961_v35 = vld [vmem:[#allocation8 + $0x4b8] sm:$0xff] }
0x172f   :  { %11637 = vmatpush1.bf16.msra.mxu0 %v15218_v56  ;;  %11669 = vmatpush1.bf16.msra.mxu1 %v15221_v7 }
0x1730   :  { %11639 = vmatprep.subr.bf16.mxu0 %v15226_v46  ;;  %11671 = vmatprep.subr.bf16.mxu1 %v15228_v28 }
0x1733   :  { %11641 = vmatpush1.bf16.msra.mxu0 %v15230_v63  ;;  %11673 = vmatpush1.bf16.msra.mxu1 %v15233_v16 }
0x1734   :  { %11643 = vmatprep.subr.bf16.mxu0 %v15237_v40  ;;  %11675 = vmatprep.subr.bf16.mxu1 %v15239_v43 }
0x1737   :  { %11645 = vmatpush1.bf16.msra.mxu0 %v15242_v12  ;;  %11677 = vmatpush1.bf16.msra.mxu1 %v15246_v62 }
0x1738   :  { %11647 = vmatprep.subr.bf16.mxu0 %v15248_v13  ;;  %11679 = vmatprep.subr.bf16.mxu1 %v15250_v36 }
0x173b   :  { %11649 = vmatpush1.bf16.msra.mxu0 %v15253_v37  ;;  %11681 = vmatpush1.bf16.msra.mxu1 %v15257_v31 }
0x173c   :  { %11651 = vmatprep.subr.bf16.mxu0 %v15259_v54  ;;  %11683 = vmatprep.subr.bf16.mxu1 %v15262_v20 }
0x173f   :  { %11653 = vmatpush1.bf16.msra.mxu0 %v15265_v5  ;;  %11685 = vmatpush1.bf16.msra.mxu1 %v15269_v23 }
0x1740   :  { %11655 = vmatprep.subr.bf16.mxu0 %v15274_v1  ;;  %11687 = vmatprep.subr.bf16.mxu1 %v15276_v14 }
0x1743   :  { %11657 = vmatpush1.bf16.msra.mxu0 %v15278_v58  ;;  %11689 = vmatpush1.bf16.msra.mxu1 %v15281_v19  ;;  %v5938_v19 = vld [vmem:[#allocation8 + $0x400] sm:$0xff] }
0x1744   :  { %11691 = vmatprep.subr.bf16.mxu0 %v11690_v2  ;;  %11723 = vmatprep.subr.bf16.mxu1 %v11722_v39  ;;  %v11692_v3 = vpack.c.bf16 %v5942_v53, %v5938_v19  ;;  %v11696_v2 = vpack.c.bf16 %v5950_v60, %v5946_v30  ;;  %v5954_v39 = vld [vmem:[#allocation8 + $0x480] sm:$0xff]  ;;  %v11740_v30 = vpack.c.bf16 %v5976_v8, %v5972_v38  ;;  %v6295_v38 = vld [vmem:[#allocation6 + $0x658] sm:$0xff] }
0x1745   :  { %v5970_v53 = vld [vmem:[#allocation8 + $0x500] sm:$0xff] }
0x1746   :  { %v5978_v60 = vld [vmem:[#allocation8 + $0x540] sm:$0xff] }
0x17f9   :  { %v5649_v49 = vpop.f32.mrb[44].mxu0  ;;  %v5720_v44 = vpop.f32.mrb[44].mxu1 }
0x17fa   :  { %v12942_v56 = vadd.f32 %v5649_v49, %v15332_v51  ;;  %v5651_v7 = vpop.f32.mrb[45].mxu0  ;;  %v5722_v46 = vpop.f32.mrb[45].mxu1  ;;  %v12958_v12 = vadd.f32 %v5720_v44, %v15344_v33  ;;  %v5958_v49 = vld [vmem:[#allocation8 + $0x4a0] sm:$0xff]  ;;  %v11698_v44 = vpack.c.bf16 %v5959_v52, %v5955_v25  ;;  %v5984_v25 = vld [vmem:[#allocation8 + $0x570] sm:$0xff]  ;;  %v5987_v52 = vld [vmem:[#allocation8 + $0x588] sm:$0xff] }
0x17fb   :  { %v12943_v28 = vadd.f32 %v5651_v7, %v15335_v59  ;;  %v12959_v40 = vadd.f32 %v5722_v46, %v15340_v21  ;;  %v5956_v7 = vld [vmem:[#allocation8 + $0x490] sm:$0xff] }
0x17fc   :  { %v9727_v63 = vmul.f32 -1.442695, %v12942_v56  ;;  %v11730_v56 = vpack.c.bf16 %v5961_v35, %v5957_v18  ;;  %v5960_v46 = vld [vmem:[#allocation8 + $0x4b0] sm:$0xff]  ;;  %v5991_v18 = vld [vmem:[#allocation8 + $0x5a8] sm:$0xff]  ;;  %v5989_v35 = vld [vmem:[#allocation8 + $0x598] sm:$0xff] }
0x17fd   :  { %v9728_v16 = vmul.f32 -1.442695, %v12943_v28  ;;  %v9729_v43 = vmul.f32 -1.442695, %v12959_v40  ;;  %v5963_v28 = vld [vmem:[#allocation8 + $0x4c8] sm:$0xff]  ;;  %v5969_v40 = vld [vmem:[#allocation8 + $0x4f8] sm:$0xff] }
0x17fe   :  { %13585 = vpow2.f32 %v9727_v63  ;;  %v5967_v63 = vld [vmem:[#allocation8 + $0x4e8] sm:$0xff] }
0x17ff   :  { %13587 = vpow2.f32 %v9728_v16  ;;  %v5965_v16 = vld [vmem:[#allocation8 + $0x4d8] sm:$0xff] }
0x1800   :  { %13589 = vpow2.f32 %v9729_v43  ;;  %v11700_v43 = vpack.c.bf16 %v5958_v49, %v5954_v39  ;;  %v5986_v49 = vld [vmem:[#allocation8 + $0x580] sm:$0xff] }
0x1801   :  { %13591 = vtanh.f32 %v12958_v12  ;;  %v11732_v12 = vpack.c.bf16 %v5960_v46, %v5956_v7  ;;  %v5988_v46 = vld [vmem:[#allocation8 + $0x590] sm:$0xff] }
0x1808   :  { %v13586_v62 = vpop.eup %13585 }
0x1809   :  { %v13588_v13 = vpop.eup %13587  ;;  %v5732_v36 = vadd.f32 1.0, %v13586_v62  ;;  %v5962_v62 = vld [vmem:[#allocation8 + $0x4c0] sm:$0xff] }
0x180a   :  { %v5738_v37 = vadd.f32 1.0, %v13588_v13  ;;  %v13590_v31 = vpop.eup %13589  ;;  %v5966_v13 = vld [vmem:[#allocation8 + $0x4e0] sm:$0xff] }
0x180b   :  { %13593 = vrcp.f32 %v5732_v36  ;;  %v13592_v54 = vpop.eup %13591  ;;  %v5745_v1 = vadd.f32 1.0, %v13590_v31  ;;  %v11702_v36 = vpack.c.bf16 %v5967_v63, %v5963_v28  ;;  %v5964_v31 = vld [vmem:[#allocation8 + $0x4d0] sm:$0xff]  ;;  %v5995_v63 = vld [vmem:[#allocation8 + $0x5c8] sm:$0xff] }
0x180c   :  { %13595 = vrcp.f32 %v5738_v37  ;;  %v11734_v37 = vpack.c.bf16 %v5969_v40, %v5965_v16  ;;  %v5992_v28 = vld [vmem:[#allocation8 + $0x5b0] sm:$0xff]  ;;  %v5999_v16 = vld [vmem:[#allocation8 + $0x5e8] sm:$0xff]  ;;  %v5997_v40 = vld [vmem:[#allocation8 + $0x5d8] sm:$0xff] }
0x180d   :  { %13597 = vrcp.f32 %v5745_v1  ;;  %v5977_v1 = vld [vmem:[#allocation8 + $0x538] sm:$0xff] }
0x1815   :  { %v13594_v20 = vpop.eup %13593 }
0x1816   :  { %v13596_v5 = vpop.eup %13595  ;;  %v5749_v23 = vmul.f32 %v13594_v20, %v13592_v54  ;;  %v5968_v54 = vld [vmem:[#allocation8 + $0x4f0] sm:$0xff]  ;;  %v5971_v20 = vld [vmem:[#allocation8 + $0x508] sm:$0xff] }
0x1817   :  { %v5748_v14 = vmul.f32 %v13596_v5, %v15577_v11  ;;  %v13598_v6 = vpop.eup %13597  ;;  %v5948_v11 = vld [vmem:[#allocation8 + $0x450] sm:$0xff]  ;;  %v5975_v5 = vld [vmem:[#allocation8 + $0x528] sm:$0xff]  ;;  %v11736_v19 = vpack.c.bf16 %v5968_v54, %v5964_v31  ;;  %v5998_v31 = vld [vmem:[#allocation8 + $0x5e0] sm:$0xff] }
0x1818   :  { %v11728_v42 = vpack.c.bf16 %v5952_v41, %v5948_v11  ;;  %v11706_v4 = vpack.c.bf16 %v5975_v5, %v5971_v20  ;;  %v5980_v41 = vld [vmem:[#allocation8 + $0x550] sm:$0xff] }
0x1819   :  { %v15621_v58 = vadd.f32 %v5749_v23, %v5748_v14  ;;  %v5973_v23 = vld [vmem:[#allocation8 + $0x518] sm:$0xff]  ;;  %v11704_v14 = vpack.c.bf16 %v5966_v13, %v5962_v62  ;;  %v11744_v39 = vpack.c.bf16 %v5984_v25, %v5980_v41  ;;  %v11748_v62 = vpack.c.bf16 %v5992_v28, %v5988_v46  ;;  %v5994_v13 = vld [vmem:[#allocation8 + $0x5c0] sm:$0xff]  ;;  %v5996_v54 = vld [vmem:[#allocation8 + $0x5d0] sm:$0xff] }
0x181a   :  { %v11738_v34 = vpack.c.bf16 %v5977_v1, %v5973_v23  ;;  %v6000_v20 = vld [vmem:[#allocation8 + $0x5f0] sm:$0xff]  ;;  %v11720_v5 = vpack.c.bf16 %v5998_v31, %v5994_v13  ;;  %v6284_v1 = vld [vmem:[#allocation6 + $0x600] sm:$0xff]  ;;  %v6303_v41 = vld [vmem:[#allocation6 + $0x698] sm:$0xff] }
0x181b   :  { %13599 = vtanh.f32 %v15621_v58  ;;  %v11752_v23 = vpack.c.bf16 %v6000_v20, %v5996_v54  ;;  %v6311_v46 = vld [vmem:[#allocation6 + $0x6d8] sm:$0xff]  ;;  %v6314_v13 = vld [vmem:[#allocation6 + $0x6f0] sm:$0xff]  ;;  %v6321_v31 = vld [vmem:[#allocation6 + $0x728] sm:$0xff] }
0x181c   :  { %v6319_v54 = vld [vmem:[#allocation6 + $0x718] sm:$0xff] }
0x181d   :  { %v6323_v20 = vld [vmem:[#allocation6 + $0x738] sm:$0xff] }
0x1825   :  { %v13600_v9 = vpop.eup %13599 }
0x1826   :  { %v15624_v27 = vmul.f32 %v13600_v9, %v13598_v6  ;;  %v5983_v6 = vld [vmem:[#allocation8 + $0x568] sm:$0xff]  ;;  %v5981_v9 = vld [vmem:[#allocation8 + $0x558] sm:$0xff] }
0x1828   :  { %5823 = vmatmul.mubr.f32.vlgmr.msra.gmra.mrb[46].mxu0 %v15624_v27  ;;  %5894 = vmatmul.mubr.f32.vlgmr.msra.gmra.mrb[46].mxu1 %v15624_v27 }
0x1829   :  { %11693 = vmatpush1.bf16.msra.mxu0 %v11692_v3  ;;  %11725 = vmatpush1.bf16.msra.mxu1 %v11724_v32  ;;  %v5985_v3 = vld [vmem:[#allocation8 + $0x578] sm:$0xff]  ;;  %v11708_v32 = vpack.c.bf16 %v5974_v57, %v5970_v53  ;;  %v6286_v53 = vld [vmem:[#allocation6 + $0x610] sm:$0xff] }
0x182a   :  { %11695 = vmatprep.subr.bf16.mxu0 %v11694_v22  ;;  %11727 = vmatprep.subr.bf16.mxu1 %v11726_v50  ;;  %v5982_v22 = vld [vmem:[#allocation8 + $0x560] sm:$0xff]  ;;  %v11710_v50 = vpack.c.bf16 %v5983_v6, %v5979_v26  ;;  %v11742_v11 = vpack.c.bf16 %v5985_v3, %v5981_v9  ;;  %v6290_v57 = vld [vmem:[#allocation6 + $0x630] sm:$0xff]  ;;  %v6299_v26 = vld [vmem:[#allocation6 + $0x678] sm:$0xff] }
0x182b   :  { %6089 = vmatprep.mubr.f32.mxu0 %v14025_v0  ;;  %6202 = vmatprep.mubr.f32.mxu1 %v14025_v0  ;;  %v6292_v6 = vld [vmem:[#allocation6 + $0x640] sm:$0xff]  ;;  %v15672_v3 = vpack.c.bf16 %v6299_v26, %v6295_v38  ;;  %v6331_v38 = vld [vmem:[#allocation6 + $0x778] sm:$0xff] }
0x182c   :  { %v6296_v9 = vld [vmem:[#allocation6 + $0x660] sm:$0xff] }
0x182d   :  { %11697 = vmatpush1.bf16.msra.mxu0 %v11696_v2  ;;  %11729 = vmatpush1.bf16.msra.mxu1 %v11728_v42  ;;  %v5993_v2 = vld [vmem:[#allocation8 + $0x5b8] sm:$0xff]  ;;  %v11712_v42 = vpack.c.bf16 %v5982_v22, %v5978_v60  ;;  %v6298_v60 = vld [vmem:[#allocation6 + $0x670] sm:$0xff]  ;;  %v6324_v26 = vld [vmem:[#allocation6 + $0x740] sm:$0xff] }
0x182e   :  { %11699 = vmatprep.subr.bf16.mxu0 %v11698_v44  ;;  %11731 = vmatprep.subr.bf16.mxu1 %v11730_v56  ;;  %v5990_v44 = vld [vmem:[#allocation8 + $0x5a0] sm:$0xff]  ;;  %v11714_v56 = vpack.c.bf16 %v5991_v18, %v5987_v52  ;;  %v11746_v7 = vpack.c.bf16 %v5993_v2, %v5989_v35  ;;  %v6307_v52 = vld [vmem:[#allocation6 + $0x6b8] sm:$0xff] }
0x182f   :  { %v6300_v18 = vld [vmem:[#allocation6 + $0x680] sm:$0xff]  ;;  %v15684_v2 = vpack.c.bf16 %v6307_v52, %v6303_v41  ;;  %v6337_v41 = vld [vmem:[#allocation6 + $0x7a8] sm:$0xff]  ;;  %v6335_v52 = vld [vmem:[#allocation6 + $0x798] sm:$0xff] }
0x1830   :  { %v6304_v35 = vld [vmem:[#allocation6 + $0x6a0] sm:$0xff] }
0x1831   :  { %11701 = vmatpush1.bf16.msra.mxu0 %v11700_v43  ;;  %11733 = vmatpush1.bf16.msra.mxu1 %v11732_v12  ;;  %v6001_v43 = vld [vmem:[#allocation8 + $0x5f8] sm:$0xff]  ;;  %v11716_v12 = vpack.c.bf16 %v5990_v44, %v5986_v49  ;;  %v6306_v49 = vld [vmem:[#allocation6 + $0x6b0] sm:$0xff] }
0x1832   :  { %11703 = vmatprep.subr.bf16.mxu0 %v11702_v36  ;;  %11735 = vmatprep.subr.bf16.mxu1 %v11734_v37  ;;  %v11718_v36 = vpack.c.bf16 %v5999_v16, %v5995_v63  ;;  %v11750_v37 = vpack.c.bf16 %v6001_v43, %v5997_v40  ;;  %v6315_v63 = vld [vmem:[#allocation6 + $0x6f8] sm:$0xff]  ;;  %v6308_v16 = vld [vmem:[#allocation6 + $0x6c0] sm:$0xff] }
0x1833   :  { %v6312_v40 = vld [vmem:[#allocation6 + $0x6e0] sm:$0xff]  ;;  %v15696_v43 = vpack.c.bf16 %v6315_v63, %v6311_v46  ;;  %v6334_v46 = vld [vmem:[#allocation6 + $0x790] sm:$0xff] }
0x1834   :  { %v6338_v63 = vld [vmem:[#allocation6 + $0x7b0] sm:$0xff] }
0x1835   :  { %11705 = vmatpush1.bf16.msra.mxu0 %v11704_v14  ;;  %11737 = vmatpush1.bf16.msra.mxu1 %v11736_v19 }
0x1836   :  { %11707 = vmatprep.subr.bf16.mxu0 %v11706_v4  ;;  %11739 = vmatprep.subr.bf16.mxu1 %v11738_v34  ;;  %v6293_v4 = vld [vmem:[#allocation6 + $0x648] sm:$0xff] }
0x1837   :  { %v6297_v34 = vld [vmem:[#allocation6 + $0x668] sm:$0xff] }
0x1838   :  { %v15670_v8 = vpack.c.bf16 %v6297_v34, %v6293_v4  ;;  %v6327_v34 = vld [vmem:[#allocation6 + $0x758] sm:$0xff] }
0x1839   :  { %11709 = vmatpush1.bf16.msra.mxu0 %v11708_v32  ;;  %11741 = vmatpush1.bf16.msra.mxu1 %v11740_v30  ;;  %v15674_v32 = vpack.c.bf16 %v6296_v9, %v6292_v6  ;;  %v6294_v30 = vld [vmem:[#allocation6 + $0x650] sm:$0xff]  ;;  %v15718_v6 = vpack.c.bf16 %v6331_v38, %v6327_v34  ;;  %v6328_v9 = vld [vmem:[#allocation6 + $0x760] sm:$0xff] }
0x183a   :  { %11711 = vmatprep.subr.bf16.mxu0 %v11710_v50  ;;  %11743 = vmatprep.subr.bf16.mxu1 %v11742_v11  ;;  %v15677_v22 = vpack.c.bf16 %v6298_v60, %v6294_v30  ;;  %v6301_v50 = vld [vmem:[#allocation6 + $0x688] sm:$0xff]  ;;  %v6326_v30 = vld [vmem:[#allocation6 + $0x750] sm:$0xff] }
0x183b   :  { %v6305_v11 = vld [vmem:[#allocation6 + $0x6a8] sm:$0xff]  ;;  %v6330_v60 = vld [vmem:[#allocation6 + $0x770] sm:$0xff] }
0x183c   :  { %v15682_v25 = vpack.c.bf16 %v6305_v11, %v6301_v50  ;;  %v15721_v50 = vpack.c.bf16 %v6328_v9, %v6324_v26  ;;  %v6333_v11 = vld [vmem:[#allocation6 + $0x788] sm:$0xff] }
0x183d   :  { %11713 = vmatpush1.bf16.msra.mxu0 %v11712_v42  ;;  %11745 = vmatpush1.bf16.msra.mxu1 %v11744_v39  ;;  %v15686_v42 = vpack.c.bf16 %v6304_v35, %v6300_v18  ;;  %v6302_v39 = vld [vmem:[#allocation6 + $0x690] sm:$0xff]  ;;  %v15725_v18 = vpack.c.bf16 %v6330_v60, %v6326_v30  ;;  %v15727_v35 = vpack.c.bf16 %v6337_v41, %v6333_v11 }
0x183e   :  { %11715 = vmatprep.subr.bf16.mxu0 %v11714_v56  ;;  %11747 = vmatprep.subr.bf16.mxu1 %v11746_v7  ;;  %v15689_v44 = vpack.c.bf16 %v6306_v49, %v6302_v39  ;;  %v6309_v56 = vld [vmem:[#allocation6 + $0x6c8] sm:$0xff]  ;;  %v6339_v39 = vld [vmem:[#allocation6 + $0x7b8] sm:$0xff]  ;;  %v6332_v49 = vld [vmem:[#allocation6 + $0x780] sm:$0xff] }
0x183f   :  { %v6313_v7 = vld [vmem:[#allocation6 + $0x6e8] sm:$0xff] }
0x1840   :  { %v15694_v28 = vpack.c.bf16 %v6313_v7, %v6309_v56  ;;  %v6336_v56 = vld [vmem:[#allocation6 + $0x7a0] sm:$0xff]  ;;  %v15730_v7 = vpack.c.bf16 %v6339_v39, %v6335_v52 }
0x1841   :  { %11717 = vmatpush1.bf16.msra.mxu0 %v11716_v12  ;;  %11749 = vmatpush1.bf16.msra.mxu1 %v11748_v62  ;;  %v15698_v12 = vpack.c.bf16 %v6312_v40, %v6308_v16  ;;  %v6310_v62 = vld [vmem:[#allocation6 + $0x6d0] sm:$0xff]  ;;  %v15733_v16 = vpack.c.bf16 %v6336_v56, %v6332_v49  ;;  %v15737_v40 = vpack.c.bf16 %v6338_v63, %v6334_v46 }
0x1842   :  { %11719 = vmatprep.subr.bf16.mxu0 %v11718_v36  ;;  %11751 = vmatprep.subr.bf16.mxu1 %v11750_v37  ;;  %v6317_v36 = vld [vmem:[#allocation6 + $0x708] sm:$0xff]  ;;  %v15701_v37 = vpack.c.bf16 %v6314_v13, %v6310_v62 }
0x1843   :  { %v6341_v62 = vld [vmem:[#allocation6 + $0x7c8] sm:$0xff] }
0x1844   :  { %v6345_v13 = vld [vmem:[#allocation6 + $0x7e8] sm:$0xff] }
0x1845   :  { %11721 = vmatpush1.bf16.msra.mxu0 %v11720_v5  ;;  %11753 = vmatpush1.bf16.msra.mxu1 %v11752_v23  ;;  %v15705_v5 = vpack.c.bf16 %v6321_v31, %v6317_v36  ;;  %v15707_v23 = vpack.c.bf16 %v6323_v20, %v6319_v54  ;;  %v6343_v36 = vld [vmem:[#allocation6 + $0x7d8] sm:$0xff]  ;;  %v15742_v31 = vpack.c.bf16 %v6345_v13, %v6341_v62  ;;  %v6340_v20 = vld [vmem:[#allocation6 + $0x7c0] sm:$0xff] }
0x1846   :  { %v6347_v54 = vld [vmem:[#allocation6 + $0x7f8] sm:$0xff] }
0x1848   :  { %6090 = vmatmul.mubr.f32.vlgmr.msra.gmra.mrb[48].mxu0 %v15350_v15  ;;  %6203 = vmatmul.mubr.f32.vlgmr.msra.gmra.mrb[48].mxu1 %v15350_v15  ;;  %v6285_v15 = vld [vmem:[#allocation6 + $0x608] sm:$0xff] }
0x1849   :  { %6095 = vmatprep.mubr.f32.mxu0 %v14025_v0  ;;  %6208 = vmatprep.mubr.f32.mxu1 %v14025_v0 }
0x184c   :  { %6096 = vmatmul.mubr.f32.gmra.mrb[50].mxu0 %v15396_v47  ;;  %6209 = vmatmul.mubr.f32.gmra.mrb[50].mxu1 %v15396_v47  ;;  %v6289_v47 = vld [vmem:[#allocation6 + $0x628] sm:$0xff] }
0x184d   :  { %6101 = vmatprep.mubr.f32.mxu0 %v14025_v0  ;;  %6214 = vmatprep.mubr.f32.mxu1 %v14025_v0 }
0x1850   :  { %6102 = vmatmul.mubr.f32.gmra.mrb[52].mxu0 %v15442_v29  ;;  %6215 = vmatmul.mubr.f32.gmra.mrb[52].mxu1 %v15442_v29  ;;  %v6287_v29 = vld [vmem:[#allocation6 + $0x618] sm:$0xff] }
0x1851   :  { %6107 = vmatprep.mubr.f32.mxu0 %v14025_v0  ;;  %6220 = vmatprep.mubr.f32.mxu1 %v14025_v0 }
0x1854   :  { %6108 = vmatmul.mubr.f32.gmra.mrb[54].mxu0 %v15488_v17  ;;  %6221 = vmatmul.mubr.f32.gmra.mrb[54].mxu1 %v15488_v17  ;;  %v15658_v17 = vpack.c.bf16 %v6289_v47, %v6285_v15  ;;  %v6316_v15 = vld [vmem:[#allocation6 + $0x700] sm:$0xff] }
0x1855   :  { %6113 = vmatprep.mubr.f32.mxu0 %v14025_v0  ;;  %6226 = vmatprep.mubr.f32.mxu1 %v14025_v0  ;;  %v6320_v47 = vld [vmem:[#allocation6 + $0x720] sm:$0xff] }
0x1856   :  { %11755 = vmatprep.subr.bf16.mxu0 %v15658_v17 }
0x1858   :  { %6114 = vmatmul.mubr.f32.gmra.mrb[56].mxu0 %v15534_v24  ;;  %6227 = vmatmul.mubr.f32.gmra.mrb[56].mxu1 %v15534_v24  ;;  %v6291_v24 = vld [vmem:[#allocation6 + $0x638] sm:$0xff] }
0x1859   :  { %6119 = vmatprep.mubr.f32.mxu0 %v14025_v0  ;;  %6232 = vmatprep.mubr.f32.mxu1 %v14025_v0  ;;  %v15660_v14 = vpack.c.bf16 %v6291_v24, %v6287_v29  ;;  %v6318_v29 = vld [vmem:[#allocation6 + $0x710] sm:$0xff]  ;;  %v15710_v24 = vpack.c.bf16 %v6320_v47, %v6316_v15  ;;  %v6344_v15 = vld [vmem:[#allocation6 + $0x7e0] sm:$0xff]  ;;  %v15744_v47 = vpack.c.bf16 %v6347_v54, %v6343_v36 }
0x185b   :  { %11787 = vmatprep.subr.bf16.mxu1 %v15660_v14 }
0x185c   :  { %6120 = vmatmul.mubr.f32.gmra.mrb[58].mxu0 %v15580_v61  ;;  %6233 = vmatmul.mubr.f32.gmra.mrb[58].mxu1 %v15580_v61  ;;  %v6288_v61 = vld [vmem:[#allocation6 + $0x620] sm:$0xff] }
0x185d   :  { %6125 = vmatprep.mubr.f32.mxu0 %v14025_v0  ;;  %6238 = vmatprep.mubr.f32.mxu1 %v14025_v0  ;;  %v15662_v19 = vpack.c.bf16 %v6288_v61, %v6284_v1  ;;  %v6322_v1 = vld [vmem:[#allocation6 + $0x730] sm:$0xff]  ;;  %v6325_v61 = vld [vmem:[#allocation6 + $0x748] sm:$0xff] }
0x185f   :  { %11757 = vmatpush1.bf16.msra.mxu0 %v15662_v19 }
0x1860   :  { %6126 = vmatmul.mubr.f32.gmra.mrb[60].mxu0 %v15624_v27  ;;  %6239 = vmatmul.mubr.f32.gmra.mrb[60].mxu1 %v15624_v27  ;;  %v15665_v27 = vpack.c.bf16 %v6290_v57, %v6286_v53  ;;  %v6329_v53 = vld [vmem:[#allocation6 + $0x768] sm:$0xff]  ;;  %v15714_v57 = vpack.c.bf16 %v6322_v1, %v6318_v29  ;;  %v15746_v29 = vpack.c.bf16 %v6344_v15, %v6340_v20  ;;  %v6342_v1 = vld [vmem:[#allocation6 + $0x7d0] sm:$0xff] }
0x1861   :  { %6131 = vmatprep.mubr.f32.mxu0 %v14025_v0  ;;  %6244 = vmatprep.mubr.f32.mxu1 %v14025_v0  ;;  %v15716_v4 = vpack.c.bf16 %v6329_v53, %v6325_v61  ;;  %v6346_v61 = vld [vmem:[#allocation6 + $0x7f0] sm:$0xff] }
0x1862   :  { %11789 = vmatpush1.bf16.msra.mxu1 %v15665_v27  ;;  %11759 = vmatprep.subr.bf16.mxu0 %v15670_v8  ;;  %v15749_v53 = vpack.c.bf16 %v6346_v61, %v6342_v1 }
0x1863   :  { %11791 = vmatprep.subr.bf16.mxu1 %v15672_v3  ;;  %11761 = vmatpush1.bf16.msra.mxu0 %v15674_v32 }
0x1864   :  { %11763 = vmatprep.subr.bf16.mxu0 %v15682_v25 }
0x1866   :  { %11793 = vmatpush1.bf16.msra.mxu1 %v15677_v22 }
0x1867   :  { %11795 = vmatprep.subr.bf16.mxu1 %v15684_v2  ;;  %11765 = vmatpush1.bf16.msra.mxu0 %v15686_v42 }
0x1868   :  { %11767 = vmatprep.subr.bf16.mxu0 %v15694_v28 }
0x186a   :  { %11797 = vmatpush1.bf16.msra.mxu1 %v15689_v44 }
0x186b   :  { %11799 = vmatprep.subr.bf16.mxu1 %v15696_v43  ;;  %11769 = vmatpush1.bf16.msra.mxu0 %v15698_v12 }
0x186c   :  { %11771 = vmatprep.subr.bf16.mxu0 %v15705_v5 }
0x186e   :  { %11801 = vmatpush1.bf16.msra.mxu1 %v15701_v37 }
0x186f   :  { %11803 = vmatprep.subr.bf16.mxu1 %v15707_v23  ;;  %11773 = vmatpush1.bf16.msra.mxu0 %v15710_v24 }
0x1870   :  { %11775 = vmatprep.subr.bf16.mxu0 %v15716_v4 }
0x1872   :  { %11805 = vmatpush1.bf16.msra.mxu1 %v15714_v57 }
0x1873   :  { %11807 = vmatprep.subr.bf16.mxu1 %v15718_v6  ;;  %11777 = vmatpush1.bf16.msra.mxu0 %v15721_v50 }
0x1874   :  { %11779 = vmatprep.subr.bf16.mxu0 %v15727_v35 }
0x1876   :  { %11809 = vmatpush1.bf16.msra.mxu1 %v15725_v18 }
0x1877   :  { %11811 = vmatprep.subr.bf16.mxu1 %v15730_v7  ;;  %11781 = vmatpush1.bf16.msra.mxu0 %v15733_v16 }
0x1878   :  { %11783 = vmatprep.subr.bf16.mxu0 %v15742_v31 }
0x187a   :  { %11813 = vmatpush1.bf16.msra.mxu1 %v15737_v40 }
0x187b   :  { %11815 = vmatprep.subr.bf16.mxu1 %v15744_v47  ;;  %11785 = vmatpush1.bf16.msra.mxu0 %v15746_v29 }
0x187c   :  { %11819 = vmatprep.subr.bf16.mxu0 %v15658_v17 }
0x187e   :  { %11817 = vmatpush1.bf16.msra.mxu1 %v15749_v53 }
0x187f   :  { %11851 = vmatprep.subr.bf16.mxu1 %v15660_v14 }
0x18fb   :  { %v5824_v34 = vpop.f32.mrb[46].mxu0  ;;  %v5895_v38 = vpop.f32.mrb[46].mxu1 }
0x18fc   :  { %v12944_v26 = vadd.f32 %v5824_v34, %v15332_v51  ;;  %v5826_v9 = vpop.f32.mrb[47].mxu0  ;;  %v5897_v30 = vpop.f32.mrb[47].mxu1  ;;  %v12960_v49 = vadd.f32 %v5895_v38, %v15344_v33 }
0x18fd   :  { %v12945_v60 = vadd.f32 %v5826_v9, %v15335_v59  ;;  %v12961_v52 = vadd.f32 %v5897_v30, %v15340_v21 }
0x18fe   :  { %v9730_v11 = vmul.f32 -1.442695, %v12944_v26 }
0x18ff   :  { %v9731_v41 = vmul.f32 -1.442695, %v12945_v60  ;;  %v9732_v39 = vmul.f32 -1.442695, %v12961_v52 }
0x1900   :  { %13601 = vpow2.f32 %v9730_v11 }
0x1901   :  { %13603 = vpow2.f32 %v9731_v41 }
0x1902   :  { %13605 = vpow2.f32 %v9732_v39 }
0x1903   :  { %13607 = vtanh.f32 %v12960_v49 }
0x190a   :  { %v13602_v56 = vpop.eup %13601 }
0x190b   :  { %v13604_v46 = vpop.eup %13603  ;;  %v5907_v63 = vadd.f32 1.0, %v13602_v56 }
0x190c   :  { %v5913_v62 = vadd.f32 1.0, %v13604_v46  ;;  %v13606_v51 = vpop.eup %13605 }
0x190d   :  { %13609 = vrcp.f32 %v5907_v63  ;;  %v13608_v13 = vpop.eup %13607  ;;  %v5920_v20 = vadd.f32 1.0, %v13606_v51 }
0x190e   :  { %13611 = vrcp.f32 %v5913_v62 }
0x190f   :  { %13613 = vrcp.f32 %v5920_v20 }
0x1917   :  { %v13610_v59 = vpop.eup %13609 }
0x1918   :  { %v13612_v36 = vpop.eup %13611  ;;  %v5924_v54 = vmul.f32 %v13610_v59, %v13608_v13 }
0x1919   :  { %v5923_v15 = vmul.f32 %v13612_v36, %v15621_v58  ;;  %v13614_v33 = vpop.eup %13613  ;;  %v6003_v58 = vld [vmem:[#allocation9 + $0xc] sm:$0xf] }
0x191a   :  { %v15800_v34 = vrot.slane %v6003_v58, %v14387_v45  ;;  %v15803_v38 = vrot.slane %v6003_v58, %v14389_v48  ;;  %v15808_v49 = vrot.slane %v6003_v58, %v14397_v55  ;;  %v15812_v46 = vrot.slane %v6003_v58, %v14404_v10 }
0x191b   :  { %v5925_v21 = vadd.f32 %v5924_v54, %v5923_v15 }
0x191d   :  { %13615 = vtanh.f32 %v5925_v21 }
0x1927   :  { %v13616_v1 = vpop.eup %13615 }
0x1928   :  { %v5927_v61 = vmul.f32 %v13616_v1, %v13614_v33 }
0x192a   :  { %6132 = vmatmul.mubr.f32.gmra.mrb[62].mxu0 %v5927_v61  ;;  %6245 = vmatmul.mubr.f32.gmra.mrb[62].mxu1 %v5927_v61 }
0x192b   :  { %6416 = vmatprep.mubr.f32.mxu0 %v14025_v0  ;;  %6487 = vmatprep.mubr.f32.mxu1 %v14025_v0 }
0x192e   :  { %6417 = vmatmul.mubr.f32.vlgmr.msra.gmra.mrb[48].mxu0 %v14025_v0  ;;  %6488 = vmatmul.mubr.f32.vlgmr.msra.gmra.mrb[48].mxu1 %v14025_v0 }
0x192f   :  { %11821 = vmatpush1.bf16.msra.mxu0 %v15662_v19  ;;  %11853 = vmatpush1.bf16.msra.mxu1 %v15665_v27 }
0x1930   :  { %11823 = vmatprep.subr.bf16.mxu0 %v15670_v8  ;;  %11855 = vmatprep.subr.bf16.mxu1 %v15672_v3 }
0x1931   :  { %6591 = vmatprep.mubr.f32.mxu0 %v14025_v0  ;;  %6662 = vmatprep.mubr.f32.mxu1 %v14025_v0 }
0x1933   :  { %11825 = vmatpush1.bf16.msra.mxu0 %v15674_v32  ;;  %11857 = vmatpush1.bf16.msra.mxu1 %v15677_v22 }
0x1934   :  { %11827 = vmatprep.subr.bf16.mxu0 %v15682_v25  ;;  %11859 = vmatprep.subr.bf16.mxu1 %v15684_v2 }
0x1937   :  { %11829 = vmatpush1.bf16.msra.mxu0 %v15686_v42  ;;  %11861 = vmatpush1.bf16.msra.mxu1 %v15689_v44 }
0x1938   :  { %11831 = vmatprep.subr.bf16.mxu0 %v15694_v28  ;;  %11863 = vmatprep.subr.bf16.mxu1 %v15696_v43 }
0x193b   :  { %11833 = vmatpush1.bf16.msra.mxu0 %v15698_v12  ;;  %11865 = vmatpush1.bf16.msra.mxu1 %v15701_v37 }
0x193c   :  { %11835 = vmatprep.subr.bf16.mxu0 %v15705_v5  ;;  %11867 = vmatprep.subr.bf16.mxu1 %v15707_v23 }
0x193f   :  { %11837 = vmatpush1.bf16.msra.mxu0 %v15710_v24  ;;  %11869 = vmatpush1.bf16.msra.mxu1 %v15714_v57 }
0x1940   :  { %11839 = vmatprep.subr.bf16.mxu0 %v15716_v4  ;;  %11871 = vmatprep.subr.bf16.mxu1 %v15718_v6 }
0x1943   :  { %11841 = vmatpush1.bf16.msra.mxu0 %v15721_v50  ;;  %11873 = vmatpush1.bf16.msra.mxu1 %v15725_v18 }
0x1944   :  { %11843 = vmatprep.subr.bf16.mxu0 %v15727_v35  ;;  %11875 = vmatprep.subr.bf16.mxu1 %v15730_v7 }
0x1947   :  { %11845 = vmatpush1.bf16.msra.mxu0 %v15733_v16  ;;  %11877 = vmatpush1.bf16.msra.mxu1 %v15737_v40 }
0x1948   :  { %11847 = vmatprep.subr.bf16.mxu0 %v15742_v31  ;;  %11879 = vmatprep.subr.bf16.mxu1 %v15744_v47 }
0x194b   :  { %11849 = vmatpush1.bf16.msra.mxu0 %v15746_v29  ;;  %11881 = vmatpush1.bf16.msra.mxu1 %v15749_v53 }
0x194c   :  { %11883 = vmatprep.subr.bf16.mxu0 %v15658_v17  ;;  %11915 = vmatprep.subr.bf16.mxu1 %v15660_v14 }
0x1a01   :  { %v6418_v26 = vpop.f32.mrb[48].mxu0  ;;  %v6489_v9 = vpop.f32.mrb[48].mxu1 }
0x1a02   :  { %v12962_v30 = vadd.f32 %v6418_v26, %v15800_v34  ;;  %v6420_v60 = vpop.f32.mrb[49].mxu0  ;;  %v6491_v11 = vpop.f32.mrb[49].mxu1  ;;  %v12978_v62 = vadd.f32 %v6489_v9, %v15812_v46 }
0x1a03   :  { %v12963_v41 = vadd.f32 %v6420_v60, %v15803_v38  ;;  %v12979_v56 = vadd.f32 %v6491_v11, %v15808_v49 }
0x1a04   :  { %v9733_v52 = vmul.f32 -1.442695, %v12962_v30 }
0x1a05   :  { %v9734_v39 = vmul.f32 -1.442695, %v12963_v41  ;;  %v9735_v63 = vmul.f32 -1.442695, %v12979_v56 }
0x1a06   :  { %13617 = vpow2.f32 %v9733_v52 }
0x1a07   :  { %13619 = vpow2.f32 %v9734_v39 }
0x1a08   :  { %13621 = vpow2.f32 %v9735_v63 }
0x1a09   :  { %13623 = vtanh.f32 %v12978_v62 }
0x1a10   :  { %v13618_v51 = vpop.eup %13617 }
0x1a11   :  { %v13620_v13 = vpop.eup %13619  ;;  %v6501_v59 = vadd.f32 1.0, %v13618_v51 }
0x1a12   :  { %v6507_v36 = vadd.f32 1.0, %v13620_v13  ;;  %v13622_v54 = vpop.eup %13621 }
0x1a13   :  { %13625 = vrcp.f32 %v6501_v59  ;;  %v13624_v20 = vpop.eup %13623  ;;  %v6514_v1 = vadd.f32 1.0, %v13622_v54 }
0x1a14   :  { %13627 = vrcp.f32 %v6507_v36 }
0x1a15   :  { %13629 = vrcp.f32 %v6514_v1 }
0x1a1d   :  { %v13626_v15 = vpop.eup %13625 }
0x1a1e   :  { %v13628_v21 = vpop.eup %13627  ;;  %v6518_v33 = vmul.f32 %v13626_v15, %v13624_v20 }
0x1a1f   :  { %v6517_v61 = vmul.f32 0.0, %v13628_v21  ;;  %v13630_v26 = vpop.eup %13629 }
0x1a21   :  { %v15815_v58 = vadd.f32 %v6518_v33, %v6517_v61 }
0x1a23   :  { %13631 = vtanh.f32 %v15815_v58 }
0x1a2d   :  { %v13632_v9 = vpop.eup %13631 }
0x1a2e   :  { %v15818_v30 = vmul.f32 %v13632_v9, %v13630_v26 }
0x1a30   :  { %6592 = vmatmul.mubr.f32.vlgmr.msra.gmra.mrb[50].mxu0 %v15818_v30  ;;  %6663 = vmatmul.mubr.f32.vlgmr.msra.gmra.mrb[50].mxu1 %v15818_v30 }
0x1a31   :  { %11885 = vmatpush1.bf16.msra.mxu0 %v15662_v19  ;;  %11917 = vmatpush1.bf16.msra.mxu1 %v15665_v27 }
0x1a32   :  { %11887 = vmatprep.subr.bf16.mxu0 %v15670_v8  ;;  %11919 = vmatprep.subr.bf16.mxu1 %v15672_v3 }
0x1a33   :  { %6766 = vmatprep.mubr.f32.mxu0 %v14025_v0  ;;  %6837 = vmatprep.mubr.f32.mxu1 %v14025_v0 }
0x1a35   :  { %11889 = vmatpush1.bf16.msra.mxu0 %v15674_v32  ;;  %11921 = vmatpush1.bf16.msra.mxu1 %v15677_v22 }
0x1a36   :  { %11891 = vmatprep.subr.bf16.mxu0 %v15682_v25  ;;  %11923 = vmatprep.subr.bf16.mxu1 %v15684_v2 }
0x1a39   :  { %11893 = vmatpush1.bf16.msra.mxu0 %v15686_v42  ;;  %11925 = vmatpush1.bf16.msra.mxu1 %v15689_v44 }
0x1a3a   :  { %11895 = vmatprep.subr.bf16.mxu0 %v15694_v28  ;;  %11927 = vmatprep.subr.bf16.mxu1 %v15696_v43 }
0x1a3d   :  { %11897 = vmatpush1.bf16.msra.mxu0 %v15698_v12  ;;  %11929 = vmatpush1.bf16.msra.mxu1 %v15701_v37 }
0x1a3e   :  { %11899 = vmatprep.subr.bf16.mxu0 %v15705_v5  ;;  %11931 = vmatprep.subr.bf16.mxu1 %v15707_v23 }
0x1a41   :  { %11901 = vmatpush1.bf16.msra.mxu0 %v15710_v24  ;;  %11933 = vmatpush1.bf16.msra.mxu1 %v15714_v57 }
0x1a42   :  { %11903 = vmatprep.subr.bf16.mxu0 %v15716_v4  ;;  %11935 = vmatprep.subr.bf16.mxu1 %v15718_v6 }
0x1a45   :  { %11905 = vmatpush1.bf16.msra.mxu0 %v15721_v50  ;;  %11937 = vmatpush1.bf16.msra.mxu1 %v15725_v18 }
0x1a46   :  { %11907 = vmatprep.subr.bf16.mxu0 %v15727_v35  ;;  %11939 = vmatprep.subr.bf16.mxu1 %v15730_v7 }
0x1a49   :  { %11909 = vmatpush1.bf16.msra.mxu0 %v15733_v16  ;;  %11941 = vmatpush1.bf16.msra.mxu1 %v15737_v40 }
0x1a4a   :  { %11911 = vmatprep.subr.bf16.mxu0 %v15742_v31  ;;  %11943 = vmatprep.subr.bf16.mxu1 %v15744_v47 }
0x1a4d   :  { %11913 = vmatpush1.bf16.msra.mxu0 %v15746_v29  ;;  %11945 = vmatpush1.bf16.msra.mxu1 %v15749_v53 }
0x1a4e   :  { %11947 = vmatprep.subr.bf16.mxu0 %v15658_v17  ;;  %11979 = vmatprep.subr.bf16.mxu1 %v15660_v14 }
0x1b03   :  { %v6593_v60 = vpop.f32.mrb[50].mxu0  ;;  %v6664_v11 = vpop.f32.mrb[50].mxu1 }
0x1b04   :  { %v12964_v41 = vadd.f32 %v6593_v60, %v15800_v34  ;;  %v6595_v52 = vpop.f32.mrb[51].mxu0  ;;  %v6666_v39 = vpop.f32.mrb[51].mxu1  ;;  %v12980_v59 = vadd.f32 %v6664_v11, %v15812_v46 }
0x1b05   :  { %v12965_v56 = vadd.f32 %v6595_v52, %v15803_v38  ;;  %v12981_v51 = vadd.f32 %v6666_v39, %v15808_v49 }
0x1b06   :  { %v9736_v63 = vmul.f32 -1.442695, %v12964_v41 }
0x1b07   :  { %v9737_v62 = vmul.f32 -1.442695, %v12965_v56  ;;  %v9738_v13 = vmul.f32 -1.442695, %v12981_v51 }
0x1b08   :  { %13633 = vpow2.f32 %v9736_v63 }
0x1b09   :  { %13635 = vpow2.f32 %v9737_v62 }
0x1b0a   :  { %13637 = vpow2.f32 %v9738_v13 }
0x1b0b   :  { %13639 = vtanh.f32 %v12980_v59 }
0x1b12   :  { %v13634_v36 = vpop.eup %13633 }
0x1b13   :  { %v13636_v54 = vpop.eup %13635  ;;  %v6676_v20 = vadd.f32 1.0, %v13634_v36 }
0x1b14   :  { %v6682_v15 = vadd.f32 1.0, %v13636_v54  ;;  %v13638_v21 = vpop.eup %13637 }
0x1b15   :  { %13641 = vrcp.f32 %v6676_v20  ;;  %v13640_v33 = vpop.eup %13639  ;;  %v6689_v9 = vadd.f32 1.0, %v13638_v21 }
0x1b16   :  { %13643 = vrcp.f32 %v6682_v15 }
0x1b17   :  { %13645 = vrcp.f32 %v6689_v9 }
0x1b1f   :  { %v13642_v1 = vpop.eup %13641 }
0x1b20   :  { %v13644_v61 = vpop.eup %13643  ;;  %v6693_v26 = vmul.f32 %v13642_v1, %v13640_v33 }
0x1b21   :  { %v6692_v60 = vmul.f32 %v13644_v61, %v15815_v58  ;;  %v13646_v11 = vpop.eup %13645 }
0x1b23   :  { %v15861_v41 = vadd.f32 %v6693_v26, %v6692_v60 }
0x1b25   :  { %13647 = vtanh.f32 %v15861_v41 }
0x1b2f   :  { %v13648_v52 = vpop.eup %13647 }
0x1b30   :  { %v15864_v39 = vmul.f32 %v13648_v52, %v13646_v11 }
0x1b32   :  { %6767 = vmatmul.mubr.f32.vlgmr.msra.gmra.mrb[52].mxu0 %v15864_v39  ;;  %6838 = vmatmul.mubr.f32.vlgmr.msra.gmra.mrb[52].mxu1 %v15864_v39 }
0x1b33   :  { %11949 = vmatpush1.bf16.msra.mxu0 %v15662_v19  ;;  %11981 = vmatpush1.bf16.msra.mxu1 %v15665_v27 }
0x1b34   :  { %11951 = vmatprep.subr.bf16.mxu0 %v15670_v8  ;;  %11983 = vmatprep.subr.bf16.mxu1 %v15672_v3 }
0x1b35   :  { %6941 = vmatprep.mubr.f32.mxu0 %v14025_v0  ;;  %7012 = vmatprep.mubr.f32.mxu1 %v14025_v0 }
0x1b37   :  { %11953 = vmatpush1.bf16.msra.mxu0 %v15674_v32  ;;  %11985 = vmatpush1.bf16.msra.mxu1 %v15677_v22 }
0x1b38   :  { %11955 = vmatprep.subr.bf16.mxu0 %v15682_v25  ;;  %11987 = vmatprep.subr.bf16.mxu1 %v15684_v2 }
0x1b3b   :  { %11957 = vmatpush1.bf16.msra.mxu0 %v15686_v42  ;;  %11989 = vmatpush1.bf16.msra.mxu1 %v15689_v44 }
0x1b3c   :  { %11959 = vmatprep.subr.bf16.mxu0 %v15694_v28  ;;  %11991 = vmatprep.subr.bf16.mxu1 %v15696_v43 }
0x1b3f   :  { %11961 = vmatpush1.bf16.msra.mxu0 %v15698_v12  ;;  %11993 = vmatpush1.bf16.msra.mxu1 %v15701_v37 }
0x1b40   :  { %11963 = vmatprep.subr.bf16.mxu0 %v15705_v5  ;;  %11995 = vmatprep.subr.bf16.mxu1 %v15707_v23 }
0x1b43   :  { %11965 = vmatpush1.bf16.msra.mxu0 %v15710_v24  ;;  %11997 = vmatpush1.bf16.msra.mxu1 %v15714_v57 }
0x1b44   :  { %11967 = vmatprep.subr.bf16.mxu0 %v15716_v4  ;;  %11999 = vmatprep.subr.bf16.mxu1 %v15718_v6 }
0x1b47   :  { %11969 = vmatpush1.bf16.msra.mxu0 %v15721_v50  ;;  %12001 = vmatpush1.bf16.msra.mxu1 %v15725_v18 }
0x1b48   :  { %11971 = vmatprep.subr.bf16.mxu0 %v15727_v35  ;;  %12003 = vmatprep.subr.bf16.mxu1 %v15730_v7 }
0x1b4b   :  { %11973 = vmatpush1.bf16.msra.mxu0 %v15733_v16  ;;  %12005 = vmatpush1.bf16.msra.mxu1 %v15737_v40 }
0x1b4c   :  { %11975 = vmatprep.subr.bf16.mxu0 %v15742_v31  ;;  %12007 = vmatprep.subr.bf16.mxu1 %v15744_v47 }
0x1b4f   :  { %11977 = vmatpush1.bf16.msra.mxu0 %v15746_v29  ;;  %12009 = vmatpush1.bf16.msra.mxu1 %v15749_v53 }
0x1b50   :  { %12011 = vmatprep.subr.bf16.mxu0 %v15658_v17  ;;  %12043 = vmatprep.subr.bf16.mxu1 %v15660_v14 }
0x1c05   :  { %v6768_v58 = vpop.f32.mrb[52].mxu0  ;;  %v6839_v56 = vpop.f32.mrb[52].mxu1 }
0x1c06   :  { %v12966_v63 = vadd.f32 %v6768_v58, %v15800_v34  ;;  %v6770_v62 = vpop.f32.mrb[53].mxu0  ;;  %v6841_v51 = vpop.f32.mrb[53].mxu1  ;;  %v12982_v15 = vadd.f32 %v6839_v56, %v15812_v46 }
0x1c07   :  { %v12967_v13 = vadd.f32 %v6770_v62, %v15803_v38  ;;  %v12983_v54 = vadd.f32 %v6841_v51, %v15808_v49 }
0x1c08   :  { %v9739_v59 = vmul.f32 -1.442695, %v12966_v63 }
0x1c09   :  { %v9740_v36 = vmul.f32 -1.442695, %v12967_v13  ;;  %v9741_v20 = vmul.f32 -1.442695, %v12983_v54 }
0x1c0a   :  { %13649 = vpow2.f32 %v9739_v59 }
0x1c0b   :  { %13651 = vpow2.f32 %v9740_v36 }
0x1c0c   :  { %13653 = vpow2.f32 %v9741_v20 }
0x1c0d   :  { %13655 = vtanh.f32 %v12982_v15 }
0x1c14   :  { %v13650_v21 = vpop.eup %13649 }
0x1c15   :  { %v13652_v33 = vpop.eup %13651  ;;  %v6851_v1 = vadd.f32 1.0, %v13650_v21 }
0x1c16   :  { %v6857_v61 = vadd.f32 1.0, %v13652_v33  ;;  %v13654_v26 = vpop.eup %13653 }
0x1c17   :  { %13657 = vrcp.f32 %v6851_v1  ;;  %v13656_v9 = vpop.eup %13655  ;;  %v6864_v58 = vadd.f32 1.0, %v13654_v26 }
0x1c18   :  { %13659 = vrcp.f32 %v6857_v61 }
0x1c19   :  { %13661 = vrcp.f32 %v6864_v58 }
0x1c21   :  { %v13658_v60 = vpop.eup %13657 }
0x1c22   :  { %v13660_v11 = vpop.eup %13659  ;;  %v6868_v52 = vmul.f32 %v13658_v60, %v13656_v9 }
0x1c23   :  { %v6867_v63 = vmul.f32 %v13660_v11, %v15861_v41  ;;  %v13662_v56 = vpop.eup %13661 }
0x1c25   :  { %v15907_v62 = vadd.f32 %v6868_v52, %v6867_v63 }
0x1c27   :  { %13663 = vtanh.f32 %v15907_v62 }
0x1c31   :  { %v13664_v51 = vpop.eup %13663 }
0x1c32   :  { %v15910_v13 = vmul.f32 %v13664_v51, %v13662_v56 }
0x1c34   :  { %6942 = vmatmul.mubr.f32.vlgmr.msra.gmra.mrb[54].mxu0 %v15910_v13  ;;  %7013 = vmatmul.mubr.f32.vlgmr.msra.gmra.mrb[54].mxu1 %v15910_v13 }
0x1c35   :  { %12013 = vmatpush1.bf16.msra.mxu0 %v15662_v19  ;;  %12045 = vmatpush1.bf16.msra.mxu1 %v15665_v27 }
0x1c36   :  { %12015 = vmatprep.subr.bf16.mxu0 %v15670_v8  ;;  %12047 = vmatprep.subr.bf16.mxu1 %v15672_v3 }
0x1c37   :  { %7116 = vmatprep.mubr.f32.mxu0 %v14025_v0  ;;  %7187 = vmatprep.mubr.f32.mxu1 %v14025_v0 }
0x1c39   :  { %12017 = vmatpush1.bf16.msra.mxu0 %v15674_v32  ;;  %12049 = vmatpush1.bf16.msra.mxu1 %v15677_v22 }
0x1c3a   :  { %12019 = vmatprep.subr.bf16.mxu0 %v15682_v25  ;;  %12051 = vmatprep.subr.bf16.mxu1 %v15684_v2 }
0x1c3d   :  { %12021 = vmatpush1.bf16.msra.mxu0 %v15686_v42  ;;  %12053 = vmatpush1.bf16.msra.mxu1 %v15689_v44 }
0x1c3e   :  { %12023 = vmatprep.subr.bf16.mxu0 %v15694_v28  ;;  %12055 = vmatprep.subr.bf16.mxu1 %v15696_v43 }
0x1c41   :  { %12025 = vmatpush1.bf16.msra.mxu0 %v15698_v12  ;;  %12057 = vmatpush1.bf16.msra.mxu1 %v15701_v37 }
0x1c42   :  { %12027 = vmatprep.subr.bf16.mxu0 %v15705_v5  ;;  %12059 = vmatprep.subr.bf16.mxu1 %v15707_v23 }
0x1c45   :  { %12029 = vmatpush1.bf16.msra.mxu0 %v15710_v24  ;;  %12061 = vmatpush1.bf16.msra.mxu1 %v15714_v57 }
0x1c46   :  { %12031 = vmatprep.subr.bf16.mxu0 %v15716_v4  ;;  %12063 = vmatprep.subr.bf16.mxu1 %v15718_v6 }
0x1c49   :  { %12033 = vmatpush1.bf16.msra.mxu0 %v15721_v50  ;;  %12065 = vmatpush1.bf16.msra.mxu1 %v15725_v18 }
0x1c4a   :  { %12035 = vmatprep.subr.bf16.mxu0 %v15727_v35  ;;  %12067 = vmatprep.subr.bf16.mxu1 %v15730_v7 }
0x1c4d   :  { %12037 = vmatpush1.bf16.msra.mxu0 %v15733_v16  ;;  %12069 = vmatpush1.bf16.msra.mxu1 %v15737_v40 }
0x1c4e   :  { %12039 = vmatprep.subr.bf16.mxu0 %v15742_v31  ;;  %12071 = vmatprep.subr.bf16.mxu1 %v15744_v47 }
0x1c51   :  { %12041 = vmatpush1.bf16.msra.mxu0 %v15746_v29  ;;  %12073 = vmatpush1.bf16.msra.mxu1 %v15749_v53 }
0x1c52   :  { %12075 = vmatprep.subr.bf16.mxu0 %v15658_v17  ;;  %12107 = vmatprep.subr.bf16.mxu1 %v15660_v14 }
0x1d07   :  { %v6943_v41 = vpop.f32.mrb[54].mxu0  ;;  %v7014_v59 = vpop.f32.mrb[54].mxu1 }
0x1d08   :  { %v12968_v36 = vadd.f32 %v6943_v41, %v15800_v34  ;;  %v6945_v54 = vpop.f32.mrb[55].mxu0  ;;  %v7016_v20 = vpop.f32.mrb[55].mxu1  ;;  %v12984_v26 = vadd.f32 %v7014_v59, %v15812_v46 }
0x1d09   :  { %v12969_v15 = vadd.f32 %v6945_v54, %v15803_v38  ;;  %v12985_v1 = vadd.f32 %v7016_v20, %v15808_v49 }
0x1d0a   :  { %v9742_v21 = vmul.f32 -1.442695, %v12968_v36 }
0x1d0b   :  { %v9743_v33 = vmul.f32 -1.442695, %v12969_v15  ;;  %v9744_v61 = vmul.f32 -1.442695, %v12985_v1 }
0x1d0c   :  { %13665 = vpow2.f32 %v9742_v21 }
0x1d0d   :  { %13667 = vpow2.f32 %v9743_v33 }
0x1d0e   :  { %13669 = vpow2.f32 %v9744_v61 }
0x1d0f   :  { %13671 = vtanh.f32 %v12984_v26 }
0x1d16   :  { %v13666_v9 = vpop.eup %13665 }
0x1d17   :  { %v13668_v60 = vpop.eup %13667  ;;  %v7026_v11 = vadd.f32 1.0, %v13666_v9 }
0x1d18   :  { %v7032_v52 = vadd.f32 1.0, %v13668_v60  ;;  %v13670_v58 = vpop.eup %13669 }
0x1d19   :  { %13673 = vrcp.f32 %v7026_v11  ;;  %v13672_v63 = vpop.eup %13671  ;;  %v7039_v36 = vadd.f32 1.0, %v13670_v58 }
0x1d1a   :  { %13675 = vrcp.f32 %v7032_v52 }
0x1d1b   :  { %13677 = vrcp.f32 %v7039_v36 }
0x1d23   :  { %v13674_v56 = vpop.eup %13673 }
0x1d24   :  { %v13676_v51 = vpop.eup %13675  ;;  %v7043_v41 = vmul.f32 %v13674_v56, %v13672_v63 }
0x1d25   :  { %v7042_v54 = vmul.f32 %v13676_v51, %v15907_v62  ;;  %v13678_v59 = vpop.eup %13677 }
0x1d27   :  { %v15953_v20 = vadd.f32 %v7043_v41, %v7042_v54 }
0x1d29   :  { %13679 = vtanh.f32 %v15953_v20 }
0x1d33   :  { %v13680_v15 = vpop.eup %13679 }
0x1d34   :  { %v15956_v21 = vmul.f32 %v13680_v15, %v13678_v59 }
0x1d36   :  { %7117 = vmatmul.mubr.f32.vlgmr.msra.gmra.mrb[56].mxu0 %v15956_v21  ;;  %7188 = vmatmul.mubr.f32.vlgmr.msra.gmra.mrb[56].mxu1 %v15956_v21 }
0x1d37   :  { %12077 = vmatpush1.bf16.msra.mxu0 %v15662_v19  ;;  %12109 = vmatpush1.bf16.msra.mxu1 %v15665_v27 }
0x1d38   :  { %12079 = vmatprep.subr.bf16.mxu0 %v15670_v8  ;;  %12111 = vmatprep.subr.bf16.mxu1 %v15672_v3 }
0x1d39   :  { %7291 = vmatprep.mubr.f32.mxu0 %v14025_v0  ;;  %7362 = vmatprep.mubr.f32.mxu1 %v14025_v0 }
0x1d3b   :  { %12081 = vmatpush1.bf16.msra.mxu0 %v15674_v32  ;;  %12113 = vmatpush1.bf16.msra.mxu1 %v15677_v22 }
0x1d3c   :  { %12083 = vmatprep.subr.bf16.mxu0 %v15682_v25  ;;  %12115 = vmatprep.subr.bf16.mxu1 %v15684_v2 }
0x1d3f   :  { %12085 = vmatpush1.bf16.msra.mxu0 %v15686_v42  ;;  %12117 = vmatpush1.bf16.msra.mxu1 %v15689_v44 }
0x1d40   :  { %12087 = vmatprep.subr.bf16.mxu0 %v15694_v28  ;;  %12119 = vmatprep.subr.bf16.mxu1 %v15696_v43 }
0x1d43   :  { %12089 = vmatpush1.bf16.msra.mxu0 %v15698_v12  ;;  %12121 = vmatpush1.bf16.msra.mxu1 %v15701_v37 }
0x1d44   :  { %12091 = vmatprep.subr.bf16.mxu0 %v15705_v5  ;;  %12123 = vmatprep.subr.bf16.mxu1 %v15707_v23 }
0x1d47   :  { %12093 = vmatpush1.bf16.msra.mxu0 %v15710_v24  ;;  %12125 = vmatpush1.bf16.msra.mxu1 %v15714_v57 }
0x1d48   :  { %12095 = vmatprep.subr.bf16.mxu0 %v15716_v4  ;;  %12127 = vmatprep.subr.bf16.mxu1 %v15718_v6 }
0x1d4b   :  { %12097 = vmatpush1.bf16.msra.mxu0 %v15721_v50  ;;  %12129 = vmatpush1.bf16.msra.mxu1 %v15725_v18 }
0x1d4c   :  { %12099 = vmatprep.subr.bf16.mxu0 %v15727_v35  ;;  %12131 = vmatprep.subr.bf16.mxu1 %v15730_v7 }
0x1d4f   :  { %12101 = vmatpush1.bf16.msra.mxu0 %v15733_v16  ;;  %12133 = vmatpush1.bf16.msra.mxu1 %v15737_v40 }
0x1d50   :  { %12103 = vmatprep.subr.bf16.mxu0 %v15742_v31  ;;  %12135 = vmatprep.subr.bf16.mxu1 %v15744_v47 }
0x1d53   :  { %12105 = vmatpush1.bf16.msra.mxu0 %v15746_v29  ;;  %12137 = vmatpush1.bf16.msra.mxu1 %v15749_v53 }
0x1d54   :  { %12139 = vmatprep.subr.bf16.mxu0 %v15658_v17  ;;  %12171 = vmatprep.subr.bf16.mxu1 %v15660_v14 }
0x1e09   :  { %v7118_v62 = vpop.f32.mrb[56].mxu0  ;;  %v7189_v33 = vpop.f32.mrb[56].mxu1 }
0x1e0a   :  { %v12970_v1 = vadd.f32 %v7118_v62, %v15800_v34  ;;  %v7120_v61 = vpop.f32.mrb[57].mxu0  ;;  %v7191_v26 = vpop.f32.mrb[57].mxu1  ;;  %v12986_v63 = vadd.f32 %v7189_v33, %v15812_v46 }
0x1e0b   :  { %v12971_v9 = vadd.f32 %v7120_v61, %v15803_v38  ;;  %v12987_v52 = vadd.f32 %v7191_v26, %v15808_v49 }
0x1e0c   :  { %v9745_v60 = vmul.f32 -1.442695, %v12970_v1 }
0x1e0d   :  { %v9746_v11 = vmul.f32 -1.442695, %v12971_v9  ;;  %v9747_v58 = vmul.f32 -1.442695, %v12987_v52 }
0x1e0e   :  { %13681 = vpow2.f32 %v9745_v60 }
0x1e0f   :  { %13683 = vpow2.f32 %v9746_v11 }
0x1e10   :  { %13685 = vpow2.f32 %v9747_v58 }
0x1e11   :  { %13687 = vtanh.f32 %v12986_v63 }
0x1e18   :  { %v13682_v56 = vpop.eup %13681 }
0x1e19   :  { %v13684_v51 = vpop.eup %13683  ;;  %v7201_v41 = vadd.f32 1.0, %v13682_v56 }
0x1e1a   :  { %v7207_v36 = vadd.f32 1.0, %v13684_v51  ;;  %v13686_v54 = vpop.eup %13685 }
0x1e1b   :  { %13689 = vrcp.f32 %v7201_v41  ;;  %v13688_v59 = vpop.eup %13687  ;;  %v7214_v61 = vadd.f32 1.0, %v13686_v54 }
0x1e1c   :  { %13691 = vrcp.f32 %v7207_v36 }
0x1e1d   :  { %13693 = vrcp.f32 %v7214_v61 }
0x1e25   :  { %v13690_v15 = vpop.eup %13689 }
0x1e26   :  { %v13692_v62 = vpop.eup %13691  ;;  %v7218_v1 = vmul.f32 %v13690_v15, %v13688_v59 }
0x1e27   :  { %v7217_v9 = vmul.f32 %v13692_v62, %v15953_v20  ;;  %v13694_v33 = vpop.eup %13693 }
0x1e29   :  { %v15999_v26 = vadd.f32 %v7218_v1, %v7217_v9 }
0x1e2b   :  { %13695 = vtanh.f32 %v15999_v26 }
0x1e35   :  { %v13696_v60 = vpop.eup %13695 }
0x1e36   :  { %v16002_v11 = vmul.f32 %v13696_v60, %v13694_v33 }
0x1e38   :  { %7292 = vmatmul.mubr.f32.vlgmr.msra.gmra.mrb[58].mxu0 %v16002_v11  ;;  %7363 = vmatmul.mubr.f32.vlgmr.msra.gmra.mrb[58].mxu1 %v16002_v11 }
0x1e39   :  { %12141 = vmatpush1.bf16.msra.mxu0 %v15662_v19  ;;  %12173 = vmatpush1.bf16.msra.mxu1 %v15665_v27 }
0x1e3a   :  { %12143 = vmatprep.subr.bf16.mxu0 %v15670_v8  ;;  %12175 = vmatprep.subr.bf16.mxu1 %v15672_v3 }
0x1e3b   :  { %7466 = vmatprep.mubr.f32.mxu0 %v14025_v0  ;;  %7537 = vmatprep.mubr.f32.mxu1 %v14025_v0 }
0x1e3d   :  { %12145 = vmatpush1.bf16.msra.mxu0 %v15674_v32  ;;  %12177 = vmatpush1.bf16.msra.mxu1 %v15677_v22 }
0x1e3e   :  { %12147 = vmatprep.subr.bf16.mxu0 %v15682_v25  ;;  %12179 = vmatprep.subr.bf16.mxu1 %v15684_v2 }
0x1e41   :  { %12149 = vmatpush1.bf16.msra.mxu0 %v15686_v42  ;;  %12181 = vmatpush1.bf16.msra.mxu1 %v15689_v44 }
0x1e42   :  { %12151 = vmatprep.subr.bf16.mxu0 %v15694_v28  ;;  %12183 = vmatprep.subr.bf16.mxu1 %v15696_v43 }
0x1e45   :  { %12153 = vmatpush1.bf16.msra.mxu0 %v15698_v12  ;;  %12185 = vmatpush1.bf16.msra.mxu1 %v15701_v37 }
0x1e46   :  { %12155 = vmatprep.subr.bf16.mxu0 %v15705_v5  ;;  %12187 = vmatprep.subr.bf16.mxu1 %v15707_v23 }
0x1e49   :  { %12157 = vmatpush1.bf16.msra.mxu0 %v15710_v24  ;;  %12189 = vmatpush1.bf16.msra.mxu1 %v15714_v57 }
0x1e4a   :  { %12159 = vmatprep.subr.bf16.mxu0 %v15716_v4  ;;  %12191 = vmatprep.subr.bf16.mxu1 %v15718_v6 }
0x1e4d   :  { %12161 = vmatpush1.bf16.msra.mxu0 %v15721_v50  ;;  %12193 = vmatpush1.bf16.msra.mxu1 %v15725_v18 }
0x1e4e   :  { %12163 = vmatprep.subr.bf16.mxu0 %v15727_v35  ;;  %12195 = vmatprep.subr.bf16.mxu1 %v15730_v7 }
0x1e51   :  { %12165 = vmatpush1.bf16.msra.mxu0 %v15733_v16  ;;  %12197 = vmatpush1.bf16.msra.mxu1 %v15737_v40 }
0x1e52   :  { %12167 = vmatprep.subr.bf16.mxu0 %v15742_v31  ;;  %12199 = vmatprep.subr.bf16.mxu1 %v15744_v47 }
0x1e55   :  { %12169 = vmatpush1.bf16.msra.mxu0 %v15746_v29  ;;  %12201 = vmatpush1.bf16.msra.mxu1 %v15749_v53 }
0x1e56   :  { %12203 = vmatprep.subr.bf16.mxu0 %v15658_v17  ;;  %12235 = vmatprep.subr.bf16.mxu1 %v15660_v14 }
0x1f0b   :  { %v7293_v20 = vpop.f32.mrb[58].mxu0  ;;  %v7364_v52 = vpop.f32.mrb[58].mxu1 }
0x1f0c   :  { %v12972_v58 = vadd.f32 %v7293_v20, %v15800_v34  ;;  %v7295_v63 = vpop.f32.mrb[59].mxu0  ;;  %v7366_v56 = vpop.f32.mrb[59].mxu1  ;;  %v12988_v15 = vadd.f32 %v7364_v52, %v15812_v46 }
0x1f0d   :  { %v12973_v51 = vadd.f32 %v7295_v63, %v15803_v38  ;;  %v12989_v54 = vadd.f32 %v7366_v56, %v15808_v49 }
0x1f0e   :  { %v9748_v41 = vmul.f32 -1.442695, %v12972_v58 }
0x1f0f   :  { %v9749_v36 = vmul.f32 -1.442695, %v12973_v51  ;;  %v9750_v59 = vmul.f32 -1.442695, %v12989_v54  ;;  %v7763_v54 = vld [vmem:[#allocation8 + $0x630] sm:$0xff] }
0x1f10   :  { %13697 = vpow2.f32 %v9748_v41 }
0x1f11   :  { %13699 = vpow2.f32 %v9749_v36  ;;  %v7759_v36 = vld [vmem:[#allocation8 + $0x610] sm:$0xff] }
0x1f12   :  { %13701 = vpow2.f32 %v9750_v59  ;;  %v7766_v59 = vld [vmem:[#allocation8 + $0x648] sm:$0xff] }
0x1f13   :  { %13703 = vtanh.f32 %v12988_v15  ;;  %v7770_v15 = vld [vmem:[#allocation8 + $0x668] sm:$0xff] }
0x1f1a   :  { %v13698_v17 = vpop.eup %13697 }
0x1f1b   :  { %v13700_v62 = vpop.eup %13699  ;;  %v7376_v14 = vadd.f32 1.0, %v13698_v17  ;;  %v7768_v17 = vld [vmem:[#allocation8 + $0x658] sm:$0xff] }
0x1f1c   :  { %v7382_v1 = vadd.f32 1.0, %v13700_v62  ;;  %v13702_v61 = vpop.eup %13701  ;;  %v7772_v62 = vld [vmem:[#allocation8 + $0x678] sm:$0xff] }
0x1f1d   :  { %13705 = vrcp.f32 %v7376_v14  ;;  %v13704_v9 = vpop.eup %13703  ;;  %v7389_v58 = vadd.f32 1.0, %v13702_v61 }
0x1f1e   :  { %13707 = vrcp.f32 %v7382_v1 }
0x1f1f   :  { %13709 = vrcp.f32 %v7389_v58  ;;  %v12270_v58 = vpack.c.bf16 %v7770_v15, %v7766_v59  ;;  %v7791_v15 = vld [vmem:[#allocation8 + $0x710] sm:$0xff] }
0x1f27   :  { %v13706_v33 = vpop.eup %13705 }
0x1f28   :  { %v13708_v60 = vpop.eup %13707  ;;  %v7393_v20 = vmul.f32 %v13706_v33, %v13704_v9  ;;  %v12300_v9 = vpack.c.bf16 %v7763_v54, %v7759_v36  ;;  %v7765_v33 = vld [vmem:[#allocation8 + $0x640] sm:$0xff] }
0x1f29   :  { %v7392_v63 = vmul.f32 %v13708_v60, %v15999_v26  ;;  %v13710_v52 = vpop.eup %13709  ;;  %v7761_v26 = vld [vmem:[#allocation8 + $0x620] sm:$0xff] }
0x1f2a   :  { %v7769_v60 = vld [vmem:[#allocation8 + $0x660] sm:$0xff] }
0x1f2b   :  { %v16045_v56 = vadd.f32 %v7393_v20, %v7392_v63  ;;  %v12302_v63 = vpack.c.bf16 %v7772_v62, %v7768_v17  ;;  %v7793_v36 = vld [vmem:[#allocation8 + $0x720] sm:$0xff]  ;;  %v7795_v17 = vld [vmem:[#allocation8 + $0x730] sm:$0xff]  ;;  %v7798_v62 = vld [vmem:[#allocation8 + $0x748] sm:$0xff] }
0x1f2d   :  { %13711 = vtanh.f32 %v16045_v56 }
0x1f37   :  { %v13712_v51 = vpop.eup %13711 }
0x1f38   :  { %v16048_v41 = vmul.f32 %v13712_v51, %v13710_v52  ;;  %v7771_v52 = vld [vmem:[#allocation8 + $0x670] sm:$0xff]  ;;  %v7774_v51 = vld [vmem:[#allocation8 + $0x688] sm:$0xff] }
0x1f3a   :  { %7467 = vmatmul.mubr.f32.vlgmr.msra.gmra.mrb[60].mxu0 %v16048_v41  ;;  %7538 = vmatmul.mubr.f32.vlgmr.msra.gmra.mrb[60].mxu1 %v16048_v41 }
0x1f3b   :  { %12205 = vmatpush1.bf16.msra.mxu0 %v15662_v19  ;;  %12237 = vmatpush1.bf16.msra.mxu1 %v15665_v27  ;;  %v7758_v19 = vld [vmem:[#allocation8 + $0x608] sm:$0xff] }
0x1f3c   :  { %12207 = vmatprep.subr.bf16.mxu0 %v15670_v8  ;;  %12239 = vmatprep.subr.bf16.mxu1 %v15672_v3  ;;  %v7762_v27 = vld [vmem:[#allocation8 + $0x628] sm:$0xff]  ;;  %v7760_v8 = vld [vmem:[#allocation8 + $0x618] sm:$0xff] }
0x1f3d   :  { %7641 = vmatprep.mubr.f32.mxu0 %v14025_v0  ;;  %7712 = vmatprep.mubr.f32.mxu1 %v14025_v0  ;;  %v12266_v3 = vpack.c.bf16 %v7762_v27, %v7758_v19  ;;  %v7778_v19 = vld [vmem:[#allocation8 + $0x6a8] sm:$0xff]  ;;  %v7776_v27 = vld [vmem:[#allocation8 + $0x698] sm:$0xff] }
0x1f3f   :  { %12209 = vmatpush1.bf16.msra.mxu0 %v15674_v32  ;;  %12241 = vmatpush1.bf16.msra.mxu1 %v15677_v22  ;;  %v7764_v32 = vld [vmem:[#allocation8 + $0x638] sm:$0xff] }
0x1f40   :  { %12211 = vmatprep.subr.bf16.mxu0 %v15682_v25  ;;  %12243 = vmatprep.subr.bf16.mxu1 %v15684_v2  ;;  %v12298_v22 = vpack.c.bf16 %v7764_v32, %v7760_v8  ;;  %v7780_v8 = vld [vmem:[#allocation8 + $0x6b8] sm:$0xff] }
0x1f43   :  { %12213 = vmatpush1.bf16.msra.mxu0 %v15686_v42  ;;  %12245 = vmatpush1.bf16.msra.mxu1 %v15689_v44 }
0x1f44   :  { %12215 = vmatprep.subr.bf16.mxu0 %v15694_v28  ;;  %12247 = vmatprep.subr.bf16.mxu1 %v15696_v43 }
0x1f47   :  { %12217 = vmatpush1.bf16.msra.mxu0 %v15698_v12  ;;  %12249 = vmatpush1.bf16.msra.mxu1 %v15701_v37 }
0x1f48   :  { %12219 = vmatprep.subr.bf16.mxu0 %v15705_v5  ;;  %12251 = vmatprep.subr.bf16.mxu1 %v15707_v23 }
0x1f4b   :  { %12221 = vmatpush1.bf16.msra.mxu0 %v15710_v24  ;;  %12253 = vmatpush1.bf16.msra.mxu1 %v15714_v57 }
0x1f4c   :  { %12223 = vmatprep.subr.bf16.mxu0 %v15716_v4  ;;  %12255 = vmatprep.subr.bf16.mxu1 %v15718_v6 }
0x1f4f   :  { %12225 = vmatpush1.bf16.msra.mxu0 %v15721_v50  ;;  %12257 = vmatpush1.bf16.msra.mxu1 %v15725_v18 }
0x1f50   :  { %12227 = vmatprep.subr.bf16.mxu0 %v15727_v35  ;;  %12259 = vmatprep.subr.bf16.mxu1 %v15730_v7 }
0x1f53   :  { %12229 = vmatpush1.bf16.msra.mxu0 %v15733_v16  ;;  %12261 = vmatpush1.bf16.msra.mxu1 %v15737_v40 }
0x1f54   :  { %12231 = vmatprep.subr.bf16.mxu0 %v15742_v31  ;;  %12263 = vmatprep.subr.bf16.mxu1 %v15744_v47 }
0x1f57   :  { %12233 = vmatpush1.bf16.msra.mxu0 %v15746_v29  ;;  %12265 = vmatpush1.bf16.msra.mxu1 %v15749_v53  ;;  %v7757_v53 = vld [vmem:[#allocation8 + $0x600] sm:$0xff] }
0x1f58   :  { %12267 = vmatprep.subr.bf16.mxu0 %v12266_v3  ;;  %12299 = vmatprep.subr.bf16.mxu1 %v12298_v22  ;;  %v12268_v61 = vpack.c.bf16 %v7761_v26, %v7757_v53  ;;  %v12272_v3 = vpack.c.bf16 %v7769_v60, %v7765_v33  ;;  %v7773_v22 = vld [vmem:[#allocation8 + $0x680] sm:$0xff]  ;;  %v12316_v33 = vpack.c.bf16 %v7795_v17, %v7791_v15  ;;  %v8114_v15 = vld [vmem:[#allocation6 + $0x858] sm:$0xff] }
0x1f59   :  { %v7789_v26 = vld [vmem:[#allocation8 + $0x700] sm:$0xff] }
0x1f5a   :  { %v7797_v60 = vld [vmem:[#allocation8 + $0x740] sm:$0xff] }
0x200d   :  { %v7468_v25 = vpop.f32.mrb[60].mxu0  ;;  %v7539_v2 = vpop.f32.mrb[60].mxu1 }
0x200e   :  { %v12974_v42 = vadd.f32 %v7468_v25, %v15800_v34  ;;  %v7470_v44 = vpop.f32.mrb[61].mxu0  ;;  %v7541_v28 = vpop.f32.mrb[61].mxu1  ;;  %v12990_v24 = vadd.f32 %v7539_v2, %v15812_v46  ;;  %v7777_v25 = vld [vmem:[#allocation8 + $0x6a0] sm:$0xff]  ;;  %v12274_v2 = vpack.c.bf16 %v7778_v19, %v7774_v51  ;;  %v7803_v51 = vld [vmem:[#allocation8 + $0x770] sm:$0xff]  ;;  %v7806_v19 = vld [vmem:[#allocation8 + $0x788] sm:$0xff] }
0x200f   :  { %v12975_v43 = vadd.f32 %v7470_v44, %v15803_v38  ;;  %v12991_v5 = vadd.f32 %v7541_v28, %v15808_v49  ;;  %v7775_v44 = vld [vmem:[#allocation8 + $0x690] sm:$0xff] }
0x2010   :  { %v9751_v12 = vmul.f32 -1.442695, %v12974_v42  ;;  %v12306_v42 = vpack.c.bf16 %v7780_v8, %v7776_v27  ;;  %v7779_v28 = vld [vmem:[#allocation8 + $0x6b0] sm:$0xff]  ;;  %v7810_v27 = vld [vmem:[#allocation8 + $0x7a8] sm:$0xff]  ;;  %v7808_v8 = vld [vmem:[#allocation8 + $0x798] sm:$0xff] }
0x2011   :  { %v9752_v37 = vmul.f32 -1.442695, %v12975_v43  ;;  %v9753_v23 = vmul.f32 -1.442695, %v12991_v5  ;;  %v7782_v43 = vld [vmem:[#allocation8 + $0x6c8] sm:$0xff]  ;;  %v7788_v5 = vld [vmem:[#allocation8 + $0x6f8] sm:$0xff] }
0x2012   :  { %13713 = vpow2.f32 %v9751_v12  ;;  %v7786_v12 = vld [vmem:[#allocation8 + $0x6e8] sm:$0xff] }
0x2013   :  { %13715 = vpow2.f32 %v9752_v37  ;;  %v7784_v37 = vld [vmem:[#allocation8 + $0x6d8] sm:$0xff] }
0x2014   :  { %13717 = vpow2.f32 %v9753_v23  ;;  %v12276_v23 = vpack.c.bf16 %v7777_v25, %v7773_v22  ;;  %v7805_v25 = vld [vmem:[#allocation8 + $0x780] sm:$0xff] }
0x2015   :  { %13719 = vtanh.f32 %v12990_v24  ;;  %v12308_v24 = vpack.c.bf16 %v7779_v28, %v7775_v44  ;;  %v7807_v28 = vld [vmem:[#allocation8 + $0x790] sm:$0xff] }
0x201c   :  { %v13714_v57 = vpop.eup %13713 }
0x201d   :  { %v13716_v4 = vpop.eup %13715  ;;  %v7551_v6 = vadd.f32 1.0, %v13714_v57  ;;  %v7781_v57 = vld [vmem:[#allocation8 + $0x6c0] sm:$0xff] }
0x201e   :  { %v7557_v50 = vadd.f32 1.0, %v13716_v4  ;;  %v13718_v18 = vpop.eup %13717  ;;  %v7785_v4 = vld [vmem:[#allocation8 + $0x6e0] sm:$0xff] }
0x201f   :  { %13721 = vrcp.f32 %v7551_v6  ;;  %v13720_v35 = vpop.eup %13719  ;;  %v7564_v31 = vadd.f32 1.0, %v13718_v18  ;;  %v12278_v6 = vpack.c.bf16 %v7786_v12, %v7782_v43  ;;  %v7783_v18 = vld [vmem:[#allocation8 + $0x6d0] sm:$0xff]  ;;  %v7814_v12 = vld [vmem:[#allocation8 + $0x7c8] sm:$0xff] }
0x2020   :  { %13723 = vrcp.f32 %v7557_v50  ;;  %v12310_v50 = vpack.c.bf16 %v7788_v5, %v7784_v37  ;;  %v7811_v43 = vld [vmem:[#allocation8 + $0x7b0] sm:$0xff]  ;;  %v7818_v37 = vld [vmem:[#allocation8 + $0x7e8] sm:$0xff]  ;;  %v7816_v5 = vld [vmem:[#allocation8 + $0x7d8] sm:$0xff] }
0x2021   :  { %13725 = vrcp.f32 %v7564_v31  ;;  %v7796_v31 = vld [vmem:[#allocation8 + $0x738] sm:$0xff] }
0x2029   :  { %v13722_v7 = vpop.eup %13721 }
0x202a   :  { %v13724_v16 = vpop.eup %13723  ;;  %v7568_v40 = vmul.f32 %v13722_v7, %v13720_v35  ;;  %v7787_v35 = vld [vmem:[#allocation8 + $0x6f0] sm:$0xff]  ;;  %v7790_v7 = vld [vmem:[#allocation8 + $0x708] sm:$0xff] }
0x202b   :  { %v7567_v47 = vmul.f32 %v13724_v16, %v16045_v56  ;;  %v13726_v14 = vpop.eup %13725  ;;  %v7767_v56 = vld [vmem:[#allocation8 + $0x650] sm:$0xff]  ;;  %v7794_v16 = vld [vmem:[#allocation8 + $0x728] sm:$0xff]  ;;  %v12312_v53 = vpack.c.bf16 %v7787_v35, %v7783_v18  ;;  %v7817_v18 = vld [vmem:[#allocation8 + $0x7e0] sm:$0xff] }
0x202c   :  { %v12304_v32 = vpack.c.bf16 %v7771_v52, %v7767_v56  ;;  %v12282_v54 = vpack.c.bf16 %v7794_v16, %v7790_v7  ;;  %v7799_v52 = vld [vmem:[#allocation8 + $0x750] sm:$0xff] }
0x202d   :  { %v16089_v29 = vadd.f32 %v7568_v40, %v7567_v47  ;;  %v7792_v40 = vld [vmem:[#allocation8 + $0x718] sm:$0xff]  ;;  %v12280_v47 = vpack.c.bf16 %v7785_v4, %v7781_v57  ;;  %v12320_v22 = vpack.c.bf16 %v7803_v51, %v7799_v52  ;;  %v12324_v57 = vpack.c.bf16 %v7811_v43, %v7807_v28  ;;  %v7813_v4 = vld [vmem:[#allocation8 + $0x7c0] sm:$0xff]  ;;  %v7815_v35 = vld [vmem:[#allocation8 + $0x7d0] sm:$0xff] }
0x202e   :  { %v12314_v59 = vpack.c.bf16 %v7796_v31, %v7792_v40  ;;  %v7819_v7 = vld [vmem:[#allocation8 + $0x7f0] sm:$0xff]  ;;  %v12296_v16 = vpack.c.bf16 %v7817_v18, %v7813_v4  ;;  %v8103_v31 = vld [vmem:[#allocation6 + $0x800] sm:$0xff]  ;;  %v8122_v52 = vld [vmem:[#allocation6 + $0x898] sm:$0xff] }
0x202f   :  { %13727 = vtanh.f32 %v16089_v29  ;;  %v12328_v40 = vpack.c.bf16 %v7819_v7, %v7815_v35  ;;  %v8130_v28 = vld [vmem:[#allocation6 + $0x8d8] sm:$0xff]  ;;  %v8133_v4 = vld [vmem:[#allocation6 + $0x8f0] sm:$0xff]  ;;  %v8140_v18 = vld [vmem:[#allocation6 + $0x928] sm:$0xff] }
0x2030   :  { %v8138_v35 = vld [vmem:[#allocation6 + $0x918] sm:$0xff] }
0x2031   :  { %v8142_v7 = vld [vmem:[#allocation6 + $0x938] sm:$0xff] }
0x2039   :  { %v13728_v1 = vpop.eup %13727 }
0x203a   :  { %v16092_v20 = vmul.f32 %v13728_v1, %v13726_v14  ;;  %v7802_v14 = vld [vmem:[#allocation8 + $0x768] sm:$0xff]  ;;  %v7800_v1 = vld [vmem:[#allocation8 + $0x758] sm:$0xff] }
0x203c   :  { %7642 = vmatmul.mubr.f32.vlgmr.msra.gmra.mrb[62].mxu0 %v16092_v20  ;;  %7713 = vmatmul.mubr.f32.vlgmr.msra.gmra.mrb[62].mxu1 %v16092_v20 }
0x203d   :  { %12269 = vmatpush1.bf16.msra.mxu0 %v12268_v61  ;;  %12301 = vmatpush1.bf16.msra.mxu1 %v12300_v9  ;;  %v7804_v61 = vld [vmem:[#allocation8 + $0x778] sm:$0xff]  ;;  %v12284_v9 = vpack.c.bf16 %v7793_v36, %v7789_v26  ;;  %v8105_v26 = vld [vmem:[#allocation6 + $0x810] sm:$0xff] }
0x203e   :  { %12271 = vmatprep.subr.bf16.mxu0 %v12270_v58  ;;  %12303 = vmatprep.subr.bf16.mxu1 %v12302_v63  ;;  %v7801_v58 = vld [vmem:[#allocation8 + $0x760] sm:$0xff]  ;;  %v12286_v63 = vpack.c.bf16 %v7802_v14, %v7798_v62  ;;  %v12318_v56 = vpack.c.bf16 %v7804_v61, %v7800_v1  ;;  %v8109_v36 = vld [vmem:[#allocation6 + $0x830] sm:$0xff]  ;;  %v8118_v62 = vld [vmem:[#allocation6 + $0x878] sm:$0xff] }
0x203f   :  { %7908 = vmatprep.mubr.f32.mxu0 %v14025_v0  ;;  %8021 = vmatprep.mubr.f32.mxu1 %v14025_v0  ;;  %v8111_v14 = vld [vmem:[#allocation6 + $0x840] sm:$0xff]  ;;  %v16140_v61 = vpack.c.bf16 %v8118_v62, %v8114_v15  ;;  %v8150_v15 = vld [vmem:[#allocation6 + $0x978] sm:$0xff] }
0x2040   :  { %v8115_v1 = vld [vmem:[#allocation6 + $0x860] sm:$0xff] }
0x2041   :  { %12273 = vmatpush1.bf16.msra.mxu0 %v12272_v3  ;;  %12305 = vmatpush1.bf16.msra.mxu1 %v12304_v32  ;;  %v7812_v3 = vld [vmem:[#allocation8 + $0x7b8] sm:$0xff]  ;;  %v12288_v32 = vpack.c.bf16 %v7801_v58, %v7797_v60  ;;  %v8117_v60 = vld [vmem:[#allocation6 + $0x870] sm:$0xff]  ;;  %v8143_v62 = vld [vmem:[#allocation6 + $0x940] sm:$0xff] }
0x2042   :  { %12275 = vmatprep.subr.bf16.mxu0 %v12274_v2  ;;  %12307 = vmatprep.subr.bf16.mxu1 %v12306_v42  ;;  %v7809_v2 = vld [vmem:[#allocation8 + $0x7a0] sm:$0xff]  ;;  %v12290_v42 = vpack.c.bf16 %v7810_v27, %v7806_v19  ;;  %v12322_v44 = vpack.c.bf16 %v7812_v3, %v7808_v8  ;;  %v8126_v19 = vld [vmem:[#allocation6 + $0x8b8] sm:$0xff] }
0x2043   :  { %v8119_v27 = vld [vmem:[#allocation6 + $0x880] sm:$0xff]  ;;  %v16152_v3 = vpack.c.bf16 %v8126_v19, %v8122_v52  ;;  %v8156_v52 = vld [vmem:[#allocation6 + $0x9a8] sm:$0xff]  ;;  %v8154_v19 = vld [vmem:[#allocation6 + $0x998] sm:$0xff] }
0x2044   :  { %v8123_v8 = vld [vmem:[#allocation6 + $0x8a0] sm:$0xff] }
0x2045   :  { %12277 = vmatpush1.bf16.msra.mxu0 %v12276_v23  ;;  %12309 = vmatpush1.bf16.msra.mxu1 %v12308_v24  ;;  %v7820_v23 = vld [vmem:[#allocation8 + $0x7f8] sm:$0xff]  ;;  %v12292_v24 = vpack.c.bf16 %v7809_v2, %v7805_v25  ;;  %v8125_v25 = vld [vmem:[#allocation6 + $0x8b0] sm:$0xff] }
0x2046   :  { %12279 = vmatprep.subr.bf16.mxu0 %v12278_v6  ;;  %12311 = vmatprep.subr.bf16.mxu1 %v12310_v50  ;;  %v12294_v6 = vpack.c.bf16 %v7818_v37, %v7814_v12  ;;  %v12326_v50 = vpack.c.bf16 %v7820_v23, %v7816_v5  ;;  %v8134_v12 = vld [vmem:[#allocation6 + $0x8f8] sm:$0xff]  ;;  %v8127_v37 = vld [vmem:[#allocation6 + $0x8c0] sm:$0xff] }
0x2047   :  { %v8131_v5 = vld [vmem:[#allocation6 + $0x8e0] sm:$0xff]  ;;  %v16164_v23 = vpack.c.bf16 %v8134_v12, %v8130_v28  ;;  %v8153_v28 = vld [vmem:[#allocation6 + $0x990] sm:$0xff] }
0x2048   :  { %v8157_v12 = vld [vmem:[#allocation6 + $0x9b0] sm:$0xff] }
0x2049   :  { %12281 = vmatpush1.bf16.msra.mxu0 %v12280_v47  ;;  %12313 = vmatpush1.bf16.msra.mxu1 %v12312_v53 }
0x204a   :  { %12283 = vmatprep.subr.bf16.mxu0 %v12282_v54  ;;  %12315 = vmatprep.subr.bf16.mxu1 %v12314_v59  ;;  %v8112_v54 = vld [vmem:[#allocation6 + $0x848] sm:$0xff] }
0x204b   :  { %v8116_v59 = vld [vmem:[#allocation6 + $0x868] sm:$0xff] }
0x204c   :  { %v16138_v17 = vpack.c.bf16 %v8116_v59, %v8112_v54  ;;  %v8146_v59 = vld [vmem:[#allocation6 + $0x958] sm:$0xff] }
0x204d   :  { %12285 = vmatpush1.bf16.msra.mxu0 %v12284_v9  ;;  %12317 = vmatpush1.bf16.msra.mxu1 %v12316_v33  ;;  %v16142_v9 = vpack.c.bf16 %v8115_v1, %v8111_v14  ;;  %v8113_v33 = vld [vmem:[#allocation6 + $0x850] sm:$0xff]  ;;  %v16186_v14 = vpack.c.bf16 %v8150_v15, %v8146_v59  ;;  %v8147_v1 = vld [vmem:[#allocation6 + $0x960] sm:$0xff] }
0x204e   :  { %12287 = vmatprep.subr.bf16.mxu0 %v12286_v63  ;;  %12319 = vmatprep.subr.bf16.mxu1 %v12318_v56  ;;  %v16145_v58 = vpack.c.bf16 %v8117_v60, %v8113_v33  ;;  %v8120_v63 = vld [vmem:[#allocation6 + $0x888] sm:$0xff]  ;;  %v8145_v33 = vld [vmem:[#allocation6 + $0x950] sm:$0xff] }
0x204f   :  { %v8124_v56 = vld [vmem:[#allocation6 + $0x8a8] sm:$0xff]  ;;  %v8149_v60 = vld [vmem:[#allocation6 + $0x970] sm:$0xff] }
0x2050   :  { %v16150_v51 = vpack.c.bf16 %v8124_v56, %v8120_v63  ;;  %v16189_v63 = vpack.c.bf16 %v8147_v1, %v8143_v62  ;;  %v8152_v56 = vld [vmem:[#allocation6 + $0x988] sm:$0xff] }
0x2051   :  { %12289 = vmatpush1.bf16.msra.mxu0 %v12288_v32  ;;  %12321 = vmatpush1.bf16.msra.mxu1 %v12320_v22  ;;  %v16154_v32 = vpack.c.bf16 %v8123_v8, %v8119_v27  ;;  %v8121_v22 = vld [vmem:[#allocation6 + $0x890] sm:$0xff]  ;;  %v16193_v27 = vpack.c.bf16 %v8149_v60, %v8145_v33  ;;  %v16195_v8 = vpack.c.bf16 %v8156_v52, %v8152_v56 }
0x2052   :  { %12291 = vmatprep.subr.bf16.mxu0 %v12290_v42  ;;  %12323 = vmatprep.subr.bf16.mxu1 %v12322_v44  ;;  %v16157_v2 = vpack.c.bf16 %v8125_v25, %v8121_v22  ;;  %v8128_v42 = vld [vmem:[#allocation6 + $0x8c8] sm:$0xff]  ;;  %v8158_v22 = vld [vmem:[#allocation6 + $0x9b8] sm:$0xff]  ;;  %v8151_v25 = vld [vmem:[#allocation6 + $0x980] sm:$0xff] }
0x2053   :  { %v8132_v44 = vld [vmem:[#allocation6 + $0x8e8] sm:$0xff] }
0x2054   :  { %v16162_v43 = vpack.c.bf16 %v8132_v44, %v8128_v42  ;;  %v8155_v42 = vld [vmem:[#allocation6 + $0x9a0] sm:$0xff]  ;;  %v16198_v44 = vpack.c.bf16 %v8158_v22, %v8154_v19 }
0x2055   :  { %12293 = vmatpush1.bf16.msra.mxu0 %v12292_v24  ;;  %12325 = vmatpush1.bf16.msra.mxu1 %v12324_v57  ;;  %v16166_v24 = vpack.c.bf16 %v8131_v5, %v8127_v37  ;;  %v8129_v57 = vld [vmem:[#allocation6 + $0x8d0] sm:$0xff]  ;;  %v16201_v37 = vpack.c.bf16 %v8155_v42, %v8151_v25  ;;  %v16205_v5 = vpack.c.bf16 %v8157_v12, %v8153_v28 }
0x2056   :  { %12295 = vmatprep.subr.bf16.mxu0 %v12294_v6  ;;  %12327 = vmatprep.subr.bf16.mxu1 %v12326_v50  ;;  %v8136_v6 = vld [vmem:[#allocation6 + $0x908] sm:$0xff]  ;;  %v16169_v50 = vpack.c.bf16 %v8133_v4, %v8129_v57 }
0x2057   :  { %v8160_v57 = vld [vmem:[#allocation6 + $0x9c8] sm:$0xff] }
0x2058   :  { %v8164_v4 = vld [vmem:[#allocation6 + $0x9e8] sm:$0xff] }
0x2059   :  { %12297 = vmatpush1.bf16.msra.mxu0 %v12296_v16  ;;  %12329 = vmatpush1.bf16.msra.mxu1 %v12328_v40  ;;  %v16173_v16 = vpack.c.bf16 %v8140_v18, %v8136_v6  ;;  %v16175_v40 = vpack.c.bf16 %v8142_v7, %v8138_v35  ;;  %v8162_v6 = vld [vmem:[#allocation6 + $0x9d8] sm:$0xff]  ;;  %v16210_v18 = vpack.c.bf16 %v8164_v4, %v8160_v57  ;;  %v8159_v7 = vld [vmem:[#allocation6 + $0x9c0] sm:$0xff] }
0x205a   :  { %v8166_v35 = vld [vmem:[#allocation6 + $0x9f8] sm:$0xff] }
0x205c   :  { %7909 = vmatmul.mubr.f32.vlgmr.msra.gmra.mrb[64].mxu0 %v15818_v30  ;;  %8022 = vmatmul.mubr.f32.vlgmr.msra.gmra.mrb[64].mxu1 %v15818_v30  ;;  %v8104_v30 = vld [vmem:[#allocation6 + $0x808] sm:$0xff] }
0x205d   :  { %7914 = vmatprep.mubr.f32.mxu0 %v14025_v0  ;;  %8027 = vmatprep.mubr.f32.mxu1 %v14025_v0 }
0x2060   :  { %7915 = vmatmul.mubr.f32.gmra.mrb[66].mxu0 %v15864_v39  ;;  %8028 = vmatmul.mubr.f32.gmra.mrb[66].mxu1 %v15864_v39  ;;  %v8108_v39 = vld [vmem:[#allocation6 + $0x828] sm:$0xff] }
0x2061   :  { %7920 = vmatprep.mubr.f32.mxu0 %v14025_v0  ;;  %8033 = vmatprep.mubr.f32.mxu1 %v14025_v0 }
0x2064   :  { %7921 = vmatmul.mubr.f32.gmra.mrb[68].mxu0 %v15910_v13  ;;  %8034 = vmatmul.mubr.f32.gmra.mrb[68].mxu1 %v15910_v13  ;;  %v8106_v13 = vld [vmem:[#allocation6 + $0x818] sm:$0xff] }
0x2065   :  { %7926 = vmatprep.mubr.f32.mxu0 %v14025_v0  ;;  %8039 = vmatprep.mubr.f32.mxu1 %v14025_v0 }
0x2068   :  { %7927 = vmatmul.mubr.f32.gmra.mrb[70].mxu0 %v15956_v21  ;;  %8040 = vmatmul.mubr.f32.gmra.mrb[70].mxu1 %v15956_v21  ;;  %v16126_v21 = vpack.c.bf16 %v8108_v39, %v8104_v30  ;;  %v8135_v30 = vld [vmem:[#allocation6 + $0x900] sm:$0xff] }
0x2069   :  { %7932 = vmatprep.mubr.f32.mxu0 %v14025_v0  ;;  %8045 = vmatprep.mubr.f32.mxu1 %v14025_v0  ;;  %v8139_v39 = vld [vmem:[#allocation6 + $0x920] sm:$0xff] }
0x206a   :  { %12331 = vmatprep.subr.bf16.mxu0 %v16126_v21 }
0x206c   :  { %7933 = vmatmul.mubr.f32.gmra.mrb[72].mxu0 %v16002_v11  ;;  %8046 = vmatmul.mubr.f32.gmra.mrb[72].mxu1 %v16002_v11  ;;  %v8110_v11 = vld [vmem:[#allocation6 + $0x838] sm:$0xff] }
0x206d   :  { %7938 = vmatprep.mubr.f32.mxu0 %v14025_v0  ;;  %8051 = vmatprep.mubr.f32.mxu1 %v14025_v0  ;;  %v16128_v47 = vpack.c.bf16 %v8110_v11, %v8106_v13  ;;  %v8137_v13 = vld [vmem:[#allocation6 + $0x910] sm:$0xff]  ;;  %v16178_v11 = vpack.c.bf16 %v8139_v39, %v8135_v30  ;;  %v8163_v30 = vld [vmem:[#allocation6 + $0x9e0] sm:$0xff]  ;;  %v16212_v39 = vpack.c.bf16 %v8166_v35, %v8162_v6 }
0x206f   :  { %12363 = vmatprep.subr.bf16.mxu1 %v16128_v47 }
0x2070   :  { %7939 = vmatmul.mubr.f32.gmra.mrb[74].mxu0 %v16048_v41  ;;  %8052 = vmatmul.mubr.f32.gmra.mrb[74].mxu1 %v16048_v41  ;;  %v8107_v41 = vld [vmem:[#allocation6 + $0x820] sm:$0xff] }
0x2071   :  { %7944 = vmatprep.mubr.f32.mxu0 %v14025_v0  ;;  %8057 = vmatprep.mubr.f32.mxu1 %v14025_v0  ;;  %v16130_v53 = vpack.c.bf16 %v8107_v41, %v8103_v31  ;;  %v8141_v31 = vld [vmem:[#allocation6 + $0x930] sm:$0xff]  ;;  %v8144_v41 = vld [vmem:[#allocation6 + $0x948] sm:$0xff] }
0x2073   :  { %12333 = vmatpush1.bf16.msra.mxu0 %v16130_v53 }
0x2074   :  { %7945 = vmatmul.mubr.f32.gmra.mrb[76].mxu0 %v16092_v20  ;;  %8058 = vmatmul.mubr.f32.gmra.mrb[76].mxu1 %v16092_v20  ;;  %v16133_v20 = vpack.c.bf16 %v8109_v36, %v8105_v26  ;;  %v8148_v26 = vld [vmem:[#allocation6 + $0x968] sm:$0xff]  ;;  %v16182_v36 = vpack.c.bf16 %v8141_v31, %v8137_v13  ;;  %v16214_v13 = vpack.c.bf16 %v8163_v30, %v8159_v7  ;;  %v8161_v31 = vld [vmem:[#allocation6 + $0x9d0] sm:$0xff] }
0x2075   :  { %7950 = vmatprep.mubr.f32.mxu0 %v14025_v0  ;;  %8063 = vmatprep.mubr.f32.mxu1 %v14025_v0  ;;  %v16184_v54 = vpack.c.bf16 %v8148_v26, %v8144_v41  ;;  %v8165_v41 = vld [vmem:[#allocation6 + $0x9f0] sm:$0xff] }
0x2076   :  { %12365 = vmatpush1.bf16.msra.mxu1 %v16133_v20  ;;  %12335 = vmatprep.subr.bf16.mxu0 %v16138_v17  ;;  %v16217_v26 = vpack.c.bf16 %v8165_v41, %v8161_v31 }
0x2077   :  { %12367 = vmatprep.subr.bf16.mxu1 %v16140_v61  ;;  %12337 = vmatpush1.bf16.msra.mxu0 %v16142_v9 }
0x2078   :  { %12339 = vmatprep.subr.bf16.mxu0 %v16150_v51 }
0x207a   :  { %12369 = vmatpush1.bf16.msra.mxu1 %v16145_v58 }
0x207b   :  { %12371 = vmatprep.subr.bf16.mxu1 %v16152_v3  ;;  %12341 = vmatpush1.bf16.msra.mxu0 %v16154_v32 }
0x207c   :  { %12343 = vmatprep.subr.bf16.mxu0 %v16162_v43 }
0x207e   :  { %12373 = vmatpush1.bf16.msra.mxu1 %v16157_v2 }
0x207f   :  { %12375 = vmatprep.subr.bf16.mxu1 %v16164_v23  ;;  %12345 = vmatpush1.bf16.msra.mxu0 %v16166_v24 }
0x2080   :  { %12347 = vmatprep.subr.bf16.mxu0 %v16173_v16 }
0x2082   :  { %12377 = vmatpush1.bf16.msra.mxu1 %v16169_v50 }
0x2083   :  { %12379 = vmatprep.subr.bf16.mxu1 %v16175_v40  ;;  %12349 = vmatpush1.bf16.msra.mxu0 %v16178_v11 }
0x2084   :  { %12351 = vmatprep.subr.bf16.mxu0 %v16184_v54 }
0x2086   :  { %12381 = vmatpush1.bf16.msra.mxu1 %v16182_v36 }
0x2087   :  { %12383 = vmatprep.subr.bf16.mxu1 %v16186_v14  ;;  %12353 = vmatpush1.bf16.msra.mxu0 %v16189_v63 }
0x2088   :  { %12355 = vmatprep.subr.bf16.mxu0 %v16195_v8 }
0x208a   :  { %12385 = vmatpush1.bf16.msra.mxu1 %v16193_v27 }
0x208b   :  { %12387 = vmatprep.subr.bf16.mxu1 %v16198_v44  ;;  %12357 = vmatpush1.bf16.msra.mxu0 %v16201_v37 }
0x208c   :  { %12359 = vmatprep.subr.bf16.mxu0 %v16210_v18 }
0x208e   :  { %12389 = vmatpush1.bf16.msra.mxu1 %v16205_v5 }
0x208f   :  { %12391 = vmatprep.subr.bf16.mxu1 %v16212_v39  ;;  %12361 = vmatpush1.bf16.msra.mxu0 %v16214_v13 }
0x2090   :  { %12395 = vmatprep.subr.bf16.mxu0 %v16126_v21 }
0x2092   :  { %12393 = vmatpush1.bf16.msra.mxu1 %v16217_v26 }
0x2093   :  { %12427 = vmatprep.subr.bf16.mxu1 %v16128_v47 }
0x210f   :  { %v7643_v59 = vpop.f32.mrb[62].mxu0  ;;  %v7714_v15 = vpop.f32.mrb[62].mxu1 }
0x2110   :  { %v12976_v62 = vadd.f32 %v7643_v59, %v15800_v34  ;;  %v7645_v1 = vpop.f32.mrb[63].mxu0  ;;  %v7716_v33 = vpop.f32.mrb[63].mxu1  ;;  %v12992_v25 = vadd.f32 %v7714_v15, %v15812_v46 }
0x2111   :  { %v12977_v60 = vadd.f32 %v7645_v1, %v15803_v38  ;;  %v12993_v19 = vadd.f32 %v7716_v33, %v15808_v49 }
0x2112   :  { %v9754_v56 = vmul.f32 -1.442695, %v12976_v62 }
0x2113   :  { %v9755_v52 = vmul.f32 -1.442695, %v12977_v60  ;;  %v9756_v22 = vmul.f32 -1.442695, %v12993_v19 }
0x2114   :  { %13729 = vpow2.f32 %v9754_v56 }
0x2115   :  { %13731 = vpow2.f32 %v9755_v52 }
0x2116   :  { %13733 = vpow2.f32 %v9756_v22 }
0x2117   :  { %13735 = vtanh.f32 %v12992_v25 }
0x211e   :  { %v13730_v42 = vpop.eup %13729 }
0x211f   :  { %v13732_v28 = vpop.eup %13731  ;;  %v7726_v12 = vadd.f32 1.0, %v13730_v42 }
0x2120   :  { %v7732_v57 = vadd.f32 1.0, %v13732_v28  ;;  %v13734_v34 = vpop.eup %13733 }
0x2121   :  { %13737 = vrcp.f32 %v7726_v12  ;;  %v13736_v4 = vpop.eup %13735  ;;  %v7739_v7 = vadd.f32 1.0, %v13734_v34 }
0x2122   :  { %13739 = vrcp.f32 %v7732_v57 }
0x2123   :  { %13741 = vrcp.f32 %v7739_v7 }
0x212b   :  { %v13738_v38 = vpop.eup %13737 }
0x212c   :  { %v13740_v6 = vpop.eup %13739  ;;  %v7743_v35 = vmul.f32 %v13738_v38, %v13736_v4 }
0x212d   :  { %v7742_v30 = vmul.f32 %v13740_v6, %v16089_v29  ;;  %v13742_v46 = vpop.eup %13741  ;;  %v7822_v29 = vld [vmem:[#allocation9 + $0x10] sm:$0xf] }
0x212e   :  { %v16268_v59 = vrot.slane %v7822_v29, %v14387_v45  ;;  %v16271_v15 = vrot.slane %v7822_v29, %v14389_v48  ;;  %v16276_v25 = vrot.slane %v7822_v29, %v14397_v55  ;;  %v16280_v48 = vrot.slane %v7822_v29, %v14404_v10 }
0x212f   :  { %v7744_v49 = vadd.f32 %v7743_v35, %v7742_v30 }
0x2131   :  { %13743 = vtanh.f32 %v7744_v49 }
0x213b   :  { %v13744_v31 = vpop.eup %13743 }
0x213c   :  { %v7746_v41 = vmul.f32 %v13744_v31, %v13742_v46 }
0x213e   :  { %7951 = vmatmul.mubr.f32.gmra.mrb[78].mxu0 %v7746_v41  ;;  %8064 = vmatmul.mubr.f32.gmra.mrb[78].mxu1 %v7746_v41 }
0x213f   :  { %8235 = vmatprep.mubr.f32.mxu0 %v14025_v0  ;;  %8306 = vmatprep.mubr.f32.mxu1 %v14025_v0 }
0x2142   :  { %8236 = vmatmul.mubr.f32.vlgmr.msra.gmra.mrb[64].mxu0 %v14025_v0  ;;  %8307 = vmatmul.mubr.f32.vlgmr.msra.gmra.mrb[64].mxu1 %v14025_v0 }
0x2143   :  { %12397 = vmatpush1.bf16.msra.mxu0 %v16130_v53  ;;  %12429 = vmatpush1.bf16.msra.mxu1 %v16133_v20 }
0x2144   :  { %12399 = vmatprep.subr.bf16.mxu0 %v16138_v17  ;;  %12431 = vmatprep.subr.bf16.mxu1 %v16140_v61 }
0x2145   :  { %8409 = vmatprep.mubr.f32.mxu0 %v14025_v0  ;;  %8480 = vmatprep.mubr.f32.mxu1 %v14025_v0 }
0x2147   :  { %12401 = vmatpush1.bf16.msra.mxu0 %v16142_v9  ;;  %12433 = vmatpush1.bf16.msra.mxu1 %v16145_v58 }
0x2148   :  { %12403 = vmatprep.subr.bf16.mxu0 %v16150_v51  ;;  %12435 = vmatprep.subr.bf16.mxu1 %v16152_v3 }
0x214b   :  { %12405 = vmatpush1.bf16.msra.mxu0 %v16154_v32  ;;  %12437 = vmatpush1.bf16.msra.mxu1 %v16157_v2 }
0x214c   :  { %12407 = vmatprep.subr.bf16.mxu0 %v16162_v43  ;;  %12439 = vmatprep.subr.bf16.mxu1 %v16164_v23 }
0x214f   :  { %12409 = vmatpush1.bf16.msra.mxu0 %v16166_v24  ;;  %12441 = vmatpush1.bf16.msra.mxu1 %v16169_v50 }
0x2150   :  { %12411 = vmatprep.subr.bf16.mxu0 %v16173_v16  ;;  %12443 = vmatprep.subr.bf16.mxu1 %v16175_v40 }
0x2153   :  { %12413 = vmatpush1.bf16.msra.mxu0 %v16178_v11  ;;  %12445 = vmatpush1.bf16.msra.mxu1 %v16182_v36 }
0x2154   :  { %12415 = vmatprep.subr.bf16.mxu0 %v16184_v54  ;;  %12447 = vmatprep.subr.bf16.mxu1 %v16186_v14 }
0x2157   :  { %12417 = vmatpush1.bf16.msra.mxu0 %v16189_v63  ;;  %12449 = vmatpush1.bf16.msra.mxu1 %v16193_v27 }
0x2158   :  { %12419 = vmatprep.subr.bf16.mxu0 %v16195_v8  ;;  %12451 = vmatprep.subr.bf16.mxu1 %v16198_v44 }
0x215b   :  { %12421 = vmatpush1.bf16.msra.mxu0 %v16201_v37  ;;  %12453 = vmatpush1.bf16.msra.mxu1 %v16205_v5 }
0x215c   :  { %12423 = vmatprep.subr.bf16.mxu0 %v16210_v18  ;;  %12455 = vmatprep.subr.bf16.mxu1 %v16212_v39 }
0x215f   :  { %12425 = vmatpush1.bf16.msra.mxu0 %v16214_v13  ;;  %12457 = vmatpush1.bf16.msra.mxu1 %v16217_v26 }
0x2160   :  { %12459 = vmatprep.subr.bf16.mxu0 %v16126_v21  ;;  %12491 = vmatprep.subr.bf16.mxu1 %v16128_v47 }
0x2215   :  { %v8237_v62 = vpop.f32.mrb[64].mxu0  ;;  %v8308_v1 = vpop.f32.mrb[64].mxu1 }
0x2216   :  { %v12994_v33 = vadd.f32 %v8237_v62, %v16268_v59  ;;  %v8239_v60 = vpop.f32.mrb[65].mxu0  ;;  %v8310_v56 = vpop.f32.mrb[65].mxu1  ;;  %v13010_v28 = vadd.f32 %v8308_v1, %v16280_v48 }
0x2217   :  { %v12995_v52 = vadd.f32 %v8239_v60, %v16271_v15  ;;  %v13011_v45 = vadd.f32 %v8310_v56, %v16276_v25 }
0x2218   :  { %v9757_v19 = vmul.f32 -1.442695, %v12994_v33 }
0x2219   :  { %v9758_v22 = vmul.f32 -1.442695, %v12995_v52  ;;  %v9759_v42 = vmul.f32 -1.442695, %v13011_v45 }
0x221a   :  { %13745 = vpow2.f32 %v9757_v19 }
0x221b   :  { %13747 = vpow2.f32 %v9758_v22 }
0x221c   :  { %13749 = vpow2.f32 %v9759_v42 }
0x221d   :  { %13751 = vtanh.f32 %v13010_v28 }
0x2224   :  { %v13746_v12 = vpop.eup %13745 }
0x2225   :  { %v13748_v57 = vpop.eup %13747  ;;  %v8320_v34 = vadd.f32 1.0, %v13746_v12 }
0x2226   :  { %v8326_v4 = vadd.f32 1.0, %v13748_v57  ;;  %v13750_v55 = vpop.eup %13749 }
0x2227   :  { %13753 = vrcp.f32 %v8320_v34  ;;  %v13752_v38 = vpop.eup %13751  ;;  %v8333_v30 = vadd.f32 1.0, %v13750_v55 }
0x2228   :  { %13755 = vrcp.f32 %v8326_v4 }
0x2229   :  { %13757 = vrcp.f32 %v8333_v30 }
0x2231   :  { %v13754_v6 = vpop.eup %13753 }
0x2232   :  { %v13756_v35 = vpop.eup %13755  ;;  %v8337_v7 = vmul.f32 %v13754_v6, %v13752_v38 }
0x2233   :  { %v8336_v49 = vmul.f32 0.0, %v13756_v35  ;;  %v13758_v46 = vpop.eup %13757 }
0x2235   :  { %v16283_v10 = vadd.f32 %v8337_v7, %v8336_v49 }
0x2237   :  { %13759 = vtanh.f32 %v16283_v10 }
0x2241   :  { %v13760_v31 = vpop.eup %13759 }
0x2242   :  { %v8340_v41 = vmul.f32 %v13760_v31, %v13758_v46 }
0x2244   :  { %8410 = vmatmul.mubr.f32.vlgmr.msra.gmra.mrb[66].mxu0 %v8340_v41  ;;  %8481 = vmatmul.mubr.f32.vlgmr.msra.gmra.mrb[66].mxu1 %v8340_v41 }
0x2245   :  { %12461 = vmatpush1.bf16.msra.mxu0 %v16130_v53  ;;  %12493 = vmatpush1.bf16.msra.mxu1 %v16133_v20 }
0x2246   :  { %12463 = vmatprep.subr.bf16.mxu0 %v16138_v17  ;;  %12495 = vmatprep.subr.bf16.mxu1 %v16140_v61 }
0x2247   :  { %8583 = vmatprep.mubr.f32.mxu0 %v14025_v0  ;;  %8654 = vmatprep.mubr.f32.mxu1 %v14025_v0 }
0x2249   :  { %12465 = vmatpush1.bf16.msra.mxu0 %v16142_v9  ;;  %12497 = vmatpush1.bf16.msra.mxu1 %v16145_v58 }
0x224a   :  { %12467 = vmatprep.subr.bf16.mxu0 %v16150_v51  ;;  %12499 = vmatprep.subr.bf16.mxu1 %v16152_v3 }
0x224d   :  { %12469 = vmatpush1.bf16.msra.mxu0 %v16154_v32  ;;  %12501 = vmatpush1.bf16.msra.mxu1 %v16157_v2 }
0x224e   :  { %12471 = vmatprep.subr.bf16.mxu0 %v16162_v43  ;;  %12503 = vmatprep.subr.bf16.mxu1 %v16164_v23 }
0x2251   :  { %12473 = vmatpush1.bf16.msra.mxu0 %v16166_v24  ;;  %12505 = vmatpush1.bf16.msra.mxu1 %v16169_v50 }
0x2252   :  { %12475 = vmatprep.subr.bf16.mxu0 %v16173_v16  ;;  %12507 = vmatprep.subr.bf16.mxu1 %v16175_v40 }
0x2255   :  { %12477 = vmatpush1.bf16.msra.mxu0 %v16178_v11  ;;  %12509 = vmatpush1.bf16.msra.mxu1 %v16182_v36 }
0x2256   :  { %12479 = vmatprep.subr.bf16.mxu0 %v16184_v54  ;;  %12511 = vmatprep.subr.bf16.mxu1 %v16186_v14 }
0x2259   :  { %12481 = vmatpush1.bf16.msra.mxu0 %v16189_v63  ;;  %12513 = vmatpush1.bf16.msra.mxu1 %v16193_v27 }
0x225a   :  { %12483 = vmatprep.subr.bf16.mxu0 %v16195_v8  ;;  %12515 = vmatprep.subr.bf16.mxu1 %v16198_v44 }
0x225d   :  { %12485 = vmatpush1.bf16.msra.mxu0 %v16201_v37  ;;  %12517 = vmatpush1.bf16.msra.mxu1 %v16205_v5 }
0x225e   :  { %12487 = vmatprep.subr.bf16.mxu0 %v16210_v18  ;;  %12519 = vmatprep.subr.bf16.mxu1 %v16212_v39 }
0x2261   :  { %12489 = vmatpush1.bf16.msra.mxu0 %v16214_v13  ;;  %12521 = vmatpush1.bf16.msra.mxu1 %v16217_v26 }
0x2262   :  { %12523 = vmatprep.subr.bf16.mxu0 %v16126_v21  ;;  %12555 = vmatprep.subr.bf16.mxu1 %v16128_v47 }
0x2317   :  { %v8411_v29 = vpop.f32.mrb[66].mxu0  ;;  %v8482_v62 = vpop.f32.mrb[66].mxu1 }
0x2318   :  { %v12996_v1 = vadd.f32 %v8411_v29, %v16268_v59  ;;  %v8413_v33 = vpop.f32.mrb[67].mxu0  ;;  %v8484_v60 = vpop.f32.mrb[67].mxu1  ;;  %v13012_v42 = vadd.f32 %v8482_v62, %v16280_v48 }
0x2319   :  { %v12997_v56 = vadd.f32 %v8413_v33, %v16271_v15  ;;  %v13013_v22 = vadd.f32 %v8484_v60, %v16276_v25 }
0x231a   :  { %v9760_v52 = vmul.f32 -1.442695, %v12996_v1 }
0x231b   :  { %v9761_v19 = vmul.f32 -1.442695, %v12997_v56  ;;  %v9762_v45 = vmul.f32 -1.442695, %v13013_v22 }
0x231c   :  { %13761 = vpow2.f32 %v9760_v52 }
0x231d   :  { %13763 = vpow2.f32 %v9761_v19 }
0x231e   :  { %13765 = vpow2.f32 %v9762_v45 }
0x231f   :  { %13767 = vtanh.f32 %v13012_v42 }
0x2326   :  { %v13762_v28 = vpop.eup %13761 }
0x2327   :  { %v13764_v12 = vpop.eup %13763  ;;  %v8494_v57 = vadd.f32 1.0, %v13762_v28 }
0x2328   :  { %v8500_v34 = vadd.f32 1.0, %v13764_v12  ;;  %v13766_v4 = vpop.eup %13765 }
0x2329   :  { %13769 = vrcp.f32 %v8494_v57  ;;  %v13768_v55 = vpop.eup %13767  ;;  %v8507_v7 = vadd.f32 1.0, %v13766_v4 }
0x232a   :  { %13771 = vrcp.f32 %v8500_v34 }
0x232b   :  { %13773 = vrcp.f32 %v8507_v7 }
0x2333   :  { %v13770_v38 = vpop.eup %13769 }
0x2334   :  { %v13772_v6 = vpop.eup %13771  ;;  %v8511_v35 = vmul.f32 %v13770_v38, %v13768_v55 }
0x2335   :  { %v8510_v30 = vmul.f32 %v13772_v6, %v16283_v10  ;;  %v13774_v46 = vpop.eup %13773 }
0x2337   :  { %v16325_v49 = vadd.f32 %v8511_v35, %v8510_v30 }
0x2339   :  { %13775 = vtanh.f32 %v16325_v49 }
0x2343   :  { %v13776_v31 = vpop.eup %13775 }
0x2344   :  { %v8514_v41 = vmul.f32 %v13776_v31, %v13774_v46 }
0x2346   :  { %8584 = vmatmul.mubr.f32.vlgmr.msra.gmra.mrb[68].mxu0 %v8514_v41  ;;  %8655 = vmatmul.mubr.f32.vlgmr.msra.gmra.mrb[68].mxu1 %v8514_v41 }
0x2347   :  { %12525 = vmatpush1.bf16.msra.mxu0 %v16130_v53  ;;  %12557 = vmatpush1.bf16.msra.mxu1 %v16133_v20 }
0x2348   :  { %12527 = vmatprep.subr.bf16.mxu0 %v16138_v17  ;;  %12559 = vmatprep.subr.bf16.mxu1 %v16140_v61 }
0x2349   :  { %8757 = vmatprep.mubr.f32.mxu0 %v14025_v0  ;;  %8828 = vmatprep.mubr.f32.mxu1 %v14025_v0 }
0x234b   :  { %12529 = vmatpush1.bf16.msra.mxu0 %v16142_v9  ;;  %12561 = vmatpush1.bf16.msra.mxu1 %v16145_v58 }
0x234c   :  { %12531 = vmatprep.subr.bf16.mxu0 %v16150_v51  ;;  %12563 = vmatprep.subr.bf16.mxu1 %v16152_v3 }
0x234f   :  { %12533 = vmatpush1.bf16.msra.mxu0 %v16154_v32  ;;  %12565 = vmatpush1.bf16.msra.mxu1 %v16157_v2 }
0x2350   :  { %12535 = vmatprep.subr.bf16.mxu0 %v16162_v43  ;;  %12567 = vmatprep.subr.bf16.mxu1 %v16164_v23 }
0x2353   :  { %12537 = vmatpush1.bf16.msra.mxu0 %v16166_v24  ;;  %12569 = vmatpush1.bf16.msra.mxu1 %v16169_v50 }
0x2354   :  { %12539 = vmatprep.subr.bf16.mxu0 %v16173_v16  ;;  %12571 = vmatprep.subr.bf16.mxu1 %v16175_v40 }
0x2357   :  { %12541 = vmatpush1.bf16.msra.mxu0 %v16178_v11  ;;  %12573 = vmatpush1.bf16.msra.mxu1 %v16182_v36 }
0x2358   :  { %12543 = vmatprep.subr.bf16.mxu0 %v16184_v54  ;;  %12575 = vmatprep.subr.bf16.mxu1 %v16186_v14 }
0x235b   :  { %12545 = vmatpush1.bf16.msra.mxu0 %v16189_v63  ;;  %12577 = vmatpush1.bf16.msra.mxu1 %v16193_v27 }
0x235c   :  { %12547 = vmatprep.subr.bf16.mxu0 %v16195_v8  ;;  %12579 = vmatprep.subr.bf16.mxu1 %v16198_v44 }
0x235f   :  { %12549 = vmatpush1.bf16.msra.mxu0 %v16201_v37  ;;  %12581 = vmatpush1.bf16.msra.mxu1 %v16205_v5 }
0x2360   :  { %12551 = vmatprep.subr.bf16.mxu0 %v16210_v18  ;;  %12583 = vmatprep.subr.bf16.mxu1 %v16212_v39 }
0x2363   :  { %12553 = vmatpush1.bf16.msra.mxu0 %v16214_v13  ;;  %12585 = vmatpush1.bf16.msra.mxu1 %v16217_v26 }
0x2364   :  { %12587 = vmatprep.subr.bf16.mxu0 %v16126_v21  ;;  %12619 = vmatprep.subr.bf16.mxu1 %v16128_v47 }
0x2419   :  { %v8585_v10 = vpop.f32.mrb[68].mxu0  ;;  %v8656_v29 = vpop.f32.mrb[68].mxu1 }
0x241a   :  { %v12998_v62 = vadd.f32 %v8585_v10, %v16268_v59  ;;  %v8587_v1 = vpop.f32.mrb[69].mxu0  ;;  %v8658_v33 = vpop.f32.mrb[69].mxu1  ;;  %v13014_v45 = vadd.f32 %v8656_v29, %v16280_v48 }
0x241b   :  { %v12999_v60 = vadd.f32 %v8587_v1, %v16271_v15  ;;  %v13015_v19 = vadd.f32 %v8658_v33, %v16276_v25 }
0x241c   :  { %v9763_v56 = vmul.f32 -1.442695, %v12998_v62 }
0x241d   :  { %v9764_v52 = vmul.f32 -1.442695, %v12999_v60  ;;  %v9765_v22 = vmul.f32 -1.442695, %v13015_v19 }
0x241e   :  { %13777 = vpow2.f32 %v9763_v56 }
0x241f   :  { %13779 = vpow2.f32 %v9764_v52 }
0x2420   :  { %13781 = vpow2.f32 %v9765_v22 }
0x2421   :  { %13783 = vtanh.f32 %v13014_v45 }
0x2428   :  { %v13778_v42 = vpop.eup %13777 }
0x2429   :  { %v13780_v28 = vpop.eup %13779  ;;  %v8668_v12 = vadd.f32 1.0, %v13778_v42 }
0x242a   :  { %v8674_v57 = vadd.f32 1.0, %v13780_v28  ;;  %v13782_v34 = vpop.eup %13781 }
0x242b   :  { %13785 = vrcp.f32 %v8668_v12  ;;  %v13784_v4 = vpop.eup %13783  ;;  %v8681_v35 = vadd.f32 1.0, %v13782_v34 }
0x242c   :  { %13787 = vrcp.f32 %v8674_v57 }
0x242d   :  { %13789 = vrcp.f32 %v8681_v35 }
0x2435   :  { %v13786_v55 = vpop.eup %13785 }
0x2436   :  { %v13788_v38 = vpop.eup %13787  ;;  %v8685_v6 = vmul.f32 %v13786_v55, %v13784_v4 }
0x2437   :  { %v8684_v7 = vmul.f32 %v13788_v38, %v16325_v49  ;;  %v13790_v46 = vpop.eup %13789 }
0x2439   :  { %v16367_v30 = vadd.f32 %v8685_v6, %v8684_v7 }
0x243b   :  { %13791 = vtanh.f32 %v16367_v30 }
0x2445   :  { %v13792_v31 = vpop.eup %13791 }
0x2446   :  { %v8688_v41 = vmul.f32 %v13792_v31, %v13790_v46 }
0x2448   :  { %8758 = vmatmul.mubr.f32.vlgmr.msra.gmra.mrb[70].mxu0 %v8688_v41  ;;  %8829 = vmatmul.mubr.f32.vlgmr.msra.gmra.mrb[70].mxu1 %v8688_v41 }
0x2449   :  { %12589 = vmatpush1.bf16.msra.mxu0 %v16130_v53  ;;  %12621 = vmatpush1.bf16.msra.mxu1 %v16133_v20 }
0x244a   :  { %12591 = vmatprep.subr.bf16.mxu0 %v16138_v17  ;;  %12623 = vmatprep.subr.bf16.mxu1 %v16140_v61 }
0x244b   :  { %8931 = vmatprep.mubr.f32.mxu0 %v14025_v0  ;;  %9002 = vmatprep.mubr.f32.mxu1 %v14025_v0 }
0x244d   :  { %12593 = vmatpush1.bf16.msra.mxu0 %v16142_v9  ;;  %12625 = vmatpush1.bf16.msra.mxu1 %v16145_v58 }
0x244e   :  { %12595 = vmatprep.subr.bf16.mxu0 %v16150_v51  ;;  %12627 = vmatprep.subr.bf16.mxu1 %v16152_v3 }
0x2451   :  { %12597 = vmatpush1.bf16.msra.mxu0 %v16154_v32  ;;  %12629 = vmatpush1.bf16.msra.mxu1 %v16157_v2 }
0x2452   :  { %12599 = vmatprep.subr.bf16.mxu0 %v16162_v43  ;;  %12631 = vmatprep.subr.bf16.mxu1 %v16164_v23 }
0x2455   :  { %12601 = vmatpush1.bf16.msra.mxu0 %v16166_v24  ;;  %12633 = vmatpush1.bf16.msra.mxu1 %v16169_v50 }
0x2456   :  { %12603 = vmatprep.subr.bf16.mxu0 %v16173_v16  ;;  %12635 = vmatprep.subr.bf16.mxu1 %v16175_v40 }
0x2459   :  { %12605 = vmatpush1.bf16.msra.mxu0 %v16178_v11  ;;  %12637 = vmatpush1.bf16.msra.mxu1 %v16182_v36 }
0x245a   :  { %12607 = vmatprep.subr.bf16.mxu0 %v16184_v54  ;;  %12639 = vmatprep.subr.bf16.mxu1 %v16186_v14 }
0x245d   :  { %12609 = vmatpush1.bf16.msra.mxu0 %v16189_v63  ;;  %12641 = vmatpush1.bf16.msra.mxu1 %v16193_v27 }
0x245e   :  { %12611 = vmatprep.subr.bf16.mxu0 %v16195_v8  ;;  %12643 = vmatprep.subr.bf16.mxu1 %v16198_v44 }
0x2461   :  { %12613 = vmatpush1.bf16.msra.mxu0 %v16201_v37  ;;  %12645 = vmatpush1.bf16.msra.mxu1 %v16205_v5 }
0x2462   :  { %12615 = vmatprep.subr.bf16.mxu0 %v16210_v18  ;;  %12647 = vmatprep.subr.bf16.mxu1 %v16212_v39 }
0x2465   :  { %12617 = vmatpush1.bf16.msra.mxu0 %v16214_v13  ;;  %12649 = vmatpush1.bf16.msra.mxu1 %v16217_v26 }
0x2466   :  { %12651 = vmatprep.subr.bf16.mxu0 %v16126_v21  ;;  %12683 = vmatprep.subr.bf16.mxu1 %v16128_v47 }
0x251b   :  { %v8759_v49 = vpop.f32.mrb[70].mxu0  ;;  %v8830_v10 = vpop.f32.mrb[70].mxu1 }
0x251c   :  { %v13000_v29 = vadd.f32 %v8759_v49, %v16268_v59  ;;  %v8761_v62 = vpop.f32.mrb[71].mxu0  ;;  %v8832_v1 = vpop.f32.mrb[71].mxu1  ;;  %v13016_v22 = vadd.f32 %v8830_v10, %v16280_v48 }
0x251d   :  { %v13001_v33 = vadd.f32 %v8761_v62, %v16271_v15  ;;  %v13017_v52 = vadd.f32 %v8832_v1, %v16276_v25 }
0x251e   :  { %v9766_v60 = vmul.f32 -1.442695, %v13000_v29 }
0x251f   :  { %v9767_v56 = vmul.f32 -1.442695, %v13001_v33  ;;  %v9768_v19 = vmul.f32 -1.442695, %v13017_v52 }
0x2520   :  { %13793 = vpow2.f32 %v9766_v60 }
0x2521   :  { %13795 = vpow2.f32 %v9767_v56 }
0x2522   :  { %13797 = vpow2.f32 %v9768_v19 }
0x2523   :  { %13799 = vtanh.f32 %v13016_v22 }
0x252a   :  { %v13794_v45 = vpop.eup %13793 }
0x252b   :  { %v13796_v42 = vpop.eup %13795  ;;  %v8842_v28 = vadd.f32 1.0, %v13794_v45 }
0x252c   :  { %v8848_v12 = vadd.f32 1.0, %v13796_v42  ;;  %v13798_v57 = vpop.eup %13797 }
0x252d   :  { %13801 = vrcp.f32 %v8842_v28  ;;  %v13800_v34 = vpop.eup %13799  ;;  %v8855_v6 = vadd.f32 1.0, %v13798_v57 }
0x252e   :  { %13803 = vrcp.f32 %v8848_v12 }
0x252f   :  { %13805 = vrcp.f32 %v8855_v6 }
0x2537   :  { %v13802_v4 = vpop.eup %13801 }
0x2538   :  { %v13804_v55 = vpop.eup %13803  ;;  %v8859_v38 = vmul.f32 %v13802_v4, %v13800_v34 }
0x2539   :  { %v8858_v35 = vmul.f32 %v13804_v55, %v16367_v30  ;;  %v13806_v46 = vpop.eup %13805 }
0x253b   :  { %v16409_v7 = vadd.f32 %v8859_v38, %v8858_v35 }
0x253d   :  { %13807 = vtanh.f32 %v16409_v7 }
0x2547   :  { %v13808_v31 = vpop.eup %13807 }
0x2548   :  { %v8862_v41 = vmul.f32 %v13808_v31, %v13806_v46 }
0x254a   :  { %8932 = vmatmul.mubr.f32.vlgmr.msra.gmra.mrb[72].mxu0 %v8862_v41  ;;  %9003 = vmatmul.mubr.f32.vlgmr.msra.gmra.mrb[72].mxu1 %v8862_v41 }
0x254b   :  { %12653 = vmatpush1.bf16.msra.mxu0 %v16130_v53  ;;  %12685 = vmatpush1.bf16.msra.mxu1 %v16133_v20 }
0x254c   :  { %12655 = vmatprep.subr.bf16.mxu0 %v16138_v17  ;;  %12687 = vmatprep.subr.bf16.mxu1 %v16140_v61 }
0x254d   :  { %9105 = vmatprep.mubr.f32.mxu0 %v14025_v0  ;;  %9176 = vmatprep.mubr.f32.mxu1 %v14025_v0 }
0x254f   :  { %12657 = vmatpush1.bf16.msra.mxu0 %v16142_v9  ;;  %12689 = vmatpush1.bf16.msra.mxu1 %v16145_v58 }
0x2550   :  { %12659 = vmatprep.subr.bf16.mxu0 %v16150_v51  ;;  %12691 = vmatprep.subr.bf16.mxu1 %v16152_v3 }
0x2553   :  { %12661 = vmatpush1.bf16.msra.mxu0 %v16154_v32  ;;  %12693 = vmatpush1.bf16.msra.mxu1 %v16157_v2 }
0x2554   :  { %12663 = vmatprep.subr.bf16.mxu0 %v16162_v43  ;;  %12695 = vmatprep.subr.bf16.mxu1 %v16164_v23 }
0x2557   :  { %12665 = vmatpush1.bf16.msra.mxu0 %v16166_v24  ;;  %12697 = vmatpush1.bf16.msra.mxu1 %v16169_v50 }
0x2558   :  { %12667 = vmatprep.subr.bf16.mxu0 %v16173_v16  ;;  %12699 = vmatprep.subr.bf16.mxu1 %v16175_v40 }
0x255b   :  { %12669 = vmatpush1.bf16.msra.mxu0 %v16178_v11  ;;  %12701 = vmatpush1.bf16.msra.mxu1 %v16182_v36 }
0x255c   :  { %12671 = vmatprep.subr.bf16.mxu0 %v16184_v54  ;;  %12703 = vmatprep.subr.bf16.mxu1 %v16186_v14 }
0x255f   :  { %12673 = vmatpush1.bf16.msra.mxu0 %v16189_v63  ;;  %12705 = vmatpush1.bf16.msra.mxu1 %v16193_v27 }
0x2560   :  { %12675 = vmatprep.subr.bf16.mxu0 %v16195_v8  ;;  %12707 = vmatprep.subr.bf16.mxu1 %v16198_v44 }
0x2563   :  { %12677 = vmatpush1.bf16.msra.mxu0 %v16201_v37  ;;  %12709 = vmatpush1.bf16.msra.mxu1 %v16205_v5 }
0x2564   :  { %12679 = vmatprep.subr.bf16.mxu0 %v16210_v18  ;;  %12711 = vmatprep.subr.bf16.mxu1 %v16212_v39 }
0x2567   :  { %12681 = vmatpush1.bf16.msra.mxu0 %v16214_v13  ;;  %12713 = vmatpush1.bf16.msra.mxu1 %v16217_v26 }
0x2568   :  { %12715 = vmatprep.subr.bf16.mxu0 %v16126_v21  ;;  %12747 = vmatprep.subr.bf16.mxu1 %v16128_v47 }
0x261d   :  { %v8933_v30 = vpop.f32.mrb[72].mxu0  ;;  %v9004_v49 = vpop.f32.mrb[72].mxu1 }
0x261e   :  { %v13002_v10 = vadd.f32 %v8933_v30, %v16268_v59  ;;  %v8935_v29 = vpop.f32.mrb[73].mxu0  ;;  %v9006_v62 = vpop.f32.mrb[73].mxu1  ;;  %v13018_v19 = vadd.f32 %v9004_v49, %v16280_v48 }
0x261f   :  { %v13003_v1 = vadd.f32 %v8935_v29, %v16271_v15  ;;  %v13019_v56 = vadd.f32 %v9006_v62, %v16276_v25 }
0x2620   :  { %v9769_v33 = vmul.f32 -1.442695, %v13002_v10 }
0x2621   :  { %v9770_v60 = vmul.f32 -1.442695, %v13003_v1  ;;  %v9771_v52 = vmul.f32 -1.442695, %v13019_v56 }
0x2622   :  { %13809 = vpow2.f32 %v9769_v33 }
0x2623   :  { %13811 = vpow2.f32 %v9770_v60 }
0x2624   :  { %13813 = vpow2.f32 %v9771_v52 }
0x2625   :  { %13815 = vtanh.f32 %v13018_v19 }
0x262c   :  { %v13810_v22 = vpop.eup %13809 }
0x262d   :  { %v13812_v45 = vpop.eup %13811  ;;  %v9016_v42 = vadd.f32 1.0, %v13810_v22 }
0x262e   :  { %v9022_v28 = vadd.f32 1.0, %v13812_v45  ;;  %v13814_v12 = vpop.eup %13813 }
0x262f   :  { %13817 = vrcp.f32 %v9016_v42  ;;  %v13816_v57 = vpop.eup %13815  ;;  %v9029_v38 = vadd.f32 1.0, %v13814_v12 }
0x2630   :  { %13819 = vrcp.f32 %v9022_v28 }
0x2631   :  { %13821 = vrcp.f32 %v9029_v38 }
0x2639   :  { %v13818_v34 = vpop.eup %13817 }
0x263a   :  { %v13820_v4 = vpop.eup %13819  ;;  %v9033_v55 = vmul.f32 %v13818_v34, %v13816_v57 }
0x263b   :  { %v9032_v6 = vmul.f32 %v13820_v4, %v16409_v7  ;;  %v13822_v46 = vpop.eup %13821 }
0x263d   :  { %v16451_v35 = vadd.f32 %v9033_v55, %v9032_v6 }
0x263f   :  { %13823 = vtanh.f32 %v16451_v35 }
0x2649   :  { %v13824_v31 = vpop.eup %13823 }
0x264a   :  { %v9036_v41 = vmul.f32 %v13824_v31, %v13822_v46  ;;  %v9562_v31 = vld [vmem:[#allocation11 + $0x18] sm:$0xff] }
0x264c   :  { %9106 = vmatmul.mubr.f32.vlgmr.msra.gmra.mrb[74].mxu0 %v9036_v41  ;;  %9177 = vmatmul.mubr.f32.vlgmr.msra.gmra.mrb[74].mxu1 %v9036_v41 }
0x264d   :  { %12717 = vmatpush1.bf16.msra.mxu0 %v16130_v53  ;;  %12749 = vmatpush1.bf16.msra.mxu1 %v16133_v20 }
0x264e   :  { %12719 = vmatprep.subr.bf16.mxu0 %v16138_v17  ;;  %12751 = vmatprep.subr.bf16.mxu1 %v16140_v61 }
0x264f   :  { %9279 = vmatprep.mubr.f32.mxu0 %v14025_v0  ;;  %9350 = vmatprep.mubr.f32.mxu1 %v14025_v0 }
0x2651   :  { %12721 = vmatpush1.bf16.msra.mxu0 %v16142_v9  ;;  %12753 = vmatpush1.bf16.msra.mxu1 %v16145_v58 }
0x2652   :  { %12723 = vmatprep.subr.bf16.mxu0 %v16150_v51  ;;  %12755 = vmatprep.subr.bf16.mxu1 %v16152_v3 }
0x2655   :  { %12725 = vmatpush1.bf16.msra.mxu0 %v16154_v32  ;;  %12757 = vmatpush1.bf16.msra.mxu1 %v16157_v2 }
0x2656   :  { %12727 = vmatprep.subr.bf16.mxu0 %v16162_v43  ;;  %12759 = vmatprep.subr.bf16.mxu1 %v16164_v23 }
0x2659   :  { %12729 = vmatpush1.bf16.msra.mxu0 %v16166_v24  ;;  %12761 = vmatpush1.bf16.msra.mxu1 %v16169_v50 }
0x265a   :  { %12731 = vmatprep.subr.bf16.mxu0 %v16173_v16  ;;  %12763 = vmatprep.subr.bf16.mxu1 %v16175_v40 }
0x265d   :  { %12733 = vmatpush1.bf16.msra.mxu0 %v16178_v11  ;;  %12765 = vmatpush1.bf16.msra.mxu1 %v16182_v36 }
0x265e   :  { %12735 = vmatprep.subr.bf16.mxu0 %v16184_v54  ;;  %12767 = vmatprep.subr.bf16.mxu1 %v16186_v14 }
0x2661   :  { %12737 = vmatpush1.bf16.msra.mxu0 %v16189_v63  ;;  %12769 = vmatpush1.bf16.msra.mxu1 %v16193_v27 }
0x2662   :  { %12739 = vmatprep.subr.bf16.mxu0 %v16195_v8  ;;  %12771 = vmatprep.subr.bf16.mxu1 %v16198_v44 }
0x2665   :  { %12741 = vmatpush1.bf16.msra.mxu0 %v16201_v37  ;;  %12773 = vmatpush1.bf16.msra.mxu1 %v16205_v5 }
0x2666   :  { %12743 = vmatprep.subr.bf16.mxu0 %v16210_v18  ;;  %12775 = vmatprep.subr.bf16.mxu1 %v16212_v39 }
0x2669   :  { %12745 = vmatpush1.bf16.msra.mxu0 %v16214_v13  ;;  %12777 = vmatpush1.bf16.msra.mxu1 %v16217_v26 }
0x266a   :  { %12779 = vmatprep.subr.bf16.mxu0 %v16126_v21  ;;  %12811 = vmatprep.subr.bf16.mxu1 %v16128_v47 }
0x271f   :  { %v9107_v7 = vpop.f32.mrb[74].mxu0  ;;  %v9178_v30 = vpop.f32.mrb[74].mxu1 }
0x2720   :  { %v13004_v49 = vadd.f32 %v9107_v7, %v16268_v59  ;;  %v9109_v10 = vpop.f32.mrb[75].mxu0  ;;  %v9180_v29 = vpop.f32.mrb[75].mxu1  ;;  %v13020_v52 = vadd.f32 %v9178_v30, %v16280_v48  ;;  %v9563_v7 = vld [vmem:[#allocation11 + $0x20] sm:$0xff]  ;;  %v9564_v30 = vld [vmem:[#allocation11 + $0x28] sm:$0xff] }
0x2721   :  { %v13005_v62 = vadd.f32 %v9109_v10, %v16271_v15  ;;  %v13021_v60 = vadd.f32 %v9180_v29, %v16276_v25  ;;  %v9565_v10 = vld [vmem:[#allocation11 + $0x30] sm:$0xff]  ;;  %v9566_v29 = vld [vmem:[#allocation11 + $0x38] sm:$0xff] }
0x2722   :  { %v9772_v1 = vmul.f32 -1.442695, %v13004_v49  ;;  %v12849_v49 = vpack.c.bf16 %v9564_v30, %v9563_v7 }
0x2723   :  { %v9773_v33 = vmul.f32 -1.442695, %v13005_v62  ;;  %v9774_v56 = vmul.f32 -1.442695, %v13021_v60  ;;  %v12852_v62 = vpack.c.bf16 %v9566_v29, %v9565_v10 }
0x2724   :  { %13825 = vpow2.f32 %v9772_v1  ;;  %v9567_v1 = vld [vmem:[#allocation11 + $0x40] sm:$0xff] }
0x2725   :  { %13827 = vpow2.f32 %v9773_v33  ;;  %v9568_v33 = vld [vmem:[#allocation11 + $0x48] sm:$0xff] }
0x2726   :  { %13829 = vpow2.f32 %v9774_v56  ;;  %v12855_v60 = vpack.c.bf16 %v9568_v33, %v9567_v1  ;;  %v9569_v56 = vld [vmem:[#allocation11 + $0x50] sm:$0xff] }
0x2727   :  { %13831 = vtanh.f32 %v13020_v52  ;;  %v9570_v52 = vld [vmem:[#allocation11 + $0x58] sm:$0xff] }
0x272e   :  { %v13826_v21 = vpop.eup %13825 }
0x272f   :  { %v13828_v19 = vpop.eup %13827  ;;  %v9190_v47 = vadd.f32 1.0, %v13826_v21  ;;  %v9571_v21 = vld [vmem:[#allocation11 + $0x60] sm:$0xff] }
0x2730   :  { %v9196_v22 = vadd.f32 1.0, %v13828_v19  ;;  %v13830_v45 = vpop.eup %13829  ;;  %v12858_v19 = vpack.c.bf16 %v9570_v52, %v9569_v56 }
0x2731   :  { %13833 = vrcp.f32 %v9190_v47  ;;  %v13832_v42 = vpop.eup %13831  ;;  %v9203_v34 = vadd.f32 1.0, %v13830_v45  ;;  %v9572_v47 = vld [vmem:[#allocation11 + $0x68] sm:$0xff]  ;;  %v9573_v45 = vld [vmem:[#allocation11 + $0x70] sm:$0xff] }
0x2732   :  { %13835 = vrcp.f32 %v9196_v22  ;;  %v12861_v22 = vpack.c.bf16 %v9572_v47, %v9571_v21 }
0x2733   :  { %13837 = vrcp.f32 %v9203_v34 }
0x273b   :  { %v13834_v28 = vpop.eup %13833 }
0x273c   :  { %v13836_v12 = vpop.eup %13835  ;;  %v9207_v57 = vmul.f32 %v13834_v28, %v13832_v42  ;;  %v9574_v42 = vld [vmem:[#allocation11 + $0x78] sm:$0xff] }
0x273d   :  { %v9206_v4 = vmul.f32 %v13836_v12, %v16451_v35  ;;  %v13838_v38 = vpop.eup %13837  ;;  %v9561_v35 = vld [vmem:[#allocation11 + $0x10] sm:$0xff]  ;;  %v12864_v28 = vpack.c.bf16 %v9574_v42, %v9573_v45 }
0x273e   :  { %v12846_v41 = vpack.c.bf16 %v9562_v31, %v9561_v35 }
0x273f   :  { %v16493_v55 = vadd.f32 %v9207_v57, %v9206_v4 }
0x2741   :  { %13839 = vtanh.f32 %v16493_v55 }
0x274b   :  { %v13840_v6 = vpop.eup %13839 }
0x274c   :  { %v9210_v46 = vmul.f32 %v13840_v6, %v13838_v38 }
0x274e   :  { %9280 = vmatmul.mubr.f32.vlgmr.msra.gmra.mrb[76].mxu0 %v9210_v46  ;;  %9351 = vmatmul.mubr.f32.vlgmr.msra.gmra.mrb[76].mxu1 %v9210_v46 }
0x274f   :  { %12781 = vmatpush1.bf16.msra.mxu0 %v16130_v53  ;;  %12813 = vmatpush1.bf16.msra.mxu1 %v16133_v20 }
0x2750   :  { %12783 = vmatprep.subr.bf16.mxu0 %v16138_v17  ;;  %12815 = vmatprep.subr.bf16.mxu1 %v16140_v61 }
0x2751   :  { %9453 = vmatprep.mubr.f32.mxu0 %v14025_v0  ;;  %9524 = vmatprep.mubr.f32.mxu1 %v14025_v0 }
0x2753   :  { %12785 = vmatpush1.bf16.msra.mxu0 %v16142_v9  ;;  %12817 = vmatpush1.bf16.msra.mxu1 %v16145_v58 }
0x2754   :  { %12787 = vmatprep.subr.bf16.mxu0 %v16150_v51  ;;  %12819 = vmatprep.subr.bf16.mxu1 %v16152_v3 }
0x2757   :  { %12789 = vmatpush1.bf16.msra.mxu0 %v16154_v32  ;;  %12821 = vmatpush1.bf16.msra.mxu1 %v16157_v2 }
0x2758   :  { %12791 = vmatprep.subr.bf16.mxu0 %v16162_v43  ;;  %12823 = vmatprep.subr.bf16.mxu1 %v16164_v23 }
0x275b   :  { %12793 = vmatpush1.bf16.msra.mxu0 %v16166_v24  ;;  %12825 = vmatpush1.bf16.msra.mxu1 %v16169_v50 }
0x275c   :  { %12795 = vmatprep.subr.bf16.mxu0 %v16173_v16  ;;  %12827 = vmatprep.subr.bf16.mxu1 %v16175_v40 }
0x275f   :  { %12797 = vmatpush1.bf16.msra.mxu0 %v16178_v11  ;;  %12829 = vmatpush1.bf16.msra.mxu1 %v16182_v36 }
0x2760   :  { %12799 = vmatprep.subr.bf16.mxu0 %v16184_v54  ;;  %12831 = vmatprep.subr.bf16.mxu1 %v16186_v14 }
0x2763   :  { %12801 = vmatpush1.bf16.msra.mxu0 %v16189_v63  ;;  %12833 = vmatpush1.bf16.msra.mxu1 %v16193_v27 }
0x2764   :  { %12803 = vmatprep.subr.bf16.mxu0 %v16195_v8  ;;  %12835 = vmatprep.subr.bf16.mxu1 %v16198_v44 }
0x2767   :  { %12805 = vmatpush1.bf16.msra.mxu0 %v16201_v37  ;;  %12837 = vmatpush1.bf16.msra.mxu1 %v16205_v5 }
0x2768   :  { %12807 = vmatprep.subr.bf16.mxu0 %v16210_v18  ;;  %12839 = vmatprep.subr.bf16.mxu1 %v16212_v39  ;;  %v9559_v18 = vld [vmem:[#allocation11] sm:$0xff]  ;;  %v9560_v39 = vld [vmem:[#allocation11 + $0x8] sm:$0xff] }
0x276b   :  { %12809 = vmatpush1.bf16.msra.mxu0 %v16214_v13  ;;  %12841 = vmatpush1.bf16.msra.mxu1 %v16217_v26  ;;  %v12843_v13 = vpack.c.bf16 %v9560_v39, %v9559_v18  ;;  %v14026_v26 = vmov 0.0|0.0  }
0x276c   :  { %12842 = vmatprep.subr.bf16.mxu0 %v14026_v26 }
0x2821   :  { %v9281_v53 = vpop.f32.mrb[76].mxu0  ;;  %v9352_v20 = vpop.f32.mrb[76].mxu1 }
0x2822   :  { %v13006_v17 = vadd.f32 %v9281_v53, %v16268_v59  ;;  %v9283_v61 = vpop.f32.mrb[77].mxu0  ;;  %v9354_v9 = vpop.f32.mrb[77].mxu1  ;;  %v13022_v43 = vadd.f32 %v9352_v20, %v16280_v48 }
0x2823   :  { %v13007_v58 = vadd.f32 %v9283_v61, %v16271_v15  ;;  %v13023_v32 = vadd.f32 %v9354_v9, %v16276_v25 }
0x2824   :  { %v9775_v51 = vmul.f32 -1.442695, %v13006_v17 }
0x2825   :  { %v9776_v3 = vmul.f32 -1.442695, %v13007_v58  ;;  %v9777_v2 = vmul.f32 -1.442695, %v13023_v32 }
0x2826   :  { %13841 = vpow2.f32 %v9775_v51 }
0x2827   :  { %13843 = vpow2.f32 %v9776_v3 }
0x2828   :  { %13845 = vpow2.f32 %v9777_v2 }
0x2829   :  { %13847 = vtanh.f32 %v13022_v43 }
0x2830   :  { %v13842_v23 = vpop.eup %13841 }
0x2831   :  { %v13844_v24 = vpop.eup %13843  ;;  %v9364_v50 = vadd.f32 1.0, %v13842_v23 }
0x2832   :  { %v9370_v16 = vadd.f32 1.0, %v13844_v24  ;;  %v13846_v40 = vpop.eup %13845 }
0x2833   :  { %13849 = vrcp.f32 %v9364_v50  ;;  %v13848_v11 = vpop.eup %13847  ;;  %v9377_v63 = vadd.f32 1.0, %v13846_v40  ;;  %v9781_v50 = vld [vmem:[#allocation12] ss:$0 sm:$0xff] }
0x2834   :  { %13851 = vrcp.f32 %v9370_v16 }
0x2835   :  { %13853 = vrcp.f32 %v9377_v63 }
0x283d   :  { %v13850_v36 = vpop.eup %13849 }
0x283e   :  { %v13852_v54 = vpop.eup %13851  ;;  %v9381_v14 = vmul.f32 %v13850_v36, %v13848_v11 }
0x283f   :  { %v9380_v27 = vmul.f32 %v13852_v54, %v16493_v55  ;;  %v13854_v44 = vpop.eup %13853 }
0x2841   :  { %v16533_v8 = vadd.f32 %v9381_v14, %v9380_v27 }
0x2843   :  { %13855 = vtanh.f32 %v16533_v8 }
0x284d   :  { %v13856_v37 = vpop.eup %13855 }
0x284e   :  { %v9384_v5 = vmul.f32 %v13856_v37, %v13854_v44 }
0x2850   :  { %9454 = vmatmul.mubr.f32.vlgmr.msra.gmra.mrb[78].mxu0 %v9384_v5  ;;  %9525 = vmatmul.mubr.f32.vlgmr.msra.gmra.mrb[78].mxu1 %v9384_v5 }
0x2851   :  { %12844 = vmatpush3.bf16.msra.mxu0 %v12843_v13  ;;  %9831 = vmatprep.mubr.msk.f32.mxu0 %vm14027_vm0, %v14025_v0 }
0x2852   :  { %12845 = vmatprep.subr.bf16.mxu0 %v14026_v26 }
0x2855   :  { %12847 = vmatpush3.bf16.msra.mxu0 %v12846_v41 }
0x2856   :  { %12848 = vmatprep.subr.bf16.mxu0 %v14026_v26 }
0x2859   :  { %12850 = vmatpush3.bf16.msra.mxu0 %v12849_v49 }
0x285a   :  { %12851 = vmatprep.subr.bf16.mxu0 %v14026_v26 }
0x285d   :  { %12853 = vmatpush3.bf16.msra.mxu0 %v12852_v62 }
0x285e   :  { %12854 = vmatprep.subr.bf16.mxu0 %v14026_v26 }
0x2861   :  { %12856 = vmatpush3.bf16.msra.mxu0 %v12855_v60 }
0x2862   :  { %12857 = vmatprep.subr.bf16.mxu0 %v14026_v26 }
0x2865   :  { %12859 = vmatpush3.bf16.msra.mxu0 %v12858_v19 }
0x2866   :  { %12860 = vmatprep.subr.bf16.mxu0 %v14026_v26 }
0x2869   :  { %12862 = vmatpush3.bf16.msra.mxu0 %v12861_v22 }
0x286a   :  { %12863 = vmatprep.subr.bf16.mxu0 %v14026_v26 }
0x286d   :  { %12865 = vmatpush3.bf16.msra.mxu0 %v12864_v28 }
0x2923   :  { %v9455_v12 = vpop.f32.mrb[78].mxu0  ;;  %v9526_v57 = vpop.f32.mrb[78].mxu1 }
0x2924   :  { %v13008_v34 = vadd.f32 %v9455_v12, %v16268_v59  ;;  %v9457_v4 = vpop.f32.mrb[79].mxu0  ;;  %v9528_v55 = vpop.f32.mrb[79].mxu1  ;;  %v13024_v20 = vadd.f32 %v9526_v57, %v16280_v48 }
0x2925   :  { %v13009_v38 = vadd.f32 %v9457_v4, %v16271_v15  ;;  %v13025_v0 = vadd.f32 %v9528_v55, %v16276_v25 }
0x2926   :  { %v9778_v6 = vmul.f32 -1.442695, %v13008_v34 }
0x2927   :  { %v9779_v46 = vmul.f32 -1.442695, %v13009_v38  ;;  %v9780_v53 = vmul.f32 -1.442695, %v13025_v0 }
0x2928   :  { %13857 = vpow2.f32 %v9778_v6 }
0x2929   :  { %13859 = vpow2.f32 %v9779_v46 }
0x292a   :  { %13861 = vpow2.f32 %v9780_v53 }
0x292b   :  { %13863 = vtanh.f32 %v13024_v20 }
0x2932   :  { %v13858_v17 = vpop.eup %13857 }
0x2933   :  { %v13860_v61 = vpop.eup %13859  ;;  %v9538_v9 = vadd.f32 1.0, %v13858_v17 }
0x2934   :  { %v9544_v58 = vadd.f32 1.0, %v13860_v61  ;;  %v13862_v59 = vpop.eup %13861 }
0x2935   :  { %13865 = vrcp.f32 %v9538_v9  ;;  %v13864_v51 = vpop.eup %13863  ;;  %v9551_v2 = vadd.f32 1.0, %v13862_v59 }
0x2936   :  { %13867 = vrcp.f32 %v9544_v58 }
0x2937   :  { %13869 = vrcp.f32 %v9551_v2 }
0x293f   :  { %v13866_v15 = vpop.eup %13865 }
0x2940   :  { %v13868_v3 = vpop.eup %13867  ;;  %v9555_v32 = vmul.f32 %v13866_v15, %v13864_v51 }
0x2941   :  { %v9554_v43 = vmul.f32 %v13868_v3, %v16533_v8  ;;  %v13870_v48 = vpop.eup %13869 }
0x2943   :  { %v9556_v25 = vadd.f32 %v9555_v32, %v9554_v43 }
0x2945   :  { %13871 = vtanh.f32 %v9556_v25 }
0x294f   :  { %v13872_v23 = vpop.eup %13871 }
0x2950   :  { %v9558_v24 = vmul.f32 %v13872_v23, %v13870_v48 }
0x2952   :  { %9832 = vmatmul.mubr.f32.vlgmr.msra.gmra.mrb[80].mxu0 %v9558_v24 }
0x2a25   :  { %v9648_v16 = vpop.f32.mrb[80].mxu0 }
0x2a26   :  { %v9649_v40 = vadd.f32 %v9781_v50, %v9648_v16  ;;  %v9833_v11 = vpop.f32.mrb[81].mxu0 }
0x2a28   :  { %9652 = vst [vmem:[%s16552_s7] sm:$0xff] %v9649_v40 }
0x2a29   :  { %9657 = vsyncpa [#allocation5], 1 }
0x2a2a   :  { %9658 = vsyncpa [#allocation7], 1 }
0x2a2b   :  { %9659 = vsyncpa [#allocation10], 1 }
0x2a2c   :  { %9660 = vsyncpa [#allocation13], 1 }

</bundles_post_ra>
